<compile_context>
chip_gen: v7x
topology: tpu7x:2x2x1
jax: 0.10.0
libtpu: 0.0.40
codegen_flags: <defaults>
</compile_context>

<pallas_src>
import jax
import jax.numpy as jnp
from jax.experimental import pallas as pl
from jax.experimental.pallas import tpu as pltpu

_VMEM_LIMIT = 32 * 1024 * 1024

_LRN_SIZE = 5
_LRN_ALPHA = 1e-4
_LRN_K = 1.0


def _round_up(x, m):
    return (x + m - 1) // m * m


# --------------------------------------------------------------------------
# Pallas kernel 1: grouped single-K-step matmul, bf16 MXU, fused bias + ReLU
#                  (+ optional fused LocalResponseNorm for ungrouped convs)
# --------------------------------------------------------------------------
def _make_gmm_kernel(fuse_lrn):
    def kernel(a_ref, w_ref, b_ref, o_ref):
        # Single K step for all AlexNet shapes: no zero-init / accumulate RMW.
        acc = jnp.dot(a_ref[0], w_ref[0], preferred_element_type=jnp.float32)
        acc = jnp.maximum(acc + b_ref[0], 0.0)
        if fuse_lrn:
            # Channel axis (lanes) is fully resident in this block -> apply LRN here.
            n = acc.shape[-1]
            row = jax.lax.broadcasted_iota(jnp.int32, (n, n), 0)
            col = jax.lax.broadcasted_iota(jnp.int32, (n, n), 1)
            band = (jnp.abs(row - col) <= (_LRN_SIZE // 2)).astype(jnp.bfloat16)
            sumsq = jnp.dot((acc * acc).astype(jnp.bfloat16), band,
                            preferred_element_type=jnp.float32)
            d = _LRN_K + (_LRN_ALPHA / _LRN_SIZE) * sumsq
            r = jax.lax.rsqrt(d)                 # EUP
            acc = acc * (r * jnp.sqrt(r))        # d ** -0.75 as multiplies
        o_ref[0] = acc.astype(o_ref.dtype)
    return kernel


def grouped_matmul_bias_relu(a, w, b, fuse_lrn=False):
    """a: (G, M, K) bf16, w: (G, K, Ncg), b: (G, Ncg).
    Returns (G, M, Np) bf16 with Np = round_up(Ncg, 128); padded output channels are zero."""
    G, M, K = a.shape
    Ncg = w.shape[2]
    Kp = _round_up(K, 128)
    Np = _round_up(Ncg, 128)

    # Tile rows: up to 512, multiple of 16 (bf16 sublane packing), byte-budgeted.
    tm = min(512, _round_up(M, 16))
    while tm > 16 and (2 * tm * Kp + Kp * Np + 2 * tm * Np) * 2 > (_VMEM_LIMIT * 3) // 4:
        tm = _round_up(max(16, tm // 2), 16)
    Mp = _round_up(M, tm)
    # Expose >= 2 parallel grid steps for v7x's two TensorCores when the group axis
    # alone does not provide them (negligible cost on single-core v5e/v6e).
    if G * (Mp // tm) < 2 and M > 16:
        tm = _round_up(-(-M // 2), 16)
        Mp = _round_up(M, tm)

    a_p = jnp.zeros((G, Mp, Kp), jnp.bfloat16).at[:, :M, :K].set(a.astype(jnp.bfloat16))
    w_p = jnp.zeros((G, Kp, Np), jnp.bfloat16).at[:, :K, :Ncg].set(w.astype(jnp.bfloat16))
    b_p = jnp.zeros((G, 1, Np), jnp.float32).at[:, 0, :Ncg].set(b.astype(jnp.float32))

    out = pl.pallas_call(
        _make_gmm_kernel(fuse_lrn),
        out_shape=jax.ShapeDtypeStruct((G, Mp, Np), jnp.bfloat16),
        grid_spec=pl.GridSpec(
            grid=(G, Mp // tm),
            in_specs=[pl.BlockSpec((1, tm, Kp), lambda g, i: (g, i, 0)),
                      pl.BlockSpec((1, Kp, Np), lambda g, i: (g, 0, 0)),
                      pl.BlockSpec((1, 1, Np), lambda g, i: (g, 0, 0))],
            out_specs=pl.BlockSpec((1, tm, Np), lambda g, i: (g, i, 0))),
        compiler_params=pltpu.CompilerParams(
            dimension_semantics=("parallel", "parallel"),
            vmem_limit_bytes=_VMEM_LIMIT),
    )(a_p, w_p, b_p)
    return out[:, :M, :]


# --------------------------------------------------------------------------
# Pallas kernel 2: standalone LocalResponseNorm(size=5, alpha=1e-4, beta=0.75, k=1)
#   (used only after conv2, whose LRN window crosses the group seam)
# --------------------------------------------------------------------------
def _lrn_kernel(x_ref, band_ref, o_ref):
    x = x_ref[...]                                               # bf16
    sumsq = jnp.dot(x * x, band_ref[...], preferred_element_type=jnp.float32)
    d = _LRN_K + (_LRN_ALPHA / _LRN_SIZE) * sumsq
    r = jax.lax.rsqrt(d)
    o_ref[...] = (x.astype(jnp.float32) * (r * jnp.sqrt(r))).astype(o_ref.dtype)


def lrn(x):
    """x: (N, H, W, C) bf16 with C a multiple of 128 -> same shape/dtype."""
    N, H, W, C = x.shape
    M = N * H * W
    tm = min(512, _round_up(M, 16))
    Mp = _round_up(M, tm)
    xf = x.reshape(M, C)
    if Mp != M:
        xf = jnp.pad(xf, ((0, Mp - M), (0, 0)))
    idx = jnp.arange(C)
    band = (jnp.abs(idx[:, None] - idx[None, :]) <= (_LRN_SIZE // 2)).astype(jnp.bfloat16)
    out = pl.pallas_call(
        _lrn_kernel,
        out_shape=jax.ShapeDtypeStruct((Mp, C), x.dtype),
        grid_spec=pl.GridSpec(
            grid=(Mp // tm,),
            in_specs=[pl.BlockSpec((tm, C), lambda i: (i, 0)),
                      pl.BlockSpec((C, C), lambda i: (0, 0))],
            out_specs=pl.BlockSpec((tm, C), lambda i: (i, 0))),
        compiler_params=pltpu.CompilerParams(
            dimension_semantics=("parallel",),
            vmem_limit_bytes=_VMEM_LIMIT),
    )(xf, band)
    return out[:M].reshape(N, H, W, C)


# --------------------------------------------------------------------------
# Pallas kernel 3: MaxPool2d(kernel_size=3, stride=2), no padding, floor mode
#   Wrapper splits the input into 4 even/odd parity streams (XLA strided slices);
#   the kernel is a vectorized 9-way maximum over unit-stride slabs (no strided
#   Ref indexing, no per-row unrolling).
# --------------------------------------------------------------------------
def _maxpool3x3s2_kernel(ee_ref, eo_ref, oe_ref, oo_ref, o_ref):
    Ho, Wo = o_ref.shape[1], o_ref.shape[2]
    ee = ee_ref[...]   # (1, Ho+1, Wo+1, C): x[2i, 2j]
    eo = eo_ref[...]   # (1, Ho+1, Wo,   C): x[2i, 2j+1]
    oe = oe_ref[...]   # (1, Ho,   Wo+1, C): x[2i+1, 2j]
    oo = oo_ref[...]   # (1, Ho,   Wo,   C): x[2i+1, 2j+1]
    m = jnp.maximum(ee[:, 0:Ho, 0:Wo], eo[:, 0:Ho, :])
    m = jnp.maximum(m, ee[:, 0:Ho, 1:Wo + 1])
    m = jnp.maximum(m, oe[:, :, 0:Wo])
    m = jnp.maximum(m, oo)
    m = jnp.maximum(m, oe[:, :, 1:Wo + 1])
    m = jnp.maximum(m, ee[:, 1:Ho + 1, 0:Wo])
    m = jnp.maximum(m, eo[:, 1:Ho + 1, :])
    m = jnp.maximum(m, ee[:, 1:Ho + 1, 1:Wo + 1])
    o_ref[...] = m


def maxpool_3x3_s2(x):
    N, H, W, C = x.shape
    Ho = (H - 3) // 2 + 1
    Wo = (W - 3) // 2 + 1
    # Parity-split streams (plain-JAX layout glue) so the kernel needs unit strides only.
    ee = x[:, 0:2 * Ho + 1:2, 0:2 * Wo + 1:2, :]
    eo = x[:, 0:2 * Ho + 1:2, 1:2 * Wo:2, :]
    oe = x[:, 1:2 * Ho:2, 0:2 * Wo + 1:2, :]
    oo = x[:, 1:2 * Ho:2, 1:2 * Wo:2, :]
    return pl.pallas_call(
        _maxpool3x3s2_kernel,
        out_shape=jax.ShapeDtypeStruct((N, Ho, Wo, C), x.dtype),
        grid_spec=pl.GridSpec(
            grid=(N,),
            in_specs=[pl.BlockSpec((1, Ho + 1, Wo + 1, C), lambda n: (n, 0, 0, 0)),
                      pl.BlockSpec((1, Ho + 1, Wo, C), lambda n: (n, 0, 0, 0)),
                      pl.BlockSpec((1, Ho, Wo + 1, C), lambda n: (n, 0, 0, 0)),
                      pl.BlockSpec((1, Ho, Wo, C), lambda n: (n, 0, 0, 0))],
            out_specs=pl.BlockSpec((1, Ho, Wo, C), lambda n: (n, 0, 0, 0))),
        compiler_params=pltpu.CompilerParams(
            dimension_semantics=("parallel",),
            vmem_limit_bytes=_VMEM_LIMIT),
    )(ee, eo, oe, oo)


# --------------------------------------------------------------------------
# Conv2d(+ReLU [+LRN]): im2col (plain-JAX layout glue) + grouped Pallas MXU matmul
# --------------------------------------------------------------------------
def _im2col(xg, kh, kw, stride, Ho, Wo):
    """xg: (N, Hp, Wp, cg) spatially padded -> (N*Ho*Wo, kh*kw*cg), feature order (i, j, c)."""
    N, _, _, cg = xg.shape
    cols = []
    for i in range(kh):
        for j in range(kw):
            patch = jax.lax.slice(
                xg, (0, i, j, 0),
                (N, i + stride * (Ho - 1) + 1, j + stride * (Wo - 1) + 1, cg),
                (1, stride, stride, 1))
            cols.append(patch)
    return jnp.concatenate(cols, axis=-1).reshape(N * Ho * Wo, kh * kw * cg)


def conv2d_relu(x, cin, w, b, stride=1, pad=0, groups=1, fuse_lrn=False,
                in_grouped=False, out_grouped=False):
    """x: NHWC (channels possibly lane-padded; `cin` real), or (G, N, H, W, Cg_pad) if
    in_grouped.  w: (Cout, Cin//G, kh, kw) torch layout.  Returns (y, cout)."""
    Cout, cin_g, kh, kw = w.shape
    G = groups
    cout_g = Cout // G
    assert cin_g * G == cin
    assert not (fuse_lrn and G != 1)     # LRN window would cross the group seam

    if in_grouped:
        assert x.shape[0] == G
        N, H, W_ = x.shape[1], x.shape[2], x.shape[3]
        group_views = [x[g][..., :cin_g] for g in range(G)]
    else:
        N, H, W_ = x.shape[0], x.shape[1], x.shape[2]
        xr = x[..., :cin]                                    # drop carried lane padding
        group_views = [xr[..., g * cin_g:(g + 1) * cin_g] for g in range(G)]

    Hp, Wp = H + 2 * pad, W_ + 2 * pad
    Ho = (Hp - kh) // stride + 1
    Wo = (Wp - kw) // stride + 1
    M = N * Ho * Wo
    K = kh * kw * cin_g

    a_groups = []
    for xg in group_views:
        if pad:
            xg = jnp.pad(xg, ((0, 0), (pad, pad), (pad, pad), (0, 0)))
        a_groups.append(_im2col(xg, kh, kw, stride, Ho, Wo))
    a = jnp.stack(a_groups, axis=0).astype(jnp.bfloat16)                   # (G, M, K)

    wm = jnp.transpose(w, (2, 3, 1, 0)).reshape(K, Cout)                   # (K, Cout), (i,j,c)
    wg = jnp.stack([wm[:, g * cout_g:(g + 1) * cout_g] for g in range(G)], axis=0)
    bg = b.reshape(G, cout_g)

    out = grouped_matmul_bias_relu(a, wg, bg, fuse_lrn=fuse_lrn)           # (G, M, Np) bf16
    Np = out.shape[-1]
    if G == 1:
        y = out[0].reshape(N, Ho, Wo, Np)                 # keep lane padding (caller tracks cout)
    elif out_grouped:
        y = out.reshape(G, N, Ho, Wo, Np)                 # grouped hand-off, lane-padded per group
    else:
        if cout_g == Np:                                  # lane-aligned groups: cheap concat
            y = jnp.transpose(out, (1, 0, 2)).reshape(M, G * cout_g)
        else:
            y = jnp.concatenate([out[g, :, :cout_g] for g in range(G)], axis=-1)
        y = y.reshape(N, Ho, Wo, G * cout_g)
    return y, Cout


# --------------------------------------------------------------------------
# AlexNet BVLC trunk
# --------------------------------------------------------------------------
def init_params(key):
    def conv_init(k, cout, cin_g, kh, kw):
        kw_, _ = jax.random.split(k)
        w = 0.01 * jax.random.normal(kw_, (cout, cin_g, kh, kw), jnp.float32)
        b = 0.01 * jnp.ones((cout,), jnp.float32)
        return w, b

    keys = jax.random.split(key, 5)
    return {
        "conv1": conv_init(keys[0], 96, 3, 11, 11),
        "conv2": conv_init(keys[1], 256, 48, 5, 5),    # groups=2
        "conv3": conv_init(keys[2], 384, 256, 3, 3),
        "conv4": conv_init(keys[3], 384, 192, 3, 3),   # groups=2
        "conv5": conv_init(keys[4], 256, 192, 3, 3),   # groups=2
    }


def alexnet_bvlc_forward(x_nchw, params):
    # NCHW (PyTorch) -> NHWC once; activations carried in bf16, channels on the 128-lane axis.
    x = jnp.transpose(x_nchw, (0, 2, 3, 1)).astype(jnp.bfloat16)
    c = 3
    w, b = params["conv1"]
    x, c = conv2d_relu(x, c, w, b, stride=4, pad=0, fuse_lrn=True)                    # conv1 + lrn1
    x = maxpool_3x3_s2(x)                                                             # pool1
    w, b = params["conv2"]
    x, c = conv2d_relu(x, c, w, b, stride=1, pad=2, groups=2)                         # conv2
    x = maxpool_3x3_s2(lrn(x))                                                        # lrn2 + pool2
    w, b = params["conv3"]
    x, c = conv2d_relu(x, c, w, b, stride=1, pad=1)                                   # conv3
    w, b = params["conv4"]
    x, c = conv2d_relu(x, c, w, b, stride=1, pad=1, groups=2, out_grouped=True)       # conv4 (grouped hand-off)
    w, b = params["conv5"]
    x, c = conv2d_relu(x, c, w, b, stride=1, pad=1, groups=2, in_grouped=True)        # conv5
    x = maxpool_3x3_s2(x)                                                             # pool5
    x = x[..., :c]                                     # drop any carried channel padding
    # flatten with PyTorch NCHW ordering (N, C*H*W)
    x = jnp.transpose(x, (0, 3, 1, 2)).reshape(x.shape[0], -1)
    return x.astype(jnp.float32)


if __name__ == "__main__":
    key = jax.random.PRNGKey(0)
    k_x, k_p = jax.random.split(key)
    # 67x67 input (smallest valid): conv1 -> 15x15, pool1 -> 7x7, pool2 -> 3x3, pool5 -> 1x1
    x = jax.random.normal(k_x, (2, 3, 67, 67), jnp.float32)
    params = init_params(k_p)
    fwd = jax.jit(alexnet_bvlc_forward)
    out = jax.block_until_ready(fwd(x, params))
    assert out.shape == (2, 256), out.shape
    assert bool(jnp.all(jnp.isfinite(out)))
    print("KERNEL_OK")
</pallas_src>

<mosaic_0001>
module attributes {stable_mosaic.version = 11 : i64} {
  func.func @kernel(%arg0: i32, %arg1: i32, %arg2: memref<1x240x384xbf16, #tpu.memory_space<vmem>>, %arg3: memref<1x384x128xbf16, #tpu.memory_space<vmem>>, %arg4: memref<1x1x128xf32, #tpu.memory_space<vmem>>, %arg5: memref<1x240x128xbf16, #tpu.memory_space<vmem>>) attributes {dimension_semantics = [#tpu.dimension_semantics<parallel>, #tpu.dimension_semantics<parallel>], iteration_bounds = array<i64: 1, 2>, scalar_prefetch = 0 : i64, scratch_operands = 0 : i64, tpu.core_type = #tpu.core_type<tc>, window_params = [{transform_indices = @transform_0, window_bounds = array<i64: 1, 240, 384>}, {transform_indices = @transform_1, window_bounds = array<i64: 1, 384, 128>}, {transform_indices = @transform_2, window_bounds = array<i64: 1, 1, 128>}, {transform_indices = @transform_3, window_bounds = array<i64: 1, 240, 128>}]} {
    %c0 = arith.constant 0 : index
    %c0_0 = arith.constant 0 : index
    %c0_1 = arith.constant 0 : index
    %0 = vector.load %arg2[%c0, %c0_0, %c0_1] : memref<1x240x384xbf16, #tpu.memory_space<vmem>>, vector<1x240x384xbf16>
    %1 = vector.shape_cast %0 : vector<1x240x384xbf16> to vector<240x384xbf16>
    %c0_2 = arith.constant 0 : index
    %c0_3 = arith.constant 0 : index
    %c0_4 = arith.constant 0 : index
    %2 = vector.load %arg3[%c0_2, %c0_3, %c0_4] : memref<1x384x128xbf16, #tpu.memory_space<vmem>>, vector<1x384x128xbf16>
    %3 = vector.shape_cast %2 : vector<1x384x128xbf16> to vector<384x128xbf16>
    %cst = arith.constant dense<0.000000e+00> : vector<240x128xf32>
    %4 = tpu.matmul %1, %3, %cst {dimension_numbers = #tpu.dot_dimension_numbers<[1], [0], [0], [1], [0, 0, 1, 1], [], []>} : vector<240x384xbf16>, vector<384x128xbf16>, vector<240x128xf32> -> vector<240x128xf32>
    %c0_5 = arith.constant 0 : index
    %c0_6 = arith.constant 0 : index
    %c0_7 = arith.constant 0 : index
    %5 = vector.load %arg4[%c0_5, %c0_6, %c0_7] : memref<1x1x128xf32, #tpu.memory_space<vmem>>, vector<1x1x128xf32>
    %6 = vector.shape_cast %5 : vector<1x1x128xf32> to vector<1x128xf32>
    %7 = vector.broadcast %6 : vector<1x128xf32> to vector<240x128xf32>
    %8 = arith.addf %4, %7 : vector<240x128xf32>
    %cst_8 = arith.constant 0.000000e+00 : f32
    %9 = vector.broadcast %cst_8 : f32 to vector<240x128xf32>
    %10 = arith.maximumf %8, %9 : vector<240x128xf32>
    %11 = tpu.iota {dimensions = array<i32: 0>} : vector<128x128xi32>
    %12 = tpu.iota {dimensions = array<i32: 1>} : vector<128x128xi32>
    %13 = arith.subi %11, %12 : vector<128x128xi32>
    %14 = math.absi %13 : vector<128x128xi32>
    %c2_i32 = arith.constant 2 : i32
    %15 = vector.broadcast %c2_i32 : i32 to vector<128x128xi32>
    %16 = arith.cmpi sle, %14, %15 : vector<128x128xi32>
    %17 = arith.extui %16 : vector<128x128xi1> to vector<128x128xi32>
    %18 = arith.sitofp %17 : vector<128x128xi32> to vector<128x128xf32>
    %19 = arith.truncf %18 : vector<128x128xf32> to vector<128x128xbf16>
    %20 = arith.mulf %10, %10 : vector<240x128xf32>
    %21 = arith.truncf %20 : vector<240x128xf32> to vector<240x128xbf16>
    %cst_9 = arith.constant dense<0.000000e+00> : vector<240x128xf32>
    %22 = tpu.matmul %21, %19, %cst_9 {dimension_numbers = #tpu.dot_dimension_numbers<[1], [0], [0], [1], [0, 0, 1, 1], [], []>} : vector<240x128xbf16>, vector<128x128xbf16>, vector<240x128xf32> -> vector<240x128xf32>
    %cst_10 = arith.constant 2.000000e-05 : f32
    %23 = vector.broadcast %cst_10 : f32 to vector<240x128xf32>
    %24 = arith.mulf %23, %22 : vector<240x128xf32>
    %cst_11 = arith.constant 1.000000e+00 : f32
    %25 = vector.broadcast %cst_11 : f32 to vector<240x128xf32>
    %26 = arith.addf %25, %24 : vector<240x128xf32>
    %27 = math.rsqrt %26 : vector<240x128xf32>
    %28 = math.sqrt %27 : vector<240x128xf32>
    %29 = arith.mulf %27, %28 : vector<240x128xf32>
    %30 = arith.mulf %10, %29 : vector<240x128xf32>
    %31 = arith.truncf %30 : vector<240x128xf32> to vector<240x128xbf16>
    %c0_12 = arith.constant 0 : index
    %c0_13 = arith.constant 0 : index
    %c0_14 = arith.constant 0 : index
    %32 = vector.load %arg5[%c0_12, %c0_13, %c0_14] : memref<1x240x128xbf16, #tpu.memory_space<vmem>>, vector<1x240x128xbf16>
    %33 = vector.shape_cast %32 : vector<1x240x128xbf16> to vector<240x128xbf16>
    %34 = vector.shape_cast %31 : vector<240x128xbf16> to vector<1x240x128xbf16>
    tpu.vector_store %arg5[%c0_12, %c0_13, %c0_14], %34 {strides = array<i32>} : memref<1x240x128xbf16, #tpu.memory_space<vmem>>, vector<1x240x128xbf16>,
    return
  }
  func.func @transform_0(%arg0: i32, %arg1: i32) -> (i32, i32, i32) {
    %c0_i32 = arith.constant 0 : i32
    %c0_i32_0 = arith.constant 0 : i32
    return %arg0, %arg1, %c0_i32 : i32, i32, i32
  }
  func.func @transform_1(%arg0: i32, %arg1: i32) -> (i32, i32, i32) {
    %c0_i32 = arith.constant 0 : i32
    %c0_i32_0 = arith.constant 0 : i32
    %c0_i32_1 = arith.constant 0 : i32
    return %arg0, %c0_i32, %c0_i32_0 : i32, i32, i32
  }
  func.func @transform_2(%arg0: i32, %arg1: i32) -> (i32, i32, i32) {
    %c0_i32 = arith.constant 0 : i32
    %c0_i32_0 = arith.constant 0 : i32
    %c0_i32_1 = arith.constant 0 : i32
    return %arg0, %c0_i32, %c0_i32_0 : i32, i32, i32
  }
  func.func @transform_3(%arg0: i32, %arg1: i32) -> (i32, i32, i32) {
    %c0_i32 = arith.constant 0 : i32
    %c0_i32_0 = arith.constant 0 : i32
    return %arg0, %arg1, %c0_i32 : i32, i32, i32
  }
}

module attributes {stable_mosaic.version = 11 : i64} {
  func.func @_maxpool3x3s2_kernel(%arg0: i32, %arg1: memref<1x8x8x128xbf16, #tpu.memory_space<vmem>>, %arg2: memref<1x8x7x128xbf16, #tpu.memory_space<vmem>>, %arg3: memref<1x7x8x128xbf16, #tpu.memory_space<vmem>>, %arg4: memref<1x7x7x128xbf16, #tpu.memory_space<vmem>>, %arg5: memref<1x7x7x128xbf16, #tpu.memory_space<vmem>>) attributes {dimension_semantics = [#tpu.dimension_semantics<parallel>], iteration_bounds = array<i64: 2>, scalar_prefetch = 0 : i64, scratch_operands = 0 : i64, tpu.core_type = #tpu.core_type<tc>, window_params = [{transform_indices = @transform_0, window_bounds = array<i64: 1, 8, 8, 128>}, {transform_indices = @transform_1, window_bounds = array<i64: 1, 8, 7, 128>}, {transform_indices = @transform_2, window_bounds = array<i64: 1, 7, 8, 128>}, {transform_indices = @transform_3, window_bounds = array<i64: 1, 7, 7, 128>}, {transform_indices = @transform_4, window_bounds = array<i64: 1, 7, 7, 128>}]} {
    %c0 = arith.constant 0 : index
    %c0_0 = arith.constant 0 : index
    %c0_1 = arith.constant 0 : index
    %c0_2 = arith.constant 0 : index
    %0 = vector.load %arg1[%c0, %c0_0, %c0_1, %c0_2] : memref<1x8x8x128xbf16, #tpu.memory_space<vmem>>, vector<1x8x8x128xbf16>
    %c0_3 = arith.constant 0 : index
    %c0_4 = arith.constant 0 : index
    %c0_5 = arith.constant 0 : index
    %c0_6 = arith.constant 0 : index
    %1 = vector.load %arg2[%c0_3, %c0_4, %c0_5, %c0_6] : memref<1x8x7x128xbf16, #tpu.memory_space<vmem>>, vector<1x8x7x128xbf16>
    %c0_7 = arith.constant 0 : index
    %c0_8 = arith.constant 0 : index
    %c0_9 = arith.constant 0 : index
    %c0_10 = arith.constant 0 : index
    %2 = vector.load %arg3[%c0_7, %c0_8, %c0_9, %c0_10] : memref<1x7x8x128xbf16, #tpu.memory_space<vmem>>, vector<1x7x8x128xbf16>
    %c0_11 = arith.constant 0 : index
    %c0_12 = arith.constant 0 : index
    %c0_13 = arith.constant 0 : index
    %c0_14 = arith.constant 0 : index
    %3 = vector.load %arg4[%c0_11, %c0_12, %c0_13, %c0_14] : memref<1x7x7x128xbf16, #tpu.memory_space<vmem>>, vector<1x7x7x128xbf16>
    %4 = vector.extract_strided_slice %0 {offsets = [0, 0, 0, 0], sizes = [1, 7, 7, 128], strides = [1, 1, 1, 1]} : vector<1x8x8x128xbf16> to vector<1x7x7x128xbf16>
    %5 = vector.extract_strided_slice %1 {offsets = [0, 0, 0, 0], sizes = [1, 7, 7, 128], strides = [1, 1, 1, 1]} : vector<1x8x7x128xbf16> to vector<1x7x7x128xbf16>
    %6 = arith.maximumf %4, %5 : vector<1x7x7x128xbf16>
    %7 = vector.extract_strided_slice %0 {offsets = [0, 0, 1, 0], sizes = [1, 7, 7, 128], strides = [1, 1, 1, 1]} : vector<1x8x8x128xbf16> to vector<1x7x7x128xbf16>
    %8 = arith.maximumf %6, %7 : vector<1x7x7x128xbf16>
    %9 = vector.extract_strided_slice %2 {offsets = [0, 0, 0, 0], sizes = [1, 7, 7, 128], strides = [1, 1, 1, 1]} : vector<1x7x8x128xbf16> to vector<1x7x7x128xbf16>
    %10 = arith.maximumf %8, %9 : vector<1x7x7x128xbf16>
    %11 = arith.maximumf %10, %3 : vector<1x7x7x128xbf16>
    %12 = vector.extract_strided_slice %2 {offsets = [0, 0, 1, 0], sizes = [1, 7, 7, 128], strides = [1, 1, 1, 1]} : vector<1x7x8x128xbf16> to vector<1x7x7x128xbf16>
    %13 = arith.maximumf %11, %12 : vector<1x7x7x128xbf16>
    %14 = vector.extract_strided_slice %0 {offsets = [0, 1, 0, 0], sizes = [1, 7, 7, 128], strides = [1, 1, 1, 1]} : vector<1x8x8x128xbf16> to vector<1x7x7x128xbf16>
    %15 = arith.maximumf %13, %14 : vector<1x7x7x128xbf16>
    %16 = vector.extract_strided_slice %1 {offsets = [0, 1, 0, 0], sizes = [1, 7, 7, 128], strides = [1, 1, 1, 1]} : vector<1x8x7x128xbf16> to vector<1x7x7x128xbf16>
    %17 = arith.maximumf %15, %16 : vector<1x7x7x128xbf16>
    %18 = vector.extract_strided_slice %0 {offsets = [0, 1, 1, 0], sizes = [1, 7, 7, 128], strides = [1, 1, 1, 1]} : vector<1x8x8x128xbf16> to vector<1x7x7x128xbf16>
    %19 = arith.maximumf %17, %18 : vector<1x7x7x128xbf16>
    %c0_15 = arith.constant 0 : index
    %c0_16 = arith.constant 0 : index
    %c0_17 = arith.constant 0 : index
    %c0_18 = arith.constant 0 : index
    %20 = vector.load %arg5[%c0_15, %c0_16, %c0_17, %c0_18] : memref<1x7x7x128xbf16, #tpu.memory_space<vmem>>, vector<1x7x7x128xbf16>
    tpu.vector_store %arg5[%c0_15, %c0_16, %c0_17, %c0_18], %19 {strides = array<i32>} : memref<1x7x7x128xbf16, #tpu.memory_space<vmem>>, vector<1x7x7x128xbf16>,
    return
  }
  func.func @transform_0(%arg0: i32) -> (i32, i32, i32, i32) {
    %c0_i32 = arith.constant 0 : i32
    %c0_i32_0 = arith.constant 0 : i32
    %c0_i32_1 = arith.constant 0 : i32
    %c0_i32_2 = arith.constant 0 : i32
    return %arg0, %c0_i32, %c0_i32_0, %c0_i32_1 : i32, i32, i32, i32
  }
  func.func @transform_1(%arg0: i32) -> (i32, i32, i32, i32) {
    %c0_i32 = arith.constant 0 : i32
    %c0_i32_0 = arith.constant 0 : i32
    %c0_i32_1 = arith.constant 0 : i32
    %c0_i32_2 = arith.constant 0 : i32
    return %arg0, %c0_i32, %c0_i32_0, %c0_i32_1 : i32, i32, i32, i32
  }
  func.func @transform_2(%arg0: i32) -> (i32, i32, i32, i32) {
    %c0_i32 = arith.constant 0 : i32
    %c0_i32_0 = arith.constant 0 : i32
    %c0_i32_1 = arith.constant 0 : i32
    %c0_i32_2 = arith.constant 0 : i32
    return %arg0, %c0_i32, %c0_i32_0, %c0_i32_1 : i32, i32, i32, i32
  }
  func.func @transform_3(%arg0: i32) -> (i32, i32, i32, i32) {
    %c0_i32 = arith.constant 0 : i32
    %c0_i32_0 = arith.constant 0 : i32
    %c0_i32_1 = arith.constant 0 : i32
    %c0_i32_2 = arith.constant 0 : i32
    return %arg0, %c0_i32, %c0_i32_0, %c0_i32_1 : i32, i32, i32, i32
  }
  func.func @transform_4(%arg0: i32) -> (i32, i32, i32, i32) {
    %c0_i32 = arith.constant 0 : i32
    %c0_i32_0 = arith.constant 0 : i32
    %c0_i32_1 = arith.constant 0 : i32
    %c0_i32_2 = arith.constant 0 : i32
    return %arg0, %c0_i32, %c0_i32_0, %c0_i32_1 : i32, i32, i32, i32
  }
}

module attributes {stable_mosaic.version = 11 : i64} {
  func.func @kernel(%arg0: i32, %arg1: i32, %arg2: memref<1x112x1280xbf16, #tpu.memory_space<vmem>>, %arg3: memref<1x1280x128xbf16, #tpu.memory_space<vmem>>, %arg4: memref<1x1x128xf32, #tpu.memory_space<vmem>>, %arg5: memref<1x112x128xbf16, #tpu.memory_space<vmem>>) attributes {dimension_semantics = [#tpu.dimension_semantics<parallel>, #tpu.dimension_semantics<parallel>], iteration_bounds = array<i64: 2, 1>, scalar_prefetch = 0 : i64, scratch_operands = 0 : i64, tpu.core_type = #tpu.core_type<tc>, window_params = [{transform_indices = @transform_0, window_bounds = array<i64: 1, 112, 1280>}, {transform_indices = @transform_1, window_bounds = array<i64: 1, 1280, 128>}, {transform_indices = @transform_2, window_bounds = array<i64: 1, 1, 128>}, {transform_indices = @transform_3, window_bounds = array<i64: 1, 112, 128>}]} {
    %c0 = arith.constant 0 : index
    %c0_0 = arith.constant 0 : index
    %c0_1 = arith.constant 0 : index
    %0 = vector.load %arg2[%c0, %c0_0, %c0_1] : memref<1x112x1280xbf16, #tpu.memory_space<vmem>>, vector<1x112x1280xbf16>
    %1 = vector.shape_cast %0 : vector<1x112x1280xbf16> to vector<112x1280xbf16>
    %c0_2 = arith.constant 0 : index
    %c0_3 = arith.constant 0 : index
    %c0_4 = arith.constant 0 : index
    %2 = vector.load %arg3[%c0_2, %c0_3, %c0_4] : memref<1x1280x128xbf16, #tpu.memory_space<vmem>>, vector<1x1280x128xbf16>
    %3 = vector.shape_cast %2 : vector<1x1280x128xbf16> to vector<1280x128xbf16>
    %cst = arith.constant dense<0.000000e+00> : vector<112x128xf32>
    %4 = tpu.matmul %1, %3, %cst {dimension_numbers = #tpu.dot_dimension_numbers<[1], [0], [0], [1], [0, 0, 1, 1], [], []>} : vector<112x1280xbf16>, vector<1280x128xbf16>, vector<112x128xf32> -> vector<112x128xf32>
    %c0_5 = arith.constant 0 : index
    %c0_6 = arith.constant 0 : index
    %c0_7 = arith.constant 0 : index
    %5 = vector.load %arg4[%c0_5, %c0_6, %c0_7] : memref<1x1x128xf32, #tpu.memory_space<vmem>>, vector<1x1x128xf32>
    %6 = vector.shape_cast %5 : vector<1x1x128xf32> to vector<1x128xf32>
    %7 = vector.broadcast %6 : vector<1x128xf32> to vector<112x128xf32>
    %8 = arith.addf %4, %7 : vector<112x128xf32>
    %cst_8 = arith.constant 0.000000e+00 : f32
    %9 = vector.broadcast %cst_8 : f32 to vector<112x128xf32>
    %10 = arith.maximumf %8, %9 : vector<112x128xf32>
    %11 = arith.truncf %10 : vector<112x128xf32> to vector<112x128xbf16>
    %c0_9 = arith.constant 0 : index
    %c0_10 = arith.constant 0 : index
    %c0_11 = arith.constant 0 : index
    %12 = vector.load %arg5[%c0_9, %c0_10, %c0_11] : memref<1x112x128xbf16, #tpu.memory_space<vmem>>, vector<1x112x128xbf16>
    %13 = vector.shape_cast %12 : vector<1x112x128xbf16> to vector<112x128xbf16>
    %14 = vector.shape_cast %11 : vector<112x128xbf16> to vector<1x112x128xbf16>
    tpu.vector_store %arg5[%c0_9, %c0_10, %c0_11], %14 {strides = array<i32>} : memref<1x112x128xbf16, #tpu.memory_space<vmem>>, vector<1x112x128xbf16>,
    return
  }
  func.func @transform_0(%arg0: i32, %arg1: i32) -> (i32, i32, i32) {
    %c0_i32 = arith.constant 0 : i32
    %c0_i32_0 = arith.constant 0 : i32
    return %arg0, %arg1, %c0_i32 : i32, i32, i32
  }
  func.func @transform_1(%arg0: i32, %arg1: i32) -> (i32, i32, i32) {
    %c0_i32 = arith.constant 0 : i32
    %c0_i32_0 = arith.constant 0 : i32
    %c0_i32_1 = arith.constant 0 : i32
    return %arg0, %c0_i32, %c0_i32_0 : i32, i32, i32
  }
  func.func @transform_2(%arg0: i32, %arg1: i32) -> (i32, i32, i32) {
    %c0_i32 = arith.constant 0 : i32
    %c0_i32_0 = arith.constant 0 : i32
    %c0_i32_1 = arith.constant 0 : i32
    return %arg0, %c0_i32, %c0_i32_0 : i32, i32, i32
  }
  func.func @transform_3(%arg0: i32, %arg1: i32) -> (i32, i32, i32) {
    %c0_i32 = arith.constant 0 : i32
    %c0_i32_0 = arith.constant 0 : i32
    return %arg0, %arg1, %c0_i32 : i32, i32, i32
  }
}

module attributes {stable_mosaic.version = 11 : i64} {
  func.func @_lrn_kernel(%arg0: i32, %arg1: memref<112x256xbf16, #tpu.memory_space<vmem>>, %arg2: memref<256x256xbf16, #tpu.memory_space<vmem>>, %arg3: memref<112x256xbf16, #tpu.memory_space<vmem>>) attributes {dimension_semantics = [#tpu.dimension_semantics<parallel>], iteration_bounds = array<i64: 1>, scalar_prefetch = 0 : i64, scratch_operands = 0 : i64, tpu.core_type = #tpu.core_type<tc>, window_params = [{transform_indices = @transform_0, window_bounds = array<i64: 112, 256>}, {pipeline_mode = #tpu.pipeline_mode<synchronous>, transform_indices = @transform_1, window_bounds = array<i64: 256, 256>}, {transform_indices = @transform_2, window_bounds = array<i64: 112, 256>}]} {
    %c0 = arith.constant 0 : index
    %c0_0 = arith.constant 0 : index
    %0 = vector.load %arg1[%c0, %c0_0] : memref<112x256xbf16, #tpu.memory_space<vmem>>, vector<112x256xbf16>
    %1 = arith.mulf %0, %0 : vector<112x256xbf16>
    %c0_1 = arith.constant 0 : index
    %c0_2 = arith.constant 0 : index
    %2 = vector.load %arg2[%c0_1, %c0_2] : memref<256x256xbf16, #tpu.memory_space<vmem>>, vector<256x256xbf16>
    %cst = arith.constant dense<0.000000e+00> : vector<112x256xf32>
    %3 = tpu.matmul %1, %2, %cst {dimension_numbers = #tpu.dot_dimension_numbers<[1], [0], [0], [1], [0, 0, 1, 1], [], []>} : vector<112x256xbf16>, vector<256x256xbf16>, vector<112x256xf32> -> vector<112x256xf32>
    %cst_3 = arith.constant 2.000000e-05 : f32
    %4 = vector.broadcast %cst_3 : f32 to vector<112x256xf32>
    %5 = arith.mulf %4, %3 : vector<112x256xf32>
    %cst_4 = arith.constant 1.000000e+00 : f32
    %6 = vector.broadcast %cst_4 : f32 to vector<112x256xf32>
    %7 = arith.addf %6, %5 : vector<112x256xf32>
    %8 = math.rsqrt %7 : vector<112x256xf32>
    %9 = arith.extf %0 : vector<112x256xbf16> to vector<112x256xf32>
    %10 = math.sqrt %8 : vector<112x256xf32>
    %11 = arith.mulf %8, %10 : vector<112x256xf32>
    %12 = arith.mulf %9, %11 : vector<112x256xf32>
    %13 = arith.truncf %12 : vector<112x256xf32> to vector<112x256xbf16>
    %c0_5 = arith.constant 0 : index
    %c0_6 = arith.constant 0 : index
    %14 = vector.load %arg3[%c0_5, %c0_6] : memref<112x256xbf16, #tpu.memory_space<vmem>>, vector<112x256xbf16>
    tpu.vector_store %arg3[%c0_5, %c0_6], %13 {strides = array<i32>} : memref<112x256xbf16, #tpu.memory_space<vmem>>, vector<112x256xbf16>,
    return
  }
  func.func @transform_0(%arg0: i32) -> (i32, i32) {
    %c0_i32 = arith.constant 0 : i32
    %c0_i32_0 = arith.constant 0 : i32
    return %arg0, %c0_i32 : i32, i32
  }
  func.func @transform_1(%arg0: i32) -> (i32, i32) {
    %c0_i32 = arith.constant 0 : i32
    %c0_i32_0 = arith.constant 0 : i32
    %c0_i32_1 = arith.constant 0 : i32
    return %c0_i32, %c0_i32_0 : i32, i32
  }
  func.func @transform_2(%arg0: i32) -> (i32, i32) {
    %c0_i32 = arith.constant 0 : i32
    %c0_i32_0 = arith.constant 0 : i32
    return %arg0, %c0_i32 : i32, i32
  }
}

module attributes {stable_mosaic.version = 11 : i64} {
  func.func @_maxpool3x3s2_kernel(%arg0: i32, %arg1: memref<1x4x4x256xbf16, #tpu.memory_space<vmem>>, %arg2: memref<1x4x3x256xbf16, #tpu.memory_space<vmem>>, %arg3: memref<1x3x4x256xbf16, #tpu.memory_space<vmem>>, %arg4: memref<1x3x3x256xbf16, #tpu.memory_space<vmem>>, %arg5: memref<1x3x3x256xbf16, #tpu.memory_space<vmem>>) attributes {dimension_semantics = [#tpu.dimension_semantics<parallel>], iteration_bounds = array<i64: 2>, scalar_prefetch = 0 : i64, scratch_operands = 0 : i64, tpu.core_type = #tpu.core_type<tc>, window_params = [{transform_indices = @transform_0, window_bounds = array<i64: 1, 4, 4, 256>}, {transform_indices = @transform_1, window_bounds = array<i64: 1, 4, 3, 256>}, {transform_indices = @transform_2, window_bounds = array<i64: 1, 3, 4, 256>}, {transform_indices = @transform_3, window_bounds = array<i64: 1, 3, 3, 256>}, {transform_indices = @transform_4, window_bounds = array<i64: 1, 3, 3, 256>}]} {
    %c0 = arith.constant 0 : index
    %c0_0 = arith.constant 0 : index
    %c0_1 = arith.constant 0 : index
    %c0_2 = arith.constant 0 : index
    %0 = vector.load %arg1[%c0, %c0_0, %c0_1, %c0_2] : memref<1x4x4x256xbf16, #tpu.memory_space<vmem>>, vector<1x4x4x256xbf16>
    %c0_3 = arith.constant 0 : index
    %c0_4 = arith.constant 0 : index
    %c0_5 = arith.constant 0 : index
    %c0_6 = arith.constant 0 : index
    %1 = vector.load %arg2[%c0_3, %c0_4, %c0_5, %c0_6] : memref<1x4x3x256xbf16, #tpu.memory_space<vmem>>, vector<1x4x3x256xbf16>
    %c0_7 = arith.constant 0 : index
    %c0_8 = arith.constant 0 : index
    %c0_9 = arith.constant 0 : index
    %c0_10 = arith.constant 0 : index
    %2 = vector.load %arg3[%c0_7, %c0_8, %c0_9, %c0_10] : memref<1x3x4x256xbf16, #tpu.memory_space<vmem>>, vector<1x3x4x256xbf16>
    %c0_11 = arith.constant 0 : index
    %c0_12 = arith.constant 0 : index
    %c0_13 = arith.constant 0 : index
    %c0_14 = arith.constant 0 : index
    %3 = vector.load %arg4[%c0_11, %c0_12, %c0_13, %c0_14] : memref<1x3x3x256xbf16, #tpu.memory_space<vmem>>, vector<1x3x3x256xbf16>
    %4 = vector.extract_strided_slice %0 {offsets = [0, 0, 0, 0], sizes = [1, 3, 3, 256], strides = [1, 1, 1, 1]} : vector<1x4x4x256xbf16> to vector<1x3x3x256xbf16>
    %5 = vector.extract_strided_slice %1 {offsets = [0, 0, 0, 0], sizes = [1, 3, 3, 256], strides = [1, 1, 1, 1]} : vector<1x4x3x256xbf16> to vector<1x3x3x256xbf16>
    %6 = arith.maximumf %4, %5 : vector<1x3x3x256xbf16>
    %7 = vector.extract_strided_slice %0 {offsets = [0, 0, 1, 0], sizes = [1, 3, 3, 256], strides = [1, 1, 1, 1]} : vector<1x4x4x256xbf16> to vector<1x3x3x256xbf16>
    %8 = arith.maximumf %6, %7 : vector<1x3x3x256xbf16>
    %9 = vector.extract_strided_slice %2 {offsets = [0, 0, 0, 0], sizes = [1, 3, 3, 256], strides = [1, 1, 1, 1]} : vector<1x3x4x256xbf16> to vector<1x3x3x256xbf16>
    %10 = arith.maximumf %8, %9 : vector<1x3x3x256xbf16>
    %11 = arith.maximumf %10, %3 : vector<1x3x3x256xbf16>
    %12 = vector.extract_strided_slice %2 {offsets = [0, 0, 1, 0], sizes = [1, 3, 3, 256], strides = [1, 1, 1, 1]} : vector<1x3x4x256xbf16> to vector<1x3x3x256xbf16>
    %13 = arith.maximumf %11, %12 : vector<1x3x3x256xbf16>
    %14 = vector.extract_strided_slice %0 {offsets = [0, 1, 0, 0], sizes = [1, 3, 3, 256], strides = [1, 1, 1, 1]} : vector<1x4x4x256xbf16> to vector<1x3x3x256xbf16>
    %15 = arith.maximumf %13, %14 : vector<1x3x3x256xbf16>
    %16 = vector.extract_strided_slice %1 {offsets = [0, 1, 0, 0], sizes = [1, 3, 3, 256], strides = [1, 1, 1, 1]} : vector<1x4x3x256xbf16> to vector<1x3x3x256xbf16>
    %17 = arith.maximumf %15, %16 : vector<1x3x3x256xbf16>
    %18 = vector.extract_strided_slice %0 {offsets = [0, 1, 1, 0], sizes = [1, 3, 3, 256], strides = [1, 1, 1, 1]} : vector<1x4x4x256xbf16> to vector<1x3x3x256xbf16>
    %19 = arith.maximumf %17, %18 : vector<1x3x3x256xbf16>
    %c0_15 = arith.constant 0 : index
    %c0_16 = arith.constant 0 : index
    %c0_17 = arith.constant 0 : index
    %c0_18 = arith.constant 0 : index
    %20 = vector.load %arg5[%c0_15, %c0_16, %c0_17, %c0_18] : memref<1x3x3x256xbf16, #tpu.memory_space<vmem>>, vector<1x3x3x256xbf16>
    tpu.vector_store %arg5[%c0_15, %c0_16, %c0_17, %c0_18], %19 {strides = array<i32>} : memref<1x3x3x256xbf16, #tpu.memory_space<vmem>>, vector<1x3x3x256xbf16>,
    return
  }
  func.func @transform_0(%arg0: i32) -> (i32, i32, i32, i32) {
    %c0_i32 = arith.constant 0 : i32
    %c0_i32_0 = arith.constant 0 : i32
    %c0_i32_1 = arith.constant 0 : i32
    %c0_i32_2 = arith.constant 0 : i32
    return %arg0, %c0_i32, %c0_i32_0, %c0_i32_1 : i32, i32, i32, i32
  }
  func.func @transform_1(%arg0: i32) -> (i32, i32, i32, i32) {
    %c0_i32 = arith.constant 0 : i32
    %c0_i32_0 = arith.constant 0 : i32
    %c0_i32_1 = arith.constant 0 : i32
    %c0_i32_2 = arith.constant 0 : i32
    return %arg0, %c0_i32, %c0_i32_0, %c0_i32_1 : i32, i32, i32, i32
  }
  func.func @transform_2(%arg0: i32) -> (i32, i32, i32, i32) {
    %c0_i32 = arith.constant 0 : i32
    %c0_i32_0 = arith.constant 0 : i32
    %c0_i32_1 = arith.constant 0 : i32
    %c0_i32_2 = arith.constant 0 : i32
    return %arg0, %c0_i32, %c0_i32_0, %c0_i32_1 : i32, i32, i32, i32
  }
  func.func @transform_3(%arg0: i32) -> (i32, i32, i32, i32) {
    %c0_i32 = arith.constant 0 : i32
    %c0_i32_0 = arith.constant 0 : i32
    %c0_i32_1 = arith.constant 0 : i32
    %c0_i32_2 = arith.constant 0 : i32
    return %arg0, %c0_i32, %c0_i32_0, %c0_i32_1 : i32, i32, i32, i32
  }
  func.func @transform_4(%arg0: i32) -> (i32, i32, i32, i32) {
    %c0_i32 = arith.constant 0 : i32
    %c0_i32_0 = arith.constant 0 : i32
    %c0_i32_1 = arith.constant 0 : i32
    %c0_i32_2 = arith.constant 0 : i32
    return %arg0, %c0_i32, %c0_i32_0, %c0_i32_1 : i32, i32, i32, i32
  }
}

module attributes {stable_mosaic.version = 11 : i64} {
  func.func @kernel(%arg0: i32, %arg1: i32, %arg2: memref<1x16x2304xbf16, #tpu.memory_space<vmem>>, %arg3: memref<1x2304x384xbf16, #tpu.memory_space<vmem>>, %arg4: memref<1x1x384xf32, #tpu.memory_space<vmem>>, %arg5: memref<1x16x384xbf16, #tpu.memory_space<vmem>>) attributes {dimension_semantics = [#tpu.dimension_semantics<parallel>, #tpu.dimension_semantics<parallel>], iteration_bounds = array<i64: 1, 2>, scalar_prefetch = 0 : i64, scratch_operands = 0 : i64, tpu.core_type = #tpu.core_type<tc>, window_params = [{transform_indices = @transform_0, window_bounds = array<i64: 1, 16, 2304>}, {transform_indices = @transform_1, window_bounds = array<i64: 1, 2304, 384>}, {transform_indices = @transform_2, window_bounds = array<i64: 1, 1, 384>}, {transform_indices = @transform_3, window_bounds = array<i64: 1, 16, 384>}]} {
    %c0 = arith.constant 0 : index
    %c0_0 = arith.constant 0 : index
    %c0_1 = arith.constant 0 : index
    %0 = vector.load %arg2[%c0, %c0_0, %c0_1] : memref<1x16x2304xbf16, #tpu.memory_space<vmem>>, vector<1x16x2304xbf16>
    %1 = vector.shape_cast %0 : vector<1x16x2304xbf16> to vector<16x2304xbf16>
    %c0_2 = arith.constant 0 : index
    %c0_3 = arith.constant 0 : index
    %c0_4 = arith.constant 0 : index
    %2 = vector.load %arg3[%c0_2, %c0_3, %c0_4] : memref<1x2304x384xbf16, #tpu.memory_space<vmem>>, vector<1x2304x384xbf16>
    %3 = vector.shape_cast %2 : vector<1x2304x384xbf16> to vector<2304x384xbf16>
    %cst = arith.constant dense<0.000000e+00> : vector<16x384xf32>
    %4 = tpu.matmul %1, %3, %cst {dimension_numbers = #tpu.dot_dimension_numbers<[1], [0], [0], [1], [0, 0, 1, 1], [], []>} : vector<16x2304xbf16>, vector<2304x384xbf16>, vector<16x384xf32> -> vector<16x384xf32>
    %c0_5 = arith.constant 0 : index
    %c0_6 = arith.constant 0 : index
    %c0_7 = arith.constant 0 : index
    %5 = vector.load %arg4[%c0_5, %c0_6, %c0_7] : memref<1x1x384xf32, #tpu.memory_space<vmem>>, vector<1x1x384xf32>
    %6 = vector.shape_cast %5 : vector<1x1x384xf32> to vector<1x384xf32>
    %7 = vector.broadcast %6 : vector<1x384xf32> to vector<16x384xf32>
    %8 = arith.addf %4, %7 : vector<16x384xf32>
    %cst_8 = arith.constant 0.000000e+00 : f32
    %9 = vector.broadcast %cst_8 : f32 to vector<16x384xf32>
    %10 = arith.maximumf %8, %9 : vector<16x384xf32>
    %11 = arith.truncf %10 : vector<16x384xf32> to vector<16x384xbf16>
    %c0_9 = arith.constant 0 : index
    %c0_10 = arith.constant 0 : index
    %c0_11 = arith.constant 0 : index
    %12 = vector.load %arg5[%c0_9, %c0_10, %c0_11] : memref<1x16x384xbf16, #tpu.memory_space<vmem>>, vector<1x16x384xbf16>
    %13 = vector.shape_cast %12 : vector<1x16x384xbf16> to vector<16x384xbf16>
    %14 = vector.shape_cast %11 : vector<16x384xbf16> to vector<1x16x384xbf16>
    tpu.vector_store %arg5[%c0_9, %c0_10, %c0_11], %14 {strides = array<i32>} : memref<1x16x384xbf16, #tpu.memory_space<vmem>>, vector<1x16x384xbf16>,
    return
  }
  func.func @transform_0(%arg0: i32, %arg1: i32) -> (i32, i32, i32) {
    %c0_i32 = arith.constant 0 : i32
    %c0_i32_0 = arith.constant 0 : i32
    return %arg0, %arg1, %c0_i32 : i32, i32, i32
  }
  func.func @transform_1(%arg0: i32, %arg1: i32) -> (i32, i32, i32) {
    %c0_i32 = arith.constant 0 : i32
    %c0_i32_0 = arith.constant 0 : i32
    %c0_i32_1 = arith.constant 0 : i32
    return %arg0, %c0_i32, %c0_i32_0 : i32, i32, i32
  }
  func.func @transform_2(%arg0: i32, %arg1: i32) -> (i32, i32, i32) {
    %c0_i32 = arith.constant 0 : i32
    %c0_i32_0 = arith.constant 0 : i32
    %c0_i32_1 = arith.constant 0 : i32
    return %arg0, %c0_i32, %c0_i32_0 : i32, i32, i32
  }
  func.func @transform_3(%arg0: i32, %arg1: i32) -> (i32, i32, i32) {
    %c0_i32 = arith.constant 0 : i32
    %c0_i32_0 = arith.constant 0 : i32
    return %arg0, %arg1, %c0_i32 : i32, i32, i32
  }
}

module attributes {stable_mosaic.version = 11 : i64} {
  func.func @kernel(%arg0: i32, %arg1: i32, %arg2: memref<1x32x1792xbf16, #tpu.memory_space<vmem>>, %arg3: memref<1x1792x256xbf16, #tpu.memory_space<vmem>>, %arg4: memref<1x1x256xf32, #tpu.memory_space<vmem>>, %arg5: memref<1x32x256xbf16, #tpu.memory_space<vmem>>) attributes {dimension_semantics = [#tpu.dimension_semantics<parallel>, #tpu.dimension_semantics<parallel>], iteration_bounds = array<i64: 2, 1>, scalar_prefetch = 0 : i64, scratch_operands = 0 : i64, tpu.core_type = #tpu.core_type<tc>, window_params = [{transform_indices = @transform_0, window_bounds = array<i64: 1, 32, 1792>}, {transform_indices = @transform_1, window_bounds = array<i64: 1, 1792, 256>}, {transform_indices = @transform_2, window_bounds = array<i64: 1, 1, 256>}, {transform_indices = @transform_3, window_bounds = array<i64: 1, 32, 256>}]} {
    %c0 = arith.constant 0 : index
    %c0_0 = arith.constant 0 : index
    %c0_1 = arith.constant 0 : index
    %0 = vector.load %arg2[%c0, %c0_0, %c0_1] : memref<1x32x1792xbf16, #tpu.memory_space<vmem>>, vector<1x32x1792xbf16>
    %1 = vector.shape_cast %0 : vector<1x32x1792xbf16> to vector<32x1792xbf16>
    %c0_2 = arith.constant 0 : index
    %c0_3 = arith.constant 0 : index
    %c0_4 = arith.constant 0 : index
    %2 = vector.load %arg3[%c0_2, %c0_3, %c0_4] : memref<1x1792x256xbf16, #tpu.memory_space<vmem>>, vector<1x1792x256xbf16>
    %3 = vector.shape_cast %2 : vector<1x1792x256xbf16> to vector<1792x256xbf16>
    %cst = arith.constant dense<0.000000e+00> : vector<32x256xf32>
    %4 = tpu.matmul %1, %3, %cst {dimension_numbers = #tpu.dot_dimension_numbers<[1], [0], [0], [1], [0, 0, 1, 1], [], []>} : vector<32x1792xbf16>, vector<1792x256xbf16>, vector<32x256xf32> -> vector<32x256xf32>
    %c0_5 = arith.constant 0 : index
    %c0_6 = arith.constant 0 : index
    %c0_7 = arith.constant 0 : index
    %5 = vector.load %arg4[%c0_5, %c0_6, %c0_7] : memref<1x1x256xf32, #tpu.memory_space<vmem>>, vector<1x1x256xf32>
    %6 = vector.shape_cast %5 : vector<1x1x256xf32> to vector<1x256xf32>
    %7 = vector.broadcast %6 : vector<1x256xf32> to vector<32x256xf32>
    %8 = arith.addf %4, %7 : vector<32x256xf32>
    %cst_8 = arith.constant 0.000000e+00 : f32
    %9 = vector.broadcast %cst_8 : f32 to vector<32x256xf32>
    %10 = arith.maximumf %8, %9 : vector<32x256xf32>
    %11 = arith.truncf %10 : vector<32x256xf32> to vector<32x256xbf16>
    %c0_9 = arith.constant 0 : index
    %c0_10 = arith.constant 0 : index
    %c0_11 = arith.constant 0 : index
    %12 = vector.load %arg5[%c0_9, %c0_10, %c0_11] : memref<1x32x256xbf16, #tpu.memory_space<vmem>>, vector<1x32x256xbf16>
    %13 = vector.shape_cast %12 : vector<1x32x256xbf16> to vector<32x256xbf16>
    %14 = vector.shape_cast %11 : vector<32x256xbf16> to vector<1x32x256xbf16>
    tpu.vector_store %arg5[%c0_9, %c0_10, %c0_11], %14 {strides = array<i32>} : memref<1x32x256xbf16, #tpu.memory_space<vmem>>, vector<1x32x256xbf16>,
    return
  }
  func.func @transform_0(%arg0: i32, %arg1: i32) -> (i32, i32, i32) {
    %c0_i32 = arith.constant 0 : i32
    %c0_i32_0 = arith.constant 0 : i32
    return %arg0, %arg1, %c0_i32 : i32, i32, i32
  }
  func.func @transform_1(%arg0: i32, %arg1: i32) -> (i32, i32, i32) {
    %c0_i32 = arith.constant 0 : i32
    %c0_i32_0 = arith.constant 0 : i32
    %c0_i32_1 = arith.constant 0 : i32
    return %arg0, %c0_i32, %c0_i32_0 : i32, i32, i32
  }
  func.func @transform_2(%arg0: i32, %arg1: i32) -> (i32, i32, i32) {
    %c0_i32 = arith.constant 0 : i32
    %c0_i32_0 = arith.constant 0 : i32
    %c0_i32_1 = arith.constant 0 : i32
    return %arg0, %c0_i32, %c0_i32_0 : i32, i32, i32
  }
  func.func @transform_3(%arg0: i32, %arg1: i32) -> (i32, i32, i32) {
    %c0_i32 = arith.constant 0 : i32
    %c0_i32_0 = arith.constant 0 : i32
    return %arg0, %arg1, %c0_i32 : i32, i32, i32
  }
}

module attributes {stable_mosaic.version = 11 : i64} {
  func.func @kernel(%arg0: i32, %arg1: i32, %arg2: memref<1x32x1792xbf16, #tpu.memory_space<vmem>>, %arg3: memref<1x1792x128xbf16, #tpu.memory_space<vmem>>, %arg4: memref<1x1x128xf32, #tpu.memory_space<vmem>>, %arg5: memref<1x32x128xbf16, #tpu.memory_space<vmem>>) attributes {dimension_semantics = [#tpu.dimension_semantics<parallel>, #tpu.dimension_semantics<parallel>], iteration_bounds = array<i64: 2, 1>, scalar_prefetch = 0 : i64, scratch_operands = 0 : i64, tpu.core_type = #tpu.core_type<tc>, window_params = [{transform_indices = @transform_0, window_bounds = array<i64: 1, 32, 1792>}, {transform_indices = @transform_1, window_bounds = array<i64: 1, 1792, 128>}, {transform_indices = @transform_2, window_bounds = array<i64: 1, 1, 128>}, {transform_indices = @transform_3, window_bounds = array<i64: 1, 32, 128>}]} {
    %c0 = arith.constant 0 : index
    %c0_0 = arith.constant 0 : index
    %c0_1 = arith.constant 0 : index
    %0 = vector.load %arg2[%c0, %c0_0, %c0_1] : memref<1x32x1792xbf16, #tpu.memory_space<vmem>>, vector<1x32x1792xbf16>
    %1 = vector.shape_cast %0 : vector<1x32x1792xbf16> to vector<32x1792xbf16>
    %c0_2 = arith.constant 0 : index
    %c0_3 = arith.constant 0 : index
    %c0_4 = arith.constant 0 : index
    %2 = vector.load %arg3[%c0_2, %c0_3, %c0_4] : memref<1x1792x128xbf16, #tpu.memory_space<vmem>>, vector<1x1792x128xbf16>
    %3 = vector.shape_cast %2 : vector<1x1792x128xbf16> to vector<1792x128xbf16>
    %cst = arith.constant dense<0.000000e+00> : vector<32x128xf32>
    %4 = tpu.matmul %1, %3, %cst {dimension_numbers = #tpu.dot_dimension_numbers<[1], [0], [0], [1], [0, 0, 1, 1], [], []>} : vector<32x1792xbf16>, vector<1792x128xbf16>, vector<32x128xf32> -> vector<32x128xf32>
    %c0_5 = arith.constant 0 : index
    %c0_6 = arith.constant 0 : index
    %c0_7 = arith.constant 0 : index
    %5 = vector.load %arg4[%c0_5, %c0_6, %c0_7] : memref<1x1x128xf32, #tpu.memory_space<vmem>>, vector<1x1x128xf32>
    %6 = vector.shape_cast %5 : vector<1x1x128xf32> to vector<1x128xf32>
    %7 = vector.broadcast %6 : vector<1x128xf32> to vector<32x128xf32>
    %8 = arith.addf %4, %7 : vector<32x128xf32>
    %cst_8 = arith.constant 0.000000e+00 : f32
    %9 = vector.broadcast %cst_8 : f32 to vector<32x128xf32>
    %10 = arith.maximumf %8, %9 : vector<32x128xf32>
    %11 = arith.truncf %10 : vector<32x128xf32> to vector<32x128xbf16>
    %c0_9 = arith.constant 0 : index
    %c0_10 = arith.constant 0 : index
    %c0_11 = arith.constant 0 : index
    %12 = vector.load %arg5[%c0_9, %c0_10, %c0_11] : memref<1x32x128xbf16, #tpu.memory_space<vmem>>, vector<1x32x128xbf16>
    %13 = vector.shape_cast %12 : vector<1x32x128xbf16> to vector<32x128xbf16>
    %14 = vector.shape_cast %11 : vector<32x128xbf16> to vector<1x32x128xbf16>
    tpu.vector_store %arg5[%c0_9, %c0_10, %c0_11], %14 {strides = array<i32>} : memref<1x32x128xbf16, #tpu.memory_space<vmem>>, vector<1x32x128xbf16>,
    return
  }
  func.func @transform_0(%arg0: i32, %arg1: i32) -> (i32, i32, i32) {
    %c0_i32 = arith.constant 0 : i32
    %c0_i32_0 = arith.constant 0 : i32
    return %arg0, %arg1, %c0_i32 : i32, i32, i32
  }
  func.func @transform_1(%arg0: i32, %arg1: i32) -> (i32, i32, i32) {
    %c0_i32 = arith.constant 0 : i32
    %c0_i32_0 = arith.constant 0 : i32
    %c0_i32_1 = arith.constant 0 : i32
    return %arg0, %c0_i32, %c0_i32_0 : i32, i32, i32
  }
  func.func @transform_2(%arg0: i32, %arg1: i32) -> (i32, i32, i32) {
    %c0_i32 = arith.constant 0 : i32
    %c0_i32_0 = arith.constant 0 : i32
    %c0_i32_1 = arith.constant 0 : i32
    return %arg0, %c0_i32, %c0_i32_0 : i32, i32, i32
  }
  func.func @transform_3(%arg0: i32, %arg1: i32) -> (i32, i32, i32) {
    %c0_i32 = arith.constant 0 : i32
    %c0_i32_0 = arith.constant 0 : i32
    return %arg0, %arg1, %c0_i32 : i32, i32, i32
  }
}

module attributes {stable_mosaic.version = 11 : i64} {
  func.func @_maxpool3x3s2_kernel(%arg0: i32, %arg1: memref<1x2x2x256xbf16, #tpu.memory_space<vmem>>, %arg2: memref<1x2x1x256xbf16, #tpu.memory_space<vmem>>, %arg3: memref<1x1x2x256xbf16, #tpu.memory_space<vmem>>, %arg4: memref<1x1x1x256xbf16, #tpu.memory_space<vmem>>, %arg5: memref<1x1x1x256xbf16, #tpu.memory_space<vmem>>) attributes {dimension_semantics = [#tpu.dimension_semantics<parallel>], iteration_bounds = array<i64: 2>, scalar_prefetch = 0 : i64, scratch_operands = 0 : i64, tpu.core_type = #tpu.core_type<tc>, window_params = [{transform_indices = @transform_0, window_bounds = array<i64: 1, 2, 2, 256>}, {transform_indices = @transform_1, window_bounds = array<i64: 1, 2, 1, 256>}, {transform_indices = @transform_2, window_bounds = array<i64: 1, 1, 2, 256>}, {transform_indices = @transform_3, window_bounds = array<i64: 1, 1, 1, 256>}, {transform_indices = @transform_4, window_bounds = array<i64: 1, 1, 1, 256>}]} {
    %c0 = arith.constant 0 : index
    %c0_0 = arith.constant 0 : index
    %c0_1 = arith.constant 0 : index
    %c0_2 = arith.constant 0 : index
    %0 = vector.load %arg1[%c0, %c0_0, %c0_1, %c0_2] : memref<1x2x2x256xbf16, #tpu.memory_space<vmem>>, vector<1x2x2x256xbf16>
    %c0_3 = arith.constant 0 : index
    %c0_4 = arith.constant 0 : index
    %c0_5 = arith.constant 0 : index
    %c0_6 = arith.constant 0 : index
    %1 = vector.load %arg2[%c0_3, %c0_4, %c0_5, %c0_6] : memref<1x2x1x256xbf16, #tpu.memory_space<vmem>>, vector<1x2x1x256xbf16>
    %c0_7 = arith.constant 0 : index
    %c0_8 = arith.constant 0 : index
    %c0_9 = arith.constant 0 : index
    %c0_10 = arith.constant 0 : index
    %2 = vector.load %arg3[%c0_7, %c0_8, %c0_9, %c0_10] : memref<1x1x2x256xbf16, #tpu.memory_space<vmem>>, vector<1x1x2x256xbf16>
    %c0_11 = arith.constant 0 : index
    %c0_12 = arith.constant 0 : index
    %c0_13 = arith.constant 0 : index
    %c0_14 = arith.constant 0 : index
    %3 = vector.load %arg4[%c0_11, %c0_12, %c0_13, %c0_14] : memref<1x1x1x256xbf16, #tpu.memory_space<vmem>>, vector<1x1x1x256xbf16>
    %4 = vector.extract_strided_slice %0 {offsets = [0, 0, 0, 0], sizes = [1, 1, 1, 256], strides = [1, 1, 1, 1]} : vector<1x2x2x256xbf16> to vector<1x1x1x256xbf16>
    %5 = vector.extract_strided_slice %1 {offsets = [0, 0, 0, 0], sizes = [1, 1, 1, 256], strides = [1, 1, 1, 1]} : vector<1x2x1x256xbf16> to vector<1x1x1x256xbf16>
    %6 = arith.maximumf %4, %5 : vector<1x1x1x256xbf16>
    %7 = vector.extract_strided_slice %0 {offsets = [0, 0, 1, 0], sizes = [1, 1, 1, 256], strides = [1, 1, 1, 1]} : vector<1x2x2x256xbf16> to vector<1x1x1x256xbf16>
    %8 = arith.maximumf %6, %7 : vector<1x1x1x256xbf16>
    %9 = vector.extract_strided_slice %2 {offsets = [0, 0, 0, 0], sizes = [1, 1, 1, 256], strides = [1, 1, 1, 1]} : vector<1x1x2x256xbf16> to vector<1x1x1x256xbf16>
    %10 = arith.maximumf %8, %9 : vector<1x1x1x256xbf16>
    %11 = arith.maximumf %10, %3 : vector<1x1x1x256xbf16>
    %12 = vector.extract_strided_slice %2 {offsets = [0, 0, 1, 0], sizes = [1, 1, 1, 256], strides = [1, 1, 1, 1]} : vector<1x1x2x256xbf16> to vector<1x1x1x256xbf16>
    %13 = arith.maximumf %11, %12 : vector<1x1x1x256xbf16>
    %14 = vector.extract_strided_slice %0 {offsets = [0, 1, 0, 0], sizes = [1, 1, 1, 256], strides = [1, 1, 1, 1]} : vector<1x2x2x256xbf16> to vector<1x1x1x256xbf16>
    %15 = arith.maximumf %13, %14 : vector<1x1x1x256xbf16>
    %16 = vector.extract_strided_slice %1 {offsets = [0, 1, 0, 0], sizes = [1, 1, 1, 256], strides = [1, 1, 1, 1]} : vector<1x2x1x256xbf16> to vector<1x1x1x256xbf16>
    %17 = arith.maximumf %15, %16 : vector<1x1x1x256xbf16>
    %18 = vector.extract_strided_slice %0 {offsets = [0, 1, 1, 0], sizes = [1, 1, 1, 256], strides = [1, 1, 1, 1]} : vector<1x2x2x256xbf16> to vector<1x1x1x256xbf16>
    %19 = arith.maximumf %17, %18 : vector<1x1x1x256xbf16>
    %c0_15 = arith.constant 0 : index
    %c0_16 = arith.constant 0 : index
    %c0_17 = arith.constant 0 : index
    %c0_18 = arith.constant 0 : index
    %20 = vector.load %arg5[%c0_15, %c0_16, %c0_17, %c0_18] : memref<1x1x1x256xbf16, #tpu.memory_space<vmem>>, vector<1x1x1x256xbf16>
    tpu.vector_store %arg5[%c0_15, %c0_16, %c0_17, %c0_18], %19 {strides = array<i32>} : memref<1x1x1x256xbf16, #tpu.memory_space<vmem>>, vector<1x1x1x256xbf16>,
    return
  }
  func.func @transform_0(%arg0: i32) -> (i32, i32, i32, i32) {
    %c0_i32 = arith.constant 0 : i32
    %c0_i32_0 = arith.constant 0 : i32
    %c0_i32_1 = arith.constant 0 : i32
    %c0_i32_2 = arith.constant 0 : i32
    return %arg0, %c0_i32, %c0_i32_0, %c0_i32_1 : i32, i32, i32, i32
  }
  func.func @transform_1(%arg0: i32) -> (i32, i32, i32, i32) {
    %c0_i32 = arith.constant 0 : i32
    %c0_i32_0 = arith.constant 0 : i32
    %c0_i32_1 = arith.constant 0 : i32
    %c0_i32_2 = arith.constant 0 : i32
    return %arg0, %c0_i32, %c0_i32_0, %c0_i32_1 : i32, i32, i32, i32
  }
  func.func @transform_2(%arg0: i32) -> (i32, i32, i32, i32) {
    %c0_i32 = arith.constant 0 : i32
    %c0_i32_0 = arith.constant 0 : i32
    %c0_i32_1 = arith.constant 0 : i32
    %c0_i32_2 = arith.constant 0 : i32
    return %arg0, %c0_i32, %c0_i32_0, %c0_i32_1 : i32, i32, i32, i32
  }
  func.func @transform_3(%arg0: i32) -> (i32, i32, i32, i32) {
    %c0_i32 = arith.constant 0 : i32
    %c0_i32_0 = arith.constant 0 : i32
    %c0_i32_1 = arith.constant 0 : i32
    %c0_i32_2 = arith.constant 0 : i32
    return %arg0, %c0_i32, %c0_i32_0, %c0_i32_1 : i32, i32, i32, i32
  }
  func.func @transform_4(%arg0: i32) -> (i32, i32, i32, i32) {
    %c0_i32 = arith.constant 0 : i32
    %c0_i32_0 = arith.constant 0 : i32
    %c0_i32_1 = arith.constant 0 : i32
    %c0_i32_2 = arith.constant 0 : i32
    return %arg0, %c0_i32, %c0_i32_0, %c0_i32_1 : i32, i32, i32, i32
  }
}

</mosaic_0001>

<bundles_post_ra>
// kernel: alexnet_bvlc_forward.9
= control target key start
LH: loop header
LB: loop body
LE: loop exit
PB: predicated region body
PF: predicated region fallthrough
CT: control target
= control target key end

     0   :  { %s2924_s12 = smov 0   ;;  %s2926_s13 = smov 0   ;;  %s3694_s0 = inlined_call_operand.vmem [shape: bf16[1,480,384], index: 0, kind: input, shape index: {}]   ;;  %s3695_s1 = inlined_call_operand.vmem [shape: bf16[1,384,128], index: 1, kind: input, shape index: {}]   ;;  %s3696_s2 = inlined_call_operand.vmem [shape: f32[1,1,128], index: 2, kind: input, shape index: {}]   ;;  %s3697_s3 = inlined_call_operand.vmem [shape: bf16[1,480,128], index: 3, kind: output, shape index: {}]  }
   0x1   :  { %s2928_s14 = smov 0  }
   0x2 LB: > { %s22_s15 = sadd.s32 1, %s2895_s13  ;;  %p2053_p0 = scmp.ge.s32.totalorder %s2899_s14, 1  ;;  %s2899_s14 = sphi %s2928_s14, %s13_s14   ;;  %s2895_s13 = sphi %s2926_s13, %s3699_s13   ;;  %s2891_s12 = sphi %s2924_s12, %s3698_s12  }
   0x3   : > { %p23_p1 = scmp.ge.s32.totalorder %s22_s15, 2  ;;  %p177_p2 = scmp.lt.s32.totalorder %s2899_s14, 3 }
   0x5   : > { %s3701_s15 = smov (%p23_p1, %s22_s15), 0  ;;  %p178_p3 = pnand %p2053_p0, %p177_p2 }
   0x6   : > { %v2673_v0 = vld [vmem:[%s3695_s1 + $0x40] sm:$0xff] (!%p178_p3)   ;;  %s218_s18 = smul.u32 (!%p178_p3), 30, %s2891_s12  ;;  %v2675_v2 = vld [vmem:[%s3695_s1 + $0x48] sm:$0xff] (!%p178_p3)   ;;  %v2677_v4 = vld [vmem:[%s3695_s1 + $0x50] sm:$0xff] (!%p178_p3)   ;;  %v2901_v20 = vmov (!%p178_p3), 0.0   ;;  %vm2902_vm0 = vmmov (!%p178_p3), 0   ;;  %v1083_v60 = vlaneseq (!%p178_p3) }
   0x7   : > { %181 = sbr.rel (%p178_p3) target bundleno = 680 (0x2a8), region = 32  ;;  %v2674_v1 = vld [vmem:[%s3695_s1] sm:$0xff] (!%p178_p3)   ;;  %2629 = vmatprep.subr.bf16.mxu1 (!%p178_p3), %v2673_v0  ;;  %2325 = vmatprep.subr.bf16.mxu0 (!%p178_p3), %v2673_v0  ;;  %v2676_v3 = vld [vmem:[%s3695_s1 + $0x8] sm:$0xff] (!%p178_p3)   ;;  %v2678_v5 = vld [vmem:[%s3695_s1 + $0x10] sm:$0xff] (!%p178_p3)  }
   0x8   : > { %p221_p4 = scmp.lt.s32.totalorder (!%p178_p3), %s218_s18, 59  ;;  %2637 = vmatpush3.bf16.msra.mxu1 (!%p178_p3), %v2674_v1  ;;  %2326 = vmatpush3.bf16.msra.mxu0 (!%p178_p3), %v2674_v1  ;;  %v2679_v6 = vld [vmem:[%s3695_s1 + $0x58] sm:$0xff] (!%p178_p3)   ;;  %v2681_v8 = vld [vmem:[%s3695_s1 + $0x60] sm:$0xff] (!%p178_p3)   ;;  %v2683_v10 = vld [vmem:[%s3695_s1 + $0x68] sm:$0xff] (!%p178_p3)   ;;  %v3080_v61 = vshrl.u32 (!%p178_p3), %v1083_v60, 7  ;;  %v3082_v62 = vand.u32 (!%p178_p3), 127, %v1083_v60 }
   0x9   : > { %2630 = vmatprep.subr.bf16.mxu1 (!%p178_p3), %v2675_v2  ;;  %2327 = vmatprep.subr.bf16.mxu0 (!%p178_p3), %v2675_v2  ;;  %v2680_v7 = vld [vmem:[%s3695_s1 + $0x18] sm:$0xff] (!%p178_p3)   ;;  %v2682_v9 = vld [vmem:[%s3695_s1 + $0x20] sm:$0xff] (!%p178_p3)   ;;  %v2684_v12 = vld [vmem:[%s3695_s1 + $0x28] sm:$0xff] (!%p178_p3)  }
   0xa   : > { %v2685_v13 = vld [vmem:[%s3695_s1 + $0x70] sm:$0xff] (!%p178_p3)   ;;  %v2687_v15 = vld [vmem:[%s3695_s1 + $0x78] sm:$0xff] (!%p178_p3)   ;;  %v2692_v18 = vld [vmem:[%s3695_s1 + $0x80] sm:$0xff] (!%p178_p3)   ;;  %v1085_v63 = vadd.s32 (!%p178_p3), 8, %v3080_v61  ;;  %v1102_v0 = vsub.s32 (!%p178_p3), %v3080_v61, %v3082_v62  ;;  %v1098_v60 = vadd.s32 (!%p178_p3), 112, %v3080_v61 }
   0xb   : > { %v2686_v14 = vld [vmem:[%s3695_s1 + $0x30] sm:$0xff] (!%p178_p3)   ;;  %v2688_v16 = vld [vmem:[%s3695_s1 + $0x38] sm:$0xff] (!%p178_p3)   ;;  %v2696_v23 = vld [vmem:[%s3695_s1 + $0x88] sm:$0xff] (!%p178_p3)  }
   0xc   : > { %2638 = vmatpush3.bf16.msra.mxu1 (!%p178_p3), %v2676_v3  ;;  %2328 = vmatpush3.bf16.msra.mxu0 (!%p178_p3), %v2676_v3  ;;  %v2699_v27 = vld [vmem:[%s3695_s1 + $0x90] sm:$0xff] (!%p178_p3)   ;;  %v2701_v30 = vld [vmem:[%s3695_s1 + $0x98] sm:$0xff] (!%p178_p3)   ;;  %v2705_v33 = vld [vmem:[%s3695_s1 + $0xa0] sm:$0xff] (!%p178_p3)   ;;  %v1103_v2 = vsub.s32 (!%p178_p3), %v1085_v63, %v3082_v62  ;;  %v1119_v3 = vsub.s32 (!%p178_p3), 0, %v1102_v0  ;;  %v1099_v63 = vadd.s32 (!%p178_p3), 120, %v3080_v61 }
   0xd   : > { %2631 = vmatprep.subr.bf16.mxu1 (!%p178_p3), %v2677_v4  ;;  %2329 = vmatprep.subr.bf16.mxu0 (!%p178_p3), %v2677_v4  ;;  %v2709_v36 = vld [vmem:[%s3695_s1 + $0xa8] sm:$0xff] (!%p178_p3)   ;;  %v2713_v39 = vld [vmem:[%s3695_s1 + $0xb0] sm:$0xff] (!%p178_p3)   ;;  %v2720_v42 = vld [vmem:[%s3695_s1 + $0xb8] sm:$0xff] (!%p178_p3)  }
   0xe   : > { %s3703_s18 = smov (!%p221_p4, %s218_s18), 59  ;;  %v2126_v4 = vmin.u32 %v1119_v3, %v1102_v0  ;;  %v1117_v3 = vsub.s32 %v1099_v63, %v3082_v62 }
   0xf   : > { %s2645_s4 = smul.u32 12, %s3703_s18 }
  0x10   : > { %2639 = vmatpush3.bf16.msra.mxu1 %v2678_v5  ;;  %2330 = vmatpush3.bf16.msra.mxu0 %v2678_v5  ;;  %v1122_v5 = vsub.s32 0, %v1103_v2  ;;  %vm1166_vm1 = vcmp.le.s32.totalorder %v2126_v4, 2 }
  0x11   : > { %2632 = vmatprep.subr.bf16.mxu1 %v2679_v6  ;;  %2331 = vmatprep.subr.bf16.mxu0 %v2679_v6  ;;  %s2975_s11 = scalar_lea.vmem %s3694_s0, %s2645_s4  ;;  %v1086_v6 = vadd.s32 16, %v3080_v61 }
  0x12   : > { %v2691_v11 = vld [vmem:[%s2975_s11 + $0xc4] ss:$12 sps:$4 sm:$0xff]   ;;  %v2689_v17 = vld [vmem:[%s2975_s11 + $0xc0] ss:$12 sps:$4 sm:$0xff]   ;;  %v2693_v19 = vld [vmem:[%s2975_s11 + $0xdc] ss:$12 sps:$4 sm:$0xff]  }
  0x13   : > { %843 = vmatprep.mubr.bf16.mxu1 %v2691_v11  ;;  %v2716_v21 = vld [vmem:[%s2975_s11] ss:$12 sps:$4 sm:$0xff]   ;;  %v2718_v22 = vld [vmem:[%s2975_s11 + $0x4] ss:$12 sps:$4 sm:$0xff]   ;;  %v2721_v24 = vld [vmem:[%s2975_s11 + $0x1c] ss:$12 sps:$4 sm:$0xff]  }
  0x14   : > { %2640 = vmatpush3.bf16.msra.mxu1 %v2680_v7  ;;  %2332 = vmatpush3.bf16.msra.mxu0 %v2680_v7  ;;  %v2695_v25 = vld [vmem:[%s2975_s11 + $0xd8] ss:$12 sps:$4 sm:$0xff]   ;;  %v2697_v26 = vld [vmem:[%s2975_s11 + $0xf4] ss:$12 sps:$4 sm:$0xff]   ;;  %v2700_v31 = vld [vmem:[%s2975_s11 + $0xf0] ss:$12 sps:$4 sm:$0xff]  }
  0x15   : > { %2633 = vmatprep.subr.bf16.mxu1 %v2681_v8  ;;  %2333 = vmatprep.subr.bf16.mxu0 %v2681_v8  ;;  %v2724_v28 = vld [vmem:[%s2975_s11 + $0x18] ss:$12 sps:$4 sm:$0xff]   ;;  %v2725_v29 = vld [vmem:[%s2975_s11 + $0x34] ss:$12 sps:$4 sm:$0xff]   ;;  %v2728_v34 = vld [vmem:[%s2975_s11 + $0x30] ss:$12 sps:$4 sm:$0xff]   ;;  %v2127_v8 = vmin.u32 %v1122_v5, %v1103_v2  ;;  %v1116_v2 = vsub.s32 %v1098_v60, %v3082_v62 }
  0x16   : > { %779 = vmatprep.mubr.bf16.mxu0 %v2718_v22  ;;  %v2702_v32 = vld [vmem:[%s2975_s11 + $0x10c] ss:$12 sps:$4 sm:$0xff]   ;;  %v2704_v37 = vld [vmem:[%s2975_s11 + $0x108] ss:$12 sps:$4 sm:$0xff]   ;;  %v2706_v38 = vld [vmem:[%s2975_s11 + $0x124] ss:$12 sps:$4 sm:$0xff]  }
  0x17   : > { %v2729_v35 = vld [vmem:[%s2975_s11 + $0x4c] ss:$12 sps:$4 sm:$0xff]   ;;  %v2732_v40 = vld [vmem:[%s2975_s11 + $0x48] ss:$12 sps:$4 sm:$0xff]   ;;  %v2733_v41 = vld [vmem:[%s2975_s11 + $0x64] ss:$12 sps:$4 sm:$0xff]  }
  0x18   : > { %2641 = vmatpush3.bf16.msra.mxu1 %v2682_v9  ;;  %2334 = vmatpush3.bf16.msra.mxu0 %v2682_v9  ;;  %v2708_v43 = vld [vmem:[%s2975_s11 + $0x120] ss:$12 sps:$4 sm:$0xff]   ;;  %v2710_v44 = vld [vmem:[%s2975_s11 + $0x13c] ss:$12 sps:$4 sm:$0xff]   ;;  %v2712_v47 = vld [vmem:[%s2975_s11 + $0x138] ss:$12 sps:$4 sm:$0xff]   ;;  %v1104_v9 = vsub.s32 %v1086_v6, %v3082_v62 }
  0x19   : > { %2634 = vmatprep.subr.bf16.mxu1 %v2683_v10  ;;  %2335 = vmatprep.subr.bf16.mxu0 %v2683_v10  ;;  %v2736_v45 = vld [vmem:[%s2975_s11 + $0x60] ss:$12 sps:$4 sm:$0xff]   ;;  %v2737_v46 = vld [vmem:[%s2975_s11 + $0x7c] ss:$12 sps:$4 sm:$0xff]   ;;  %v2740_v49 = vld [vmem:[%s2975_s11 + $0x78] ss:$12 sps:$4 sm:$0xff]  }
  0x1a   : > { %v2714_v48 = vld [vmem:[%s2975_s11 + $0x154] ss:$12 sps:$4 sm:$0xff]   ;;  %v2719_v51 = vld [vmem:[%s2975_s11 + $0x150] ss:$12 sps:$4 sm:$0xff]   ;;  %v2745_v53 = vld [vmem:[%s2975_s11 + $0xac] ss:$12 sps:$4 sm:$0xff]  }
  0x1b   : > { %v2741_v50 = vld [vmem:[%s2975_s11 + $0x94] ss:$12 sps:$4 sm:$0xff]   ;;  %v2744_v52 = vld [vmem:[%s2975_s11 + $0x90] ss:$12 sps:$4 sm:$0xff]   ;;  %v2731_v57 = vld [vmem:[%s2975_s11 + $0x38] ss:$12 sps:$4 sm:$0xff]  }
  0x1c   : > { %2642 = vmatpush3.bf16.msra.mxu1 %v2684_v12  ;;  %2336 = vmatpush3.bf16.msra.mxu0 %v2684_v12  ;;  %v2723_v54 = vld [vmem:[%s2975_s11 + $0x8] ss:$12 sps:$4 sm:$0xff]   ;;  %v2727_v56 = vld [vmem:[%s2975_s11 + $0x20] ss:$12 sps:$4 sm:$0xff]   ;;  %v2735_v58 = vld [vmem:[%s2975_s11 + $0x50] ss:$12 sps:$4 sm:$0xff]  }
  0x1d   : > { %2635 = vmatprep.subr.bf16.mxu1 %v2685_v13  ;;  %2337 = vmatprep.subr.bf16.mxu0 %v2685_v13  ;;  %v2748_v55 = vld [vmem:[%s2975_s11 + $0xa8] ss:$12 sps:$4 sm:$0xff]   ;;  %v2743_v1 = vld [vmem:[%s2975_s11 + $0x80] ss:$12 sps:$4 sm:$0xff]   ;;  %v1087_v7 = vadd.s32 24, %v3080_v61  ;;  %vm1167_vm2 = vcmp.le.s32.totalorder %v2127_v8, 2 }
  0x1e   : > { %v2739_v59 = vld [vmem:[%s2975_s11 + $0x68] ss:$12 sps:$4 sm:$0xff]   ;;  %v1125_v11 = vsub.s32 0, %v1104_v9  ;;  %v2747_v13 = vld [vmem:[%s2975_s11 + $0x98] ss:$12 sps:$4 sm:$0xff]   ;;  %vm2158_vm3 = vmpackc.low %vm1167_vm2, %vm1166_vm1  ;;  %v1161_v5 = vsub.s32 0, %v1116_v2 }
  0x1f   : > { %v1105_v10 = vsub.s32 %v1087_v7, %v3082_v62  ;;  %v2753_v4 = vld [vmem:[%s2975_s11 + $0x110] ss:$12 sps:$4 sm:$0xff]   ;;  %v1164_v6 = vsub.s32 0, %v1117_v3  ;;  %v2755_v8 = vld [vmem:[%s2975_s11 + $0x140] ss:$12 sps:$4 sm:$0xff]  }
  0x20   : > { %2643 = vmatpush3.bf16.msra.mxu1 %v2686_v14  ;;  %2338 = vmatpush3.bf16.msra.mxu0 %v2686_v14  ;;  %v2903_v14 = vmov 1.0|1.0  }
  0x21   : > { %2636 = vmatprep.subr.bf16.mxu1 %v2687_v15  ;;  %2339 = vmatprep.subr.bf16.mxu0 %v2687_v15  ;;  %v1128_v12 = vsub.s32 0, %v1105_v10  ;;  %v2128_v15 = vmin.u32 %v1125_v11, %v1104_v9  ;;  %v2141_v7 = vmin.u32 %v1164_v6, %v1117_v3  ;;  %v2756_v9 = vld [vmem:[%s2975_s11 + $0x158] ss:$12 sps:$4 sm:$0xff]  }
  0x23   : > { %vm1168_vm4 = vcmp.le.s32.totalorder %v2128_v15, 2 }
  0x24   : > { %2644 = vmatpush3.bf16.msra.mxu1 %v2688_v16  ;;  %2340 = vmatpush3.bf16.msra.mxu0 %v2688_v16  ;;  %v2129_v16 = vmin.u32 %v1128_v12, %v1105_v10  ;;  %v3162_v12 = vld [vmem:[%s3696_s2] ss:$0 sm:$0xff] }
  0x25   : > { %2477 = vmatprep.subr.bf16.mxu1 %v2901_v20  ;;  %2553 = vmatprep.subr.bf16.mxu0 %v2901_v20 }
  0x26   : > { %vm1169_vm5 = vcmp.le.s32.totalorder %v2129_v16, 2 }
  0x27   : > { %844 = vmatmul.mubr.bf16.vlgmr.msra.gmra.mrb[0].mxu1 %v2689_v17  ;;  %780 = vmatmul.mubr.bf16.vlgmr.msra.gmra.mrb[0].mxu0 %v2716_v21  ;;  %v1088_v17 = vadd.s32 32, %v3080_v61  ;;  %vm2160_vm6 = vmpackc.low %vm1169_vm5, %vm1168_vm4 }
  0x28   : > { %2478 = vmatpush3.bf16.msra.mxu1 %v2692_v18  ;;  %851 = vmatprep.mubr.bf16.mxu1 %v2693_v19  ;;  %v1089_v18 = vadd.s32 40, %v3080_v61 }
  0x29   : > { %2479 = vmatprep.subr.bf16.mxu1 %v2901_v20  ;;  %787 = vmatprep.mubr.bf16.mxu0 %v2721_v24  ;;  %v1106_v19 = vsub.s32 %v1088_v17, %v3082_v62  ;;  %v2749_v24 = vld [vmem:[%s2975_s11 + $0xb0] ss:$12 sps:$4 sm:$0xff]  }
  0x2a   : > { %2554 = vmatpush3.bf16.msk.msra.mxu0 %vm2158_vm3, %v2903_v14  ;;  %v1107_v21 = vsub.s32 %v1089_v18, %v3082_v62 }
  0x2b   : > { %2555 = vmatprep.subr.bf16.mxu0 %v2901_v20  ;;  %v1131_v22 = vsub.s32 0, %v1106_v19 }
  0x2c   : > { %2480 = vmatpush3.bf16.msra.mxu1 %v2696_v23  ;;  %v1134_v23 = vsub.s32 0, %v1107_v21 }
  0x2d   : > { %2481 = vmatprep.subr.bf16.mxu1 %v2901_v20 }
  0x2e   : > { %2556 = vmatpush3.bf16.msk.msra.mxu0 %vm2160_vm6, %v2903_v14 }
  0x2f   : > { %852 = vmatmul.mubr.bf16.gmra.mrb[4].mxu1 %v2695_v25  ;;  %788 = vmatmul.mubr.bf16.gmra.mrb[4].mxu0 %v2724_v28  ;;  %v2130_v25 = vmin.u32 %v1131_v22, %v1106_v19  ;;  %v1091_v28 = vadd.s32 56, %v3080_v61 }
  0x30   : > { %859 = vmatprep.mubr.bf16.mxu1 %v2697_v26  ;;  %2482 = vmatpush3.bf16.msra.mxu1 %v2699_v27  ;;  %v2131_v26 = vmin.u32 %v1134_v23, %v1107_v21  ;;  %v1090_v27 = vadd.s32 48, %v3080_v61 }
  0x31   : > { %2483 = vmatprep.subr.bf16.mxu1 %v2901_v20  ;;  %795 = vmatprep.mubr.bf16.mxu0 %v2725_v29  ;;  %vm1170_vm7 = vcmp.le.s32.totalorder %v2130_v25, 2 }
  0x32   : > { %2557 = vmatprep.subr.bf16.mxu0 %v2901_v20  ;;  %vm1171_vm8 = vcmp.le.s32.totalorder %v2131_v26, 2  ;;  %v1108_v29 = vsub.s32 %v1090_v27, %v3082_v62 }
  0x33   : > { %vm2162_vm9 = vmpackc.low %vm1171_vm8, %vm1170_vm7  ;;  %vm1181_vm8 = vcmp.le.s32.totalorder %v2141_v7, 2 }
  0x34   : > { %2484 = vmatpush3.bf16.msra.mxu1 %v2701_v30  ;;  %2558 = vmatpush3.bf16.msk.msra.mxu0 %vm2162_vm9, %v2903_v14  ;;  %v1109_v30 = vsub.s32 %v1091_v28, %v3082_v62 }
  0x35   : > { %2485 = vmatprep.subr.bf16.mxu1 %v2901_v20  ;;  %2559 = vmatprep.subr.bf16.mxu0 %v2901_v20 }
  0x37   : > { %860 = vmatmul.mubr.bf16.gmra.mrb[8].mxu1 %v2700_v31  ;;  %796 = vmatmul.mubr.bf16.gmra.mrb[8].mxu0 %v2728_v34  ;;  %v1137_v31 = vsub.s32 0, %v1108_v29 }
  0x38   : > { %867 = vmatprep.mubr.bf16.mxu1 %v2702_v32  ;;  %2486 = vmatpush3.bf16.msra.mxu1 %v2705_v33  ;;  %v1140_v32 = vsub.s32 0, %v1109_v30  ;;  %v2750_v33 = vld [vmem:[%s2975_s11 + $0xc8] ss:$12 sps:$4 sm:$0xff]  }
  0x39   : > { %2487 = vmatprep.subr.bf16.mxu1 %v2901_v20  ;;  %803 = vmatprep.mubr.bf16.mxu0 %v2729_v35  ;;  %v2132_v34 = vmin.u32 %v1137_v31, %v1108_v29 }
  0x3a   : > { %v2133_v35 = vmin.u32 %v1140_v32, %v1109_v30 }
  0x3b   : > { %vm1172_vm10 = vcmp.le.s32.totalorder %v2132_v34, 2 }
  0x3c   : > { %2488 = vmatpush3.bf16.msra.mxu1 %v2709_v36  ;;  %vm1173_vm11 = vcmp.le.s32.totalorder %v2133_v35, 2  ;;  %v1092_v36 = vadd.s32 64, %v3080_v61 }
  0x3d   : > { %2489 = vmatprep.subr.bf16.mxu1 %v2901_v20  ;;  %vm2164_vm12 = vmpackc.low %vm1173_vm11, %vm1172_vm10 }
  0x3e   : > { %2560 = vmatpush3.bf16.msk.msra.mxu0 %vm2164_vm12, %v2903_v14 }
  0x3f   : > { %868 = vmatmul.mubr.bf16.gmra.mrb[12].mxu1 %v2704_v37  ;;  %804 = vmatmul.mubr.bf16.gmra.mrb[12].mxu0 %v2732_v40  ;;  %v1093_v37 = vadd.s32 72, %v3080_v61 }
  0x40   : > { %875 = vmatprep.mubr.bf16.mxu1 %v2706_v38  ;;  %2490 = vmatpush3.bf16.msra.mxu1 %v2713_v39  ;;  %v1110_v38 = vsub.s32 %v1092_v36, %v3082_v62 }
  0x41   : > { %2491 = vmatprep.subr.bf16.mxu1 %v2901_v20  ;;  %811 = vmatprep.mubr.bf16.mxu0 %v2733_v41  ;;  %v1111_v39 = vsub.s32 %v1093_v37, %v3082_v62 }
  0x42   : > { %2561 = vmatprep.subr.bf16.mxu0 %v2901_v20  ;;  %v1143_v40 = vsub.s32 0, %v1110_v38 }
  0x43   : > { %v1146_v41 = vsub.s32 0, %v1111_v39 }
  0x44   : > { %2492 = vmatpush3.bf16.msra.mxu1 %v2720_v42  ;;  %v2751_v42 = vld [vmem:[%s2975_s11 + $0xe0] ss:$12 sps:$4 sm:$0xff]  }
  0x47   : > { %876 = vmatmul.mubr.bf16.gmra.mrb[16].mxu1 %v2708_v43  ;;  %812 = vmatmul.mubr.bf16.gmra.mrb[16].mxu0 %v2736_v45  ;;  %v2134_v43 = vmin.u32 %v1143_v40, %v1110_v38  ;;  %v1094_v45 = vadd.s32 80, %v3080_v61 }
  0x48   : > { %883 = vmatprep.mubr.bf16.mxu1 %v2710_v44  ;;  %819 = vmatprep.mubr.bf16.mxu0 %v2737_v46  ;;  %v2135_v44 = vmin.u32 %v1146_v41, %v1111_v39  ;;  %v1095_v46 = vadd.s32 88, %v3080_v61 }
  0x49   : > { %vm1174_vm13 = vcmp.le.s32.totalorder %v2134_v43, 2 }
  0x4a   : > { %vm1175_vm14 = vcmp.le.s32.totalorder %v2135_v44, 2 }
  0x4b   : > { %vm2166_vm15 = vmpackc.low %vm1175_vm14, %vm1174_vm13 }
  0x4c   : > { %2562 = vmatpush3.bf16.msk.msra.mxu0 %vm2166_vm15, %v2903_v14 }
  0x4d   : > { %2563 = vmatprep.subr.bf16.mxu0 %v2901_v20 }
  0x4f   : > { %884 = vmatmul.mubr.bf16.gmra.mrb[20].mxu1 %v2712_v47  ;;  %820 = vmatmul.mubr.bf16.gmra.mrb[20].mxu0 %v2740_v49  ;;  %v1112_v47 = vsub.s32 %v1094_v45, %v3082_v62 }
  0x50   : > { %891 = vmatprep.mubr.bf16.mxu1 %v2714_v48  ;;  %827 = vmatprep.mubr.bf16.mxu0 %v2741_v50  ;;  %v1113_v48 = vsub.s32 %v1095_v46, %v3082_v62 }
  0x51   : > { %v1149_v49 = vsub.s32 0, %v1112_v47 }
  0x52   : > { %v1152_v50 = vsub.s32 0, %v1113_v48 }
  0x57   : > { %892 = vmatmul.mubr.bf16.gmra.mrb[24].mxu1 %v2719_v51  ;;  %828 = vmatmul.mubr.bf16.gmra.mrb[24].mxu0 %v2744_v52  ;;  %v2752_v51 = vld [vmem:[%s2975_s11 + $0xf8] ss:$12 sps:$4 sm:$0xff]   ;;  %v2136_v52 = vmin.u32 %v1149_v49, %v1112_v47 }
  0x58   : > { %2493 = vmatprep.mubr.msk.bf16.mxu1 %vm2902_vm0, %v2901_v20  ;;  %835 = vmatprep.mubr.bf16.mxu0 %v2745_v53  ;;  %v2137_v53 = vmin.u32 %v1152_v50, %v1113_v48 }
  0x59   : > { %vm1176_vm1 = vcmp.le.s32.totalorder %v2136_v52, 2 }
  0x5a   : > { %vm1177_vm2 = vcmp.le.s32.totalorder %v2137_v53, 2 }
  0x5b   : > { %vm2168_vm3 = vmpackc.low %vm1177_vm2, %vm1176_vm1 }
  0x5c   : > { %2564 = vmatpush3.bf16.msk.msra.mxu0 %vm2168_vm3, %v2903_v14 }
  0x5d   : > { %2565 = vmatprep.subr.bf16.mxu0 %v2901_v20 }
  0x5f   : > { %2494 = vmatmul.mubr.bf16.vlgmr.msra.gmra.mrb[28].mxu1 %v2723_v54  ;;  %836 = vmatmul.mubr.bf16.gmra.mrb[28].mxu0 %v2748_v55  ;;  %v1096_v54 = vadd.s32 96, %v3080_v61  ;;  %v1097_v55 = vadd.s32 104, %v3080_v61  ;;  %v2140_v61 = vmin.u32 %v1161_v5, %v1116_v2 }
  0x60   : > { %2497 = vmatprep.mubr.msk.bf16.mxu1 %vm2902_vm0, %v2901_v20  ;;  %2569 = vmatprep.mubr.msk.bf16.mxu0 %vm2902_vm0, %v2901_v20 }
  0x61   : > { %vm1180_vm7 = vcmp.le.s32.totalorder %v2140_v61, 2 }
  0x62   : > { %vm2172_vm9 = vmpackc.low %vm1181_vm8, %vm1180_vm7 }
  0x67   : > { %2498 = vmatmul.mubr.bf16.gmra.mrb[32].mxu1 %v2727_v56  ;;  %v1114_v56 = vsub.s32 %v1096_v54, %v3082_v62 }
  0x68   : > { %2501 = vmatprep.mubr.msk.bf16.mxu1 %vm2902_vm0, %v2901_v20 }
  0x6f   : > { %2502 = vmatmul.mubr.bf16.gmra.mrb[36].mxu1 %v2731_v57  ;;  %v1115_v57 = vsub.s32 %v1097_v55, %v3082_v62  ;;  %v2754_v62 = vld [vmem:[%s2975_s11 + $0x128] ss:$12 sps:$4 sm:$0xff]   ;;  %s2055_s11 = sshll.u32 %s3703_s18, 2 }
  0x70   : > { %2505 = vmatprep.mubr.msk.bf16.mxu1 %vm2902_vm0, %v2901_v20  ;;  %s3447_s18 = scalar_lea.vmem %s3697_s3, %s2055_s11 }
  0x77   : > { %2506 = vmatmul.mubr.bf16.gmra.mrb[40].mxu1 %v2735_v58  ;;  %v1155_v58 = vsub.s32 0, %v1114_v56 }
  0x78   : > { %2509 = vmatprep.mubr.msk.bf16.mxu1 %vm2902_vm0, %v2901_v20 }
  0x79   : > { %v2138_v0 = vmin.u32 %v1155_v58, %v1114_v56 }
  0x7b   : > { %vm1178_vm4 = vcmp.le.s32.totalorder %v2138_v0, 2 }
  0x7f   : > { %2510 = vmatmul.mubr.bf16.gmra.mrb[44].mxu1 %v2739_v59  ;;  %v1158_v59 = vsub.s32 0, %v1115_v57 }
  0x80   : > { %2513 = vmatprep.mubr.msk.bf16.mxu1 %vm2902_vm0, %v2901_v20 }
  0x87   : > { %2514 = vmatmul.mubr.bf16.gmra.mrb[48].mxu1 %v2743_v1  ;;  %v2139_v1 = vmin.u32 %v1158_v59, %v1115_v57 }
  0x88   : > { %2517 = vmatprep.mubr.msk.bf16.mxu1 %vm2902_vm0, %v2901_v20 }
  0x89   : > { %vm1179_vm5 = vcmp.le.s32.totalorder %v2139_v1, 2 }
  0x8a   : > { %vm2170_vm6 = vmpackc.low %vm1179_vm5, %vm1178_vm4 }
  0x8b   : > { %2566 = vmatpush3.bf16.msk.msra.mxu0 %vm2170_vm6, %v2903_v14 }
  0x8c   : > { %2567 = vmatprep.subr.bf16.mxu0 %v2901_v20 }
  0x8f   : > { %2518 = vmatmul.mubr.bf16.gmra.mrb[52].mxu1 %v2747_v13  ;;  %2568 = vmatpush3.bf16.msk.msra.mxu0 %vm2172_vm9, %v2903_v14 }
  0x90   : > { %2521 = vmatprep.mubr.msk.bf16.mxu1 %vm2902_vm0, %v2901_v20 }
  0x97   : > { %2522 = vmatmul.mubr.bf16.gmra.mrb[56].mxu1 %v2749_v24 }
  0x98   : > { %2525 = vmatprep.mubr.msk.bf16.mxu1 %vm2902_vm0, %v2901_v20 }
  0x9f   : > { %2526 = vmatmul.mubr.bf16.gmra.mrb[60].mxu1 %v2750_v33 }
  0xa0   : > { %2529 = vmatprep.mubr.msk.bf16.mxu1 %vm2902_vm0, %v2901_v20 }
  0xa7   : > { %2530 = vmatmul.mubr.bf16.gmra.mrb[64].mxu1 %v2751_v42 }
  0xa8   : > { %2533 = vmatprep.mubr.msk.bf16.mxu1 %vm2902_vm0, %v2901_v20 }
  0xaf   : > { %2534 = vmatmul.mubr.bf16.gmra.mrb[68].mxu1 %v2752_v51 }
  0xb0   : > { %2537 = vmatprep.mubr.msk.bf16.mxu1 %vm2902_vm0, %v2901_v20 }
  0xb7   : > { %2538 = vmatmul.mubr.bf16.gmra.mrb[72].mxu1 %v2753_v4 }
  0xb8   : > { %2541 = vmatprep.mubr.msk.bf16.mxu1 %vm2902_vm0, %v2901_v20 }
  0xbf   : > { %2542 = vmatmul.mubr.bf16.gmra.mrb[76].mxu1 %v2754_v62 }
  0xc0   : > { %2545 = vmatprep.mubr.msk.bf16.mxu1 %vm2902_vm0, %v2901_v20 }
  0xc7   : > { %2546 = vmatmul.mubr.bf16.gmra.mrb[80].mxu1 %v2755_v8 }
  0xc8   : > { %2549 = vmatprep.mubr.msk.bf16.mxu1 %vm2902_vm0, %v2901_v20 }
  0xcf   : > { %2550 = vmatmul.mubr.bf16.gmra.mrb[84].mxu1 %v2756_v9 }
  0xfa   : > { %v2389_v10 = vpop.f32.mrb[0].mxu1  ;;  %v2341_v16 = vpop.f32.mrb[0].mxu0 }
  0xfb   : > { %v2390_v11 = vpop.f32.mrb[1].mxu1  ;;  %v2342_v18 = vpop.f32.mrb[1].mxu0 }
  0xfc   : > { %v2391_v13 = vadd.f32 %v2390_v11, %v2389_v10  ;;  %v2392_v14 = vpop.f32.mrb[2].mxu1  ;;  %v3167_v21 = vadd.f32 %v2342_v18, %v2341_v16  ;;  %v2344_v22 = vpop.f32.mrb[2].mxu0 }
  0xfd   : > { %v2393_v15 = vpop.f32.mrb[3].mxu1  ;;  %v2345_v23 = vpop.f32.mrb[3].mxu0 }
  0xfe   : > { %v2394_v17 = vadd.f32 %v2393_v15, %v2392_v14  ;;  %v3165_v19 = vadd.f32 %v2391_v13, %v3162_v12  ;;  %v3172_v25 = vadd.f32 %v2345_v23, %v2344_v22 }
 0x100   : > { %v3170_v24 = vadd.f32 %v2394_v17, %v3162_v12 }
 0x102   : > { %v2395_v26 = vpop.f32.mrb[4].mxu1  ;;  %v2347_v31 = vpop.f32.mrb[4].mxu0 }
 0x103   : > { %v2396_v27 = vpop.f32.mrb[5].mxu1  ;;  %v2348_v33 = vpop.f32.mrb[5].mxu0 }
 0x104   : > { %v2397_v28 = vadd.f32 %v2396_v27, %v2395_v26  ;;  %v2398_v29 = vpop.f32.mrb[6].mxu1  ;;  %v3177_v35 = vadd.f32 %v2348_v33, %v2347_v31  ;;  %v2350_v36 = vpop.f32.mrb[6].mxu0 }
 0x105   : > { %v2399_v30 = vpop.f32.mrb[7].mxu1  ;;  %v2351_v37 = vpop.f32.mrb[7].mxu0 }
 0x106   : > { %v2400_v32 = vadd.f32 %v2399_v30, %v2398_v29  ;;  %v3175_v34 = vadd.f32 %v2397_v28, %v3162_v12  ;;  %v3182_v39 = vadd.f32 %v2351_v37, %v2350_v36 }
 0x108   : > { %v3180_v38 = vadd.f32 %v2400_v32, %v3162_v12 }
 0x10a   : > { %v2401_v40 = vpop.f32.mrb[8].mxu1  ;;  %v2353_v45 = vpop.f32.mrb[8].mxu0 }
 0x10b   : > { %v2402_v41 = vpop.f32.mrb[9].mxu1  ;;  %v2354_v47 = vpop.f32.mrb[9].mxu0 }
 0x10c   : > { %v2403_v42 = vadd.f32 %v2402_v41, %v2401_v40  ;;  %v2404_v43 = vpop.f32.mrb[10].mxu1  ;;  %v3187_v49 = vadd.f32 %v2354_v47, %v2353_v45  ;;  %v2356_v50 = vpop.f32.mrb[10].mxu0 }
 0x10d   : > { %v2405_v44 = vpop.f32.mrb[11].mxu1  ;;  %v2357_v51 = vpop.f32.mrb[11].mxu0 }
 0x10e   : > { %v2406_v46 = vadd.f32 %v2405_v44, %v2404_v43  ;;  %v3185_v48 = vadd.f32 %v2403_v42, %v3162_v12  ;;  %v3192_v53 = vadd.f32 %v2357_v51, %v2356_v50 }
 0x110   : > { %v3190_v52 = vadd.f32 %v2406_v46, %v3162_v12 }
 0x112   : > { %v2407_v54 = vpop.f32.mrb[12].mxu1  ;;  %v2359_v59 = vpop.f32.mrb[12].mxu0 }
 0x113   : > { %v2408_v55 = vpop.f32.mrb[13].mxu1  ;;  %v2360_v63 = vpop.f32.mrb[13].mxu0 }
 0x114   : > { %v2409_v56 = vadd.f32 %v2408_v55, %v2407_v54  ;;  %v2410_v57 = vpop.f32.mrb[14].mxu1  ;;  %v3197_v1 = vadd.f32 %v2360_v63, %v2359_v59  ;;  %v2362_v2 = vpop.f32.mrb[14].mxu0  ;;  %v782_v55 = vadd.f32 %v3167_v21, %v3162_v12 }
 0x115   : > { %v2411_v58 = vpop.f32.mrb[15].mxu1  ;;  %v2363_v3 = vpop.f32.mrb[15].mxu0 }
 0x116   : > { %v2412_v60 = vadd.f32 %v2411_v58, %v2410_v57  ;;  %v3195_v0 = vadd.f32 %v2409_v56, %v3162_v12  ;;  %v3202_v5 = vadd.f32 %v2363_v3, %v2362_v2 }
 0x118   : > { %v3200_v4 = vadd.f32 %v2412_v60, %v3162_v12 }
 0x11a   : > { %v2413_v6 = vpop.f32.mrb[16].mxu1  ;;  %v2365_v9 = vpop.f32.mrb[16].mxu0 }
 0x11b   : > { %v2414_v61 = vpop.f32.mrb[17].mxu1  ;;  %v2366_v11 = vpop.f32.mrb[17].mxu0 }
 0x11c   : > { %v2415_v7 = vadd.f32 %v2414_v61, %v2413_v6  ;;  %v2416_v62 = vpop.f32.mrb[18].mxu1  ;;  %v3207_v14 = vadd.f32 %v2366_v11, %v2365_v9  ;;  %v2368_v15 = vpop.f32.mrb[18].mxu0  ;;  %v785_v6 = vadd.f32 %v3172_v25, %v3162_v12  ;;  %v790_v11 = vadd.f32 %v3177_v35, %v3162_v12 }
 0x11d   : > { %v2417_v8 = vpop.f32.mrb[19].mxu1  ;;  %v2369_v16 = vpop.f32.mrb[19].mxu0 }
 0x11e   : > { %v2418_v10 = vadd.f32 %v2417_v8, %v2416_v62  ;;  %v3205_v13 = vadd.f32 %v2415_v7, %v3162_v12  ;;  %v3212_v18 = vadd.f32 %v2369_v16, %v2368_v15 }
 0x120   : > { %v3210_v17 = vadd.f32 %v2418_v10, %v3162_v12 }
 0x122   : > { %v2419_v22 = vpop.f32.mrb[20].mxu1  ;;  %v2371_v29 = vpop.f32.mrb[20].mxu0 }
 0x123   : > { %v2420_v23 = vpop.f32.mrb[21].mxu1  ;;  %v2372_v31 = vpop.f32.mrb[21].mxu0 }
 0x124   : > { %v2421_v26 = vadd.f32 %v2420_v23, %v2419_v22  ;;  %v2422_v27 = vpop.f32.mrb[22].mxu1  ;;  %v3217_v33 = vadd.f32 %v2372_v31, %v2371_v29  ;;  %v2374_v36 = vpop.f32.mrb[22].mxu0  ;;  %v793_v31 = vadd.f32 %v3182_v39, %v3162_v12 }
 0x125   : > { %v2423_v28 = vpop.f32.mrb[23].mxu1  ;;  %v2375_v37 = vpop.f32.mrb[23].mxu0 }
 0x126   : > { %v2424_v30 = vadd.f32 %v2423_v28, %v2422_v27  ;;  %v3215_v32 = vadd.f32 %v2421_v26, %v3162_v12  ;;  %v3222_v41 = vadd.f32 %v2375_v37, %v2374_v36 }
 0x128   : > { %v3220_v40 = vadd.f32 %v2424_v30, %v3162_v12 }
 0x12a   : > { %v2425_v42 = vpop.f32.mrb[24].mxu1  ;;  %v2377_v47 = vpop.f32.mrb[24].mxu0 }
 0x12b   : > { %v2426_v43 = vpop.f32.mrb[25].mxu1  ;;  %v2378_v51 = vpop.f32.mrb[25].mxu0 }
 0x12c   : > { %v2427_v44 = vadd.f32 %v2426_v43, %v2425_v42  ;;  %v2428_v45 = vpop.f32.mrb[26].mxu1  ;;  %v3229_v56 = vadd.f32 %v2378_v51, %v2377_v47  ;;  %v2380_v57 = vpop.f32.mrb[26].mxu0  ;;  %v801_v51 = vadd.f32 %v3192_v53, %v3162_v12 }
 0x12d   : > { %v2429_v46 = vpop.f32.mrb[27].mxu1  ;;  %v2381_v58 = vpop.f32.mrb[27].mxu0 }
 0x12e   : > { %v2430_v50 = vadd.f32 %v2429_v46, %v2428_v45  ;;  %v3225_v54 = vadd.f32 %v2427_v44, %v3162_v12  ;;  %v3234_v60 = vadd.f32 %v2381_v58, %v2380_v57  ;;  %v798_v44 = vadd.f32 %v3187_v49, %v3162_v12 }
 0x130   : > { %v3232_v59 = vadd.f32 %v2430_v50, %v3162_v12 }
 0x132   : > { %v934_v63 = vpop.f32.mrb[28].mxu1  ;;  %v2383_v8 = vpop.f32.mrb[28].mxu0 }
 0x133   : > { %v935_v2 = vadd.f32 %v934_v63, %v782_v55  ;;  %v2495_v3 = vpop.f32.mrb[29].mxu1  ;;  %v2384_v9 = vpop.f32.mrb[29].mxu0 }
 0x134   : > { %v937_v61 = vpop.f32.mrb[30].mxu1  ;;  %v3244_v15 = vadd.f32 %v2384_v9, %v2383_v8  ;;  %v2386_v16 = vpop.f32.mrb[30].mxu0  ;;  %v806_v3 = vadd.f32 %v3197_v1, %v3162_v12  ;;  %v809_v8 = vadd.f32 %v3202_v5, %v3162_v12 }
 0x135   : > { %v3238_v7 = vmax.f32 %v935_v2, 0.0  ;;  %v938_v62 = vadd.f32 %v937_v61, %v785_v6  ;;  %v2496_v21 = vpop.f32.mrb[31].mxu1  ;;  %v2387_v22 = vpop.f32.mrb[31].mxu0 }
 0x136   : > { %v3250_v26 = vadd.f32 %v2387_v22, %v2386_v16 }
 0x137   : > { %v3240_v10 = vmax.f32 %v938_v62, 0.0  ;;  %v1222_v23 = vmul.f32 %v3238_v7, %v3238_v7 }
 0x139   : > { %v1223_v25 = vmul.f32 %v3240_v10, %v3240_v10 }
 0x13a   : > { %v942_v27 = vpop.f32.mrb[32].mxu1 }
 0x13b   : > { %v1252_v28 = vpack.c.bf16 %v1223_v25, %v1222_v23  ;;  %v943_v29 = vadd.f32 %v942_v27, %v790_v11  ;;  %v2499_v30 = vpop.f32.mrb[33].mxu1  ;;  %v814_v25 = vadd.f32 %v3207_v14, %v3162_v12 }
 0x13c   : > { %v945_v35 = vpop.f32.mrb[34].mxu1 }
 0x13d   : > { %v3254_v36 = vmax.f32 %v943_v29, 0.0  ;;  %v946_v37 = vadd.f32 %v945_v35, %v793_v31  ;;  %v2500_v42 = vpop.f32.mrb[35].mxu1  ;;  %2570 = vmatmul.mubr.bf16.vlgmr.msra.gmra.mrb[32].mxu0 %v1252_v28  ;;  %v817_v31 = vadd.f32 %v3212_v18, %v3162_v12 }
 0x13e   : > { %2573 = vmatprep.mubr.msk.bf16.mxu0 %vm2902_vm0, %v2901_v20 }
 0x13f   : > { %v3258_v43 = vmax.f32 %v946_v37, 0.0  ;;  %v1224_v45 = vmul.f32 %v3254_v36, %v3254_v36 }
 0x141   : > { %v1225_v39 = vmul.f32 %v3258_v43, %v3258_v43 }
 0x142   : > { %v950_v46 = vpop.f32.mrb[36].mxu1 }
 0x143   : > { %v951_v47 = vadd.f32 %v950_v46, %v798_v44  ;;  %v2503_v50 = vpop.f32.mrb[37].mxu1  ;;  %v1253_v55 = vpack.c.bf16 %v1225_v39, %v1224_v45  ;;  %v822_v39 = vadd.f32 %v3217_v33, %v3162_v12 }
 0x144   : > { %v953_v57 = vpop.f32.mrb[38].mxu1 }
 0x145   : > { %v3268_v58 = vmax.f32 %v951_v47, 0.0  ;;  %v954_v63 = vadd.f32 %v953_v57, %v801_v51  ;;  %v2504_v2 = vpop.f32.mrb[39].mxu1  ;;  %2574 = vmatmul.mubr.bf16.gmra.mrb[36].mxu0 %v1253_v55  ;;  %v825_v55 = vadd.f32 %v3222_v41, %v3162_v12 }
 0x146   : > { %2577 = vmatprep.mubr.msk.bf16.mxu0 %vm2902_vm0, %v2901_v20 }
 0x147   : > { %v3272_v49 = vmax.f32 %v954_v63, 0.0  ;;  %v1226_v6 = vmul.f32 %v3268_v58, %v3268_v58 }
 0x149   : > { %v1227_v53 = vmul.f32 %v3272_v49, %v3272_v49 }
 0x14a   : > { %v958_v61 = vpop.f32.mrb[40].mxu1 }
 0x14b   : > { %v959_v62 = vadd.f32 %v958_v61, %v806_v3  ;;  %v2507_v21 = vpop.f32.mrb[41].mxu1  ;;  %v1254_v9 = vpack.c.bf16 %v1227_v53, %v1226_v6  ;;  %v830_v53 = vadd.f32 %v3229_v56, %v3162_v12 }
 0x14c   : > { %v961_v11 = vpop.f32.mrb[42].mxu1 }
 0x14d   : > { %v3282_v16 = vmax.f32 %v959_v62, 0.0  ;;  %v962_v22 = vadd.f32 %v961_v11, %v809_v8  ;;  %v2508_v23 = vpop.f32.mrb[43].mxu1  ;;  %2578 = vmatmul.mubr.bf16.gmra.mrb[40].mxu0 %v1254_v9  ;;  %v833_v9 = vadd.f32 %v3234_v60, %v3162_v12 }
 0x14e   : > { %2581 = vmatprep.mubr.msk.bf16.mxu0 %vm2902_vm0, %v2901_v20 }
 0x14f   : > { %v3286_v1 = vmax.f32 %v962_v22, 0.0  ;;  %v1228_v27 = vmul.f32 %v3282_v16, %v3282_v16 }
 0x151   : > { %v1229_v5 = vmul.f32 %v3286_v1, %v3286_v1 }
 0x152   : > { %v966_v28 = vpop.f32.mrb[44].mxu1 }
 0x153   : > { %v967_v29 = vadd.f32 %v966_v28, %v814_v25  ;;  %v2511_v30 = vpop.f32.mrb[45].mxu1  ;;  %v1255_v35 = vpack.c.bf16 %v1229_v5, %v1228_v27  ;;  %v838_v5 = vadd.f32 %v3244_v15, %v3162_v12 }
 0x154   : > { %v969_v37 = vpop.f32.mrb[46].mxu1 }
 0x155   : > { %v3296_v42 = vmax.f32 %v967_v29, 0.0  ;;  %v970_v44 = vadd.f32 %v969_v37, %v817_v31  ;;  %v2512_v45 = vpop.f32.mrb[47].mxu1  ;;  %2582 = vmatmul.mubr.bf16.gmra.mrb[44].mxu0 %v1255_v35  ;;  %v841_v35 = vadd.f32 %v3250_v26, %v3162_v12 }
 0x156   : > { %2585 = vmatprep.mubr.msk.bf16.mxu0 %vm2902_vm0, %v2901_v20 }
 0x157   : > { %v3300_v14 = vmax.f32 %v970_v44, 0.0  ;;  %v1230_v46 = vmul.f32 %v3296_v42, %v3296_v42 }
 0x159   : > { %v1231_v18 = vmul.f32 %v3300_v14, %v3300_v14 }
 0x15a   : > { %v974_v47 = vpop.f32.mrb[48].mxu1 }
 0x15b   : > { %v975_v50 = vadd.f32 %v974_v47, %v822_v39  ;;  %v2515_v51 = vpop.f32.mrb[49].mxu1  ;;  %v1256_v57 = vpack.c.bf16 %v1231_v18, %v1230_v46 }
 0x15c   : > { %v977_v63 = vpop.f32.mrb[50].mxu1 }
 0x15d   : > { %v3310_v2 = vmax.f32 %v975_v50, 0.0  ;;  %v978_v3 = vadd.f32 %v977_v63, %v825_v55  ;;  %v2516_v6 = vpop.f32.mrb[51].mxu1  ;;  %2586 = vmatmul.mubr.bf16.gmra.mrb[48].mxu0 %v1256_v57 }
 0x15e   : > { %2589 = vmatprep.mubr.msk.bf16.mxu0 %vm2902_vm0, %v2901_v20 }
 0x15f   : > { %v3314_v33 = vmax.f32 %v978_v3, 0.0  ;;  %v1232_v61 = vmul.f32 %v3310_v2, %v3310_v2 }
 0x161   : > { %v1233_v41 = vmul.f32 %v3314_v33, %v3314_v33 }
 0x162   : > { %v982_v62 = vpop.f32.mrb[52].mxu1 }
 0x163   : > { %v983_v21 = vadd.f32 %v982_v62, %v830_v53  ;;  %v2519_v8 = vpop.f32.mrb[53].mxu1  ;;  %v1257_v11 = vpack.c.bf16 %v1233_v41, %v1232_v61 }
 0x164   : > { %v985_v22 = vpop.f32.mrb[54].mxu1 }
 0x165   : > { %v3324_v23 = vmax.f32 %v983_v21, 0.0  ;;  %v986_v25 = vadd.f32 %v985_v22, %v833_v9  ;;  %v2520_v27 = vpop.f32.mrb[55].mxu1  ;;  %2590 = vmatmul.mubr.bf16.gmra.mrb[52].mxu0 %v1257_v11 }
 0x166   : > { %2593 = vmatprep.mubr.msk.bf16.mxu0 %vm2902_vm0, %v2901_v20 }
 0x167   : > { %v3328_v56 = vmax.f32 %v986_v25, 0.0  ;;  %v1234_v28 = vmul.f32 %v3324_v23, %v3324_v23 }
 0x169   : > { %v1235_v60 = vmul.f32 %v3328_v56, %v3328_v56 }
 0x16a   : > { %v990_v29 = vpop.f32.mrb[56].mxu1 }
 0x16b   : > { %v991_v30 = vadd.f32 %v990_v29, %v838_v5  ;;  %v2523_v31 = vpop.f32.mrb[57].mxu1  ;;  %v1258_v37 = vpack.c.bf16 %v1235_v60, %v1234_v28 }
 0x16c   : > { %v993_v44 = vpop.f32.mrb[58].mxu1 }
 0x16d   : > { %v3338_v45 = vmax.f32 %v991_v30, 0.0  ;;  %v994_v39 = vadd.f32 %v993_v44, %v841_v35  ;;  %v2524_v46 = vpop.f32.mrb[59].mxu1  ;;  %2594 = vmatmul.mubr.bf16.gmra.mrb[56].mxu0 %v1258_v37 }
 0x16e   : > { %2597 = vmatprep.mubr.msk.bf16.mxu0 %vm2902_vm0, %v2901_v20 }
 0x16f   : > { %v3342_v15 = vmax.f32 %v994_v39, 0.0  ;;  %v1236_v18 = vmul.f32 %v3338_v45, %v3338_v45 }
 0x171   : > { %v1237_v47 = vmul.f32 %v3342_v15, %v3342_v15 }
 0x172   : > { %v998_v50 = vpop.f32.mrb[60].mxu1 }
 0x173   : > { %v999_v12 = vadd.f32 %v998_v50, %v3165_v19  ;;  %v2527_v26 = vpop.f32.mrb[61].mxu1  ;;  %v1259_v51 = vpack.c.bf16 %v1237_v47, %v1236_v18 }
 0x174   : > { %v1001_v55 = vpop.f32.mrb[62].mxu1 }
 0x175   : > { %v3349_v57 = vmax.f32 %v999_v12, 0.0  ;;  %v1002_v63 = vadd.f32 %v1001_v55, %v3170_v24  ;;  %v2528_v3 = vpop.f32.mrb[63].mxu1  ;;  %2598 = vmatmul.mubr.bf16.gmra.mrb[60].mxu0 %v1259_v51 }
 0x176   : > { %2601 = vmatprep.mubr.msk.bf16.mxu0 %vm2902_vm0, %v2901_v20 }
 0x177   : > { %v3354_v6 = vmax.f32 %v1002_v63, 0.0  ;;  %v1238_v53 = vmul.f32 %v3349_v57, %v3349_v57 }
 0x179   : > { %v1239_v19 = vmul.f32 %v3354_v6, %v3354_v6 }
 0x17a   : > { %v1006_v61 = vpop.f32.mrb[64].mxu1 }
 0x17b   : > { %v1007_v41 = vadd.f32 %v1006_v61, %v3175_v34  ;;  %v2531_v62 = vpop.f32.mrb[65].mxu1  ;;  %v1260_v21 = vpack.c.bf16 %v1239_v19, %v1238_v53 }
 0x17c   : > { %v1009_v8 = vpop.f32.mrb[66].mxu1 }
 0x17d   : > { %v3361_v24 = vmax.f32 %v1007_v41, 0.0  ;;  %v1010_v9 = vadd.f32 %v1009_v8, %v3180_v38  ;;  %v2532_v11 = vpop.f32.mrb[67].mxu1  ;;  %2602 = vmatmul.mubr.bf16.gmra.mrb[64].mxu0 %v1260_v21 }
 0x17e   : > { %2605 = vmatprep.mubr.msk.bf16.mxu0 %vm2902_vm0, %v2901_v20 }
 0x17f   : > { %v3366_v22 = vmax.f32 %v1010_v9, 0.0  ;;  %v1240_v25 = vmul.f32 %v3361_v24, %v3361_v24 }
 0x181   : > { %v1241_v34 = vmul.f32 %v3366_v22, %v3366_v22 }
 0x182   : > { %v1014_v27 = vpop.f32.mrb[68].mxu1 }
 0x183   : > { %v1015_v5 = vadd.f32 %v1014_v27, %v3185_v48  ;;  %v2535_v28 = vpop.f32.mrb[69].mxu1  ;;  %v1261_v60 = vpack.c.bf16 %v1241_v34, %v1240_v25 }
 0x184   : > { %v1017_v29 = vpop.f32.mrb[70].mxu1 }
 0x185   : > { %v3373_v38 = vmax.f32 %v1015_v5, 0.0  ;;  %v1018_v30 = vadd.f32 %v1017_v29, %v3190_v52  ;;  %v2536_v31 = vpop.f32.mrb[71].mxu1  ;;  %2606 = vmatmul.mubr.bf16.gmra.mrb[68].mxu0 %v1261_v60 }
 0x186   : > { %2609 = vmatprep.mubr.msk.bf16.mxu0 %vm2902_vm0, %v2901_v20 }
 0x187   : > { %v3378_v35 = vmax.f32 %v1018_v30, 0.0  ;;  %v1242_v37 = vmul.f32 %v3373_v38, %v3373_v38 }
 0x189   : > { %v1243_v48 = vmul.f32 %v3378_v35, %v3378_v35 }
 0x18a   : > { %v1022_v44 = vpop.f32.mrb[72].mxu1 }
 0x18b   : > { %v1023_v39 = vadd.f32 %v1022_v44, %v3195_v0  ;;  %v2539_v46 = vpop.f32.mrb[73].mxu1  ;;  %v1262_v18 = vpack.c.bf16 %v1243_v48, %v1242_v37 }
 0x18c   : > { %v1025_v47 = vpop.f32.mrb[74].mxu1 }
 0x18d   : > { %v3385_v52 = vmax.f32 %v1023_v39, 0.0  ;;  %v1026_v50 = vadd.f32 %v1025_v47, %v3200_v4  ;;  %v2540_v12 = vpop.f32.mrb[75].mxu1  ;;  %2610 = vmatmul.mubr.bf16.gmra.mrb[72].mxu0 %v1262_v18 }
 0x18e   : > { %2613 = vmatprep.mubr.msk.bf16.mxu0 %vm2902_vm0, %v2901_v20 }
 0x18f   : > { %v3390_v26 = vmax.f32 %v1026_v50, 0.0  ;;  %v1244_v51 = vmul.f32 %v3385_v52, %v3385_v52 }
 0x191   : > { %v1245_v0 = vmul.f32 %v3390_v26, %v3390_v26 }
 0x192   : > { %v1030_v55 = vpop.f32.mrb[76].mxu1 }
 0x193   : > { %v1031_v63 = vadd.f32 %v1030_v55, %v3205_v13  ;;  %v2543_v3 = vpop.f32.mrb[77].mxu1  ;;  %v1263_v53 = vpack.c.bf16 %v1245_v0, %v1244_v51 }
 0x194   : > { %v1033_v19 = vpop.f32.mrb[78].mxu1 }
 0x195   : > { %v3397_v4 = vmax.f32 %v1031_v63, 0.0  ;;  %v1034_v61 = vadd.f32 %v1033_v19, %v3210_v17  ;;  %v2544_v41 = vpop.f32.mrb[79].mxu1  ;;  %2614 = vmatmul.mubr.bf16.gmra.mrb[76].mxu0 %v1263_v53 }
 0x196   : > { %2617 = vmatprep.mubr.msk.bf16.mxu0 %vm2902_vm0, %v2901_v20 }
 0x197   : > { %v3402_v62 = vmax.f32 %v1034_v61, 0.0  ;;  %v1246_v21 = vmul.f32 %v3397_v4, %v3397_v4 }
 0x199   : > { %v1247_v13 = vmul.f32 %v3402_v62, %v3402_v62 }
 0x19a   : > { %v1038_v8 = vpop.f32.mrb[80].mxu1 }
 0x19b   : > { %v1039_v9 = vadd.f32 %v1038_v8, %v3215_v32  ;;  %v2547_v11 = vpop.f32.mrb[81].mxu1  ;;  %v1264_v25 = vpack.c.bf16 %v1247_v13, %v1246_v21 }
 0x19c   : > { %v1041_v34 = vpop.f32.mrb[82].mxu1 }
 0x19d   : > { %v3409_v17 = vmax.f32 %v1039_v9, 0.0  ;;  %v1042_v27 = vadd.f32 %v1041_v34, %v3220_v40  ;;  %v2548_v5 = vpop.f32.mrb[83].mxu1  ;;  %2618 = vmatmul.mubr.bf16.gmra.mrb[80].mxu0 %v1264_v25 }
 0x19e   : > { %2621 = vmatprep.mubr.msk.bf16.mxu0 %vm2902_vm0, %v2901_v20 }
 0x19f   : > { %v3414_v28 = vmax.f32 %v1042_v27, 0.0  ;;  %v1248_v60 = vmul.f32 %v3409_v17, %v3409_v17 }
 0x1a1   : > { %v1249_v32 = vmul.f32 %v3414_v28, %v3414_v28 }
 0x1a2   : > { %v1046_v29 = vpop.f32.mrb[84].mxu1 }
 0x1a3   : > { %v1047_v30 = vadd.f32 %v1046_v29, %v3225_v54  ;;  %v2551_v31 = vpop.f32.mrb[85].mxu1  ;;  %v1265_v37 = vpack.c.bf16 %v1249_v32, %v1248_v60 }
 0x1a4   : > { %v1049_v48 = vpop.f32.mrb[86].mxu1 }
 0x1a5   : > { %v3421_v40 = vmax.f32 %v1047_v30, 0.0  ;;  %v1050_v44 = vadd.f32 %v1049_v48, %v3232_v59  ;;  %v2552_v39 = vpop.f32.mrb[87].mxu1  ;;  %2622 = vmatmul.mubr.bf16.gmra.mrb[84].mxu0 %v1265_v37 }
 0x1a6   : > { %2625 = vmatprep.mubr.msk.bf16.mxu0 %vm2902_vm0, %v2901_v20 }
 0x1a7   : > { %v3426_v46 = vmax.f32 %v1050_v44, 0.0  ;;  %v1250_v18 = vmul.f32 %v3421_v40, %v3421_v40 }
 0x1a9   : > { %v1251_v54 = vmul.f32 %v3426_v46, %v3426_v46 }
 0x1ab   : > { %v1266_v47 = vpack.c.bf16 %v1251_v54, %v1250_v18 }
 0x1ad   : > { %2626 = vmatmul.mubr.bf16.gmra.mrb[88].mxu0 %v1266_v47 }
 0x210   : > { %v1301_v50 = vpop.f32.mrb[32].mxu0 }
 0x211   : > { %v1420_v12 = vmul.f32 2e-05, %v1301_v50  ;;  %v2571_v51 = vpop.f32.mrb[33].mxu0 }
 0x212   : > { %v1304_v0 = vpop.f32.mrb[34].mxu0 }
 0x213   : > { %v1450_v59 = vadd.f32 1.0, %v1420_v12  ;;  %v1421_v55 = vmul.f32 2e-05, %v1304_v0  ;;  %v2572_v63 = vpop.f32.mrb[35].mxu0 }
 0x215   : > { %2757 = vrsqrt.f32 %v1450_v59  ;;  %v1451_v3 = vadd.f32 1.0, %v1421_v55 }
 0x217   : > { %2759 = vrsqrt.f32 %v1451_v3 }
 0x218   : > { %v1309_v20 = vpop.f32.mrb[36].mxu0 }
 0x219   : > { %v1422_v53 = vmul.f32 2e-05, %v1309_v20  ;;  %v2575_v19 = vpop.f32.mrb[37].mxu0 }
 0x21a   : > { %v1312_v61 = vpop.f32.mrb[38].mxu0 }
 0x21b   : > { %v1452_v41 = vadd.f32 1.0, %v1422_v53  ;;  %v1423_v21 = vmul.f32 2e-05, %v1312_v61  ;;  %v2576_v13 = vpop.f32.mrb[39].mxu0 }
 0x21d   : > { %2761 = vrsqrt.f32 %v1452_v41  ;;  %v1453_v8 = vadd.f32 1.0, %v1423_v21 }
 0x21f   : > { %v2758_v9 = vpop.eup %2757  ;;  %2763 = vrsqrt.f32 %v1453_v8 }
 0x220   : > { %2765 = vrsqrt.f32 %v2758_v9  ;;  %v1317_v11 = vpop.f32.mrb[40].mxu0  ;;  %vm1512_vm0 = vcmp.eq.f32.partialorder %v2758_v9, inf  ;;  %vm1514_vm10 = vcmp.eq.f32.partialorder %v2758_v9, 0.0  ;;  %v1515_v59 = vand.u32 2147483648, %v2758_v9 }
 0x221   : > { %v2760_v25 = vpop.eup %2759  ;;  %v1424_v34 = vmul.f32 2e-05, %v1317_v11  ;;  %v2579_v27 = vpop.f32.mrb[41].mxu0 }
 0x222   : > { %2767 = vrsqrt.f32 %v2760_v25  ;;  %v1320_v5 = vpop.f32.mrb[42].mxu0  ;;  %vm1519_vm11 = vcmp.eq.f32.partialorder %v2760_v25, inf  ;;  %v1522_v53 = vand.u32 2147483648, %v2760_v25  ;;  %vm1521_vm12 = vcmp.eq.f32.partialorder %v2760_v25, 0.0 }
 0x223   : > { %v1454_v60 = vadd.f32 1.0, %v1424_v34  ;;  %v1425_v32 = vmul.f32 2e-05, %v1320_v5  ;;  %v2580_v29 = vpop.f32.mrb[43].mxu0 }
 0x225   : > { %2769 = vrsqrt.f32 %v1454_v60  ;;  %v1455_v30 = vadd.f32 1.0, %v1425_v32 }
 0x227   : > { %v2762_v31 = vpop.eup %2761  ;;  %2771 = vrsqrt.f32 %v1455_v30 }
 0x228   : > { %2773 = vrsqrt.f32 %v2762_v31  ;;  %v1325_v37 = vpop.f32.mrb[44].mxu0  ;;  %vm1526_vm13 = vcmp.eq.f32.partialorder %v2762_v31, inf  ;;  %vm1528_vm14 = vcmp.eq.f32.partialorder %v2762_v31, 0.0 }
 0x229   : > { %v3432_v48 = vpop.eup %2763  ;;  %v1426_v44 = vmul.f32 2e-05, %v1325_v37  ;;  %v2583_v39 = vpop.f32.mrb[45].mxu0 }
 0x22a   : > { %v2766_v18 = vpop.eup %2765  ;;  %2775 = vrsqrt.f32 %v3432_v48  ;;  %v1328_v54 = vpop.f32.mrb[46].mxu0  ;;  %vm1533_vm15 = vcmp.eq.f32.partialorder %v3432_v48, inf  ;;  %vm1535_vm1 = vcmp.eq.f32.partialorder %v3432_v48, 0.0 }
 0x22b   : > { %v1511_v47 = vmul.f32 %v2766_v18, %v2758_v9  ;;  %v1456_v50 = vadd.f32 1.0, %v1426_v44  ;;  %v1427_v12 = vmul.f32 2e-05, %v1328_v54  ;;  %v2584_v51 = vpop.f32.mrb[47].mxu0 }
 0x22c   : > { %v2768_v0 = vpop.eup %2767 }
 0x22d   : > { %v1513_v55 = vsel %vm1512_vm0, %v2758_v9, %v1511_v47  ;;  %v1518_v63 = vmul.f32 %v2768_v0, %v2760_v25  ;;  %2777 = vrsqrt.f32 %v1456_v50  ;;  %v1457_v3 = vadd.f32 1.0, %v1427_v12 }
 0x22e   : > { %v1516_v20 = vsel %vm1514_vm10, %v1515_v59, %v1513_v55  ;;  %v1536_v47 = vand.u32 2147483648, %v3432_v48 }
 0x22f   : > { %v3435_v19 = vpop.eup %2769  ;;  %v1720_v61 = vmul.f32 %v2758_v9, %v1516_v20  ;;  %v1520_v41 = vsel %vm1519_vm11, %v2760_v25, %v1518_v63  ;;  %2779 = vrsqrt.f32 %v1457_v3 }
 0x230   : > { %v1523_v21 = vsel %vm1521_vm12, %v1522_v53, %v1520_v41  ;;  %2781 = vrsqrt.f32 %v3435_v19  ;;  %v1333_v13 = vpop.f32.mrb[48].mxu0  ;;  %vm1540_vm2 = vcmp.eq.f32.partialorder %v3435_v19, inf  ;;  %vm1542_vm3 = vcmp.eq.f32.partialorder %v3435_v19, 0.0 }
 0x231   : > { %v3438_v8 = vpop.eup %2771  ;;  %v1721_v11 = vmul.f32 %v2760_v25, %v1523_v21  ;;  %v1428_v34 = vmul.f32 2e-05, %v1333_v13  ;;  %v2587_v27 = vpop.f32.mrb[49].mxu0  ;;  %v1750_v60 = vmul.f32 %v1720_v61, %v3238_v7  ;;  %v1529_v25 = vand.u32 2147483648, %v2762_v31 }
 0x232   : > { %v2774_v5 = vpop.eup %2773  ;;  %2783 = vrsqrt.f32 %v3438_v8  ;;  %v1336_v32 = vpop.f32.mrb[50].mxu0  ;;  %vm1547_vm4 = vcmp.eq.f32.partialorder %v3438_v8, inf  ;;  %vm1549_vm5 = vcmp.eq.f32.partialorder %v3438_v8, 0.0 }
 0x233   : > { %v1751_v9 = vmul.f32 %v1721_v11, %v3240_v10  ;;  %v1525_v29 = vmul.f32 %v2774_v5, %v2762_v31  ;;  %v1458_v30 = vadd.f32 1.0, %v1428_v34  ;;  %v1429_v37 = vmul.f32 2e-05, %v1336_v32  ;;  %v2588_v44 = vpop.f32.mrb[51].mxu0 }
 0x234   : > { %v2776_v39 = vpop.eup %2775 }
 0x235   : > { %v2239_v7 = vpack.c.bf16 %v1751_v9, %v1750_v60  ;;  %v1527_v18 = vsel %vm1526_vm13, %v2762_v31, %v1525_v29  ;;  %v1532_v54 = vmul.f32 %v2776_v39, %v3432_v48  ;;  %2785 = vrsqrt.f32 %v1458_v30 }
 0x236   : > { %v1530_v10 = vsel %vm1528_vm14, %v1529_v25, %v1527_v18  ;;  %v1459_v50 = vadd.f32 1.0, %v1429_v37  ;;  %v1550_v9 = vand.u32 2147483648, %v3438_v8 }
 0x237   : > { %v3452_v12 = vpop.eup %2777  ;;  %2240 = vst [vmem:[%s3447_s18] sm:$0xff] %v2239_v7   ;;  %v1722_v51 = vmul.f32 %v2762_v31, %v1530_v10  ;;  %v1534_v0 = vsel %vm1533_vm15, %v3432_v48, %v1532_v54 }
 0x238   : > { %v1537_v59 = vsel %vm1535_vm1, %v1536_v47, %v1534_v0  ;;  %2787 = vrsqrt.f32 %v3452_v12  ;;  %v1341_v55 = vpop.f32.mrb[52].mxu0  ;;  %vm1554_vm6 = vcmp.eq.f32.partialorder %v3452_v12, inf  ;;  %vm1556_vm7 = vcmp.eq.f32.partialorder %v3452_v12, 0.0 }
 0x239   : > { %v3458_v63 = vpop.eup %2779  ;;  %v1723_v3 = vmul.f32 %v3432_v48, %v1537_v59  ;;  %2789 = vrsqrt.f32 %v1459_v50  ;;  %v2591_v20 = vpop.f32.mrb[53].mxu0  ;;  %v1752_v61 = vmul.f32 %v1722_v51, %v3254_v36  ;;  %v1430_v13 = vmul.f32 2e-05, %v1341_v55 }
 0x23a   : > { %v2782_v53 = vpop.eup %2781  ;;  %2791 = vrsqrt.f32 %v3458_v63  ;;  %v1344_v31 = vpop.f32.mrb[54].mxu0  ;;  %v1543_v48 = vand.u32 2147483648, %v3435_v19  ;;  %vm1561_vm8 = vcmp.eq.f32.partialorder %v3458_v63, inf  ;;  %vm1563_vm9 = vcmp.eq.f32.partialorder %v3458_v63, 0.0 }
 0x23b   : > { %v1753_v41 = vmul.f32 %v1723_v3, %v3258_v43  ;;  %v1539_v21 = vmul.f32 %v2782_v53, %v3435_v19  ;;  %v1431_v11 = vmul.f32 2e-05, %v1344_v31  ;;  %v2592_v34 = vpop.f32.mrb[55].mxu0  ;;  %v1460_v32 = vadd.f32 1.0, %v1430_v13 }
 0x23c   : > { %v2784_v27 = vpop.eup %2783  ;;  %v1564_v31 = vand.u32 2147483648, %v3458_v63 }
 0x23d   : > { %v2244_v5 = vpack.c.bf16 %v1753_v41, %v1752_v61  ;;  %v1541_v36 = vsel %vm1540_vm2, %v3435_v19, %v1539_v21  ;;  %v1546_v60 = vmul.f32 %v2784_v27, %v3438_v8  ;;  %v1461_v29 = vadd.f32 1.0, %v1431_v11 }
 0x23e   : > { %v1544_v43 = vsel %vm1542_vm3, %v1543_v48, %v1541_v36  ;;  %2793 = vrsqrt.f32 %v1460_v32 }
 0x23f   : > { %v3472_v30 = vpop.eup %2785  ;;  %2311 = vst [vmem:[%s3447_s18 + $0x8] sm:$0xff] %v2244_v5   ;;  %v1724_v37 = vmul.f32 %v3435_v19, %v1544_v43  ;;  %v1548_v44 = vsel %vm1547_vm4, %v3438_v8, %v1546_v60 }
 0x240   : > { %v1551_v39 = vsel %vm1549_vm5, %v1550_v9, %v1548_v44  ;;  %2795 = vrsqrt.f32 %v3472_v30  ;;  %v1349_v25 = vpop.f32.mrb[56].mxu0  ;;  %vm1568_vm0 = vcmp.eq.f32.partialorder %v3472_v30, inf  ;;  %vm1570_vm10 = vcmp.eq.f32.partialorder %v3472_v30, 0.0 }
 0x241   : > { %v1725_v7 = vmul.f32 %v3438_v8, %v1551_v39  ;;  %2797 = vrsqrt.f32 %v1461_v29  ;;  %v2595_v18 = vpop.f32.mrb[57].mxu0  ;;  %v1432_v10 = vmul.f32 2e-05, %v1349_v25  ;;  %v1754_v19 = vmul.f32 %v1724_v37, %v3268_v58 }
 0x242   : > { %v2788_v54 = vpop.eup %2787  ;;  %v1352_v47 = vpop.f32.mrb[58].mxu0  ;;  %v1557_v8 = vand.u32 2147483648, %v3452_v12 }
 0x243   : > { %v3480_v50 = vpop.eup %2789  ;;  %v1755_v51 = vmul.f32 %v1725_v7, %v3272_v49  ;;  %v1553_v0 = vmul.f32 %v2788_v54, %v3452_v12  ;;  %v1433_v59 = vmul.f32 2e-05, %v1352_v47  ;;  %v2596_v55 = vpop.f32.mrb[59].mxu0  ;;  %v1462_v49 = vadd.f32 1.0, %v1432_v10 }
 0x244   : > { %v2792_v3 = vpop.eup %2791  ;;  %2799 = vrsqrt.f32 %v3480_v50  ;;  %vm1575_vm11 = vcmp.eq.f32.partialorder %v3480_v50, inf  ;;  %v1578_v10 = vand.u32 2147483648, %v3480_v50  ;;  %vm1577_vm12 = vcmp.eq.f32.partialorder %v3480_v50, 0.0 }
 0x245   : > { %v2249_v20 = vpack.c.bf16 %v1755_v51, %v1754_v19  ;;  %v1555_v53 = vsel %vm1554_vm6, %v3452_v12, %v1553_v0  ;;  %v1560_v58 = vmul.f32 %v2792_v3, %v3458_v63  ;;  %v1463_v41 = vadd.f32 1.0, %v1433_v59 }
 0x246   : > { %v1558_v61 = vsel %vm1556_vm7, %v1557_v8, %v1555_v53  ;;  %2801 = vrsqrt.f32 %v1462_v49 }
 0x247   : > { %2312 = vst [vmem:[%s3447_s18 + $0x10] sm:$0xff] %v2249_v20   ;;  %v1726_v21 = vmul.f32 %v3452_v12, %v1558_v61  ;;  %v1562_v13 = vsel %vm1561_vm8, %v3458_v63, %v1560_v58  ;;  %2803 = vrsqrt.f32 %v1463_v41 }
 0x248   : > { %v1565_v11 = vsel %vm1563_vm9, %v1564_v31, %v1562_v13  ;;  %v1357_v34 = vpop.f32.mrb[60].mxu0  ;;  %v3497_v27 = vpop.eup %2793 }
 0x249   : > { %v1727_v48 = vmul.f32 %v3458_v63, %v1565_v11  ;;  %v1434_v5 = vmul.f32 2e-05, %v1357_v34  ;;  %v2599_v36 = vpop.f32.mrb[61].mxu0  ;;  %v1756_v32 = vmul.f32 %v1726_v21, %v3282_v16  ;;  %2805 = vrsqrt.f32 %v3497_v27 }
 0x24a   : > { %v2796_v60 = vpop.eup %2795  ;;  %v1360_v12 = vpop.f32.mrb[62].mxu0  ;;  %v1571_v63 = vand.u32 2147483648, %v3472_v30  ;;  %vm1582_vm13 = vcmp.eq.f32.partialorder %v3497_v27, inf  ;;  %v1585_v11 = vand.u32 2147483648, %v3497_v27  ;;  %vm1584_vm14 = vcmp.eq.f32.partialorder %v3497_v27, 0.0 }
 0x24b   : > { %v3502_v43 = vpop.eup %2797  ;;  %v1757_v9 = vmul.f32 %v1727_v48, %v3286_v1  ;;  %v1567_v29 = vmul.f32 %v2796_v60, %v3472_v30  ;;  %v1464_v37 = vadd.f32 1.0, %v1434_v5  ;;  %v1435_v44 = vmul.f32 2e-05, %v1360_v12  ;;  %v2600_v39 = vpop.f32.mrb[63].mxu0 }
 0x24c   : > { %2807 = vrsqrt.f32 %v3502_v43  ;;  %vm1589_vm15 = vcmp.eq.f32.partialorder %v3502_v43, inf  ;;  %v1592_v36 = vand.u32 2147483648, %v3502_v43  ;;  %vm1591_vm1 = vcmp.eq.f32.partialorder %v3502_v43, 0.0 }
 0x24d   : > { %v2254_v16 = vpack.c.bf16 %v1757_v9, %v1756_v32  ;;  %v1569_v25 = vsel %vm1568_vm0, %v3472_v30, %v1567_v29  ;;  %2809 = vrsqrt.f32 %v1464_v37  ;;  %v1465_v7 = vadd.f32 1.0, %v1435_v44 }
 0x24e   : > { %v2800_v18 = vpop.eup %2799  ;;  %v1572_v1 = vsel %vm1570_vm10, %v1571_v63, %v1569_v25 }
 0x24f   : > { %2313 = vst [vmem:[%s3447_s18 + $0x18] sm:$0xff] %v2254_v16   ;;  %v1574_v54 = vmul.f32 %v2800_v18, %v3480_v50  ;;  %2811 = vrsqrt.f32 %v1465_v7  ;;  %v1728_v51 = vmul.f32 %v3472_v30, %v1572_v1 }
 0x250   : > { %v1365_v47 = vpop.f32.mrb[64].mxu0  ;;  %v3515_v19 = vpop.eup %2801 }
 0x251   : > { %v1576_v0 = vsel %vm1575_vm11, %v3480_v50, %v1574_v54  ;;  %v1436_v59 = vmul.f32 2e-05, %v1365_v47  ;;  %v2603_v55 = vpop.f32.mrb[65].mxu0  ;;  %v3520_v3 = vpop.eup %2803  ;;  %2813 = vrsqrt.f32 %v3515_v19  ;;  %v1758_v31 = vmul.f32 %v1728_v51, %v3296_v42 }
 0x252   : > { %v1579_v8 = vsel %vm1577_vm12, %v1578_v10, %v1576_v0  ;;  %v1368_v20 = vpop.f32.mrb[66].mxu0  ;;  %2815 = vrsqrt.f32 %v3520_v3  ;;  %vm1596_vm2 = vcmp.eq.f32.partialorder %v3515_v19, inf  ;;  %vm1598_vm3 = vcmp.eq.f32.partialorder %v3515_v19, 0.0 }
 0x253   : > { %v1729_v53 = vmul.f32 %v3480_v50, %v1579_v8  ;;  %v2604_v58 = vpop.f32.mrb[67].mxu0  ;;  %v2806_v49 = vpop.eup %2805  ;;  %v1466_v61 = vadd.f32 1.0, %v1436_v59  ;;  %v1437_v30 = vmul.f32 2e-05, %v1368_v20  ;;  %v1599_v47 = vand.u32 2147483648, %v3515_v19 }
 0x254   : > { %v1581_v21 = vmul.f32 %v2806_v49, %v3497_v27  ;;  %vm1603_vm4 = vcmp.eq.f32.partialorder %v3520_v3, inf  ;;  %v1606_v55 = vand.u32 2147483648, %v3520_v3  ;;  %vm1605_vm5 = vcmp.eq.f32.partialorder %v3520_v3, 0.0 }
 0x255   : > { %v1759_v41 = vmul.f32 %v1729_v53, %v3300_v14  ;;  %2817 = vrsqrt.f32 %v1466_v61  ;;  %v1467_v50 = vadd.f32 1.0, %v1437_v30 }
 0x256   : > { %v2808_v13 = vpop.eup %2807  ;;  %v1583_v5 = vsel %vm1582_vm13, %v3497_v27, %v1581_v21 }
 0x257   : > { %v3530_v34 = vpop.eup %2809  ;;  %v2259_v48 = vpack.c.bf16 %v1759_v41, %v1758_v31  ;;  %v1588_v42 = vmul.f32 %v2808_v13, %v3502_v43  ;;  %v1586_v14 = vsel %vm1584_vm14, %v1585_v11, %v1583_v5 }
 0x258   : > { %2819 = vrsqrt.f32 %v3530_v34  ;;  %v1373_v60 = vpop.f32.mrb[68].mxu0  ;;  %v1730_v12 = vmul.f32 %v3497_v27, %v1586_v14  ;;  %vm1610_vm6 = vcmp.eq.f32.partialorder %v3530_v34, inf  ;;  %vm1612_vm7 = vcmp.eq.f32.partialorder %v3530_v34, 0.0 }
 0x259   : > { %v3538_v32 = vpop.eup %2811  ;;  %2314 = vst [vmem:[%s3447_s18 + $0x20] sm:$0xff] %v2259_v48   ;;  %v1590_v9 = vsel %vm1589_vm15, %v3502_v43, %v1588_v42  ;;  %2821 = vrsqrt.f32 %v1467_v50  ;;  %v2607_v29 = vpop.f32.mrb[69].mxu0  ;;  %v1438_v63 = vmul.f32 2e-05, %v1373_v60 }
 0x25a   : > { %v1593_v37 = vsel %vm1591_vm1, %v1592_v36, %v1590_v9  ;;  %2823 = vrsqrt.f32 %v3538_v32  ;;  %v1376_v44 = vpop.f32.mrb[70].mxu0  ;;  %v1760_v18 = vmul.f32 %v1730_v12, %v3310_v2  ;;  %vm1617_vm8 = vcmp.eq.f32.partialorder %v3538_v32, inf }
 0x25b   : > { %v1731_v39 = vmul.f32 %v3502_v43, %v1593_v37  ;;  %v2608_v16 = vpop.f32.mrb[71].mxu0  ;;  %v2814_v25 = vpop.eup %2813  ;;  %v1439_v27 = vmul.f32 2e-05, %v1376_v44  ;;  %v1468_v10 = vadd.f32 1.0, %v1438_v63  ;;  %v1620_v9 = vand.u32 2147483648, %v3538_v32 }
 0x25c   : > { %v2816_v7 = vpop.eup %2815  ;;  %v1595_v54 = vmul.f32 %v2814_v25, %v3515_v19  ;;  %vm1619_vm9 = vcmp.eq.f32.partialorder %v3538_v32, 0.0 }
 0x25d   : > { %v1761_v1 = vmul.f32 %v1731_v39, %v3314_v33  ;;  %v1602_v43 = vmul.f32 %v2816_v7, %v3520_v3  ;;  %v1469_v51 = vadd.f32 1.0, %v1439_v27  ;;  %2825 = vrsqrt.f32 %v1468_v10 }
 0x25e   : > { %v1597_v59 = vsel %vm1596_vm2, %v3515_v19, %v1595_v54 }
 0x25f   : > { %v2264_v0 = vpack.c.bf16 %v1761_v1, %v1760_v18  ;;  %v3556_v2 = vpop.eup %2817  ;;  %v1600_v33 = vsel %vm1598_vm3, %v1599_v47, %v1597_v59  ;;  %v1604_v8 = vsel %vm1603_vm4, %v3520_v3, %v1602_v43  ;;  %2827 = vrsqrt.f32 %v1469_v51 }
 0x260   : > { %v1381_v20 = vpop.f32.mrb[72].mxu0  ;;  %v1732_v53 = vmul.f32 %v3515_v19, %v1600_v33  ;;  %v1607_v58 = vsel %vm1605_vm5, %v1606_v55, %v1604_v8  ;;  %2829 = vrsqrt.f32 %v3556_v2  ;;  %vm1624_vm0 = vcmp.eq.f32.partialorder %v3556_v2, inf }
 0x261   : > { %2315 = vst [vmem:[%s3447_s18 + $0x28] sm:$0xff] %v2264_v0   ;;  %v2611_v49 = vpop.f32.mrb[73].mxu0  ;;  %v1733_v30 = vmul.f32 %v3520_v3, %v1607_v58  ;;  %v1440_v31 = vmul.f32 2e-05, %v1381_v20  ;;  %v1613_v3 = vand.u32 2147483648, %v3530_v34  ;;  %v1627_v51 = vand.u32 2147483648, %v3556_v2 }
 0x262   : > { %v2820_v61 = vpop.eup %2819  ;;  %v1384_v41 = vpop.f32.mrb[74].mxu0  ;;  %v1762_v48 = vmul.f32 %v1732_v53, %v3324_v23  ;;  %vm1626_vm10 = vcmp.eq.f32.partialorder %v3556_v2, 0.0 }
 0x263   : > { %v3566_v21 = vpop.eup %2821  ;;  %v1609_v13 = vmul.f32 %v2820_v61, %v3530_v34  ;;  %v1441_v11 = vmul.f32 2e-05, %v1384_v41  ;;  %v2612_v50 = vpop.f32.mrb[75].mxu0  ;;  %v1763_v5 = vmul.f32 %v1733_v30, %v3328_v56  ;;  %v1470_v36 = vadd.f32 1.0, %v1440_v31 }
 0x264   : > { %v2824_v19 = vpop.eup %2823  ;;  %2831 = vrsqrt.f32 %v3566_v21  ;;  %vm1631_vm11 = vcmp.eq.f32.partialorder %v3566_v21, inf  ;;  %v1634_v33 = vand.u32 2147483648, %v3566_v21  ;;  %vm1633_vm12 = vcmp.eq.f32.partialorder %v3566_v21, 0.0 }
 0x265   : > { %v1611_v42 = vsel %vm1610_vm6, %v3530_v34, %v1609_v13  ;;  %v1616_v14 = vmul.f32 %v2824_v19, %v3538_v32  ;;  %v2269_v60 = vpack.c.bf16 %v1763_v5, %v1762_v48  ;;  %v1471_v29 = vadd.f32 1.0, %v1441_v11 }
 0x266   : > { %v1614_v12 = vsel %vm1612_vm7, %v1613_v3, %v1611_v42  ;;  %2833 = vrsqrt.f32 %v1470_v36 }
 0x267   : > { %v1734_v23 = vmul.f32 %v3530_v34, %v1614_v12  ;;  %v1618_v56 = vsel %vm1617_vm8, %v3538_v32, %v1616_v14  ;;  %2316 = vst [vmem:[%s3447_s18 + $0x30] sm:$0xff] %v2269_v60   ;;  %2835 = vrsqrt.f32 %v1471_v29  ;;  %v3583_v39 = vpop.eup %2825 }
 0x268   : > { %v1621_v37 = vsel %vm1619_vm9, %v1620_v9, %v1618_v56  ;;  %v1389_v44 = vpop.f32.mrb[76].mxu0  ;;  %2837 = vrsqrt.f32 %v3583_v39  ;;  %vm1638_vm13 = vcmp.eq.f32.partialorder %v3583_v39, inf  ;;  %vm1640_vm14 = vcmp.eq.f32.partialorder %v3583_v39, 0.0 }
 0x269   : > { %v1735_v63 = vmul.f32 %v3538_v32, %v1621_v37  ;;  %v1442_v16 = vmul.f32 2e-05, %v1389_v44  ;;  %v2615_v25 = vpop.f32.mrb[77].mxu0  ;;  %v3586_v27 = vpop.eup %2827  ;;  %v1764_v18 = vmul.f32 %v1734_v23, %v3338_v45 }
 0x26a   : > { %v1392_v34 = vpop.f32.mrb[78].mxu0  ;;  %v2830_v7 = vpop.eup %2829  ;;  %2839 = vrsqrt.f32 %v3586_v27  ;;  %vm1645_vm15 = vcmp.eq.f32.partialorder %v3586_v27, inf  ;;  %v1648_v12 = vand.u32 2147483648, %v3586_v27  ;;  %vm1647_vm1 = vcmp.eq.f32.partialorder %v3586_v27, 0.0 }
 0x26b   : > { %v1765_v1 = vmul.f32 %v1735_v63, %v3342_v15  ;;  %v2616_v54 = vpop.f32.mrb[79].mxu0  ;;  %v1623_v10 = vmul.f32 %v2830_v7, %v3556_v2  ;;  %v1472_v47 = vadd.f32 1.0, %v1442_v16  ;;  %v1443_v32 = vmul.f32 2e-05, %v1392_v34 }
 0x26d   : > { %v2274_v43 = vpack.c.bf16 %v1765_v1, %v1764_v18  ;;  %v1625_v59 = vsel %vm1624_vm0, %v3556_v2, %v1623_v10  ;;  %2841 = vrsqrt.f32 %v1472_v47  ;;  %v1473_v45 = vadd.f32 1.0, %v1443_v32 }
 0x26e   : > { %v2832_v0 = vpop.eup %2831  ;;  %v1628_v15 = vsel %vm1626_vm10, %v1627_v51, %v1625_v59 }
 0x26f   : > { %2317 = vst [vmem:[%s3447_s18 + $0x38] sm:$0xff] %v2274_v43   ;;  %v1630_v55 = vmul.f32 %v2832_v0, %v3566_v21  ;;  %2843 = vrsqrt.f32 %v1473_v45  ;;  %v1736_v53 = vmul.f32 %v3556_v2, %v1628_v15 }
 0x270   : > { %v1397_v8 = vpop.f32.mrb[80].mxu0  ;;  %v3601_v20 = vpop.eup %2833 }
 0x271   : > { %v1632_v58 = vsel %vm1631_vm11, %v3566_v21, %v1630_v55  ;;  %v1444_v49 = vmul.f32 2e-05, %v1397_v8  ;;  %v2619_v61 = vpop.f32.mrb[81].mxu0  ;;  %v3606_v30 = vpop.eup %2835  ;;  %2845 = vrsqrt.f32 %v3601_v20  ;;  %v1766_v48 = vmul.f32 %v1736_v53, %v3349_v57 }
 0x272   : > { %v1635_v31 = vsel %vm1633_vm12, %v1634_v33, %v1632_v58  ;;  %v1400_v41 = vpop.f32.mrb[82].mxu0  ;;  %2847 = vrsqrt.f32 %v3606_v30  ;;  %v2838_v50 = vpop.eup %2837  ;;  %vm1652_vm2 = vcmp.eq.f32.partialorder %v3601_v20, inf  ;;  %vm1654_vm3 = vcmp.eq.f32.partialorder %v3601_v20, 0.0 }
 0x273   : > { %v1737_v13 = vmul.f32 %v3566_v21, %v1635_v31  ;;  %v2620_v11 = vpop.f32.mrb[83].mxu0  ;;  %v1474_v2 = vadd.f32 1.0, %v1444_v49  ;;  %v1637_v3 = vmul.f32 %v2838_v50, %v3583_v39  ;;  %v1445_v42 = vmul.f32 2e-05, %v1400_v41 }
 0x274   : > { %v2840_v19 = vpop.eup %2839  ;;  %v1641_v21 = vand.u32 2147483648, %v3583_v39  ;;  %vm1659_vm4 = vcmp.eq.f32.partialorder %v3606_v30, inf  ;;  %vm1661_vm5 = vcmp.eq.f32.partialorder %v3606_v30, 0.0 }
 0x275   : > { %v1767_v5 = vmul.f32 %v1737_v13, %v3354_v6  ;;  %v1644_v14 = vmul.f32 %v2840_v19, %v3586_v27  ;;  %2849 = vrsqrt.f32 %v1474_v2  ;;  %v1639_v60 = vsel %vm1638_vm13, %v3583_v39, %v1637_v3 }
 0x276   : > { %v1475_v9 = vadd.f32 1.0, %v1445_v42  ;;  %v1642_v6 = vsel %vm1640_vm14, %v1641_v21, %v1639_v60 }
 0x277   : > { %v2279_v36 = vpack.c.bf16 %v1767_v5, %v1766_v48  ;;  %v3621_v57 = vpop.eup %2841  ;;  %v1646_v29 = vsel %vm1645_vm15, %v3586_v27, %v1644_v14  ;;  %v1738_v56 = vmul.f32 %v3583_v39, %v1642_v6 }
 0x278   : > { %v1405_v23 = vpop.f32.mrb[84].mxu0  ;;  %v1649_v37 = vsel %vm1647_vm1, %v1648_v12, %v1646_v29  ;;  %2851 = vrsqrt.f32 %v3621_v57  ;;  %vm1666_vm6 = vcmp.eq.f32.partialorder %v3621_v57, inf  ;;  %vm1668_vm7 = vcmp.eq.f32.partialorder %v3621_v57, 0.0 }
 0x279   : > { %2318 = vst [vmem:[%s3447_s18 + $0x40] sm:$0xff] %v2279_v36   ;;  %v2623_v44 = vpop.f32.mrb[85].mxu0  ;;  %v3630_v63 = vpop.eup %2843  ;;  %v1739_v16 = vmul.f32 %v3586_v27, %v1649_v37  ;;  %2853 = vrsqrt.f32 %v1475_v9  ;;  %v1768_v18 = vmul.f32 %v1738_v56, %v3361_v24  ;;  %v1446_v39 = vmul.f32 2e-05, %v1405_v23 }
 0x27a   : > { %v1408_v25 = vpop.f32.mrb[86].mxu0  ;;  %2855 = vrsqrt.f32 %v3630_v63  ;;  %v1655_v27 = vand.u32 2147483648, %v3601_v20  ;;  %v1662_v24 = vand.u32 2147483648, %v3606_v30  ;;  %vm1673_vm8 = vcmp.eq.f32.partialorder %v3630_v63, inf }
 0x27b   : > { %v2624_v34 = vpop.f32.mrb[87].mxu0  ;;  %v2846_v7 = vpop.eup %2845  ;;  %v1769_v1 = vmul.f32 %v1739_v16, %v3366_v22  ;;  %v1447_v54 = vmul.f32 2e-05, %v1408_v25  ;;  %v1476_v51 = vadd.f32 1.0, %v1446_v39  ;;  %vm1675_vm9 = vcmp.eq.f32.partialorder %v3630_v63, 0.0 }
 0x27c   : > { %v2848_v10 = vpop.eup %2847  ;;  %v1651_v47 = vmul.f32 %v2846_v7, %v3601_v20 }
 0x27d   : > { %v2284_v32 = vpack.c.bf16 %v1769_v1, %v1768_v18  ;;  %v1658_v43 = vmul.f32 %v2848_v10, %v3606_v30  ;;  %v1477_v0 = vadd.f32 1.0, %v1447_v54  ;;  %2857 = vrsqrt.f32 %v1476_v51 }
 0x27e   : > { %v1653_v59 = vsel %vm1652_vm2, %v3601_v20, %v1651_v47 }
 0x27f   : > { %v3644_v22 = vpop.eup %2849  ;;  %2319 = vst [vmem:[%s3447_s18 + $0x48] sm:$0xff] %v2284_v32   ;;  %v1656_v45 = vsel %vm1654_vm3, %v1655_v27, %v1653_v59  ;;  %v1660_v15 = vsel %vm1659_vm4, %v3606_v30, %v1658_v43 }
 0x280   : > { %v1413_v55 = vpop.f32.mrb[88].mxu0  ;;  %v1740_v33 = vmul.f32 %v3601_v20, %v1656_v45  ;;  %v1663_v8 = vsel %vm1661_vm5, %v1662_v24, %v1660_v15  ;;  %2859 = vrsqrt.f32 %v3644_v22  ;;  %vm1680_vm0 = vcmp.eq.f32.partialorder %v3644_v22, inf }
 0x281   : > { %v2627_v53 = vpop.f32.mrb[89].mxu0  ;;  %v1741_v58 = vmul.f32 %v3606_v30, %v1663_v8  ;;  %2861 = vrsqrt.f32 %v1477_v0  ;;  %v1448_v31 = vmul.f32 2e-05, %v1413_v55  ;;  %v1669_v30 = vand.u32 2147483648, %v3621_v57 }
 0x282   : > { %v1416_v49 = vpop.f32.mrb[90].mxu0  ;;  %v2852_v61 = vpop.eup %2851  ;;  %v1770_v50 = vmul.f32 %v1740_v33, %v3373_v38  ;;  %v1683_v37 = vand.u32 2147483648, %v3644_v22  ;;  %vm1682_vm10 = vcmp.eq.f32.partialorder %v3644_v22, 0.0 }
 0x283   : > { %v1449_v41 = vmul.f32 2e-05, %v1416_v49  ;;  %v2628_v13 = vpop.f32.mrb[91].mxu0  ;;  %v2854_v11 = vpop.eup %2853  ;;  %v1771_v2 = vmul.f32 %v1741_v58, %v3378_v35  ;;  %v1665_v20 = vmul.f32 %v2852_v61, %v3621_v57  ;;  %v1478_v42 = vadd.f32 1.0, %v1448_v31 }
 0x284   : > { %v2856_v19 = vpop.eup %2855  ;;  %2863 = vrsqrt.f32 %v2854_v11  ;;  %v1676_v35 = vand.u32 2147483648, %v3630_v63  ;;  %vm1687_vm11 = vcmp.eq.f32.partialorder %v2854_v11, inf  ;;  %vm1689_vm12 = vcmp.eq.f32.partialorder %v2854_v11, 0.0 }
 0x285   : > { %v2289_v48 = vpack.c.bf16 %v1771_v2, %v1770_v50  ;;  %v1667_v5 = vsel %vm1666_vm6, %v3621_v57, %v1665_v20  ;;  %v1672_v3 = vmul.f32 %v2856_v19, %v3630_v63  ;;  %v1479_v21 = vadd.f32 1.0, %v1449_v41 }
 0x286   : > { %v1670_v38 = vsel %vm1668_vm7, %v1669_v30, %v1667_v5  ;;  %2865 = vrsqrt.f32 %v1478_v42 }
 0x287   : > { %2320 = vst [vmem:[%s3447_s18 + $0x50] sm:$0xff] %v2289_v48   ;;  %v1742_v14 = vmul.f32 %v3621_v57, %v1670_v38  ;;  %v1674_v36 = vsel %vm1673_vm8, %v3630_v63, %v1672_v3  ;;  %2867 = vrsqrt.f32 %v1479_v21  ;;  %v2858_v12 = vpop.eup %2857 }
 0x288   : > { %v1677_v60 = vsel %vm1675_vm9, %v1676_v35, %v1674_v36  ;;  %2869 = vrsqrt.f32 %v2858_v12  ;;  %vm1694_vm13 = vcmp.eq.f32.partialorder %v2858_v12, inf  ;;  %v1697_v51 = vand.u32 2147483648, %v2858_v12 }
 0x289   : > { %v1743_v9 = vmul.f32 %v3630_v63, %v1677_v60  ;;  %v1772_v23 = vmul.f32 %v1742_v14, %v3385_v52  ;;  %v1690_v52 = vand.u32 2147483648, %v2854_v11  ;;  %vm1696_vm14 = vcmp.eq.f32.partialorder %v2858_v12, 0.0 }
 0x28a   : > { %v2860_v6 = vpop.eup %2859 }
 0x28b   : > { %v2862_v29 = vpop.eup %2861  ;;  %v1773_v56 = vmul.f32 %v1743_v9, %v3390_v26  ;;  %v1679_v57 = vmul.f32 %v2860_v6, %v3644_v22 }
 0x28c   : > { %2871 = vrsqrt.f32 %v2862_v29  ;;  %vm1701_vm15 = vcmp.eq.f32.partialorder %v2862_v29, inf  ;;  %v1704_v45 = vand.u32 2147483648, %v2862_v29  ;;  %vm1703_vm1 = vcmp.eq.f32.partialorder %v2862_v29, 0.0 }
 0x28d   : > { %v2294_v44 = vpack.c.bf16 %v1773_v56, %v1772_v23  ;;  %v1681_v16 = vsel %vm1680_vm0, %v3644_v22, %v1679_v57 }
 0x28e   : > { %v2864_v63 = vpop.eup %2863  ;;  %v1684_v25 = vsel %vm1682_vm10, %v1683_v37, %v1681_v16 }
 0x28f   : > { %2321 = vst [vmem:[%s3447_s18 + $0x58] sm:$0xff] %v2294_v44   ;;  %v1686_v34 = vmul.f32 %v2864_v63, %v2854_v11  ;;  %v1744_v26 = vmul.f32 %v3644_v22, %v1684_v25 }
 0x290   : > { %v2866_v7 = vpop.eup %2865 }
 0x291   : > { %v1688_v18 = vsel %vm1687_vm11, %v2854_v11, %v1686_v34  ;;  %v2868_v1 = vpop.eup %2867  ;;  %2873 = vrsqrt.f32 %v2866_v7  ;;  %v1774_v47 = vmul.f32 %v1744_v26, %v3397_v4  ;;  %vm1708_vm2 = vcmp.eq.f32.partialorder %v2866_v7, inf }
 0x292   : > { %v1691_v39 = vsel %vm1689_vm12, %v1690_v52, %v1688_v18  ;;  %2875 = vrsqrt.f32 %v2868_v1  ;;  %v2870_v10 = vpop.eup %2869  ;;  %vm1710_vm3 = vcmp.eq.f32.partialorder %v2866_v7, 0.0  ;;  %v1711_v61 = vand.u32 2147483648, %v2866_v7 }
 0x293   : > { %v1745_v54 = vmul.f32 %v2854_v11, %v1691_v39  ;;  %v1693_v32 = vmul.f32 %v2870_v10, %v2858_v12  ;;  %vm1715_vm4 = vcmp.eq.f32.partialorder %v2868_v1, inf  ;;  %v1718_v11 = vand.u32 2147483648, %v2868_v1 }
 0x294   : > { %vm1717_vm5 = vcmp.eq.f32.partialorder %v2868_v1, 0.0 }
 0x295   : > { %v1775_v27 = vmul.f32 %v1745_v54, %v3402_v62  ;;  %v1695_v59 = vsel %vm1694_vm13, %v2858_v12, %v1693_v32 }
 0x296   : > { %v2872_v43 = vpop.eup %2871  ;;  %v1698_v22 = vsel %vm1696_vm14, %v1697_v51, %v1695_v59 }
 0x297   : > { %v2299_v0 = vpack.c.bf16 %v1775_v27, %v1774_v47  ;;  %v1700_v24 = vmul.f32 %v2872_v43, %v2862_v29  ;;  %v1746_v15 = vmul.f32 %v2858_v12, %v1698_v22 }
 0x299   : > { %2322 = vst [vmem:[%s3447_s18 + $0x60] sm:$0xff] %v2299_v0   ;;  %v1702_v55 = vsel %vm1701_vm15, %v2862_v29, %v1700_v24  ;;  %v1776_v53 = vmul.f32 %v1746_v15, %v3409_v17 }
 0x29a   : > { %v1705_v33 = vsel %vm1703_vm1, %v1704_v45, %v1702_v55 }
 0x29b   : > { %v1747_v8 = vmul.f32 %v2862_v29, %v1705_v33  ;;  %v2874_v4 = vpop.eup %2873 }
 0x29c   : > { %v2876_v62 = vpop.eup %2875  ;;  %v1707_v49 = vmul.f32 %v2874_v4, %v2866_v7 }
 0x29d   : > { %v1777_v58 = vmul.f32 %v1747_v8, %v3414_v28  ;;  %v1714_v31 = vmul.f32 %v2876_v62, %v2868_v1 }
 0x29e   : > { %v1709_v13 = vsel %vm1708_vm2, %v2866_v7, %v1707_v49 }
 0x29f   : > { %v2304_v41 = vpack.c.bf16 %v1777_v58, %v1776_v53  ;;  %v1712_v50 = vsel %vm1710_vm3, %v1711_v61, %v1709_v13  ;;  %v1716_v2 = vsel %vm1715_vm4, %v2868_v1, %v1714_v31 }
 0x2a0   : > { %v1748_v20 = vmul.f32 %v2866_v7, %v1712_v50  ;;  %v1719_v19 = vsel %vm1717_vm5, %v1718_v11, %v1716_v2 }
 0x2a1   : > { %2323 = vst [vmem:[%s3447_s18 + $0x68] sm:$0xff] %v2304_v41   ;;  %v1749_v30 = vmul.f32 %v2868_v1, %v1719_v19 }
 0x2a2   : > { %v1778_v17 = vmul.f32 %v1748_v20, %v3421_v40 }
 0x2a3   : > { %v1779_v28 = vmul.f32 %v1749_v30, %v3426_v46 }
 0x2a5   : > { %v2309_v48 = vpack.c.bf16 %v1779_v28, %v1778_v17 }
 0x2a7   : > { %2324 = vst [vmem:[%s3447_s18 + $0x70] sm:$0xff] %v2309_v48  }
 0x2a8 PF: > { %s13_s14 = sadd.s32 1, %s2899_s14   ;;  %s3698_s12 = smov %s2895_s13 }
 0x2a9   : > { %p10_p5 = scmp.ge.s32.totalorder %s13_s14, 4   ;;  %s3699_s13 = smov %s3701_s15 }
 0x2ab   :  { %12 = sbr.rel (!%p10_p5) target bundleno = 2 (0x2), region = 68 }

// kernel: squeeze.4
= control target key start
LH: loop header
LB: loop body
LE: loop exit
PB: predicated region body
PF: predicated region fallthrough
CT: control target
= control target key end

     0   :  { %s2415_s0 = inlined_call_operand.vmem [shape: bf16[1,450,128], index: 0, kind: input, shape index: {}]   ;;  %s2416_s1 = inlined_call_operand.vmem [shape: bf16[2,15,15,128], index: 1, kind: output, shape index: {}]  }
   0x1   :  { %v1724_v0 = vld [vmem:[%s2415_s0 + $0xe0] sm:$0xf]  ;;  %v2101_v1 = vld [vmem:[%s2415_s0 + $0xd8] sm:$0xff]   ;;  %v2102_v2 = vld [vmem:[%s2415_s0 + $0xd0] sm:$0xff]  }
   0x2   :  { %v17_v3 = vunpack.c.l.bf16 %v1724_v0  ;;  %v1841_v4 = vunpack.c.l.bf16 %v2101_v1  ;;  %v1842_v5 = vunpack.c.h.bf16 %v2101_v1  ;;  %v1845_v6 = vunpack.c.l.bf16 %v2102_v2  ;;  %v2103_v7 = vld [vmem:[%s2415_s0 + $0xc8] sm:$0xff]   ;;  %v2104_v8 = vld [vmem:[%s2415_s0 + $0xc0] sm:$0xff]   ;;  %v2105_v9 = vld [vmem:[%s2415_s0 + $0xb8] sm:$0xff]  }
   0x3   :  { %v1846_v10 = vunpack.c.h.bf16 %v2102_v2  ;;  %v1849_v11 = vunpack.c.l.bf16 %v2103_v7  ;;  %v1850_v12 = vunpack.c.h.bf16 %v2103_v7  ;;  %v1853_v13 = vunpack.c.l.bf16 %v2104_v8  ;;  %v2188_v14 = vld [vmem:[%s2415_s0 + $0xb0] sm:$0xff]   ;;  %v2107_v15 = vld [vmem:[%s2415_s0 + $0xa8] sm:$0xff]   ;;  %v2108_v16 = vld [vmem:[%s2415_s0 + $0xa0] sm:$0xff]  }
   0x4   :  { %20 = vst [vmem:[#allocation1 + $0x1c0] sm:$0xff] %v17_v3  ;;  %v1854_v17 = vunpack.c.h.bf16 %v2104_v8  ;;  %v1857_v18 = vunpack.c.l.bf16 %v2105_v9  ;;  %v1858_v19 = vunpack.c.h.bf16 %v2105_v9  ;;  %v1861_v20 = vunpack.c.l.bf16 %v2188_v14  ;;  %v2109_v21 = vld [vmem:[%s2415_s0 + $0x98] sm:$0xff]   ;;  %v2110_v22 = vld [vmem:[%s2415_s0 + $0x90] sm:$0xff]   ;;  %v2111_v23 = vld [vmem:[%s2415_s0 + $0x88] sm:$0xff]  }
   0x5   :  { %1170 = vst [vmem:[#allocation0 + $0x1bb] ss:$5 sps:$4 sm:$0xff] %v1845_v6   ;;  %1180 = vst [vmem:[#allocation0 + $0x1cc] sm:$0x7] %v1841_v4   ;;  %v1862_v24 = vunpack.c.h.bf16 %v2188_v14  ;;  %v1865_v25 = vunpack.c.l.bf16 %v2107_v15  ;;  %v1866_v26 = vunpack.c.h.bf16 %v2107_v15  ;;  %v1869_v27 = vunpack.c.l.bf16 %v2108_v16  ;;  %v2210_v28 = vld [vmem:[%s2415_s0 + $0x80] sm:$0xff]   ;;  %v2215_v29 = vld [vmem:[%s2415_s0 + $0x78] sm:$0xff]  }
   0x6   :  { %1182 = vst [vmem:[#allocation0 + $0x1cd] sm:$0xf8] %v1841_v4   ;;  %1186 = vst [vmem:[#allocation0 + $0x1d5] sm:$0xff] %v1842_v5   ;;  %v2220_v30 = vld [vmem:[%s2415_s0 + $0x70] sm:$0xff]   ;;  %v1870_v31 = vunpack.c.h.bf16 %v2108_v16  ;;  %v1873_v32 = vunpack.c.l.bf16 %v2109_v21  ;;  %v1874_v33 = vunpack.c.h.bf16 %v2109_v21  ;;  %v1877_v34 = vunpack.c.l.bf16 %v2110_v22  ;;  %v2115_v35 = vld [vmem:[%s2415_s0 + $0x68] sm:$0xff]  }
   0x7   :  { %1150 = vst [vmem:[#allocation0 + $0x199] sm:$0x3f] %v1853_v13   ;;  %1152 = vst [vmem:[#allocation0 + $0x19a] sm:$0xc0] %v1853_v13   ;;  %v2228_v36 = vld [vmem:[%s2415_s0 + $0x60] sm:$0xff]   ;;  %v1878_v37 = vunpack.c.h.bf16 %v2110_v22  ;;  %v1881_v38 = vunpack.c.l.bf16 %v2111_v23  ;;  %v1882_v39 = vunpack.c.h.bf16 %v2111_v23  ;;  %v1885_v40 = vunpack.c.l.bf16 %v2210_v28  ;;  %v2234_v41 = vld [vmem:[%s2415_s0 + $0x58] sm:$0xff]  }
   0x8   :  { %1160 = vst [vmem:[#allocation0 + $0x1aa] sm:$0x1f] %v1849_v11   ;;  %1162 = vst [vmem:[#allocation0 + $0x1ab] sm:$0xe0] %v1849_v11   ;;  %v2239_v42 = vld [vmem:[%s2415_s0 + $0x50] sm:$0xff]   ;;  %v1886_v43 = vunpack.c.h.bf16 %v2210_v28  ;;  %v1889_v44 = vunpack.c.l.bf16 %v2215_v29  ;;  %v1890_v45 = vunpack.c.h.bf16 %v2215_v29  ;;  %v1893_v46 = vunpack.c.l.bf16 %v2220_v30  ;;  %v2248_v47 = vld [vmem:[%s2415_s0 + $0x48] sm:$0xff]  }
   0x9   :  { %1166 = vst [vmem:[#allocation0 + $0x1b3] sm:$0xff] %v1850_v12   ;;  %1176 = vst [vmem:[#allocation0 + $0x1c4] sm:$0xff] %v1846_v10   ;;  %v2253_v48 = vld [vmem:[%s2415_s0 + $0x40] sm:$0xff]   ;;  %v1894_v49 = vunpack.c.h.bf16 %v2220_v30  ;;  %v1897_v50 = vunpack.c.l.bf16 %v2115_v35  ;;  %v1898_v51 = vunpack.c.h.bf16 %v2115_v35  ;;  %v1901_v52 = vunpack.c.l.bf16 %v2228_v36  ;;  %v2260_v53 = vld [vmem:[%s2415_s0 + $0x38] sm:$0xff]  }
   0xa   :  { %1132 = vst [vmem:[#allocation0 + $0x177] sm:$0xff] %v1861_v20   ;;  %1140 = vst [vmem:[#allocation0 + $0x188] sm:$0x7f] %v1857_v18   ;;  %v2265_v54 = vld [vmem:[%s2415_s0 + $0x30] sm:$0xff]   ;;  %v1902_v55 = vunpack.c.h.bf16 %v2228_v36  ;;  %v1905_v56 = vunpack.c.l.bf16 %v2234_v41  ;;  %v1906_v57 = vunpack.c.h.bf16 %v2234_v41  ;;  %v1909_v58 = vunpack.c.l.bf16 %v2239_v42  ;;  %v2274_v59 = vld [vmem:[%s2415_s0 + $0x28] sm:$0xff]  }
   0xb   :  { %1142 = vst [vmem:[#allocation0 + $0x189] sm:$0x80] %v1857_v18   ;;  %1146 = vst [vmem:[#allocation0 + $0x191] sm:$0xff] %v1858_v19   ;;  %v2279_v60 = vld [vmem:[%s2415_s0 + $0x20] sm:$0xff]   ;;  %v1910_v61 = vunpack.c.h.bf16 %v2239_v42  ;;  %v1913_v62 = vunpack.c.l.bf16 %v2248_v47  ;;  %v1914_v63 = vunpack.c.h.bf16 %v2248_v47  ;;  %v1917_v0 = vunpack.c.l.bf16 %v2253_v48  ;;  %v2125_v1 = vld [vmem:[%s2415_s0 + $0x18] sm:$0xff]  }
   0xc   :  { %1156 = vst [vmem:[#allocation0 + $0x1a2] sm:$0xff] %v1854_v17   ;;  %1112 = vst [vmem:[#allocation0 + $0x155] sm:$0xff] %v1869_v27   ;;  %v2291_v2 = vld [vmem:[%s2415_s0 + $0x10] sm:$0xff]   ;;  %v1188_v3 = vld [vmem:[#allocation1 + $0x1c0] sm:$0x3]   ;;  %v1918_v4 = vunpack.c.h.bf16 %v2253_v48  ;;  %v1921_v5 = vunpack.c.l.bf16 %v2260_v53  ;;  %v1922_v6 = vunpack.c.h.bf16 %v2260_v53  ;;  %v1925_v7 = vunpack.c.l.bf16 %v2265_v54 }
   0xd   :  { %1122 = vst [vmem:[#allocation0 + $0x166] sm:$0xff] %v1865_v25   ;;  %1126 = vst [vmem:[#allocation0 + $0x16e] ss:$2 sm:$0x3] %v1866_v26   ;;  %v2127_v8 = vld [vmem:[%s2415_s0 + $0x8] sm:$0xff]   ;;  %v2303_v9 = vld [vmem:[%s2415_s0] sm:$0xff]   ;;  %v1926_v11 = vunpack.c.h.bf16 %v2265_v54  ;;  %v1929_v12 = vunpack.c.l.bf16 %v2274_v59  ;;  %v1930_v13 = vunpack.c.h.bf16 %v2274_v59  ;;  %v1933_v15 = vunpack.c.l.bf16 %v2279_v60 }
   0xe   :  { %1128 = vst [vmem:[#allocation0 + $0x16f] sm:$0xfc] %v1866_v26   ;;  %1092 = vst [vmem:[#allocation0 + $0x133] sm:$0xff] %v1877_v34   ;;  %v1934_v19 = vunpack.c.h.bf16 %v2279_v60  ;;  %v1937_v20 = vunpack.c.l.bf16 %v2125_v1  ;;  %v1938_v21 = vunpack.c.h.bf16 %v2125_v1  ;;  %v1941_v22 = vunpack.c.l.bf16 %v2291_v2 }
   0xf   :  { %1102 = vst [vmem:[#allocation0 + $0x144] sm:$0xff] %v1873_v32   ;;  %1106 = vst [vmem:[#allocation0 + $0x14c] sm:$0x7] %v1874_v33   ;;  %v1942_v27 = vunpack.c.h.bf16 %v2291_v2  ;;  %v1945_v28 = vunpack.c.l.bf16 %v2127_v8  ;;  %v1946_v30 = vunpack.c.h.bf16 %v2127_v8  ;;  %v1950_v34 = vunpack.c.h.bf16 %v2303_v9 }
  0x10   :  { %1108 = vst [vmem:[#allocation0 + $0x14d] sm:$0xf8] %v1874_v33   ;;  %1116 = vst [vmem:[#allocation0 + $0x15d] sm:$0x3] %v1870_v31   ;;  %v2305_v10 = vld [vmem:[#allocation0 + $0x1b0] sm:$0xff]  ;;  %v1577_v18 = vld [vmem:[#allocation0 + $0x1b8] sm:$0xff] }
  0x11   :  { %1118 = vst [vmem:[#allocation0 + $0x15e] sm:$0xfc] %v1870_v31   ;;  %1072 = vst [vmem:[#allocation0 + $0x111] sm:$0xff] %v1885_v40   ;;  %v1521_v16 = vld [vmem:[#allocation0 + $0x178] sm:$0xff]  ;;  %v1535_v17 = vld [vmem:[#allocation0 + $0x188] sm:$0xff]  ;;  %v1949_v31 = vunpack.c.l.bf16 %v2303_v9 }
  0x12   :  { %1082 = vst [vmem:[#allocation0 + $0x122] sm:$0xff] %v1881_v38   ;;  %1086 = vst [vmem:[#allocation0 + $0x12a] sm:$0x1f] %v1882_v39   ;;  %v1542_v25 = vld [vmem:[#allocation0 + $0x190] sm:$0xff]  ;;  %v1549_v26 = vld [vmem:[#allocation0 + $0x198] sm:$0xff]  ;;  %v2074_v14 = vpack.c.bf16 %v1535_v17, %v1862_v24 }
  0x13   :  { %1088 = vst [vmem:[#allocation0 + $0x12b] sm:$0xe0] %v1882_v39   ;;  %1096 = vst [vmem:[#allocation0 + $0x13b] ss:$5 sps:$4 sm:$0xff] %v1878_v37   ;;  %v2079_v42 = vpack.c.bf16 %v1549_v26, %v1542_v25  ;;  %v1598_v25 = vld [vmem:[#allocation0 + $0x1d0] sm:$0xff] }
  0x14   :  { %1052 = vst [vmem:[#allocation0 + $0xee] ss:$2 sm:$0x3] %v1893_v46   ;;  %1054 = vst [vmem:[#allocation0 + $0xef] sm:$0xfc] %v1893_v46  }
  0x15   :  { %1066 = vst [vmem:[#allocation0 + $0x108] sm:$0x7f] %v1890_v45   ;;  %1068 = vst [vmem:[#allocation0 + $0x109] sm:$0x80] %v1890_v45   ;;  %v1514_v23 = vld [vmem:[#allocation0 + $0x170] sm:$0xff] }
  0x16   :  { %1076 = vst [vmem:[#allocation0 + $0x119] sm:$0x3f] %v1886_v43   ;;  %1078 = vst [vmem:[#allocation0 + $0x11a] sm:$0xc0] %v1886_v43   ;;  %v2069_v38 = vpack.c.bf16 %v1521_v16, %v1514_v23  ;;  %v2089_v43 = vpack.c.bf16 %v1577_v18, %v2305_v10  ;;  %v1584_v18 = vld [vmem:[#allocation0 + $0x1c0] sm:$0xff] }
  0x17   :  { %1032 = vst [vmem:[#allocation0 + $0xcc] sm:$0x7] %v1901_v52   ;;  %1034 = vst [vmem:[#allocation0 + $0xcd] sm:$0xf8] %v1901_v52   ;;  %v1486_v32 = vld [vmem:[#allocation0 + $0x150] sm:$0xff]  ;;  %v1493_v33 = vld [vmem:[#allocation0 + $0x158] sm:$0xff] }
  0x18   :  { %1042 = vst [vmem:[#allocation0 + $0xdd] sm:$0x3] %v1897_v50   ;;  %1044 = vst [vmem:[#allocation0 + $0xde] sm:$0xfc] %v1897_v50   ;;  %v2059_v37 = vpack.c.bf16 %v1493_v33, %v1486_v32 }
  0x19   :  { %1048 = vst [vmem:[#allocation0 + $0xe6] sm:$0xff] %v1898_v51   ;;  %1058 = vst [vmem:[#allocation0 + $0xf7] sm:$0xff] %v1894_v49   ;;  %v1451_v10 = vld [vmem:[#allocation0 + $0x128] sm:$0xff] }
  0x1a   :  { %1012 = vst [vmem:[#allocation0 + $0xaa] sm:$0x1f] %v1909_v58   ;;  %1014 = vst [vmem:[#allocation0 + $0xab] sm:$0xe0] %v1909_v58   ;;  %v1458_v35 = vld [vmem:[#allocation0 + $0x130] sm:$0xff]  ;;  %v1465_v36 = vld [vmem:[#allocation0 + $0x138] sm:$0xff] }
  0x1b   :  { %1022 = vst [vmem:[#allocation0 + $0xbb] ss:$5 sps:$4 sm:$0xff] %v1905_v56   ;;  %1028 = vst [vmem:[#allocation0 + $0xc4] sm:$0xff] %v1906_v57   ;;  %v2049_v41 = vpack.c.bf16 %v1465_v36, %v1458_v35  ;;  %v1472_v36 = vld [vmem:[#allocation0 + $0x140] sm:$0xff] }
  0x1c   :  { %1038 = vst [vmem:[#allocation0 + $0xd5] sm:$0xff] %v1902_v55   ;;  %1190 = vst [vmem:[#allocation0 + $0x1dd] sm:$0x3] %v1188_v3   ;;  %v1423_v24 = vld [vmem:[#allocation0 + $0x108] sm:$0xff]  ;;  %v1430_v39 = vld [vmem:[#allocation0 + $0x110] sm:$0xff] }
  0x1d   :  { %992 = vst [vmem:[#allocation0 + $0x88] sm:$0x7f] %v1917_v0   ;;  %994 = vst [vmem:[#allocation0 + $0x89] sm:$0x80] %v1917_v0   ;;  %v1437_v40 = vld [vmem:[#allocation0 + $0x118] sm:$0xff]  ;;  %v2034_v29 = vpack.c.bf16 %v1423_v24, %v1889_v44  ;;  %v1444_v35 = vld [vmem:[#allocation0 + $0x120] sm:$0xff] }
  0x1e   :  { %1002 = vst [vmem:[#allocation0 + $0x99] sm:$0x3f] %v1913_v62   ;;  %1004 = vst [vmem:[#allocation0 + $0x9a] sm:$0xc0] %v1913_v62   ;;  %v2039_v44 = vpack.c.bf16 %v1437_v40, %v1430_v39  ;;  %v1556_v39 = vld [vmem:[#allocation0 + $0x1a0] sm:$0xff]  ;;  %v1563_v40 = vld [vmem:[#allocation0 + $0x1a8] sm:$0xff] }
  0x1f   :  { %1008 = vst [vmem:[#allocation0 + $0xa2] sm:$0xff] %v1914_v63   ;;  %1018 = vst [vmem:[#allocation0 + $0xb3] sm:$0xff] %v1910_v61  }
  0x20   :  { %974 = vst [vmem:[#allocation0 + $0x66] sm:$0xff] %v1925_v7   ;;  %984 = vst [vmem:[#allocation0 + $0x77] sm:$0xff] %v1921_v5   ;;  %v1388_v45 = vld [vmem:[#allocation0 + $0xe0] sm:$0xff]  ;;  %v1395_v46 = vld [vmem:[#allocation0 + $0xe8] sm:$0xff] }
  0x21   :  { %998 = vst [vmem:[#allocation0 + $0x91] sm:$0xff] %v1918_v4   ;;  %954 = vst [vmem:[#allocation0 + $0x44] sm:$0xff] %v1933_v15   ;;  %v2024_v49 = vpack.c.bf16 %v1395_v46, %v1388_v45  ;;  %v1402_v4 = vld [vmem:[#allocation0 + $0xf0] sm:$0xff] }
  0x22   :  { %964 = vst [vmem:[#allocation0 + $0x55] sm:$0xff] %v1929_v12   ;;  %968 = vst [vmem:[#allocation0 + $0x5d] sm:$0x3] %v1930_v13   ;;  %v1360_v47 = vld [vmem:[#allocation0 + $0xc0] sm:$0xff]  ;;  %v1367_v48 = vld [vmem:[#allocation0 + $0xc8] sm:$0xff] }
  0x23   :  { %970 = vst [vmem:[#allocation0 + $0x5e] sm:$0xfc] %v1930_v13   ;;  %978 = vst [vmem:[#allocation0 + $0x6e] ss:$2 sm:$0x3] %v1926_v11   ;;  %v2014_v54 = vpack.c.bf16 %v1367_v48, %v1360_v47  ;;  %v1374_v3 = vld [vmem:[#allocation0 + $0xd0] sm:$0xff] }
  0x24   :  { %980 = vst [vmem:[#allocation0 + $0x6f] sm:$0xfc] %v1926_v11   ;;  %934 = vst [vmem:[#allocation0 + $0x22] sm:$0xff] %v1941_v22   ;;  %v1311_v50 = vld [vmem:[#allocation0 + $0x88] sm:$0xff]  ;;  %v1605_v45 = vld [vmem:[#allocation0 + $0x1d8] sm:$0xff] }
  0x25   :  { %944 = vst [vmem:[#allocation0 + $0x33] sm:$0xff] %v1937_v20   ;;  %948 = vst [vmem:[#allocation0 + $0x3b] ss:$5 sps:$4 sm:$0xff] %v1938_v21   ;;  %v1994_v53 = vpack.c.bf16 %v1311_v50, %v1922_v6  ;;  %v1479_v11 = vld [vmem:[#allocation0 + $0x148] sm:$0xff]  ;;  %v2099_v46 = vpack.c.bf16 %v1605_v45, %v1598_v25 }
  0x26   :  { %958 = vst [vmem:[#allocation0 + $0x4c] sm:$0x7] %v1934_v19   ;;  %960 = vst [vmem:[#allocation0 + $0x4d] sm:$0xf8] %v1934_v19   ;;  %v1332_v51 = vld [vmem:[#allocation0 + $0xa0] sm:$0xff]  ;;  %v1339_v52 = vld [vmem:[#allocation0 + $0xa8] sm:$0xff] }
  0x27   :  { %924 = vst [vmem:[#allocation0 + $0x11] sm:$0xff] %v1945_v28   ;;  %928 = vst [vmem:[#allocation0 + $0x19] sm:$0x3f] %v1946_v30   ;;  %v2004_v57 = vpack.c.bf16 %v1339_v52, %v1332_v51  ;;  %v1297_v61 = vld [vmem:[#allocation0 + $0x78] sm:$0xff]  ;;  %v1507_v12 = vld [vmem:[#allocation0 + $0x168] sm:$0xff] }
  0x28   :  { %930 = vst [vmem:[#allocation0 + $0x1a] sm:$0xc0] %v1946_v30   ;;  %938 = vst [vmem:[#allocation0 + $0x2a] sm:$0x1f] %v1942_v27   ;;  %v1318_v55 = vld [vmem:[#allocation0 + $0x90] sm:$0xff]  ;;  %v1325_v56 = vld [vmem:[#allocation0 + $0x98] sm:$0xff] }
  0x29   :  { %940 = vst [vmem:[#allocation0 + $0x2b] sm:$0xe0] %v1942_v27   ;;  %918 = vst [vmem:[#allocation0 + $0x8] sm:$0x7f] %v1950_v34   ;;  %v1269_v58 = vld [vmem:[#allocation0 + $0x58] sm:$0xff]  ;;  %v1999_v62 = vpack.c.bf16 %v1325_v56, %v1318_v55  ;;  %v1346_v23 = vld [vmem:[#allocation0 + $0xb0] sm:$0xff] }
  0x2a   :  { %920 = vst [vmem:[#allocation0 + $0x9] sm:$0x80] %v1950_v34   ;;  %2148 = vst [vmem:[%s2416_s1 + $0xa8] sm:$0xff] %v2059_v37   ;;  %v1276_v59 = vld [vmem:[#allocation0 + $0x60] sm:$0xff]  ;;  %v1283_v60 = vld [vmem:[#allocation0 + $0x68] sm:$0xff] }
  0x2b   :  { %2150 = vst [vmem:[%s2416_s1 + $0xb8] sm:$0xff] %v2069_v38   ;;  %2151 = vst [vmem:[%s2416_s1 + $0xc0] sm:$0xff] %v2074_v14   ;;  %v1984_v2 = vpack.c.bf16 %v1283_v60, %v1276_v59  ;;  %v1290_v22 = vld [vmem:[#allocation0 + $0x70] sm:$0xff]  ;;  %v1353_v28 = vld [vmem:[#allocation0 + $0xb8] sm:$0xff]  ;;  %v2044_v38 = vpack.c.bf16 %v1451_v10, %v1444_v35  ;;  %v2054_v14 = vpack.c.bf16 %v1479_v11, %v1472_v36 }
  0x2c   :  { %2146 = vst [vmem:[%s2416_s1 + $0x98] sm:$0xff] %v2049_v41   ;;  %2152 = vst [vmem:[%s2416_s1 + $0xc8] sm:$0xff] %v2079_v42   ;;  %v1241_v63 = vld [vmem:[#allocation0 + $0x38] sm:$0xff]  ;;  %v1248_v0 = vld [vmem:[#allocation0 + $0x40] sm:$0xff]  ;;  %v1989_v27 = vpack.c.bf16 %v1297_v61, %v1290_v22  ;;  %v2009_v32 = vpack.c.bf16 %v1353_v28, %v1346_v23  ;;  %v2084_v42 = vpack.c.bf16 %v1563_v40, %v1556_v39 }
  0x2d   :  { %2154 = vst [vmem:[%s2416_s1 + $0xd8] sm:$0xff] %v2089_v43   ;;  %2143 = vst [vmem:[%s2416_s1 + $0x80] sm:$0xff] %v2034_v29   ;;  %v1255_v1 = vld [vmem:[#allocation0 + $0x48] sm:$0xff]  ;;  %v1262_v21 = vld [vmem:[#allocation0 + $0x50] sm:$0xff] }
  0x2e   :  { %2144 = vst [vmem:[%s2416_s1 + $0x88] sm:$0xff] %v2039_v44   ;;  %2141 = vst [vmem:[%s2416_s1 + $0x70] sm:$0xff] %v2024_v49   ;;  %v1213_v5 = vld [vmem:[#allocation0 + $0x18] sm:$0xff]  ;;  %v1974_v8 = vpack.c.bf16 %v1255_v1, %v1248_v0  ;;  %v1979_v26 = vpack.c.bf16 %v1269_v58, %v1262_v21  ;;  %v1500_v37 = vld [vmem:[#allocation0 + $0x160] sm:$0xff] }
  0x2f   :  { %2139 = vst [vmem:[%s2416_s1 + $0x60] sm:$0xff] %v2014_v54   ;;  %2135 = vst [vmem:[%s2416_s1 + $0x40] sm:$0xff] %v1994_v53   ;;  %v1220_v6 = vld [vmem:[#allocation0 + $0x20] sm:$0xff]  ;;  %v1227_v7 = vld [vmem:[#allocation0 + $0x28] sm:$0xff]  ;;  %v2064_v24 = vpack.c.bf16 %v1507_v12, %v1500_v37 }
  0x30   :  { %2137 = vst [vmem:[%s2416_s1 + $0x50] sm:$0xff] %v2004_v57   ;;  %2136 = vst [vmem:[%s2416_s1 + $0x48] sm:$0xff] %v1999_v62   ;;  %v1200_v13 = vld [vmem:[#allocation0 + $0x8] sm:$0xff]  ;;  %v1964_v16 = vpack.c.bf16 %v1227_v7, %v1220_v6  ;;  %v1234_v17 = vld [vmem:[#allocation0 + $0x30] sm:$0xff] }
  0x31   :  { %v1206_v15 = vld [vmem:[#allocation0 + $0x10] sm:$0xff]  ;;  %2133 = vst [vmem:[%s2416_s1 + $0x30] sm:$0xff] %v1984_v2   ;;  %v1954_v9 = vpack.c.bf16 %v1200_v13, %v1949_v31  ;;  %v1969_v20 = vpack.c.bf16 %v1241_v63, %v1234_v17  ;;  %2131 = vst [vmem:[%s2416_s1 + $0x20] sm:$0xff] %v1974_v8   ;;  %v1381_v30 = vld [vmem:[#allocation0 + $0xd8] sm:$0xff] }
  0x32   :  { %v1959_v19 = vpack.c.bf16 %v1213_v5, %v1206_v15  ;;  %2129 = vst [vmem:[%s2416_s1 + $0x10] sm:$0xff] %v1964_v16   ;;  %v1409_v31 = vld [vmem:[#allocation0 + $0xf8] sm:$0xff]  ;;  %v2019_v33 = vpack.c.bf16 %v1381_v30, %v1374_v3  ;;  %2132 = vst [vmem:[%s2416_s1 + $0x28] sm:$0xff] %v1979_v26   ;;  %v1591_v41 = vld [vmem:[#allocation0 + $0x1c8] sm:$0xff] }
  0x33   :  { %1955 = vst [vmem:[%s2416_s1] sm:$0xff] %v1954_v9   ;;  %2130 = vst [vmem:[%s2416_s1 + $0x18] sm:$0xff] %v1969_v20   ;;  %v2029_v34 = vpack.c.bf16 %v1409_v31, %v1402_v4  ;;  %v2094_v43 = vpack.c.bf16 %v1591_v41, %v1584_v18 }
  0x34   :  { %2128 = vst [vmem:[%s2416_s1 + $0x8] sm:$0xff] %v1959_v19   ;;  %2134 = vst [vmem:[%s2416_s1 + $0x38] sm:$0xff] %v1989_v27  }
  0x35   :  { %2138 = vst [vmem:[%s2416_s1 + $0x58] sm:$0xff] %v2009_v32   ;;  %2140 = vst [vmem:[%s2416_s1 + $0x68] sm:$0xff] %v2019_v33  }
  0x36   :  { %2142 = vst [vmem:[%s2416_s1 + $0x78] sm:$0xff] %v2029_v34   ;;  %2145 = vst [vmem:[%s2416_s1 + $0x90] sm:$0xff] %v2044_v38  }
  0x37   :  { %2147 = vst [vmem:[%s2416_s1 + $0xa0] sm:$0xff] %v2054_v14   ;;  %2149 = vst [vmem:[%s2416_s1 + $0xb0] sm:$0xff] %v2064_v24  }
  0x38   :  { %2153 = vst [vmem:[%s2416_s1 + $0xd0] sm:$0xff] %v2084_v42   ;;  %2155 = vst [vmem:[%s2416_s1 + $0xe0] sm:$0xff] %v2094_v43  }
  0x39   :  { %2156 = vst [vmem:[%s2416_s1 + $0xe8] sm:$0xff] %v2099_v46  }

// kernel: alexnet_bvlc_forward.10
= control target key start
LH: loop header
LB: loop body
LE: loop exit
PB: predicated region body
PF: predicated region fallthrough
CT: control target
= control target key end

     0   :  { %s667_s15 = smov 0   ;;  %s845_s0 = inlined_call_operand.vmem [shape: bf16[2,8,8,128], index: 0, kind: input, shape index: {}]   ;;  %s846_s1 = inlined_call_operand.vmem [shape: bf16[2,8,7,128], index: 1, kind: input, shape index: {}]   ;;  %s847_s2 = inlined_call_operand.vmem [shape: bf16[2,7,8,128], index: 2, kind: input, shape index: {}]   ;;  %s848_s3 = inlined_call_operand.vmem [shape: bf16[2,7,7,128], index: 3, kind: input, shape index: {}]   ;;  %s849_s4 = inlined_call_operand.vmem [shape: bf16[2,7,7,128], index: 4, kind: output, shape index: {}]  }
   0x1 LB: > { %s609_s16 = sadd.s32 4294967295, %s640_s15   ;;  %p613_p0 = scmp.ge.s32.totalorder %s640_s15, 1  ;;  %s640_s15 = sphi %s667_s15, %s14_s15  }
   0x2   : > { %p192_p1 = scmp.lt.s32.totalorder %s640_s15, 3 }
   0x4   : > { %p193_p2 = pnand %p613_p0, %p192_p1 }
   0x5   : > { %p233_p3 = scmp.lt.s32.totalorder (!%p193_p2), %s609_s16, 1  ;;  %vm494_vm0 = vcmask (!%p193_p2), 1043456   ;;  %vm495_vm1 = vsmask.f32 (!%p193_p2), 3328 }
   0x6   : > { %196 = sbr.rel (%p193_p2) target bundleno = 68 (0x44), region = 36  ;;  %vm787_vm2 = vmand (!%p193_p2), %vm494_vm0, %vm495_vm1 }
   0xd   : > { %s853_s16 = smov (!%p233_p3, %s609_s16), 1 }
   0xe   : > { %s623_s17 = sshll.u32 %s853_s16, 5  ;;  %s675_s18 = smul.u32 28, %s853_s16 }
   0xf   : > { %s680_s21 = scalar_lea.vmem %s845_s0, %s623_s17  ;;  %s685_s24 = scalar_lea.vmem %s846_s1, %s623_s17 }
  0x10   : > { %s691_s27 = scalar_lea.vmem %s847_s2, %s675_s18  ;;  %v258_v0 = vld [vmem:[%s680_s21] sm:$0xf]  ;;  %v695_v1 = vld [vmem:[%s680_s21 + $0x4] sm:$0xf]  ;;  %v716_v19 = vld [vmem:[%s680_s21 + $0x8] sm:$0xf]  ;;  %s726_s30 = scalar_lea.vmem %s848_s3, %s675_s18 }
  0x11   : > { %v266_v2 = vld [vmem:[%s685_s24] sm:$0xf]  ;;  %v699_v3 = vld [vmem:[%s685_s24 + $0x4] sm:$0xf]  ;;  %v296_v8 = vshrl.u32 %v258_v0, 16  ;;  %v299_v9 = vshll.u32 %v258_v0, 16  ;;  %s774_s7 = scalar_lea.vmem %s849_s4, %s675_s18 }
  0x12   : > { %v702_v4 = vld [vmem:[%s691_s27] sm:$0xf]  ;;  %v705_v5 = vld [vmem:[%s691_s27 + $0x4] sm:$0xf]  ;;  %v288_v6 = vmax.bf16 %v266_v2, %v258_v0  ;;  %v289_v7 = vmax.bf16 %v699_v3, %v695_v1  ;;  %v305_v10 = vshrl.u32 %v695_v1, 16  ;;  %v308_v11 = vshll.u32 %v695_v1, 16 }
  0x13   : > { %v387_v12 = vshrl.u32 %v702_v4, 16  ;;  %v390_v13 = vshll.u32 %v702_v4, 16  ;;  %v396_v14 = vshrl.u32 %v705_v5, 16  ;;  %v298_v15 = vrot.slane %v296_v8, 4  ;;  %v719_v23 = vld [vmem:[%s685_s24 + $0x8] sm:$0xf] }
  0x14   : > { %v301_v16 = vrot.slane %v299_v9, 5  ;;  %v307_v17 = vrot.slane %v305_v10, 4  ;;  %v399_v18 = vshll.u32 %v705_v5, 16  ;;  %v310_v20 = vrot.slane %v308_v11, 5  ;;  %v729_v26 = vld [vmem:[%s691_s27 + $0x8] sm:$0xf] }
  0x15   : > { %v389_v21 = vrot.slane %v387_v12, 4  ;;  %v392_v22 = vrot.slane %v390_v13, 5  ;;  %v314_v24 = vshrl.u32 %v716_v19, 16  ;;  %v290_v27 = vmax.bf16 %v719_v23, %v716_v19  ;;  %v735_v34 = vld [vmem:[%s680_s21 + $0xc] sm:$0xf] }
  0x16   : > { %v302_v25 = vor.u32 %v301_v16, %v298_v15  ;;  %v317_v28 = vshll.u32 %v716_v19, 16  ;;  %v398_v29 = vrot.slane %v396_v14, 4  ;;  %v311_v30 = vor.u32 %v310_v20, %v307_v17  ;;  %v740_v39 = vld [vmem:[%s685_s24 + $0xc] sm:$0xf]  ;;  %v281_v40 = vld [vmem:[%s726_s30] sm:$0xf] }
  0x17   : > { %v393_v31 = vor.u32 %v392_v22, %v389_v21  ;;  %v316_v32 = vrot.slane %v314_v24, 4  ;;  %v401_v33 = vrot.slane %v399_v18, 5  ;;  %v405_v37 = vshrl.u32 %v729_v26, 16  ;;  %v282_v46 = vld [vmem:[%s726_s30 + $0x4] sm:$0xf] }
  0x18   : > { %v303_v35 = vrot.slane %v302_v25, 4  ;;  %v319_v36 = vrot.slane %v317_v28, 5  ;;  %v408_v38 = vshll.u32 %v729_v26, 16  ;;  %v743_v41 = vrot.slane %v311_v30, 4  ;;  %v277_v48 = vld [vmem:[%s691_s27 + $0xc] sm:$0xf] }
  0x19   : > { %v394_v42 = vrot.slane %v393_v31, 4  ;;  %v402_v43 = vor.u32 %v401_v33, %v398_v29  ;;  %v291_v44 = vmax.bf16 %v740_v39, %v735_v34  ;;  %v323_v49 = vshrl.u32 %v735_v34, 16  ;;  %v753_v55 = vld [vmem:[%s685_s24 + $0x10] sm:$0xf]  ;;  %v768_v22 = vld [vmem:[%s685_s24 + $0x14] sm:$0xf] }
  0x1a   : > { %v365_v45 = vmax.bf16 %v303_v35, %v288_v6  ;;  %v320_v47 = vor.u32 %v319_v36, %v316_v32  ;;  %v326_v50 = vshll.u32 %v735_v34, 16  ;;  %v366_v51 = vmax.bf16 %v743_v41, %v289_v7  ;;  %v757_v60 = vld [vmem:[%s680_s21 + $0x10] sm:$0xf]  ;;  %v283_v7 = vld [vmem:[%s726_s30 + $0x8] sm:$0xf] }
  0x1b   : > { %v403_v52 = vrot.slane %v402_v43, 4  ;;  %v407_v53 = vrot.slane %v405_v37, 4  ;;  %v410_v54 = vrot.slane %v408_v38, 5  ;;  %v325_v58 = vrot.slane %v323_v49, 4  ;;  %v278_v11 = vld [vmem:[%s691_s27 + $0x10] sm:$0xf] }
  0x1c   : > { %v372_v56 = vmax.bf16 %v365_v45, %v702_v4  ;;  %v321_v57 = vrot.slane %v320_v47, 4  ;;  %v328_v59 = vrot.slane %v326_v50, 5  ;;  %v373_v61 = vmax.bf16 %v366_v51, %v705_v5  ;;  %v284_v30 = vld [vmem:[%s726_s30 + $0xc] sm:$0xf]  ;;  %v500_v45 = vld [vmem:[%s774_s7 + $0x4] sm:$0xf] }
  0x1d   : > { %v411_v62 = vor.u32 %v410_v54, %v407_v53  ;;  %v414_v63 = vshrl.u32 %v277_v48, 16  ;;  %v417_v0 = vshll.u32 %v277_v48, 16  ;;  %v292_v4 = vmax.bf16 %v753_v55, %v757_v60 }
  0x1e   : > { %v379_v2 = vmax.bf16 %v372_v56, %v281_v40  ;;  %v367_v6 = vmax.bf16 %v321_v57, %v290_v27  ;;  %v329_v8 = vor.u32 %v328_v59, %v325_v58  ;;  %v380_v9 = vmax.bf16 %v373_v61, %v282_v46  ;;  %v805_v59 = vld [vmem:[%s685_s24 + $0x18] sm:$0xf]  ;;  %v503_v61 = vld [vmem:[%s774_s7 + $0x8] sm:$0xf] }
  0x1f   : > { %v412_v10 = vrot.slane %v411_v62, 4  ;;  %v332_v12 = vshrl.u32 %v757_v60, 16  ;;  %v335_v5 = vshll.u32 %v757_v60, 16  ;;  %v416_v16 = vrot.slane %v414_v63, 4 }
  0x20   : > { %v456_v13 = vmax.bf16 %v394_v42, %v379_v2  ;;  %v374_v14 = vmax.bf16 %v367_v6, %v729_v26  ;;  %v330_v15 = vrot.slane %v329_v8, 4  ;;  %v457_v17 = vmax.bf16 %v403_v52, %v380_v9  ;;  %v778_v26 = vld [vmem:[%s680_s21 + $0x14] sm:$0xf]  ;;  %v280_v9 = vld [vmem:[%s691_s27 + $0x18] sm:$0xf] }
  0x21   : > { %v334_v18 = vrot.slane %v332_v12, 4  ;;  %v337_v20 = vrot.slane %v335_v5, 5  ;;  %v419_v21 = vrot.slane %v417_v0, 5  ;;  %v423_v28 = vshrl.u32 %v278_v11, 16 }
  0x22   : > { %v463_v24 = vmax.bf16 %v456_v13, %v695_v1  ;;  %v368_v25 = vmax.bf16 %v330_v15, %v291_v44  ;;  %v381_v27 = vmax.bf16 %v374_v14, %v283_v7  ;;  %v464_v29 = vmax.bf16 %v457_v17, %v716_v19  ;;  %v497_v19 = vld [vmem:[%s774_s7] sm:$0xf] }
  0x23   : > { %v338_v31 = vor.u32 %v337_v20, %v334_v18  ;;  %v420_v32 = vor.u32 %v419_v21, %v416_v16  ;;  %v426_v33 = vshll.u32 %v278_v11, 16  ;;  %v293_v1 = vmax.bf16 %v768_v22, %v778_v26  ;;  %v265_v16 = vld [vmem:[%s680_s21 + $0x1c] sm:$0xf] }
  0x24   : > { %v470_v35 = vmax.bf16 %v463_v24, %v699_v3  ;;  %v375_v36 = vmax.bf16 %v368_v25, %v277_v48  ;;  %v458_v37 = vmax.bf16 %v412_v10, %v381_v27  ;;  %v471_v40 = vmax.bf16 %v464_v29, %v719_v23  ;;  %v279_v48 = vld [vmem:[%s691_s27 + $0x14] sm:$0xf]  ;;  %v285_v23 = vld [vmem:[%s726_s30 + $0x10] sm:$0xf] }
  0x25   : > { %v339_v42 = vrot.slane %v338_v31, 4  ;;  %v421_v43 = vrot.slane %v420_v32, 4  ;;  %v341_v44 = vshrl.u32 %v778_v26, 16  ;;  %v344_v49 = vshll.u32 %v778_v26, 16  ;;  %v286_v29 = vld [vmem:[%s726_s30 + $0x14] sm:$0xf] }
  0x26   : > { %v487_v3 = vmax.bf16 %v470_v35, %v743_v41  ;;  %v465_v46 = vmax.bf16 %v458_v37, %v735_v34  ;;  %v382_v47 = vmax.bf16 %v375_v36, %v284_v30  ;;  %v488_v50 = vmax.bf16 %v471_v40, %v321_v57  ;;  %v264_v34 = vld [vmem:[%s680_s21 + $0x18] sm:$0xf] }
  0x27   : > { %v369_v51 = vmax.bf16 %v339_v42, %v292_v4  ;;  %v343_v52 = vrot.slane %v341_v44, 4  ;;  %v425_v53 = vrot.slane %v423_v28, 4  ;;  %v346_v58 = vrot.slane %v344_v49, 5 }
  0x28   : > { %v498_v54 = vsel %vm787_vm2, %v487_v3, %v497_v19  ;;  %v472_v41 = vmax.bf16 %v465_v46, %v740_v39  ;;  %v459_v56 = vmax.bf16 %v421_v43, %v382_v47  ;;  %v501_v57 = vsel %vm787_vm2, %v488_v50, %v500_v45  ;;  %v509_v45 = vld [vmem:[%s774_s7 + $0x10] sm:$0xf] }
  0x29   : > { %499 = vst [vmem:[%s774_s7] sm:$0xf] %v498_v54  ;;  %v376_v62 = vmax.bf16 %v369_v51, %v278_v11  ;;  %v428_v63 = vrot.slane %v426_v33, 5  ;;  %v432_v0 = vshrl.u32 %v279_v48, 16  ;;  %502 = vst [vmem:[%s774_s7 + $0x4] sm:$0xf] %v501_v57  ;;  %v347_v6 = vor.u32 %v346_v58, %v343_v52 }
  0x2a   : > { %v489_v2 = vmax.bf16 %v472_v41, %v330_v15  ;;  %v466_v39 = vmax.bf16 %v459_v56, %v757_v60  ;;  %v435_v7 = vshll.u32 %v279_v48, 16  ;;  %v294_v10 = vmax.bf16 %v805_v59, %v264_v34  ;;  %v506_v15 = vld [vmem:[%s774_s7 + $0xc] sm:$0xf]  ;;  %v287_v51 = vld [vmem:[%s726_s30 + $0x18] sm:$0xf] }
  0x2b   : > { %v383_v8 = vmax.bf16 %v376_v62, %v285_v23  ;;  %v429_v4 = vor.u32 %v428_v63, %v425_v53  ;;  %v350_v12 = vshrl.u32 %v264_v34, 16  ;;  %v348_v13 = vrot.slane %v347_v6, 4  ;;  %v512_v56 = vld [vmem:[%s774_s7 + $0x14] sm:$0xf] }
  0x2c   : > { %v504_v11 = vsel %vm787_vm2, %v489_v2, %v503_v61  ;;  %v473_v5 = vmax.bf16 %v466_v39, %v753_v55  ;;  %v353_v14 = vshll.u32 %v264_v34, 16  ;;  %v434_v18 = vrot.slane %v432_v0, 4  ;;  %v273_v61 = vld [vmem:[%s685_s24 + $0x1c] sm:$0xf]  ;;  %v515_v2 = vld [vmem:[%s774_s7 + $0x18] sm:$0xf] }
  0x2d   : > { %505 = vst [vmem:[%s774_s7 + $0x8] sm:$0xf] %v504_v11  ;;  %v430_v60 = vrot.slane %v429_v4, 4  ;;  %v352_v17 = vrot.slane %v350_v12, 4  ;;  %v437_v20 = vrot.slane %v435_v7, 5  ;;  %v370_v24 = vmax.bf16 %v348_v13, %v293_v1 }
  0x2e   : > { %v490_v21 = vmax.bf16 %v473_v5, %v339_v42  ;;  %v355_v25 = vrot.slane %v353_v14, 5  ;;  %v441_v27 = vshrl.u32 %v280_v9, 16  ;;  %v444_v31 = vshll.u32 %v280_v9, 16 }
  0x2f   : > { %v460_v28 = vmax.bf16 %v430_v60, %v383_v8  ;;  %v438_v30 = vor.u32 %v437_v20, %v434_v18  ;;  %v478_v55 = vshrl.u32 %v265_v16, 16  ;;  %v377_v33 = vmax.bf16 %v370_v24, %v279_v48 }
  0x30   : > { %v507_v32 = vsel %vm787_vm2, %v490_v21, %v506_v15  ;;  %v356_v35 = vor.u32 %v355_v25, %v352_v17  ;;  %v443_v36 = vrot.slane %v441_v27, 4  ;;  %v446_v1 = vrot.slane %v444_v31, 5 }
  0x31   : > { %508 = vst [vmem:[%s774_s7 + $0xc] sm:$0xf] %v507_v32  ;;  %v467_v37 = vmax.bf16 %v460_v28, %v778_v26  ;;  %v439_v19 = vrot.slane %v438_v30, 4  ;;  %v384_v42 = vmax.bf16 %v377_v33, %v286_v29  ;;  %v481_v43 = vshll.u32 %v265_v16, 16 }
  0x32   : > { %v357_v40 = vrot.slane %v356_v35, 4  ;;  %v447_v3 = vor.u32 %v446_v1, %v443_v36  ;;  %v480_v48 = vrot.slane %v478_v55, 4 }
  0x33   : > { %v474_v44 = vmax.bf16 %v467_v37, %v768_v22  ;;  %v461_v47 = vmax.bf16 %v439_v19, %v384_v42  ;;  %v483_v49 = vrot.slane %v481_v43, 5 }
  0x34   : > { %v371_v46 = vmax.bf16 %v357_v40, %v294_v10  ;;  %v448_v52 = vrot.slane %v447_v3, 4 }
  0x35   : > { %v491_v50 = vmax.bf16 %v474_v44, %v348_v13  ;;  %v468_v23 = vmax.bf16 %v461_v47, %v264_v34  ;;  %v484_v41 = vor.u32 %v483_v49, %v480_v48 }
  0x36   : > { %v378_v26 = vmax.bf16 %v371_v46, %v280_v9 }
  0x37   : > { %v510_v53 = vsel %vm787_vm2, %v491_v50, %v509_v45  ;;  %v475_v22 = vmax.bf16 %v468_v23, %v805_v59  ;;  %v485_v34 = vrot.slane %v484_v41, 4 }
  0x38   : > { %511 = vst [vmem:[%s774_s7 + $0x10] sm:$0xf] %v510_v53  ;;  %v385_v54 = vmax.bf16 %v378_v26, %v287_v51 }
  0x39   : > { %v492_v58 = vmax.bf16 %v475_v22, %v357_v40 }
  0x3a   : > { %v462_v57 = vmax.bf16 %v448_v52, %v385_v54 }
  0x3b   : > { %v513_v62 = vsel %vm787_vm2, %v492_v58, %v512_v56 }
  0x3c   : > { %v469_v63 = vmax.bf16 %v462_v57, %v265_v16  ;;  %514 = vst [vmem:[%s774_s7 + $0x14] sm:$0xf] %v513_v62 }
  0x3e   : > { %v476_v0 = vmax.bf16 %v469_v63, %v273_v61 }
  0x40   : > { %v493_v39 = vmax.bf16 %v485_v34, %v476_v0 }
  0x42   : > { %v516_v6 = vsel %vm787_vm2, %v493_v39, %v515_v2 }
  0x43   : > { %517 = vst [vmem:[%s774_s7 + $0x18] sm:$0xf] %v516_v6 }
  0x44 PF: > { %s14_s15 = sadd.s32 1, %s640_s15  }
  0x45   : > { %p11_p4 = scmp.ge.s32.totalorder %s14_s15, 4  }
  0x47   :  { %13 = sbr.rel (!%p11_p4) target bundleno = 1 (0x1), region = 75 }

// kernel: alexnet_bvlc_forward.11
= control target key start
LH: loop header
LB: loop body
LE: loop exit
PB: predicated region body
PF: predicated region fallthrough
CT: control target
= control target key end

     0   :  { %s2747_s12 = smov 0   ;;  %s2749_s13 = smov 0   ;;  %s3037_s0 = inlined_call_operand.vmem [shape: bf16[2,112,1280], index: 0, kind: input, shape index: {}]   ;;  %s3038_s1 = inlined_call_operand.vmem [shape: bf16[2,1280,128], index: 1, kind: input, shape index: {}]   ;;  %s3039_s2 = inlined_call_operand.vmem [shape: f32[2,1,128], index: 2, kind: input, shape index: {}]   ;;  %s3040_s3 = inlined_call_operand.vmem [shape: bf16[2,112,128], index: 3, kind: output, shape index: {}]  }
   0x1   :  { %s2751_s14 = smov 0  }
   0x2 LB: > { %s25_s15 = sadd.s32 1, %s2721_s13  ;;  %p1959_p0 = scmp.ge.s32.totalorder %s2725_s14, 1  ;;  %s2725_s14 = sphi %s2751_s14, %s13_s14   ;;  %s2721_s13 = sphi %s2749_s13, %s3042_s13   ;;  %s2717_s12 = sphi %s2747_s12, %s3041_s12  }
   0x3   : > { %p27_p1 = scmp.ge.s32.totalorder %s25_s15, 2  ;;  %p177_p2 = scmp.lt.s32.totalorder %s2725_s14, 3 }
   0x5   : > { %s3044_s15 = smov (%p27_p1, %s25_s15), 0  ;;  %p178_p3 = pnand %p1959_p0, %p177_p2 }
   0x6   : > { %p219_p4 = scmp.lt.s32.totalorder (!%p178_p3), %s2717_s12, 1 }
   0x7   : > { %181 = sbr.rel (%p178_p3) target bundleno = 413 (0x19d), region = 32 }
   0xe   : > { %s3046_s12 = smov (!%p219_p4, %s2717_s12), 1 }
   0xf   : > { %s2492_s16 = smul.u32 640, %s3046_s12  ;;  %s236_s26 = scalar_lea.vmem %s3039_s2, %s3046_s12 }
  0x10   : > { %s2491_s20 = smul.u32 560, %s3046_s12 }
  0x11   : > { %s2771_s19 = scalar_lea.vmem %s3038_s1, %s2492_s16  ;;  %s2493_s27 = smul.u32 56, %s3046_s12 }
  0x12   : > { %v2518_v0 = vld [vmem:[%s2771_s19 + $0x40] sm:$0xff]   ;;  %v2520_v2 = vld [vmem:[%s2771_s19 + $0x48] sm:$0xff]   ;;  %v2522_v4 = vld [vmem:[%s2771_s19 + $0x50] sm:$0xff]   ;;  %s2786_s23 = scalar_lea.vmem %s3037_s0, %s2491_s20 }
  0x13   : > { %v2519_v1 = vld [vmem:[%s2771_s19] sm:$0xff]   ;;  %2185 = vmatprep.subr.bf16.mxu0 %v2518_v0  ;;  %2475 = vmatprep.subr.bf16.mxu1 %v2518_v0  ;;  %v2521_v3 = vld [vmem:[%s2771_s19 + $0x8] sm:$0xff]   ;;  %v2523_v5 = vld [vmem:[%s2771_s19 + $0x10] sm:$0xff]   ;;  %s3007_s30 = scalar_lea.vmem %s3040_s3, %s2493_s27 }
  0x14   : > { %2186 = vmatpush3.bf16.msra.mxu0 %v2519_v1  ;;  %2483 = vmatpush3.bf16.msra.mxu1 %v2519_v1  ;;  %v2524_v6 = vld [vmem:[%s2771_s19 + $0x58] sm:$0xff]   ;;  %v2526_v8 = vld [vmem:[%s2771_s19 + $0x60] sm:$0xff]   ;;  %v2528_v10 = vld [vmem:[%s2771_s19 + $0x68] sm:$0xff]  }
  0x15   : > { %2187 = vmatprep.subr.bf16.mxu0 %v2520_v2  ;;  %2476 = vmatprep.subr.bf16.mxu1 %v2520_v2  ;;  %v2525_v7 = vld [vmem:[%s2771_s19 + $0x18] sm:$0xff]   ;;  %v2527_v9 = vld [vmem:[%s2771_s19 + $0x20] sm:$0xff]   ;;  %v2529_v13 = vld [vmem:[%s2771_s19 + $0x28] sm:$0xff]  }
  0x16   : > { %v2536_v11 = vld [vmem:[%s2786_s23 + $0x4] ss:$40 sps:$4 sm:$0xff]   ;;  %v2530_v14 = vld [vmem:[%s2771_s19 + $0x70] sm:$0xff]   ;;  %v2532_v16 = vld [vmem:[%s2771_s19 + $0x78] sm:$0xff]  }
  0x17   : > { %v2539_v12 = vld [vmem:[%s2786_s23 + $0x144] ss:$40 sps:$4 sm:$0xff]   ;;  %1347 = vmatprep.mubr.bf16.mxu0 %v2536_v11  ;;  %v2531_v15 = vld [vmem:[%s2771_s19 + $0x30] sm:$0xff]   ;;  %v2533_v17 = vld [vmem:[%s2771_s19 + $0x38] sm:$0xff]  }
  0x18   : > { %2188 = vmatpush3.bf16.msra.mxu0 %v2521_v3  ;;  %2484 = vmatpush3.bf16.msra.mxu1 %v2521_v3  ;;  %v2540_v18 = vld [vmem:[%s2771_s19 + $0xc0] sm:$0xff]   ;;  %v2544_v24 = vld [vmem:[%s2771_s19 + $0xc8] sm:$0xff]   ;;  %v2548_v28 = vld [vmem:[%s2786_s23 + $0x54] ss:$40 sps:$4 sm:$0xff]  }
  0x19   : > { %2189 = vmatprep.subr.bf16.mxu0 %v2522_v4  ;;  %2477 = vmatprep.subr.bf16.mxu1 %v2522_v4  ;;  %v2534_v19 = vld [vmem:[%s2786_s23] ss:$40 sps:$4 sm:$0xff]   ;;  %v2557_v29 = vld [vmem:[%s2786_s23 + $0x194] ss:$40 sps:$4 sm:$0xff]   ;;  %v2550_v31 = vld [vmem:[%s2786_s23 + $0x50] ss:$40 sps:$4 sm:$0xff]  }
  0x1a   : > { %1379 = vmatprep.mubr.bf16.mxu1 %v2539_v12  ;;  %v2537_v20 = vld [vmem:[%s2786_s23 + $0x140] ss:$40 sps:$4 sm:$0xff]   ;;  %v2551_v30 = vld [vmem:[%s2771_s19 + $0xd0] sm:$0xff]   ;;  %v2555_v36 = vld [vmem:[%s2771_s19 + $0xd8] sm:$0xff]  }
  0x1b   : > { %v2541_v21 = vld [vmem:[%s2771_s19 + $0x140] sm:$0xff]   ;;  %v2545_v25 = vld [vmem:[%s2771_s19 + $0x148] sm:$0xff]   ;;  %v2552_v32 = vld [vmem:[%s2771_s19 + $0x150] sm:$0xff]  }
  0x1c   : > { %2190 = vmatpush3.bf16.msra.mxu0 %v2523_v5  ;;  %2485 = vmatpush3.bf16.msra.mxu1 %v2523_v5  ;;  %v2542_v22 = vld [vmem:[%s2771_s19 + $0x80] sm:$0xff]   ;;  %v2546_v26 = vld [vmem:[%s2771_s19 + $0x88] sm:$0xff]   ;;  %v2553_v33 = vld [vmem:[%s2771_s19 + $0x90] sm:$0xff]  }
  0x1d   : > { %2191 = vmatprep.subr.bf16.mxu0 %v2524_v6  ;;  %2478 = vmatprep.subr.bf16.mxu1 %v2524_v6  ;;  %v2543_v23 = vld [vmem:[%s2771_s19 + $0x100] sm:$0xff]   ;;  %v2547_v27 = vld [vmem:[%s2771_s19 + $0x108] sm:$0xff]   ;;  %v2554_v34 = vld [vmem:[%s2771_s19 + $0x110] sm:$0xff]  }
  0x1e   : > { %v2561_v35 = vld [vmem:[%s2786_s23 + $0x190] ss:$40 sps:$4 sm:$0xff]   ;;  %v2562_v39 = vld [vmem:[%s2786_s23 + $0xa4] ss:$40 sps:$4 sm:$0xff]   ;;  %v2564_v42 = vld [vmem:[%s2786_s23 + $0xa0] ss:$40 sps:$4 sm:$0xff]  }
  0x1f   : > { %v2556_v37 = vld [vmem:[%s2771_s19 + $0x158] sm:$0xff]   ;;  %v2565_v41 = vld [vmem:[%s2771_s19 + $0xe0] sm:$0xff]   ;;  %v2569_v47 = vld [vmem:[%s2771_s19 + $0xe8] sm:$0xff]  }
  0x20   : > { %2192 = vmatpush3.bf16.msra.mxu0 %v2525_v7  ;;  %2486 = vmatpush3.bf16.msra.mxu1 %v2525_v7  ;;  %v2559_v38 = vld [vmem:[%s2771_s19 + $0x98] sm:$0xff]   ;;  %v2566_v43 = vld [vmem:[%s2771_s19 + $0x160] sm:$0xff]   ;;  %v2570_v49 = vld [vmem:[%s2771_s19 + $0x168] sm:$0xff]  }
  0x21   : > { %2193 = vmatprep.subr.bf16.mxu0 %v2526_v8  ;;  %2479 = vmatprep.subr.bf16.mxu1 %v2526_v8  ;;  %v2560_v40 = vld [vmem:[%s2771_s19 + $0x118] sm:$0xff]   ;;  %v2567_v44 = vld [vmem:[%s2771_s19 + $0xa0] sm:$0xff]   ;;  %v2573_v50 = vld [vmem:[%s2771_s19 + $0xa8] sm:$0xff]  }
  0x22   : > { %v2571_v45 = vld [vmem:[%s2786_s23 + $0x1e4] ss:$40 sps:$4 sm:$0xff]   ;;  %v2575_v48 = vld [vmem:[%s2786_s23 + $0x1e0] ss:$40 sps:$4 sm:$0xff]   ;;  %v2576_v51 = vld [vmem:[%s2786_s23 + $0xf4] ss:$40 sps:$4 sm:$0xff]  }
  0x23   : > { %v2568_v46 = vld [vmem:[%s2771_s19 + $0x120] sm:$0xff]   ;;  %v2574_v52 = vld [vmem:[%s2771_s19 + $0x128] sm:$0xff]   ;;  %v2579_v53 = vld [vmem:[%s2771_s19 + $0xf0] sm:$0xff]  }
  0x24   : > { %2194 = vmatpush3.bf16.msra.mxu0 %v2527_v9  ;;  %2487 = vmatpush3.bf16.msra.mxu1 %v2527_v9  ;;  %v2578_v54 = vld [vmem:[%s2786_s23 + $0xf0] ss:$40 sps:$4 sm:$0xff]   ;;  %v2589_v61 = vld [vmem:[%s2786_s23 + $0xc] ss:$40 sps:$4 sm:$0xff]   ;;  %v2593_v2 = vld [vmem:[%s2771_s19 + $0x1c0] sm:$0xff]  }
  0x25   : > { %2195 = vmatprep.subr.bf16.mxu0 %v2528_v10  ;;  %2480 = vmatprep.subr.bf16.mxu1 %v2528_v10  ;;  %v2580_v55 = vld [vmem:[%s2771_s19 + $0x170] sm:$0xff]   ;;  %v2583_v58 = vld [vmem:[%s2771_s19 + $0xf8] sm:$0xff]   ;;  %v2594_v3 = vld [vmem:[%s2771_s19 + $0x180] sm:$0xff]  }
  0x26   : > { %v2581_v56 = vld [vmem:[%s2771_s19 + $0xb0] sm:$0xff]   ;;  %v2584_v59 = vld [vmem:[%s2771_s19 + $0x178] sm:$0xff]   ;;  %v2595_v4 = vld [vmem:[%s2771_s19 + $0x240] sm:$0xff]  }
  0x27   : > { %v2582_v57 = vld [vmem:[%s2771_s19 + $0x130] sm:$0xff]   ;;  %v2585_v60 = vld [vmem:[%s2771_s19 + $0xb8] sm:$0xff]   ;;  %v2596_v5 = vld [vmem:[%s2771_s19 + $0x200] sm:$0xff]  }
  0x28   : > { %2196 = vmatpush3.bf16.msra.mxu0 %v2529_v13  ;;  %2488 = vmatpush3.bf16.msra.mxu1 %v2529_v13  ;;  %v2586_v62 = vld [vmem:[%s2771_s19 + $0x138] sm:$0xff]   ;;  %v2587_v0 = vld [vmem:[%s2786_s23 + $0x8] ss:$40 sps:$4 sm:$0xff]   ;;  %v2599_v7 = vld [vmem:[%s2786_s23 + $0x64] ss:$40 sps:$4 sm:$0xff]  }
  0x29   : > { %2197 = vmatprep.subr.bf16.mxu0 %v2530_v14  ;;  %2481 = vmatprep.subr.bf16.mxu1 %v2530_v14  ;;  %v2592_v63 = vld [vmem:[%s2786_s23 + $0x14] ss:$40 sps:$4 sm:$0xff]   ;;  %v2590_v1 = vld [vmem:[%s2786_s23 + $0x10] ss:$40 sps:$4 sm:$0xff]   ;;  %v2601_v8 = vld [vmem:[%s2771_s19 + $0x1c8] sm:$0xff]  }
  0x2a   : > { %v2597_v6 = vld [vmem:[%s2786_s23 + $0x5c] ss:$40 sps:$4 sm:$0xff]   ;;  %v2602_v9 = vld [vmem:[%s2786_s23 + $0x58] ss:$40 sps:$4 sm:$0xff]   ;;  %v2604_v11 = vld [vmem:[%s2771_s19 + $0x188] sm:$0xff]  }
  0x2b   : > { %v2603_v10 = vld [vmem:[%s2786_s23 + $0x60] ss:$40 sps:$4 sm:$0xff]   ;;  %v2607_v14 = vld [vmem:[%s2771_s19 + $0x1d0] sm:$0xff]  }
  0x2c   : > { %2198 = vmatpush3.bf16.msra.mxu0 %v2531_v15  ;;  %2489 = vmatpush3.bf16.msra.mxu1 %v2531_v15  ;;  %v2605_v12 = vld [vmem:[%s2771_s19 + $0x248] sm:$0xff]  }
  0x2d   : > { %2199 = vmatprep.subr.bf16.mxu0 %v2532_v16  ;;  %2482 = vmatprep.subr.bf16.mxu1 %v2532_v16  ;;  %v2606_v13 = vld [vmem:[%s2771_s19 + $0x208] sm:$0xff]   ;;  %v2610_v16 = vld [vmem:[%s2786_s23 + $0xb4] ss:$40 sps:$4 sm:$0xff]  }
  0x2e   : > { %v2608_v15 = vld [vmem:[%s2786_s23 + $0xac] ss:$40 sps:$4 sm:$0xff]  }
  0x30   : > { %2200 = vmatpush3.bf16.msra.mxu0 %v2533_v17  ;;  %2490 = vmatpush3.bf16.msra.mxu1 %v2533_v17  ;;  %v2612_v17 = vld [vmem:[%s2771_s19 + $0x190] sm:$0xff]  }
  0x31   : > { %2243 = vmatprep.subr.bf16.mxu1 %v2540_v18  ;;  %2301 = vmatprep.subr.bf16.mxu0 %v2541_v21  ;;  %v2613_v18 = vld [vmem:[%s2786_s23 + $0xa8] ss:$40 sps:$4 sm:$0xff]  }
  0x32   : > { %v2616_v21 = vld [vmem:[%s2771_s19 + $0x210] sm:$0xff]  }
  0x33   : > { %1348 = vmatmul.mubr.bf16.vlgmr.msra.gmra.mrb[0].mxu0 %v2534_v19  ;;  %1380 = vmatmul.mubr.bf16.vlgmr.msra.gmra.mrb[0].mxu1 %v2537_v20  ;;  %v2614_v19 = vld [vmem:[%s2786_s23 + $0xb0] ss:$40 sps:$4 sm:$0xff]  }
  0x34   : > { %2244 = vmatpush3.bf16.msra.mxu1 %v2542_v22  ;;  %2302 = vmatpush3.bf16.msra.mxu0 %v2543_v23  ;;  %v2615_v20 = vld [vmem:[%s2771_s19 + $0x250] sm:$0xff]   ;;  %v2617_v22 = vld [vmem:[%s2771_s19 + $0x1d8] sm:$0xff]  }
  0x35   : > { %2245 = vmatprep.subr.bf16.mxu1 %v2544_v24  ;;  %2303 = vmatprep.subr.bf16.mxu0 %v2545_v25  ;;  %v2618_v23 = vld [vmem:[%s2771_s19 + $0x198] sm:$0xff]   ;;  %v2621_v25 = vld [vmem:[%s2786_s23 + $0x104] ss:$40 sps:$4 sm:$0xff]  }
  0x36   : > { %1355 = vmatprep.mubr.bf16.mxu0 %v2548_v28  ;;  %1387 = vmatprep.mubr.bf16.mxu1 %v2557_v29  ;;  %v2619_v24 = vld [vmem:[%s2786_s23 + $0xfc] ss:$40 sps:$4 sm:$0xff]   ;;  %v2624_v28 = vld [vmem:[%s2786_s23 + $0xf8] ss:$40 sps:$4 sm:$0xff]  }
  0x37   : > { %v2625_v29 = vld [vmem:[%s2786_s23 + $0x100] ss:$40 sps:$4 sm:$0xff]  }
  0x38   : > { %2246 = vmatpush3.bf16.msra.mxu1 %v2546_v26  ;;  %2304 = vmatpush3.bf16.msra.mxu0 %v2547_v27  ;;  %v2623_v26 = vld [vmem:[%s2771_s19 + $0x258] sm:$0xff]  }
  0x39   : > { %2247 = vmatprep.subr.bf16.mxu1 %v2551_v30  ;;  %2305 = vmatprep.subr.bf16.mxu0 %v2552_v32  ;;  %v2626_v27 = vld [vmem:[%s2771_s19 + $0x218] sm:$0xff]   ;;  %v2627_v30 = vld [vmem:[%s2771_s19 + $0x1e0] sm:$0xff]  }
  0x3a   : > { %v2629_v32 = vld [vmem:[%s2771_s19 + $0x260] sm:$0xff]  }
  0x3b   : > { %1356 = vmatmul.mubr.bf16.gmra.mrb[4].mxu0 %v2550_v31  ;;  %1388 = vmatmul.mubr.bf16.gmra.mrb[4].mxu1 %v2561_v35  ;;  %v2628_v31 = vld [vmem:[%s2771_s19 + $0x1a0] sm:$0xff]  }
  0x3c   : > { %2248 = vmatpush3.bf16.msra.mxu1 %v2553_v33  ;;  %2306 = vmatpush3.bf16.msra.mxu0 %v2554_v34  ;;  %v2630_v33 = vld [vmem:[%s2786_s23 + $0x14c] ss:$40 sps:$4 sm:$0xff]   ;;  %v2634_v35 = vld [vmem:[%s2771_s19 + $0x220] sm:$0xff]  }
  0x3d   : > { %2249 = vmatprep.subr.bf16.mxu1 %v2555_v36  ;;  %2307 = vmatprep.subr.bf16.mxu0 %v2556_v37  ;;  %v2632_v34 = vld [vmem:[%s2786_s23 + $0x154] ss:$40 sps:$4 sm:$0xff]   ;;  %v2637_v36 = vld [vmem:[%s2771_s19 + $0x1e8] sm:$0xff]  }
  0x3e   : > { %1363 = vmatprep.mubr.bf16.mxu0 %v2562_v39  ;;  %1395 = vmatprep.mubr.bf16.mxu1 %v2571_v45  ;;  %v2635_v37 = vld [vmem:[%s2786_s23 + $0x148] ss:$40 sps:$4 sm:$0xff]  }
  0x3f   : > { %v2638_v39 = vld [vmem:[%s2771_s19 + $0x1a8] sm:$0xff]   ;;  %v2648_v45 = vld [vmem:[%s2771_s19 + $0x1b0] sm:$0xff]  }
  0x40   : > { %2250 = vmatpush3.bf16.msra.mxu1 %v2559_v38  ;;  %2308 = vmatpush3.bf16.msra.mxu0 %v2560_v40  ;;  %v2636_v38 = vld [vmem:[%s2786_s23 + $0x150] ss:$40 sps:$4 sm:$0xff]   ;;  %v2639_v40 = vld [vmem:[%s2771_s19 + $0x268] sm:$0xff]  }
  0x41   : > { %2251 = vmatprep.subr.bf16.mxu1 %v2565_v41  ;;  %2309 = vmatprep.subr.bf16.mxu0 %v2566_v43  ;;  %v2640_v41 = vld [vmem:[%s2771_s19 + $0x228] sm:$0xff]  }
  0x42   : > { %v2643_v43 = vld [vmem:[%s2786_s23 + $0x1a4] ss:$40 sps:$4 sm:$0xff]  }
  0x43   : > { %1364 = vmatmul.mubr.bf16.gmra.mrb[8].mxu0 %v2564_v42  ;;  %1396 = vmatmul.mubr.bf16.gmra.mrb[8].mxu1 %v2575_v48  ;;  %v2641_v42 = vld [vmem:[%s2786_s23 + $0x19c] ss:$40 sps:$4 sm:$0xff]   ;;  %v2650_v48 = vld [vmem:[%s2771_s19 + $0x230] sm:$0xff]  }
  0x44   : > { %2252 = vmatpush3.bf16.msra.mxu1 %v2567_v44  ;;  %2310 = vmatpush3.bf16.msra.mxu0 %v2568_v46  ;;  %v2647_v44 = vld [vmem:[%s2771_s19 + $0x1f0] sm:$0xff]   ;;  %v2645_v46 = vld [vmem:[%s2786_s23 + $0x198] ss:$40 sps:$4 sm:$0xff]  }
  0x45   : > { %2253 = vmatprep.subr.bf16.mxu1 %v2569_v47  ;;  %2311 = vmatprep.subr.bf16.mxu0 %v2570_v49  ;;  %v2649_v47 = vld [vmem:[%s2771_s19 + $0x270] sm:$0xff]   ;;  %v2646_v49 = vld [vmem:[%s2786_s23 + $0x1a0] ss:$40 sps:$4 sm:$0xff]  }
  0x46   : > { %1371 = vmatprep.mubr.bf16.mxu0 %v2576_v51  ;;  %1436 = vmatprep.mubr.bf16.mxu1 %v2589_v61  ;;  %v2653_v51 = vld [vmem:[%s2786_s23 + $0x1f4] ss:$40 sps:$4 sm:$0xff]   ;;  %v2664_v61 = vld [vmem:[%s2786_s23 + $0x20] ss:$40 sps:$4 sm:$0xff]  }
  0x48   : > { %2254 = vmatpush3.bf16.msra.mxu1 %v2573_v50  ;;  %2312 = vmatpush3.bf16.msra.mxu0 %v2574_v52  ;;  %v2651_v50 = vld [vmem:[%s2786_s23 + $0x1ec] ss:$40 sps:$4 sm:$0xff]   ;;  %v2657_v52 = vld [vmem:[%s2771_s19 + $0x1f8] sm:$0xff]  }
  0x49   : > { %2255 = vmatprep.subr.bf16.mxu1 %v2579_v53  ;;  %2313 = vmatprep.subr.bf16.mxu0 %v2580_v55  ;;  %v2658_v53 = vld [vmem:[%s2771_s19 + $0x1b8] sm:$0xff]  }
  0x4a   : > { %v2660_v55 = vld [vmem:[%s2771_s19 + $0x238] sm:$0xff]  }
  0x4b   : > { %1372 = vmatmul.mubr.bf16.gmra.mrb[12].mxu0 %v2578_v54  ;;  %v2659_v54 = vld [vmem:[%s2771_s19 + $0x278] sm:$0xff]  }
  0x4c   : > { %2256 = vmatpush3.bf16.msra.mxu1 %v2581_v56  ;;  %2314 = vmatpush3.bf16.msra.mxu0 %v2582_v57  ;;  %v2655_v56 = vld [vmem:[%s2786_s23 + $0x1e8] ss:$40 sps:$4 sm:$0xff]  }
  0x4d   : > { %2257 = vmatprep.subr.bf16.mxu1 %v2583_v58  ;;  %2315 = vmatprep.subr.bf16.mxu0 %v2584_v59  ;;  %v2656_v57 = vld [vmem:[%s2786_s23 + $0x1f0] ss:$40 sps:$4 sm:$0xff]   ;;  %v2663_v58 = vld [vmem:[%s2786_s23 + $0x1c] ss:$40 sps:$4 sm:$0xff]  }
  0x4e   : > { %1525 = vmatprep.mubr.bf16.mxu0 %v2592_v63  ;;  %v2666_v59 = vld [vmem:[%s2786_s23 + $0x24] ss:$40 sps:$4 sm:$0xff]   ;;  %v2669_v63 = vld [vmem:[%s2786_s23 + $0x74] ss:$40 sps:$4 sm:$0xff]  }
  0x50   : > { %2258 = vmatpush3.bf16.msra.mxu1 %v2585_v60  ;;  %2316 = vmatpush3.bf16.msra.mxu0 %v2586_v62  ;;  %v2661_v60 = vld [vmem:[%s2786_s23 + $0x18] ss:$40 sps:$4 sm:$0xff]   ;;  %v2667_v62 = vld [vmem:[%s2786_s23 + $0x6c] ss:$40 sps:$4 sm:$0xff]  }
  0x51   : > { %2359 = vmatprep.subr.bf16.mxu1 %v2593_v2  ;;  %2417 = vmatprep.subr.bf16.mxu0 %v2595_v4  ;;  %v2673_v2 = vld [vmem:[%s2786_s23 + $0xbc] ss:$40 sps:$4 sm:$0xff]   ;;  %v2677_v4 = vld [vmem:[%s2786_s23 + $0xb8] ss:$40 sps:$4 sm:$0xff]  }
  0x53   : > { %1437 = vmatmul.mubr.bf16.vlgmr.msra.gmra.mrb[12].mxu1 %v2587_v0  ;;  %1526 = vmatmul.mubr.bf16.vlgmr.msra.gmra.mrb[16].mxu0 %v2590_v1  ;;  %v2671_v0 = vld [vmem:[%s2786_s23 + $0x68] ss:$40 sps:$4 sm:$0xff]  }
  0x54   : > { %2360 = vmatpush3.bf16.msra.mxu1 %v2594_v3  ;;  %2418 = vmatpush3.bf16.msra.mxu0 %v2596_v5  ;;  %v2672_v1 = vld [vmem:[%s2786_s23 + $0x70] ss:$40 sps:$4 sm:$0xff]   ;;  %v2675_v3 = vld [vmem:[%s2786_s23 + $0xc4] ss:$40 sps:$4 sm:$0xff]   ;;  %v2678_v5 = vld [vmem:[%s2786_s23 + $0xc0] ss:$40 sps:$4 sm:$0xff]  }
  0x55   : > { %1444 = vmatprep.mubr.bf16.mxu1 %v2597_v6  ;;  %1533 = vmatprep.mubr.bf16.mxu0 %v2599_v7  ;;  %v2679_v6 = vld [vmem:[%s2786_s23 + $0x10c] ss:$40 sps:$4 sm:$0xff]  }
  0x56   : > { %2361 = vmatprep.subr.bf16.mxu1 %v2601_v8  ;;  %2419 = vmatprep.subr.bf16.mxu0 %v2605_v12  ;;  %v2681_v7 = vld [vmem:[%s2786_s23 + $0x114] ss:$40 sps:$4 sm:$0xff]   ;;  %v2683_v8 = vld [vmem:[%s2786_s23 + $0x108] ss:$40 sps:$4 sm:$0xff]   ;;  %v2689_v12 = vld [vmem:[%s2786_s23 + $0x158] ss:$40 sps:$4 sm:$0xff]  }
  0x58   : > { %2362 = vmatpush3.bf16.msra.mxu1 %v2604_v11  ;;  %2420 = vmatpush3.bf16.msra.mxu0 %v2606_v13  ;;  %v2687_v11 = vld [vmem:[%s2786_s23 + $0x164] ss:$40 sps:$4 sm:$0xff]   ;;  %v2690_v13 = vld [vmem:[%s2786_s23 + $0x160] ss:$40 sps:$4 sm:$0xff]  }
  0x59   : > { %2363 = vmatprep.subr.bf16.mxu1 %v2607_v14  ;;  %2421 = vmatprep.subr.bf16.mxu0 %v2615_v20  ;;  %v2691_v14 = vld [vmem:[%s2786_s23 + $0x1ac] ss:$40 sps:$4 sm:$0xff]   ;;  %v2701_v20 = vld [vmem:[%s2786_s23 + $0x1f8] ss:$40 sps:$4 sm:$0xff]  }
  0x5b   : > { %1445 = vmatmul.mubr.bf16.gmra.mrb[16].mxu1 %v2602_v9  ;;  %1534 = vmatmul.mubr.bf16.gmra.mrb[20].mxu0 %v2603_v10  ;;  %v2684_v9 = vld [vmem:[%s2786_s23 + $0x110] ss:$40 sps:$4 sm:$0xff]   ;;  %v2685_v10 = vld [vmem:[%s2786_s23 + $0x15c] ss:$40 sps:$4 sm:$0xff]  }
  0x5c   : > { %1452 = vmatprep.mubr.bf16.mxu1 %v2608_v15  ;;  %1541 = vmatprep.mubr.bf16.mxu0 %v2610_v16  ;;  %v2693_v15 = vld [vmem:[%s2786_s23 + $0x1b4] ss:$40 sps:$4 sm:$0xff]   ;;  %v2695_v16 = vld [vmem:[%s2786_s23 + $0x1a8] ss:$40 sps:$4 sm:$0xff]  }
  0x5d   : > { %2364 = vmatpush3.bf16.msra.mxu1 %v2612_v17  ;;  %2422 = vmatpush3.bf16.msra.mxu0 %v2616_v21  ;;  %v2696_v17 = vld [vmem:[%s2786_s23 + $0x1b0] ss:$40 sps:$4 sm:$0xff]   ;;  %v2702_v21 = vld [vmem:[%s2786_s23 + $0x200] ss:$40 sps:$4 sm:$0xff]  }
  0x5e   : > { %2365 = vmatprep.subr.bf16.mxu1 %v2617_v22  ;;  %2423 = vmatprep.subr.bf16.mxu0 %v2623_v26 }
  0x61   : > { %2366 = vmatpush3.bf16.msra.mxu1 %v2618_v23  ;;  %2424 = vmatpush3.bf16.msra.mxu0 %v2626_v27 }
  0x62   : > { %2367 = vmatprep.subr.bf16.mxu1 %v2627_v30  ;;  %2425 = vmatprep.subr.bf16.mxu0 %v2629_v32 }
  0x63   : > { %1453 = vmatmul.mubr.bf16.gmra.mrb[20].mxu1 %v2613_v18  ;;  %1542 = vmatmul.mubr.bf16.gmra.mrb[24].mxu0 %v2614_v19  ;;  %v2697_v18 = vld [vmem:[%s2786_s23 + $0x1fc] ss:$40 sps:$4 sm:$0xff]  }
  0x64   : > { %1460 = vmatprep.mubr.bf16.mxu1 %v2619_v24  ;;  %1549 = vmatprep.mubr.bf16.mxu0 %v2621_v25  ;;  %v2699_v19 = vld [vmem:[%s2786_s23 + $0x204] ss:$40 sps:$4 sm:$0xff]  }
  0x65   : > { %2368 = vmatpush3.bf16.msra.mxu1 %v2628_v31  ;;  %2426 = vmatpush3.bf16.msra.mxu0 %v2634_v35 }
  0x66   : > { %2369 = vmatprep.subr.bf16.mxu1 %v2637_v36  ;;  %2427 = vmatprep.subr.bf16.mxu0 %v2639_v40 }
  0x69   : > { %2370 = vmatpush3.bf16.msra.mxu1 %v2638_v39  ;;  %2428 = vmatpush3.bf16.msra.mxu0 %v2640_v41 }
  0x6a   : > { %2371 = vmatprep.subr.bf16.mxu1 %v2647_v44  ;;  %2429 = vmatprep.subr.bf16.mxu0 %v2649_v47 }
  0x6b   : > { %1461 = vmatmul.mubr.bf16.gmra.mrb[24].mxu1 %v2624_v28  ;;  %1550 = vmatmul.mubr.bf16.gmra.mrb[28].mxu0 %v2625_v29 }
  0x6c   : > { %1468 = vmatprep.mubr.bf16.mxu1 %v2630_v33  ;;  %1557 = vmatprep.mubr.bf16.mxu0 %v2632_v34 }
  0x6d   : > { %2372 = vmatpush3.bf16.msra.mxu1 %v2648_v45  ;;  %2430 = vmatpush3.bf16.msra.mxu0 %v2650_v48 }
  0x6e   : > { %2373 = vmatprep.subr.bf16.mxu1 %v2657_v52  ;;  %2431 = vmatprep.subr.bf16.mxu0 %v2659_v54 }
  0x71   : > { %2374 = vmatpush3.bf16.msra.mxu1 %v2658_v53  ;;  %2432 = vmatpush3.bf16.msra.mxu0 %v2660_v55 }
  0x73   : > { %1469 = vmatmul.mubr.bf16.gmra.mrb[28].mxu1 %v2635_v37  ;;  %1558 = vmatmul.mubr.bf16.gmra.mrb[32].mxu0 %v2636_v38 }
  0x74   : > { %1476 = vmatprep.mubr.bf16.mxu1 %v2641_v42  ;;  %1565 = vmatprep.mubr.bf16.mxu0 %v2643_v43 }
  0x7b   : > { %1477 = vmatmul.mubr.bf16.gmra.mrb[32].mxu1 %v2645_v46  ;;  %1566 = vmatmul.mubr.bf16.gmra.mrb[36].mxu0 %v2646_v49 }
  0x7c   : > { %1484 = vmatprep.mubr.bf16.mxu1 %v2651_v50  ;;  %1573 = vmatprep.mubr.bf16.mxu0 %v2653_v51 }
  0x83   : > { %1485 = vmatmul.mubr.bf16.gmra.mrb[36].mxu1 %v2655_v56  ;;  %1574 = vmatmul.mubr.bf16.gmra.mrb[40].mxu0 %v2656_v57 }
  0x84   : > { %1614 = vmatprep.mubr.bf16.mxu1 %v2663_v58  ;;  %1703 = vmatprep.mubr.bf16.mxu0 %v2666_v59 }
  0x8b   : > { %1615 = vmatmul.mubr.bf16.vlgmr.msra.gmra.mrb[40].mxu1 %v2661_v60  ;;  %1704 = vmatmul.mubr.bf16.vlgmr.msra.gmra.mrb[44].mxu0 %v2664_v61 }
  0x8c   : > { %1622 = vmatprep.mubr.bf16.mxu1 %v2667_v62  ;;  %1711 = vmatprep.mubr.bf16.mxu0 %v2669_v63 }
  0x93   : > { %1623 = vmatmul.mubr.bf16.gmra.mrb[44].mxu1 %v2671_v0  ;;  %1712 = vmatmul.mubr.bf16.gmra.mrb[48].mxu0 %v2672_v1  ;;  %v2949_v0 = vld [vmem:[%s236_s26] ss:$0 sm:$0xff] }
  0x94   : > { %1630 = vmatprep.mubr.bf16.mxu1 %v2673_v2  ;;  %1719 = vmatprep.mubr.bf16.mxu0 %v2675_v3 }
  0x9b   : > { %1631 = vmatmul.mubr.bf16.gmra.mrb[48].mxu1 %v2677_v4  ;;  %1720 = vmatmul.mubr.bf16.gmra.mrb[52].mxu0 %v2678_v5 }
  0x9c   : > { %1638 = vmatprep.mubr.bf16.mxu1 %v2679_v6  ;;  %1727 = vmatprep.mubr.bf16.mxu0 %v2681_v7 }
  0xa3   : > { %1639 = vmatmul.mubr.bf16.gmra.mrb[52].mxu1 %v2683_v8  ;;  %1728 = vmatmul.mubr.bf16.gmra.mrb[56].mxu0 %v2684_v9 }
  0xa4   : > { %1646 = vmatprep.mubr.bf16.mxu1 %v2685_v10  ;;  %1735 = vmatprep.mubr.bf16.mxu0 %v2687_v11 }
  0xab   : > { %1647 = vmatmul.mubr.bf16.gmra.mrb[56].mxu1 %v2689_v12  ;;  %1736 = vmatmul.mubr.bf16.gmra.mrb[60].mxu0 %v2690_v13 }
  0xac   : > { %1654 = vmatprep.mubr.bf16.mxu1 %v2691_v14  ;;  %1743 = vmatprep.mubr.bf16.mxu0 %v2693_v15 }
  0xb3   : > { %1655 = vmatmul.mubr.bf16.gmra.mrb[60].mxu1 %v2695_v16  ;;  %1744 = vmatmul.mubr.bf16.gmra.mrb[64].mxu0 %v2696_v17 }
  0xb4   : > { %1662 = vmatprep.mubr.bf16.mxu1 %v2697_v18  ;;  %1751 = vmatprep.mubr.bf16.mxu0 %v2699_v19 }
  0xbb   : > { %1663 = vmatmul.mubr.bf16.gmra.mrb[64].mxu1 %v2701_v20  ;;  %1752 = vmatmul.mubr.bf16.gmra.mrb[68].mxu0 %v2702_v21 }
 0x106   : > { %v2201_v22 = vpop.f32.mrb[0].mxu0  ;;  %v2225_v23 = vpop.f32.mrb[0].mxu1 }
 0x107   : > { %v2202_v24 = vpop.f32.mrb[1].mxu0  ;;  %v2226_v25 = vpop.f32.mrb[1].mxu1 }
 0x108   : > { %v2203_v26 = vadd.f32 %v2202_v24, %v2201_v22  ;;  %v2929_v27 = vadd.f32 %v2226_v25, %v2225_v23  ;;  %v2204_v28 = vpop.f32.mrb[2].mxu0  ;;  %v2228_v29 = vpop.f32.mrb[2].mxu1 }
 0x109   : > { %v2205_v30 = vpop.f32.mrb[3].mxu0  ;;  %v2229_v31 = vpop.f32.mrb[3].mxu1 }
 0x10a   : > { %v2206_v32 = vadd.f32 %v2205_v30, %v2204_v28  ;;  %v2931_v33 = vadd.f32 %v2229_v31, %v2228_v29  ;;  %v1350_v5 = vadd.f32 %v2203_v26, %v2949_v0 }
 0x10c   : > { %v1353_v12 = vadd.f32 %v2206_v32, %v2949_v0 }
 0x10e   : > { %v2207_v34 = vpop.f32.mrb[4].mxu0  ;;  %v2231_v35 = vpop.f32.mrb[4].mxu1 }
 0x10f   : > { %v2208_v36 = vpop.f32.mrb[5].mxu0  ;;  %v2232_v37 = vpop.f32.mrb[5].mxu1 }
 0x110   : > { %v2209_v38 = vadd.f32 %v2208_v36, %v2207_v34  ;;  %v2210_v39 = vpop.f32.mrb[6].mxu0  ;;  %v2933_v40 = vadd.f32 %v2232_v37, %v2231_v35  ;;  %v2234_v41 = vpop.f32.mrb[6].mxu1 }
 0x111   : > { %v2211_v42 = vpop.f32.mrb[7].mxu0  ;;  %v2235_v43 = vpop.f32.mrb[7].mxu1 }
 0x112   : > { %v2212_v44 = vadd.f32 %v2211_v42, %v2210_v39  ;;  %v2935_v45 = vadd.f32 %v2235_v43, %v2234_v41  ;;  %v1358_v23 = vadd.f32 %v2209_v38, %v2949_v0 }
 0x114   : > { %v1361_v31 = vadd.f32 %v2212_v44, %v2949_v0 }
 0x116   : > { %v2213_v46 = vpop.f32.mrb[8].mxu0  ;;  %v2237_v47 = vpop.f32.mrb[8].mxu1 }
 0x117   : > { %v2214_v48 = vpop.f32.mrb[9].mxu0  ;;  %v2238_v49 = vpop.f32.mrb[9].mxu1 }
 0x118   : > { %v2215_v50 = vadd.f32 %v2214_v48, %v2213_v46  ;;  %v2216_v51 = vpop.f32.mrb[10].mxu0  ;;  %v2937_v52 = vadd.f32 %v2238_v49, %v2237_v47  ;;  %v2240_v53 = vpop.f32.mrb[10].mxu1 }
 0x119   : > { %v2217_v54 = vpop.f32.mrb[11].mxu0  ;;  %v2241_v55 = vpop.f32.mrb[11].mxu1 }
 0x11a   : > { %v2218_v56 = vadd.f32 %v2217_v54, %v2216_v51  ;;  %v2939_v57 = vadd.f32 %v2241_v55, %v2240_v53  ;;  %v1366_v46 = vadd.f32 %v2215_v50, %v2949_v0 }
 0x11c   : > { %v1369_v54 = vadd.f32 %v2218_v56, %v2949_v0 }
 0x11e   : > { %v2219_v58 = vpop.f32.mrb[12].mxu0 }
 0x11f   : > { %v2220_v59 = vpop.f32.mrb[13].mxu0 }
 0x120   : > { %v2941_v60 = vadd.f32 %v2220_v59, %v2219_v58  ;;  %v2222_v61 = vpop.f32.mrb[14].mxu0 }
 0x121   : > { %v2223_v62 = vpop.f32.mrb[15].mxu0 }
 0x122   : > { %v2947_v63 = vadd.f32 %v2223_v62, %v2222_v61 }
 0x126   : > { %v2259_v1 = vpop.f32.mrb[12].mxu1  ;;  %v2317_v2 = vpop.f32.mrb[16].mxu0 }
 0x127   : > { %v2260_v3 = vpop.f32.mrb[13].mxu1  ;;  %v2318_v4 = vpop.f32.mrb[17].mxu0 }
 0x128   : > { %v2261_v6 = vadd.f32 %v2260_v3, %v2259_v1  ;;  %v2319_v7 = vadd.f32 %v2318_v4, %v2317_v2  ;;  %v2262_v8 = vpop.f32.mrb[14].mxu1  ;;  %v2320_v9 = vpop.f32.mrb[18].mxu0 }
 0x129   : > { %v2263_v10 = vpop.f32.mrb[15].mxu1  ;;  %v2321_v11 = vpop.f32.mrb[19].mxu0 }
 0x12a   : > { %v1439_v13 = vadd.f32 %v2261_v6, %v1350_v5  ;;  %v2264_v14 = vadd.f32 %v2263_v10, %v2262_v8  ;;  %v2322_v15 = vadd.f32 %v2321_v11, %v2320_v9  ;;  %v1374_v5 = vadd.f32 %v2941_v60, %v2949_v0 }
 0x12b   : > { %v1377_v11 = vadd.f32 %v2947_v63, %v2949_v0 }
 0x12c   : > { %v2953_v16 = vadd.f32 %v2319_v7, %v1439_v13  ;;  %v1442_v17 = vadd.f32 %v2264_v14, %v1353_v12 }
 0x12e   : > { %v2955_v18 = vadd.f32 %v2322_v15, %v1442_v17  ;;  %v2265_v19 = vpop.f32.mrb[16].mxu1  ;;  %v2323_v20 = vpop.f32.mrb[20].mxu0 }
 0x12f   : > { %v2266_v21 = vpop.f32.mrb[17].mxu1  ;;  %v2324_v22 = vpop.f32.mrb[21].mxu0 }
 0x130   : > { %v2267_v24 = vadd.f32 %v2266_v21, %v2265_v19  ;;  %v2325_v25 = vadd.f32 %v2324_v22, %v2323_v20  ;;  %v2268_v26 = vpop.f32.mrb[18].mxu1  ;;  %v2326_v28 = vpop.f32.mrb[22].mxu0 }
 0x131   : > { %v2269_v29 = vpop.f32.mrb[19].mxu1  ;;  %v2327_v30 = vpop.f32.mrb[23].mxu0 }
 0x132   : > { %v1447_v32 = vadd.f32 %v2267_v24, %v1358_v23  ;;  %v2270_v34 = vadd.f32 %v2269_v29, %v2268_v26  ;;  %v2328_v35 = vadd.f32 %v2327_v30, %v2326_v28  ;;  %v1382_v23 = vadd.f32 %v2929_v27, %v2949_v0 }
 0x133   : > { %v1385_v30 = vadd.f32 %v2931_v33, %v2949_v0 }
 0x134   : > { %v2959_v36 = vadd.f32 %v2325_v25, %v1447_v32  ;;  %v1450_v37 = vadd.f32 %v2270_v34, %v1361_v31 }
 0x136   : > { %v2961_v39 = vadd.f32 %v2328_v35, %v1450_v37  ;;  %v2271_v41 = vpop.f32.mrb[20].mxu1  ;;  %v2329_v42 = vpop.f32.mrb[24].mxu0 }
 0x137   : > { %v2272_v43 = vpop.f32.mrb[21].mxu1  ;;  %v2330_v38 = vpop.f32.mrb[25].mxu0 }
 0x138   : > { %v2273_v47 = vadd.f32 %v2272_v43, %v2271_v41  ;;  %v2331_v48 = vadd.f32 %v2330_v38, %v2329_v42  ;;  %v2274_v49 = vpop.f32.mrb[22].mxu1  ;;  %v2332_v51 = vpop.f32.mrb[26].mxu0 }
 0x139   : > { %v2275_v53 = vpop.f32.mrb[23].mxu1  ;;  %v2333_v44 = vpop.f32.mrb[27].mxu0 }
 0x13a   : > { %v1455_v55 = vadd.f32 %v2273_v47, %v1366_v46  ;;  %v2276_v58 = vadd.f32 %v2275_v53, %v2274_v49  ;;  %v2334_v59 = vadd.f32 %v2333_v44, %v2332_v51  ;;  %v1390_v46 = vadd.f32 %v2933_v40, %v2949_v0 }
 0x13b   : > { %v1393_v44 = vadd.f32 %v2935_v45, %v2949_v0 }
 0x13c   : > { %v2965_v61 = vadd.f32 %v2331_v48, %v1455_v55  ;;  %v1458_v62 = vadd.f32 %v2276_v58, %v1369_v54 }
 0x13e   : > { %v2967_v1 = vadd.f32 %v2334_v59, %v1458_v62  ;;  %v2277_v2 = vpop.f32.mrb[24].mxu1  ;;  %v2335_v3 = vpop.f32.mrb[28].mxu0 }
 0x13f   : > { %v2278_v4 = vpop.f32.mrb[25].mxu1  ;;  %v2336_v50 = vpop.f32.mrb[29].mxu0 }
 0x140   : > { %v2279_v6 = vadd.f32 %v2278_v4, %v2277_v2  ;;  %v2337_v7 = vadd.f32 %v2336_v50, %v2335_v3  ;;  %v2280_v8 = vpop.f32.mrb[26].mxu1  ;;  %v2338_v9 = vpop.f32.mrb[30].mxu0 }
 0x141   : > { %v2281_v56 = vpop.f32.mrb[27].mxu1  ;;  %v2339_v10 = vpop.f32.mrb[31].mxu0 }
 0x142   : > { %v1463_v12 = vadd.f32 %v2279_v6, %v1374_v5  ;;  %v2282_v13 = vadd.f32 %v2281_v56, %v2280_v8  ;;  %v2340_v14 = vadd.f32 %v2339_v10, %v2338_v9  ;;  %v1398_v5 = vadd.f32 %v2937_v52, %v2949_v0 }
 0x143   : > { %v1401_v10 = vadd.f32 %v2939_v57, %v2949_v0 }
 0x144   : > { %v2973_v15 = vadd.f32 %v2337_v7, %v1463_v12  ;;  %v1466_v17 = vadd.f32 %v2282_v13, %v1377_v11 }
 0x146   : > { %v2975_v19 = vadd.f32 %v2340_v14, %v1466_v17  ;;  %v2283_v20 = vpop.f32.mrb[28].mxu1  ;;  %v2341_v21 = vpop.f32.mrb[32].mxu0 }
 0x147   : > { %v2284_v60 = vpop.f32.mrb[29].mxu1  ;;  %v2342_v22 = vpop.f32.mrb[33].mxu0 }
 0x148   : > { %v2285_v24 = vadd.f32 %v2284_v60, %v2283_v20  ;;  %v2343_v25 = vadd.f32 %v2342_v22, %v2341_v21  ;;  %v2286_v26 = vpop.f32.mrb[30].mxu1  ;;  %v2344_v28 = vpop.f32.mrb[34].mxu0 }
 0x149   : > { %v2287_v63 = vpop.f32.mrb[31].mxu1  ;;  %v2345_v29 = vpop.f32.mrb[35].mxu0 }
 0x14a   : > { %v1471_v31 = vadd.f32 %v2285_v24, %v1382_v23  ;;  %v2288_v32 = vadd.f32 %v2287_v63, %v2286_v26  ;;  %v2346_v34 = vadd.f32 %v2345_v29, %v2344_v28 }
 0x14c   : > { %v2981_v35 = vadd.f32 %v2343_v25, %v1471_v31  ;;  %v1474_v37 = vadd.f32 %v2288_v32, %v1385_v30 }
 0x14e   : > { %v2983_v41 = vadd.f32 %v2346_v34, %v1474_v37  ;;  %v2289_v42 = vpop.f32.mrb[32].mxu1  ;;  %v2347_v43 = vpop.f32.mrb[36].mxu0 }
 0x14f   : > { %v2290_v27 = vpop.f32.mrb[33].mxu1  ;;  %v2348_v38 = vpop.f32.mrb[37].mxu0 }
 0x150   : > { %v2291_v47 = vadd.f32 %v2290_v27, %v2289_v42  ;;  %v2349_v48 = vadd.f32 %v2348_v38, %v2347_v43  ;;  %v2292_v49 = vpop.f32.mrb[34].mxu1  ;;  %v2350_v51 = vpop.f32.mrb[38].mxu0 }
 0x151   : > { %v2293_v33 = vpop.f32.mrb[35].mxu1  ;;  %v2351_v53 = vpop.f32.mrb[39].mxu0 }
 0x152   : > { %v1479_v54 = vadd.f32 %v2291_v47, %v1390_v46  ;;  %v2294_v55 = vadd.f32 %v2293_v33, %v2292_v49  ;;  %v2352_v58 = vadd.f32 %v2351_v53, %v2350_v51 }
 0x154   : > { %v2989_v59 = vadd.f32 %v2349_v48, %v1479_v54  ;;  %v1482_v62 = vadd.f32 %v2294_v55, %v1393_v44 }
 0x156   : > { %v2991_v2 = vadd.f32 %v2352_v58, %v1482_v62  ;;  %v2295_v3 = vpop.f32.mrb[36].mxu1  ;;  %v2353_v4 = vpop.f32.mrb[40].mxu0 }
 0x157   : > { %v2296_v40 = vpop.f32.mrb[37].mxu1  ;;  %v2354_v50 = vpop.f32.mrb[41].mxu0 }
 0x158   : > { %v2297_v6 = vadd.f32 %v2296_v40, %v2295_v3  ;;  %v2355_v7 = vadd.f32 %v2354_v50, %v2353_v4  ;;  %v2298_v8 = vpop.f32.mrb[38].mxu1  ;;  %v2356_v9 = vpop.f32.mrb[42].mxu0 }
 0x159   : > { %v2299_v45 = vpop.f32.mrb[39].mxu1  ;;  %v2357_v56 = vpop.f32.mrb[43].mxu0 }
 0x15a   : > { %v1487_v11 = vadd.f32 %v2297_v6, %v1398_v5  ;;  %v2300_v12 = vadd.f32 %v2299_v45, %v2298_v8  ;;  %v2358_v13 = vadd.f32 %v2357_v56, %v2356_v9 }
 0x15c   : > { %v2997_v14 = vadd.f32 %v2355_v7, %v1487_v11  ;;  %v1490_v17 = vadd.f32 %v2300_v12, %v1401_v10 }
 0x15e   : > { %v2999_v20 = vadd.f32 %v2358_v13, %v1490_v17  ;;  %v2375_v21 = vpop.f32.mrb[40].mxu1  ;;  %v2433_v52 = vpop.f32.mrb[44].mxu0 }
 0x15f   : > { %v2376_v60 = vpop.f32.mrb[41].mxu1  ;;  %v2434_v22 = vpop.f32.mrb[45].mxu0 }
 0x160   : > { %v2377_v23 = vadd.f32 %v2376_v60, %v2375_v21  ;;  %v2435_v24 = vadd.f32 %v2434_v22, %v2433_v52  ;;  %v2378_v25 = vpop.f32.mrb[42].mxu1  ;;  %v2436_v26 = vpop.f32.mrb[46].mxu0 }
 0x161   : > { %v2379_v28 = vpop.f32.mrb[43].mxu1  ;;  %v2437_v63 = vpop.f32.mrb[47].mxu0 }
 0x162   : > { %v1617_v57 = vadd.f32 %v2377_v23, %v2953_v16  ;;  %v2380_v0 = vadd.f32 %v2379_v28, %v2378_v25  ;;  %v2438_v29 = vadd.f32 %v2437_v63, %v2436_v26 }
 0x164   : > { %v1706_v30 = vadd.f32 %v2435_v24, %v1617_v57  ;;  %v1620_v31 = vadd.f32 %v2380_v0, %v2955_v18 }
 0x166   : > { %v1709_v32 = vadd.f32 %v2438_v29, %v1620_v31  ;;  %v2381_v34 = vpop.f32.mrb[44].mxu1  ;;  %v2439_v37 = vpop.f32.mrb[48].mxu0  ;;  %v1760_v27 = vmax.f32 %v1706_v30, 0.0 }
 0x167   : > { %v2382_v42 = vpop.f32.mrb[45].mxu1  ;;  %v2440_v43 = vpop.f32.mrb[49].mxu0 }
 0x168   : > { %v1761_v38 = vmax.f32 %v1709_v32, 0.0  ;;  %v2383_v46 = vadd.f32 %v2382_v42, %v2381_v34  ;;  %v2441_v47 = vadd.f32 %v2440_v43, %v2439_v37  ;;  %v2384_v48 = vpop.f32.mrb[46].mxu1  ;;  %v2442_v49 = vpop.f32.mrb[50].mxu0 }
 0x169   : > { %v2385_v16 = vpop.f32.mrb[47].mxu1  ;;  %v2443_v18 = vpop.f32.mrb[51].mxu0 }
 0x16a   : > { %v2147_v51 = vpack.c.bf16 %v1761_v38, %v1760_v27  ;;  %v1625_v33 = vadd.f32 %v2383_v46, %v2959_v36  ;;  %v2386_v53 = vadd.f32 %v2385_v16, %v2384_v48  ;;  %v2444_v44 = vadd.f32 %v2443_v18, %v2442_v49 }
 0x16c   : > { %2148 = vst [vmem:[%s3007_s30] sm:$0xff] %v2147_v51   ;;  %v1714_v54 = vadd.f32 %v2441_v47, %v1625_v33  ;;  %v1628_v55 = vadd.f32 %v2386_v53, %v2961_v39 }
 0x16e   : > { %v1717_v58 = vadd.f32 %v2444_v44, %v1628_v55  ;;  %v2387_v62 = vpop.f32.mrb[48].mxu1  ;;  %v2445_v3 = vpop.f32.mrb[52].mxu0  ;;  %v1762_v50 = vmax.f32 %v1714_v54, 0.0 }
 0x16f   : > { %v2388_v4 = vpop.f32.mrb[49].mxu1  ;;  %v2446_v40 = vpop.f32.mrb[53].mxu0 }
 0x170   : > { %v1763_v5 = vmax.f32 %v1717_v58, 0.0  ;;  %v2389_v6 = vadd.f32 %v2388_v4, %v2387_v62  ;;  %v2447_v7 = vadd.f32 %v2446_v40, %v2445_v3  ;;  %v2390_v8 = vpop.f32.mrb[50].mxu1  ;;  %v2448_v9 = vpop.f32.mrb[54].mxu0 }
 0x171   : > { %v2391_v45 = vpop.f32.mrb[51].mxu1  ;;  %v2449_v36 = vpop.f32.mrb[55].mxu0 }
 0x172   : > { %v2152_v56 = vpack.c.bf16 %v1763_v5, %v1762_v50  ;;  %v1633_v10 = vadd.f32 %v2389_v6, %v2965_v61  ;;  %v2392_v11 = vadd.f32 %v2391_v45, %v2390_v8  ;;  %v2450_v12 = vadd.f32 %v2449_v36, %v2448_v9 }
 0x174   : > { %2179 = vst [vmem:[%s3007_s30 + $0x8] sm:$0xff] %v2152_v56   ;;  %v1722_v39 = vadd.f32 %v2447_v7, %v1633_v10  ;;  %v1636_v13 = vadd.f32 %v2392_v11, %v2967_v1 }
 0x176   : > { %v1725_v17 = vadd.f32 %v2450_v12, %v1636_v13  ;;  %v2393_v21 = vpop.f32.mrb[52].mxu1  ;;  %v2451_v52 = vpop.f32.mrb[56].mxu0  ;;  %v1764_v23 = vmax.f32 %v1722_v39, 0.0 }
 0x177   : > { %v2394_v60 = vpop.f32.mrb[53].mxu1  ;;  %v2452_v22 = vpop.f32.mrb[57].mxu0 }
 0x178   : > { %v1765_v24 = vmax.f32 %v1725_v17, 0.0  ;;  %v2395_v25 = vadd.f32 %v2394_v60, %v2393_v21  ;;  %v2453_v26 = vadd.f32 %v2452_v22, %v2451_v52  ;;  %v2396_v28 = vpop.f32.mrb[54].mxu1  ;;  %v2454_v63 = vpop.f32.mrb[58].mxu0 }
 0x179   : > { %v2397_v57 = vpop.f32.mrb[55].mxu1  ;;  %v2455_v61 = vpop.f32.mrb[59].mxu0 }
 0x17a   : > { %v2157_v0 = vpack.c.bf16 %v1765_v24, %v1764_v23  ;;  %v1641_v29 = vadd.f32 %v2395_v25, %v2973_v15  ;;  %v2398_v30 = vadd.f32 %v2397_v57, %v2396_v28  ;;  %v2456_v31 = vadd.f32 %v2455_v61, %v2454_v63 }
 0x17c   : > { %2180 = vst [vmem:[%s3007_s30 + $0x10] sm:$0xff] %v2157_v0   ;;  %v1730_v1 = vadd.f32 %v2453_v26, %v1641_v29  ;;  %v1644_v32 = vadd.f32 %v2398_v30, %v2975_v19 }
 0x17e   : > { %v1733_v34 = vadd.f32 %v2456_v31, %v1644_v32  ;;  %v2399_v37 = vpop.f32.mrb[56].mxu1  ;;  %v2457_v42 = vpop.f32.mrb[60].mxu0  ;;  %v1766_v38 = vmax.f32 %v1730_v1, 0.0 }
 0x17f   : > { %v2400_v43 = vpop.f32.mrb[57].mxu1  ;;  %v2458_v27 = vpop.f32.mrb[61].mxu0 }
 0x180   : > { %v1767_v46 = vmax.f32 %v1733_v34, 0.0  ;;  %v2401_v47 = vadd.f32 %v2400_v43, %v2399_v37  ;;  %v2459_v48 = vadd.f32 %v2458_v27, %v2457_v42  ;;  %v2402_v49 = vpop.f32.mrb[58].mxu1  ;;  %v2460_v16 = vpop.f32.mrb[62].mxu0 }
 0x181   : > { %v2403_v18 = vpop.f32.mrb[59].mxu1  ;;  %v2461_v15 = vpop.f32.mrb[63].mxu0 }
 0x182   : > { %v2162_v51 = vpack.c.bf16 %v1767_v46, %v1766_v38  ;;  %v1649_v33 = vadd.f32 %v2401_v47, %v2981_v35  ;;  %v2404_v53 = vadd.f32 %v2403_v18, %v2402_v49  ;;  %v2462_v44 = vadd.f32 %v2461_v15, %v2460_v16 }
 0x184   : > { %2181 = vst [vmem:[%s3007_s30 + $0x18] sm:$0xff] %v2162_v51   ;;  %v1738_v19 = vadd.f32 %v2459_v48, %v1649_v33  ;;  %v1652_v54 = vadd.f32 %v2404_v53, %v2983_v41 }
 0x186   : > { %v1741_v55 = vadd.f32 %v2462_v44, %v1652_v54  ;;  %v2405_v58 = vpop.f32.mrb[60].mxu1  ;;  %v2463_v62 = vpop.f32.mrb[64].mxu0  ;;  %v1768_v40 = vmax.f32 %v1738_v19, 0.0 }
 0x187   : > { %v2406_v3 = vpop.f32.mrb[61].mxu1  ;;  %v2464_v4 = vpop.f32.mrb[65].mxu0 }
 0x188   : > { %v1769_v50 = vmax.f32 %v1741_v55, 0.0  ;;  %v2407_v5 = vadd.f32 %v2406_v3, %v2405_v58  ;;  %v2465_v6 = vadd.f32 %v2464_v4, %v2463_v62  ;;  %v2408_v7 = vpop.f32.mrb[62].mxu1  ;;  %v2466_v8 = vpop.f32.mrb[66].mxu0 }
 0x189   : > { %v2409_v9 = vpop.f32.mrb[63].mxu1  ;;  %v2467_v35 = vpop.f32.mrb[67].mxu0 }
 0x18a   : > { %v2167_v45 = vpack.c.bf16 %v1769_v50, %v1768_v40  ;;  %v1657_v36 = vadd.f32 %v2407_v5, %v2989_v59  ;;  %v2410_v56 = vadd.f32 %v2409_v9, %v2408_v7  ;;  %v2468_v10 = vadd.f32 %v2467_v35, %v2466_v8 }
 0x18c   : > { %2182 = vst [vmem:[%s3007_s30 + $0x20] sm:$0xff] %v2167_v45   ;;  %v1746_v41 = vadd.f32 %v2465_v6, %v1657_v36  ;;  %v1660_v11 = vadd.f32 %v2410_v56, %v2991_v2 }
 0x18e   : > { %v1749_v12 = vadd.f32 %v2468_v10, %v1660_v11  ;;  %v2411_v39 = vpop.f32.mrb[64].mxu1  ;;  %v2469_v13 = vpop.f32.mrb[68].mxu0  ;;  %v1770_v52 = vmax.f32 %v1746_v41, 0.0 }
 0x18f   : > { %v2412_v17 = vpop.f32.mrb[65].mxu1  ;;  %v2470_v21 = vpop.f32.mrb[69].mxu0 }
 0x190   : > { %v1771_v60 = vmax.f32 %v1749_v12, 0.0  ;;  %v2413_v22 = vadd.f32 %v2412_v17, %v2411_v39  ;;  %v2471_v23 = vadd.f32 %v2470_v21, %v2469_v13  ;;  %v2414_v24 = vpop.f32.mrb[66].mxu1  ;;  %v2472_v25 = vpop.f32.mrb[70].mxu0 }
 0x191   : > { %v2415_v59 = vpop.f32.mrb[67].mxu1  ;;  %v2473_v26 = vpop.f32.mrb[71].mxu0 }
 0x192   : > { %v2172_v28 = vpack.c.bf16 %v1771_v60, %v1770_v52  ;;  %v1665_v63 = vadd.f32 %v2413_v22, %v2997_v14  ;;  %v2416_v57 = vadd.f32 %v2415_v59, %v2414_v24  ;;  %v2474_v2 = vadd.f32 %v2473_v26, %v2472_v25 }
 0x194   : > { %2183 = vst [vmem:[%s3007_s30 + $0x28] sm:$0xff] %v2172_v28   ;;  %v1754_v61 = vadd.f32 %v2471_v23, %v1665_v63  ;;  %v1668_v0 = vadd.f32 %v2416_v57, %v2999_v20 }
 0x196   : > { %v1757_v29 = vadd.f32 %v2474_v2, %v1668_v0  ;;  %v1772_v30 = vmax.f32 %v1754_v61, 0.0 }
 0x198   : > { %v1773_v31 = vmax.f32 %v1757_v29, 0.0 }
 0x19a   : > { %v2177_v1 = vpack.c.bf16 %v1773_v31, %v1772_v30 }
 0x19c   : > { %2184 = vst [vmem:[%s3007_s30 + $0x30] sm:$0xff] %v2177_v1  }
 0x19d PF: > { %s13_s14 = sadd.s32 1, %s2725_s14   ;;  %s3041_s12 = smov %s2721_s13 }
 0x19e   : > { %p10_p5 = scmp.ge.s32.totalorder %s13_s14, 4   ;;  %s3042_s13 = smov %s3044_s15 }
 0x1a0   :  { %12 = sbr.rel (!%p10_p5) target bundleno = 2 (0x2), region = 68 }

// kernel: alexnet_bvlc_forward.12
= control target key start
LH: loop header
LB: loop body
LE: loop exit
PB: predicated region body
PF: predicated region fallthrough
CT: control target
= control target key end

     0   :  { %s1864_s1 = inlined_call_operand.vmem [shape: bf16[256,256], index: 1, kind: input, shape index: {}]   ;;  %s1865_s0 = inlined_call_operand.vmem [shape: bf16[112,256], index: 0, kind: input, shape index: {}]   ;;  %s1866_s2 = inlined_call_operand.vmem [shape: bf16[112,256], index: 2, kind: output, shape index: {}]  }
   0x1   :  { %v976_v0 = vld [vmem:[%s1864_s1 + $0x4] ss:$8 sps:$4 sm:$0xff]   ;;  %v978_v1 = vld [vmem:[%s1864_s1] ss:$8 sps:$4 sm:$0xff]   ;;  %v979_v2 = vld [vmem:[%s1864_s1 + $0x14] ss:$8 sps:$4 sm:$0xff]  }
   0x2   :  { %301 = vmatprep.subr.bf16.mxu0 %v976_v0  ;;  %944 = vmatprep.subr.bf16.mxu1 %v976_v0  ;;  %v981_v3 = vld [vmem:[%s1864_s1 + $0x10] ss:$8 sps:$4 sm:$0xff]   ;;  %v982_v4 = vld [vmem:[%s1864_s1 + $0x24] ss:$8 sps:$4 sm:$0xff]   ;;  %v984_v5 = vld [vmem:[%s1864_s1 + $0x20] ss:$8 sps:$4 sm:$0xff]  }
   0x3   :  { %302 = vmatpush1.bf16.msra.mxu0 %v978_v1  ;;  %960 = vmatpush1.bf16.msra.mxu1 %v978_v1  ;;  %v985_v6 = vld [vmem:[%s1864_s1 + $0x34] ss:$8 sps:$4 sm:$0xff]   ;;  %v987_v7 = vld [vmem:[%s1864_s1 + $0x30] ss:$8 sps:$4 sm:$0xff]   ;;  %v988_v8 = vld [vmem:[%s1864_s1 + $0x44] ss:$8 sps:$4 sm:$0xff]  }
   0x4   :  { %303 = vmatprep.subr.bf16.mxu0 %v979_v2  ;;  %945 = vmatprep.subr.bf16.mxu1 %v979_v2  ;;  %v990_v9 = vld [vmem:[%s1864_s1 + $0x40] ss:$8 sps:$4 sm:$0xff]   ;;  %v991_v10 = vld [vmem:[%s1864_s1 + $0x54] ss:$8 sps:$4 sm:$0xff]   ;;  %v993_v11 = vld [vmem:[%s1864_s1 + $0x50] ss:$8 sps:$4 sm:$0xff]  }
   0x5   :  { %v994_v12 = vld [vmem:[%s1864_s1 + $0x64] ss:$8 sps:$4 sm:$0xff]   ;;  %v996_v19 = vld [vmem:[%s1864_s1 + $0x60] ss:$8 sps:$4 sm:$0xff]   ;;  %v997_v22 = vld [vmem:[%s1864_s1 + $0x74] ss:$8 sps:$4 sm:$0xff]  }
   0x6   :  { %v1193_v13 = vld [vmem:[%s1865_s0] sm:$0xff]  ;;  %v1198_v14 = vld [vmem:[%s1865_s0 + $0x8] sm:$0xff]  ;;  %v999_v25 = vld [vmem:[%s1864_s1 + $0x70] ss:$8 sps:$4 sm:$0xff]  }
   0x7   :  { %304 = vmatpush1.bf16.msra.mxu0 %v981_v3  ;;  %961 = vmatpush1.bf16.msra.mxu1 %v981_v3  ;;  %v1202_v15 = vmul.bf16 %v1193_v13, %v1193_v13  ;;  %v1206_v16 = vmul.bf16 %v1198_v14, %v1198_v14  ;;  %v1211_v17 = vld [vmem:[%s1865_s0 + $0x40] sm:$0xff]  ;;  %v1216_v18 = vld [vmem:[%s1865_s0 + $0x48] sm:$0xff]  ;;  %v1003_v28 = vld [vmem:[%s1864_s1 + $0x94] ss:$8 sps:$4 sm:$0xff]  }
   0x8   :  { %305 = vmatprep.subr.bf16.mxu0 %v982_v4  ;;  %946 = vmatprep.subr.bf16.mxu1 %v982_v4  ;;  %v1223_v20 = vmul.bf16 %v1211_v17, %v1211_v17  ;;  %v1227_v21 = vmul.bf16 %v1216_v18, %v1216_v18  ;;  %v1000_v26 = vld [vmem:[%s1864_s1 + $0x84] ss:$8 sps:$4 sm:$0xff]   ;;  %v1002_v27 = vld [vmem:[%s1864_s1 + $0x80] ss:$8 sps:$4 sm:$0xff]   ;;  %v1005_v29 = vld [vmem:[%s1864_s1 + $0x90] ss:$8 sps:$4 sm:$0xff]  }
   0x9   :  { %v871_v23 = vcombine.high %v1202_v15, %v1206_v16  ;;  %v1006_v30 = vld [vmem:[%s1864_s1 + $0xa4] ss:$8 sps:$4 sm:$0xff]   ;;  %v1008_v31 = vld [vmem:[%s1864_s1 + $0xa0] ss:$8 sps:$4 sm:$0xff]   ;;  %v1009_v32 = vld [vmem:[%s1864_s1 + $0xb4] ss:$8 sps:$4 sm:$0xff]   ;;  %v870_v50 = vcombine.low %v1202_v15, %v1206_v16 }
   0xa   :  { %v879_v24 = vcombine.high %v1223_v20, %v1227_v21  ;;  %v1011_v33 = vld [vmem:[%s1864_s1 + $0xb0] ss:$8 sps:$4 sm:$0xff]   ;;  %v1012_v34 = vld [vmem:[%s1864_s1 + $0xc4] ss:$8 sps:$4 sm:$0xff]   ;;  %v1014_v35 = vld [vmem:[%s1864_s1 + $0xc0] ss:$8 sps:$4 sm:$0xff]   ;;  %v878_v51 = vcombine.low %v1223_v20, %v1227_v21 }
   0xb   :  { %306 = vmatpush1.bf16.msra.mxu0 %v984_v5  ;;  %962 = vmatpush1.bf16.msra.mxu1 %v984_v5  ;;  %v1015_v36 = vld [vmem:[%s1864_s1 + $0xd4] ss:$8 sps:$4 sm:$0xff]   ;;  %v1017_v37 = vld [vmem:[%s1864_s1 + $0xd0] ss:$8 sps:$4 sm:$0xff]   ;;  %v1018_v38 = vld [vmem:[%s1864_s1 + $0xe4] ss:$8 sps:$4 sm:$0xff]  }
   0xc   :  { %307 = vmatprep.subr.bf16.mxu0 %v985_v6  ;;  %947 = vmatprep.subr.bf16.mxu1 %v985_v6  ;;  %v1020_v39 = vld [vmem:[%s1864_s1 + $0xe0] ss:$8 sps:$4 sm:$0xff]   ;;  %v1021_v40 = vld [vmem:[%s1864_s1 + $0xf4] ss:$8 sps:$4 sm:$0xff]   ;;  %v1023_v46 = vld [vmem:[%s1864_s1 + $0xf0] ss:$8 sps:$4 sm:$0xff]  }
   0xd   :  { %333 = vmatprep.mubr.bf16.mxu0 %v871_v23  ;;  %373 = vmatprep.mubr.bf16.mxu1 %v879_v24  ;;  %v1287_v41 = vld [vmem:[%s1865_s0 + $0x10] sm:$0xff]  ;;  %v1292_v42 = vld [vmem:[%s1865_s0 + $0x18] sm:$0xff]  ;;  %v1322_v54 = vld [vmem:[%s1865_s0 + $0x20] sm:$0xff] }
   0xe   :  { %v1297_v43 = vld [vmem:[%s1865_s0 + $0x50] sm:$0xff]  ;;  %v1302_v44 = vld [vmem:[%s1865_s0 + $0x58] sm:$0xff]  ;;  %v27_v45 = vmul.bf16 %v1287_v41, %v1287_v41  ;;  %v28_v47 = vmul.bf16 %v1292_v42, %v1292_v42  ;;  %v1327_v55 = vld [vmem:[%s1865_s0 + $0x28] sm:$0xff]  ;;  %v29_v58 = vmul.bf16 %v1322_v54, %v1322_v54 }
   0xf   :  { %308 = vmatpush1.bf16.msra.mxu0 %v987_v7  ;;  %963 = vmatpush1.bf16.msra.mxu1 %v987_v7  ;;  %v35_v48 = vmul.bf16 %v1297_v43, %v1297_v43  ;;  %v36_v49 = vmul.bf16 %v1302_v44, %v1302_v44  ;;  %v1332_v56 = vld [vmem:[%s1865_s0 + $0x60] sm:$0xff]  ;;  %v1337_v57 = vld [vmem:[%s1865_s0 + $0x68] sm:$0xff]  ;;  %v30_v59 = vmul.bf16 %v1327_v55, %v1327_v55  ;;  %v1350_v2 = vld [vmem:[%s1865_s0 + $0x30] sm:$0xff] }
  0x10   :  { %309 = vmatprep.subr.bf16.mxu0 %v988_v8  ;;  %948 = vmatprep.subr.bf16.mxu1 %v988_v8  ;;  %v873_v52 = vcombine.high %v27_v45, %v28_v47  ;;  %v37_v60 = vmul.bf16 %v1332_v56, %v1332_v56  ;;  %v38_v61 = vmul.bf16 %v1337_v57, %v1337_v57  ;;  %v1355_v3 = vld [vmem:[%s1865_s0 + $0x38] sm:$0xff] }
  0x11   :  { %v881_v53 = vcombine.high %v35_v48, %v36_v49  ;;  %v872_v62 = vcombine.low %v27_v45, %v28_v47  ;;  %v880_v63 = vcombine.low %v35_v48, %v36_v49  ;;  %v875_v0 = vcombine.high %v29_v58, %v30_v59 }
  0x12   :  { %v883_v1 = vcombine.high %v37_v60, %v38_v61  ;;  %v31_v4 = vmul.bf16 %v1350_v2, %v1350_v2  ;;  %v32_v5 = vmul.bf16 %v1355_v3, %v1355_v3  ;;  %v874_v6 = vcombine.low %v29_v58, %v30_v59 }
  0x13   :  { %310 = vmatpush1.bf16.msra.mxu0 %v990_v9  ;;  %964 = vmatpush1.bf16.msra.mxu1 %v990_v9  ;;  %v882_v7 = vcombine.low %v37_v60, %v38_v61  ;;  %v488_v59 = vunpack.c.l.bf16 %v1193_v13  ;;  %v489_v61 = vunpack.c.h.bf16 %v1193_v13 }
  0x14   :  { %311 = vmatprep.subr.bf16.mxu0 %v991_v10  ;;  %949 = vmatprep.subr.bf16.mxu1 %v991_v10  ;;  %v877_v8 = vcombine.high %v31_v4, %v32_v5  ;;  %v876_v9 = vcombine.low %v31_v4, %v32_v5  ;;  %v506_v4 = vunpack.c.l.bf16 %v1216_v18 }
  0x17   :  { %312 = vmatpush1.bf16.msra.mxu0 %v993_v11  ;;  %965 = vmatpush1.bf16.msra.mxu1 %v993_v11 }
  0x18   :  { %313 = vmatprep.subr.bf16.mxu0 %v994_v12  ;;  %950 = vmatprep.subr.bf16.mxu1 %v994_v12 }
  0x1b   :  { %314 = vmatpush1.bf16.msra.mxu0 %v996_v19  ;;  %966 = vmatpush1.bf16.msra.mxu1 %v996_v19 }
  0x1c   :  { %315 = vmatprep.subr.bf16.mxu0 %v997_v22  ;;  %951 = vmatprep.subr.bf16.mxu1 %v997_v22 }
  0x1f   :  { %316 = vmatpush1.bf16.msra.mxu0 %v999_v25  ;;  %967 = vmatpush1.bf16.msra.mxu1 %v999_v25 }
  0x20   :  { %317 = vmatprep.subr.bf16.mxu0 %v1000_v26  ;;  %952 = vmatprep.subr.bf16.mxu1 %v1000_v26 }
  0x23   :  { %318 = vmatpush1.bf16.msra.mxu0 %v1002_v27  ;;  %968 = vmatpush1.bf16.msra.mxu1 %v1002_v27 }
  0x24   :  { %319 = vmatprep.subr.bf16.mxu0 %v1003_v28  ;;  %953 = vmatprep.subr.bf16.mxu1 %v1003_v28 }
  0x27   :  { %320 = vmatpush1.bf16.msra.mxu0 %v1005_v29  ;;  %969 = vmatpush1.bf16.msra.mxu1 %v1005_v29 }
  0x28   :  { %321 = vmatprep.subr.bf16.mxu0 %v1006_v30  ;;  %954 = vmatprep.subr.bf16.mxu1 %v1006_v30 }
  0x2b   :  { %322 = vmatpush1.bf16.msra.mxu0 %v1008_v31  ;;  %970 = vmatpush1.bf16.msra.mxu1 %v1008_v31 }
  0x2c   :  { %323 = vmatprep.subr.bf16.mxu0 %v1009_v32  ;;  %955 = vmatprep.subr.bf16.mxu1 %v1009_v32 }
  0x2f   :  { %324 = vmatpush1.bf16.msra.mxu0 %v1011_v33  ;;  %971 = vmatpush1.bf16.msra.mxu1 %v1011_v33 }
  0x30   :  { %325 = vmatprep.subr.bf16.mxu0 %v1012_v34  ;;  %956 = vmatprep.subr.bf16.mxu1 %v1012_v34 }
  0x33   :  { %326 = vmatpush1.bf16.msra.mxu0 %v1014_v35  ;;  %972 = vmatpush1.bf16.msra.mxu1 %v1014_v35 }
  0x34   :  { %327 = vmatprep.subr.bf16.mxu0 %v1015_v36  ;;  %957 = vmatprep.subr.bf16.mxu1 %v1015_v36 }
  0x37   :  { %328 = vmatpush1.bf16.msra.mxu0 %v1017_v37  ;;  %973 = vmatpush1.bf16.msra.mxu1 %v1017_v37 }
  0x38   :  { %329 = vmatprep.subr.bf16.mxu0 %v1018_v38  ;;  %958 = vmatprep.subr.bf16.mxu1 %v1018_v38 }
  0x3b   :  { %330 = vmatpush1.bf16.msra.mxu0 %v1020_v39  ;;  %974 = vmatpush1.bf16.msra.mxu1 %v1020_v39 }
  0x3c   :  { %331 = vmatprep.subr.bf16.mxu0 %v1021_v40  ;;  %959 = vmatprep.subr.bf16.mxu1 %v1021_v40 }
  0x3f   :  { %332 = vmatpush1.bf16.msra.mxu0 %v1023_v46  ;;  %975 = vmatpush1.bf16.msra.mxu1 %v1023_v46 }
  0x42   :  { %334 = vmatmul.mubr.bf16.vlgmr.msra.gmra.mrb[0].mxu0 %v870_v50  ;;  %374 = vmatmul.mubr.bf16.vlgmr.msra.gmra.mrb[0].mxu1 %v878_v51 }
  0x43   :  { %343 = vmatprep.mubr.bf16.mxu0 %v873_v52  ;;  %383 = vmatprep.mubr.bf16.mxu1 %v881_v53 }
  0x4a   :  { %344 = vmatmul.mubr.bf16.gmra.mrb[4].mxu0 %v872_v62  ;;  %384 = vmatmul.mubr.bf16.gmra.mrb[4].mxu1 %v880_v63  ;;  %v490_v62 = vunpack.c.l.bf16 %v1198_v14 }
  0x4b   :  { %353 = vmatprep.mubr.bf16.mxu0 %v875_v0  ;;  %393 = vmatprep.mubr.bf16.mxu1 %v883_v1  ;;  %v504_v0 = vunpack.c.l.bf16 %v1211_v17  ;;  %v505_v1 = vunpack.c.h.bf16 %v1211_v17 }
  0x52   :  { %354 = vmatmul.mubr.bf16.gmra.mrb[8].mxu0 %v874_v6  ;;  %394 = vmatmul.mubr.bf16.gmra.mrb[8].mxu1 %v882_v7 }
  0x53   :  { %363 = vmatprep.mubr.bf16.mxu0 %v877_v8 }
  0x5a   :  { %364 = vmatmul.mubr.bf16.gmra.mrb[12].mxu0 %v876_v9 }
 0x115   :  { %v335_v10 = vpop.f32.mrb[0].mxu0  ;;  %v375_v11 = vpop.f32.mrb[0].mxu1 }
 0x116   :  { %v404_v12 = vmul.f32 2e-05, %v335_v10  ;;  %v420_v15 = vmul.f32 2e-05, %v375_v11  ;;  %v337_v16 = vpop.f32.mrb[1].mxu0  ;;  %v377_v19 = vpop.f32.mrb[1].mxu1 }
 0x117   :  { %v405_v20 = vmul.f32 2e-05, %v337_v16  ;;  %v421_v21 = vmul.f32 2e-05, %v377_v19  ;;  %v339_v22 = vpop.f32.mrb[2].mxu0  ;;  %v379_v23 = vpop.f32.mrb[2].mxu1 }
 0x118   :  { %v432_v24 = vadd.f32 1.0, %v404_v12  ;;  %v448_v25 = vadd.f32 1.0, %v420_v15  ;;  %v406_v26 = vmul.f32 2e-05, %v339_v22  ;;  %v422_v27 = vmul.f32 2e-05, %v379_v23 }
 0x119   :  { %v433_v28 = vadd.f32 1.0, %v405_v20  ;;  %v449_v29 = vadd.f32 1.0, %v421_v21  ;;  %v341_v30 = vpop.f32.mrb[3].mxu0  ;;  %v381_v31 = vpop.f32.mrb[3].mxu1 }
 0x11a   :  { %1024 = vrsqrt.f32 %v432_v24  ;;  %v434_v32 = vadd.f32 1.0, %v406_v26  ;;  %v407_v33 = vmul.f32 2e-05, %v341_v30  ;;  %v450_v34 = vadd.f32 1.0, %v422_v27 }
 0x11b   :  { %1026 = vrsqrt.f32 %v448_v25  ;;  %v423_v35 = vmul.f32 2e-05, %v381_v31 }
 0x11c   :  { %1028 = vrsqrt.f32 %v433_v28  ;;  %v435_v36 = vadd.f32 1.0, %v407_v33 }
 0x11d   :  { %1030 = vrsqrt.f32 %v449_v29  ;;  %v451_v37 = vadd.f32 1.0, %v423_v35  ;;  %v345_v38 = vpop.f32.mrb[4].mxu0  ;;  %v385_v39 = vpop.f32.mrb[4].mxu1 }
 0x11e   :  { %1032 = vrsqrt.f32 %v434_v32  ;;  %v408_v40 = vmul.f32 2e-05, %v345_v38  ;;  %v424_v45 = vmul.f32 2e-05, %v385_v39  ;;  %v347_v46 = vpop.f32.mrb[5].mxu0  ;;  %v387_v47 = vpop.f32.mrb[5].mxu1 }
 0x11f   :  { %1034 = vrsqrt.f32 %v450_v34  ;;  %v409_v48 = vmul.f32 2e-05, %v347_v46  ;;  %v349_v49 = vpop.f32.mrb[6].mxu0  ;;  %v389_v50 = vpop.f32.mrb[6].mxu1  ;;  %v425_v6 = vmul.f32 2e-05, %v387_v47 }
 0x120   :  { %1036 = vrsqrt.f32 %v435_v36  ;;  %v436_v51 = vadd.f32 1.0, %v408_v40  ;;  %v452_v52 = vadd.f32 1.0, %v424_v45  ;;  %v351_v53 = vpop.f32.mrb[7].mxu0  ;;  %v391_v58 = vpop.f32.mrb[7].mxu1  ;;  %v410_v7 = vmul.f32 2e-05, %v349_v49 }
 0x121   :  { %1038 = vrsqrt.f32 %v451_v37  ;;  %v437_v60 = vadd.f32 1.0, %v409_v48  ;;  %v426_v8 = vmul.f32 2e-05, %v389_v50  ;;  %v411_v11 = vmul.f32 2e-05, %v351_v53 }
 0x122   :  { %1040 = vrsqrt.f32 %v436_v51  ;;  %v427_v12 = vmul.f32 2e-05, %v391_v58  ;;  %v453_v32 = vadd.f32 1.0, %v425_v6  ;;  %v438_v33 = vadd.f32 1.0, %v410_v7 }
 0x123   :  { %1042 = vrsqrt.f32 %v452_v52  ;;  %v454_v34 = vadd.f32 1.0, %v426_v8  ;;  %v439_v38 = vadd.f32 1.0, %v411_v11 }
 0x124   :  { %v1368_v5 = vpop.eup %1024  ;;  %1044 = vrsqrt.f32 %v437_v60  ;;  %v1409_v39 = vadd.f32 1.0, %v427_v12 }
 0x125   :  { %v1370_v9 = vpop.eup %1026  ;;  %1046 = vrsqrt.f32 %v1368_v5  ;;  %v1374_v15 = vpop.f32.mrb[8].mxu0  ;;  %vm518_vm0 = vcmp.eq.f32.partialorder %v1368_v5, inf  ;;  %vm520_vm1 = vcmp.eq.f32.partialorder %v1368_v5, 0.0  ;;  %v521_v45 = vand.u32 2147483648, %v1368_v5 }
 0x126   :  { %v1376_v16 = vpop.f32.mrb[8].mxu1  ;;  %v1378_v19 = vpop.eup %1028  ;;  %1048 = vrsqrt.f32 %v1370_v9  ;;  %vm630_vm2 = vcmp.eq.f32.partialorder %v1370_v9, inf  ;;  %vm632_vm3 = vcmp.eq.f32.partialorder %v1370_v9, 0.0  ;;  %v633_v47 = vand.u32 2147483648, %v1370_v9 }
 0x127   :  { %v1384_v23 = vpop.f32.mrb[9].mxu0  ;;  %v1386_v24 = vpop.f32.mrb[9].mxu1  ;;  %1050 = vrsqrt.f32 %v1378_v19  ;;  %vm525_vm4 = vcmp.eq.f32.partialorder %v1378_v19, inf  ;;  %vm527_vm5 = vcmp.eq.f32.partialorder %v1378_v19, 0.0  ;;  %v528_v49 = vand.u32 2147483648, %v1378_v19 }
 0x128   :  { %v1388_v25 = vpop.eup %1030  ;;  %v1394_v29 = vpop.f32.mrb[10].mxu0 }
 0x129   :  { %v1396_v30 = vpop.f32.mrb[10].mxu1  ;;  %v1398_v31 = vpop.eup %1032  ;;  %1052 = vrsqrt.f32 %v1388_v25  ;;  %vm637_vm6 = vcmp.eq.f32.partialorder %v1388_v25, inf  ;;  %vm639_vm7 = vcmp.eq.f32.partialorder %v1388_v25, 0.0  ;;  %v640_v51 = vand.u32 2147483648, %v1388_v25 }
 0x12a   :  { %v1401_v35 = vpop.f32.mrb[11].mxu0  ;;  %v1403_v36 = vpop.f32.mrb[11].mxu1  ;;  %1054 = vrsqrt.f32 %v1398_v31  ;;  %vm532_vm8 = vcmp.eq.f32.partialorder %v1398_v31, inf  ;;  %vm534_vm9 = vcmp.eq.f32.partialorder %v1398_v31, 0.0  ;;  %v535_v58 = vand.u32 2147483648, %v1398_v31 }
 0x12b   :  { %v1405_v37 = vpop.eup %1034 }
 0x12c   :  { %v1411_v40 = vpop.eup %1036  ;;  %1056 = vrsqrt.f32 %v1405_v37  ;;  %vm644_vm10 = vcmp.eq.f32.partialorder %v1405_v37, inf  ;;  %vm646_vm11 = vcmp.eq.f32.partialorder %v1405_v37, 0.0  ;;  %v647_v7 = vand.u32 2147483648, %v1405_v37 }
 0x12d   :  { %v1417_v46 = vpop.eup %1038  ;;  %1058 = vrsqrt.f32 %v1411_v40  ;;  %v1435_v52 = vpop.f32.mrb[12].mxu0  ;;  %vm539_vm12 = vcmp.eq.f32.partialorder %v1411_v40, inf  ;;  %vm541_vm13 = vcmp.eq.f32.partialorder %v1411_v40, 0.0 }
 0x12e   :  { %v1423_v48 = vpop.eup %1040  ;;  %1060 = vrsqrt.f32 %v1417_v46  ;;  %v1443_v60 = vpop.f32.mrb[13].mxu0  ;;  %v654_v22 = vand.u32 2147483648, %v1417_v46  ;;  %vm653_vm15 = vcmp.eq.f32.partialorder %v1417_v46, 0.0 }
 0x12f   :  { %v1429_v50 = vpop.eup %1042  ;;  %1062 = vrsqrt.f32 %v1423_v48  ;;  %v1449_v11 = vpop.f32.mrb[14].mxu0 }
 0x130   :  { %v1437_v53 = vpop.eup %1044  ;;  %1064 = vrsqrt.f32 %v1429_v50  ;;  %v1454_v21 = vpop.f32.mrb[15].mxu0  ;;  %v661_v10 = vand.u32 2147483648, %v1429_v50  ;;  %vm658_vm14 = vcmp.eq.f32.partialorder %v1429_v50, inf }
 0x131   :  { %v1047_v6 = vpop.eup %1046  ;;  %1066 = vrsqrt.f32 %v1437_v53 }
 0x132   :  { %v1049_v12 = vpop.eup %1048  ;;  %v517_v26 = vmul.f32 %v1047_v6, %v1368_v5  ;;  %1068 = vrsqrt.f32 %v453_v32  ;;  %v1467_v32 = vmul.f32 2e-05, %v1374_v15 }
 0x133   :  { %v1051_v27 = vpop.eup %1050  ;;  %v629_v20 = vmul.f32 %v1049_v12, %v1370_v9  ;;  %1070 = vrsqrt.f32 %v438_v33 }
 0x134   :  { %v1053_v8 = vpop.eup %1052  ;;  %v519_v6 = vsel %vm518_vm0, %v1368_v5, %v517_v26  ;;  %v524_v28 = vmul.f32 %v1051_v27, %v1378_v19  ;;  %1072 = vrsqrt.f32 %v454_v34  ;;  %vm546_vm0 = vcmp.eq.f32.partialorder %v1423_v48, inf }
 0x135   :  { %v1055_v12 = vpop.eup %1054  ;;  %v522_v63 = vsel %vm520_vm1, %v521_v45, %v519_v6  ;;  %v631_v33 = vsel %vm630_vm2, %v1370_v9, %v629_v20  ;;  %v636_v26 = vmul.f32 %v1053_v8, %v1388_v25  ;;  %1074 = vrsqrt.f32 %v439_v38 }
 0x136   :  { %v1057_v27 = vpop.eup %1056  ;;  %v712_v15 = vmul.f32 %v1368_v5, %v522_v63  ;;  %v634_v34 = vsel %vm632_vm3, %v633_v47, %v631_v33  ;;  %v526_v45 = vsel %vm525_vm4, %v1378_v19, %v524_v28  ;;  %v531_v20 = vmul.f32 %v1055_v12, %v1398_v31 }
 0x137   :  { %vm548_vm1 = vcmp.eq.f32.partialorder %v1423_v48, 0.0  ;;  %vm660_vm2 = vcmp.eq.f32.partialorder %v1429_v50, 0.0  ;;  %v1059_v8 = vpop.eup %1058  ;;  %v728_v6 = vmul.f32 %v1370_v9, %v634_v34  ;;  %v529_v38 = vsel %vm527_vm5, %v528_v49, %v526_v45 }
 0x138   :  { %v638_v63 = vsel %vm637_vm6, %v1388_v25, %v636_v26  ;;  %v643_v5 = vmul.f32 %v1057_v27, %v1405_v37  ;;  %v1061_v47 = vpop.eup %1060  ;;  %v740_v28 = vmul.f32 %v712_v15, %v488_v59  ;;  %v713_v12 = vmul.f32 %v1378_v19, %v529_v38 }
 0x139   :  { %v641_v33 = vsel %vm639_vm7, %v640_v51, %v638_v63  ;;  %v533_v9 = vsel %vm532_vm8, %v1398_v31, %v531_v20  ;;  %vm553_vm3 = vcmp.eq.f32.partialorder %v1437_v53, inf  ;;  %v1063_v49 = vpop.eup %1062  ;;  %v756_v26 = vmul.f32 %v728_v6, %v504_v0 }
 0x13a   :  { %v729_v27 = vmul.f32 %v1388_v25, %v641_v33  ;;  %v536_v59 = vsel %vm534_vm9, %v535_v58, %v533_v9  ;;  %v645_v19 = vsel %vm644_vm10, %v1405_v37, %v643_v5  ;;  %v1065_v51 = vpop.eup %1064  ;;  %v741_v15 = vmul.f32 %v713_v12, %v489_v61 }
 0x13b   :  { %v714_v34 = vmul.f32 %v1398_v31, %v536_v59  ;;  %v648_v45 = vsel %vm646_vm11, %v647_v7, %v645_v19  ;;  %v538_v0 = vmul.f32 %v1059_v8, %v1411_v40  ;;  %v1067_v20 = vpop.eup %1066  ;;  %v650_v6 = vmul.f32 %v1061_v47, %v1417_v46 }
 0x13c   :  { %v757_v25 = vmul.f32 %v729_v27, %v505_v1  ;;  %v730_v58 = vmul.f32 %v1405_v37, %v648_v45  ;;  %v545_v38 = vmul.f32 %v1063_v49, %v1423_v48  ;;  %v1522_v63 = vpop.eup %1068  ;;  %v930_v13 = vpack.c.bf16 %v741_v15, %v740_v28 }
 0x13d   :  { %v742_v61 = vmul.f32 %v714_v34, %v490_v62  ;;  %v540_v31 = vsel %vm539_vm12, %v1411_v40, %v538_v0  ;;  %v657_v7 = vmul.f32 %v1065_v51, %v1429_v50  ;;  %v1530_v17 = vpop.eup %1070  ;;  %v1867_v8 = vand.u32 2147483648, %v1411_v40 }
 0x13e   :  { %v938_v1 = vpack.c.bf16 %v757_v25, %v756_v26  ;;  %v758_v37 = vmul.f32 %v730_v58, %v506_v4  ;;  %vm1868_vm4 = vcmp.eq.f32.partialorder %v1417_v46, inf  ;;  %v1541_v47 = vpop.eup %1072  ;;  %852 = vst [vmem:[%s1866_s2] sm:$0xff] %v930_v13  ;;  %v547_v12 = vsel %vm546_vm0, %v1423_v48, %v545_v38 }
 0x13f   :  { %v543_v5 = vsel %vm541_vm13, %v1867_v8, %v540_v31  ;;  %v652_v62 = vsel %vm1868_vm4, %v1417_v46, %v650_v6  ;;  %v659_v33 = vsel %vm658_vm14, %v1429_v50, %v657_v7  ;;  %v1557_v9 = vpop.eup %1074  ;;  %v1869_v49 = vand.u32 2147483648, %v1423_v48 }
 0x140   :  { %v715_v28 = vmul.f32 %v1411_v40, %v543_v5  ;;  %v655_v4 = vsel %vm653_vm15, %v654_v22, %v652_v62  ;;  %860 = vst [vmem:[%s1866_s2 + $0x40] sm:$0xff] %v938_v1  ;;  %v662_v26 = vsel %vm660_vm2, %v661_v10, %v659_v33  ;;  %v552_v27 = vmul.f32 %v1067_v20, %v1437_v53 }
 0x141   :  { %v731_v40 = vmul.f32 %v1417_v46, %v655_v4  ;;  %v550_v22 = vsel %vm548_vm1, %v1869_v49, %v547_v12  ;;  %v1870_v59 = vunpack.c.h.bf16 %v1198_v14  ;;  %v732_v15 = vmul.f32 %v1429_v50, %v662_v26 }
 0x142   :  { %v716_v51 = vmul.f32 %v1423_v48, %v550_v22  ;;  %1076 = vrsqrt.f32 %v1522_v63  ;;  %v1871_v46 = vunpack.c.h.bf16 %v1216_v18  ;;  %v554_v45 = vsel %vm553_vm3, %v1437_v53, %v552_v27 }
 0x143   :  { %v743_v19 = vmul.f32 %v715_v28, %v1870_v59  ;;  %vm555_vm5 = vcmp.eq.f32.partialorder %v1437_v53, 0.0  ;;  %v428_v10 = vmul.f32 2e-05, %v1376_v16  ;;  %v1872_v14 = vunpack.c.l.bf16 %v1287_v41 }
 0x144   :  { %v759_v34 = vmul.f32 %v731_v40, %v1871_v46  ;;  %v1873_v48 = vunpack.c.l.bf16 %v1297_v43  ;;  %v1874_v25 = vand.u32 2147483648, %v1437_v53  ;;  %1078 = vrsqrt.f32 %v1530_v17 }
 0x145   :  { %v931_v0 = vpack.c.bf16 %v743_v19, %v742_v61  ;;  %v744_v20 = vmul.f32 %v716_v51, %v1872_v14  ;;  %v413_v38 = vmul.f32 2e-05, %v1384_v23  ;;  %v510_v16 = vunpack.c.l.bf16 %v1302_v44 }
 0x146   :  { %v1588_v50 = vmul.f32 %v732_v15, %v1873_v48  ;;  %v557_v18 = vsel %vm555_vm5, %v1874_v25, %v554_v45  ;;  %v939_v58 = vpack.c.bf16 %v759_v34, %v758_v37  ;;  %1080 = vrsqrt.f32 %v1541_v47 }
 0x147   :  { %v717_v6 = vmul.f32 %v1437_v53, %v557_v18  ;;  %853 = vst [vmem:[%s1866_s2 + $0x8] sm:$0xff] %v931_v0  ;;  %v440_v13 = vadd.f32 1.0, %v1467_v32  ;;  %v429_v61 = vmul.f32 2e-05, %v1386_v24  ;;  %v511_v31 = vunpack.c.h.bf16 %v1302_v44 }
 0x148   :  { %v496_v53 = vunpack.c.l.bf16 %v1322_v54  ;;  %v497_v7 = vunpack.c.h.bf16 %v1322_v54  ;;  %861 = vst [vmem:[%s1866_s2 + $0x48] sm:$0xff] %v939_v58  ;;  %v1875_v23 = vunpack.c.h.bf16 %v1287_v41  ;;  %vm665_vm6 = vcmp.eq.f32.partialorder %v1522_v63, inf }
 0x149   :  { %vm667_vm7 = vcmp.eq.f32.partialorder %v1522_v63, 0.0  ;;  %v668_v32 = vand.u32 2147483648, %v1522_v63  ;;  %1082 = vrsqrt.f32 %v1557_v9  ;;  %v456_v37 = vadd.f32 1.0, %v428_v10 }
 0x14a   :  { %v745_v1 = vmul.f32 %v717_v6, %v1875_v23  ;;  %1084 = vrsqrt.f32 %v1409_v39  ;;  %v441_v8 = vadd.f32 1.0, %v413_v38  ;;  %v457_v5 = vadd.f32 1.0, %v429_v61 }
 0x14b   :  { %1086 = vrsqrt.f32 %v440_v13  ;;  %v414_v62 = vmul.f32 2e-05, %v1394_v29  ;;  %v430_v41 = vmul.f32 2e-05, %v1396_v30  ;;  %v415_v28 = vmul.f32 2e-05, %v1401_v35 }
 0x14c   :  { %v932_v24 = vpack.c.bf16 %v745_v1, %v744_v20  ;;  %1088 = vrsqrt.f32 %v456_v37  ;;  %v431_v4 = vmul.f32 2e-05, %v1403_v36  ;;  %v416_v12 = vmul.f32 2e-05, %v1435_v52  ;;  %v1077_v39 = vpop.eup %1076 }
 0x14d   :  { %vm560_vm8 = vcmp.eq.f32.partialorder %v1530_v17, inf  ;;  %1090 = vrsqrt.f32 %v441_v8  ;;  %v442_v33 = vadd.f32 1.0, %v414_v62  ;;  %v458_v40 = vadd.f32 1.0, %v430_v41 }
 0x14e   :  { %854 = vst [vmem:[%s1866_s2 + $0x10] sm:$0xff] %v932_v24  ;;  %v664_v29 = vmul.f32 %v1077_v39, %v1522_v63  ;;  %1092 = vrsqrt.f32 %v457_v5  ;;  %v443_v30 = vadd.f32 1.0, %v415_v28  ;;  %v459_v49 = vadd.f32 1.0, %v431_v4  ;;  %v1079_v36 = vpop.eup %1078 }
 0x14f   :  { %vm562_vm9 = vcmp.eq.f32.partialorder %v1530_v17, 0.0  ;;  %v563_v22 = vand.u32 2147483648, %v1530_v17  ;;  %1094 = vrsqrt.f32 %v442_v33  ;;  %v444_v35 = vadd.f32 1.0, %v416_v12 }
 0x150   :  { %v666_v52 = vsel %vm665_vm6, %v1522_v63, %v664_v29  ;;  %vm672_vm10 = vcmp.eq.f32.partialorder %v1541_v47, inf  ;;  %vm674_vm11 = vcmp.eq.f32.partialorder %v1541_v47, 0.0  ;;  %1096 = vrsqrt.f32 %v458_v40  ;;  %v1081_v26 = vpop.eup %1080 }
 0x151   :  { %v669_v27 = vsel %vm667_vm7, %v668_v32, %v666_v52  ;;  %v559_v59 = vmul.f32 %v1079_v36, %v1530_v17  ;;  %v675_v19 = vand.u32 2147483648, %v1541_v47  ;;  %1098 = vrsqrt.f32 %v443_v30 }
 0x152   :  { %v733_v51 = vmul.f32 %v1522_v63, %v669_v27  ;;  %v671_v15 = vmul.f32 %v1081_v26, %v1541_v47  ;;  %vm567_vm12 = vcmp.eq.f32.partialorder %v1557_v9, inf  ;;  %1100 = vrsqrt.f32 %v459_v49 }
 0x153   :  { %v1083_v46 = vpop.eup %1082  ;;  %v561_v34 = vsel %vm560_vm8, %v1530_v17, %v559_v59  ;;  %vm569_vm13 = vcmp.eq.f32.partialorder %v1557_v9, 0.0  ;;  %v570_v45 = vand.u32 2147483648, %v1557_v9  ;;  %1102 = vrsqrt.f32 %v444_v35 }
 0x154   :  { %v1644_v10 = vpop.eup %1084  ;;  %v1876_v0 = vunpack.c.h.bf16 %v1297_v43  ;;  %v564_v14 = vsel %vm562_vm9, %v563_v22, %v561_v34  ;;  %v673_v20 = vsel %vm672_vm10, %v1541_v47, %v671_v15  ;;  %v566_v48 = vmul.f32 %v1083_v46, %v1557_v9 }
 0x155   :  { %v1654_v25 = vpop.eup %1086  ;;  %v718_v18 = vmul.f32 %v1530_v17, %v564_v14  ;;  %v676_v58 = vsel %vm674_vm11, %v675_v19, %v673_v20  ;;  %1104 = vrsqrt.f32 %v1644_v10  ;;  %v417_v43 = vmul.f32 2e-05, %v1443_v60 }
 0x156   :  { %v761_v63 = vmul.f32 %v733_v51, %v1876_v0  ;;  %v1661_v6 = vpop.eup %1088  ;;  %v734_v13 = vmul.f32 %v1541_v47, %v676_v58  ;;  %v568_v61 = vsel %vm567_vm12, %v1557_v9, %v566_v48  ;;  %v418_v23 = vmul.f32 2e-05, %v1449_v11 }
 0x157   :  { %v1669_v17 = vpop.eup %1090  ;;  %v1877_v1 = vunpack.c.l.bf16 %v1292_v42  ;;  %v571_v60 = vsel %vm569_vm13, %v570_v45, %v568_v61  ;;  %1106 = vrsqrt.f32 %v1654_v25  ;;  %v498_v47 = vunpack.c.l.bf16 %v1327_v55 }
 0x158   :  { %v940_v38 = vpack.c.bf16 %v761_v63, %v1588_v50  ;;  %v419_v50 = vmul.f32 2e-05, %v1454_v21  ;;  %v1677_v24 = vpop.eup %1092  ;;  %v499_v37 = vunpack.c.h.bf16 %v1327_v55  ;;  %v1686_v11 = vmul.f32 %v734_v13, %v510_v16 }
 0x159   :  { %v746_v32 = vmul.f32 %v718_v18, %v1877_v1  ;;  %v719_v8 = vmul.f32 %v1557_v9, %v571_v60  ;;  %v1689_v5 = vpop.eup %1094  ;;  %v512_v21 = vunpack.c.l.bf16 %v1332_v56  ;;  %v513_v62 = vunpack.c.h.bf16 %v1332_v56 }
 0x15a   :  { %862 = vst [vmem:[%s1866_s2 + $0x50] sm:$0xff] %v940_v38  ;;  %v514_v41 = vunpack.c.l.bf16 %v1337_v57  ;;  %1108 = vrsqrt.f32 %v1661_v6  ;;  %v1695_v28 = vpop.eup %1096  ;;  %v515_v4 = vunpack.c.h.bf16 %v1337_v57  ;;  %v500_v12 = vunpack.c.l.bf16 %v1350_v2 }
 0x15b   :  { %v1878_v16 = vunpack.c.h.bf16 %v1292_v42  ;;  %1110 = vrsqrt.f32 %v1669_v17  ;;  %v1702_v9 = vpop.eup %1098  ;;  %v445_v33 = vadd.f32 1.0, %v417_v43  ;;  %v446_v40 = vadd.f32 1.0, %v418_v23 }
 0x15c   :  { %1112 = vrsqrt.f32 %v1677_v24  ;;  %v447_v29 = vadd.f32 1.0, %v419_v50  ;;  %v1705_v30 = vpop.eup %1100  ;;  %vm679_vm14 = vcmp.eq.f32.partialorder %v1644_v10, inf  ;;  %vm681_vm15 = vcmp.eq.f32.partialorder %v1644_v10, 0.0 }
 0x15d   :  { %v747_v39 = vmul.f32 %v719_v8, %v1878_v16  ;;  %1114 = vrsqrt.f32 %v1689_v5  ;;  %v1710_v42 = vpop.eup %1102  ;;  %v682_v22 = vand.u32 2147483648, %v1644_v10  ;;  %vm574_vm0 = vcmp.eq.f32.partialorder %v1654_v25, inf }
 0x15e   :  { %vm576_vm1 = vcmp.eq.f32.partialorder %v1654_v25, 0.0  ;;  %1116 = vrsqrt.f32 %v1695_v28  ;;  %v577_v35 = vand.u32 2147483648, %v1654_v25  ;;  %vm686_vm2 = vcmp.eq.f32.partialorder %v1661_v6, inf }
 0x15f   :  { %v933_v49 = vpack.c.bf16 %v747_v39, %v746_v32  ;;  %vm688_vm3 = vcmp.eq.f32.partialorder %v1661_v6, 0.0  ;;  %1118 = vrsqrt.f32 %v1702_v9  ;;  %v1105_v36 = vpop.eup %1104  ;;  %v689_v52 = vand.u32 2147483648, %v1661_v6 }
 0x160   :  { %vm581_vm4 = vcmp.eq.f32.partialorder %v1669_v17, inf  ;;  %vm583_vm5 = vcmp.eq.f32.partialorder %v1669_v17, 0.0  ;;  %1120 = vrsqrt.f32 %v1705_v30  ;;  %v678_v26 = vmul.f32 %v1105_v36, %v1644_v10 }
 0x161   :  { %855 = vst [vmem:[%s1866_s2 + $0x18] sm:$0xff] %v933_v49  ;;  %v584_v27 = vand.u32 2147483648, %v1669_v17  ;;  %vm693_vm6 = vcmp.eq.f32.partialorder %v1677_v24, inf  ;;  %v696_v59 = vand.u32 2147483648, %v1677_v24  ;;  %v1107_v19 = vpop.eup %1106  ;;  %vm695_vm7 = vcmp.eq.f32.partialorder %v1677_v24, 0.0 }
 0x162   :  { %vm588_vm8 = vcmp.eq.f32.partialorder %v1689_v5, inf  ;;  %vm590_vm9 = vcmp.eq.f32.partialorder %v1689_v5, 0.0  ;;  %v591_v51 = vand.u32 2147483648, %v1689_v5  ;;  %1122 = vrsqrt.f32 %v1710_v42 }
 0x163   :  { %v680_v15 = vsel %vm679_vm14, %v1644_v10, %v678_v26  ;;  %v573_v46 = vmul.f32 %v1107_v19, %v1654_v25  ;;  %vm700_vm10 = vcmp.eq.f32.partialorder %v1695_v28, inf  ;;  %v703_v34 = vand.u32 2147483648, %v1695_v28 }
 0x164   :  { %1124 = vrsqrt.f32 %v445_v33  ;;  %v1109_v45 = vpop.eup %1108  ;;  %v683_v0 = vsel %vm681_vm15, %v682_v22, %v680_v15  ;;  %vm702_vm11 = vcmp.eq.f32.partialorder %v1695_v28, 0.0  ;;  %vm595_vm12 = vcmp.eq.f32.partialorder %v1702_v9, inf }
 0x165   :  { %v598_v63 = vand.u32 2147483648, %v1702_v9  ;;  %v710_v14 = vand.u32 2147483648, %v1705_v30  ;;  %v1111_v20 = vpop.eup %1110  ;;  %v735_v48 = vmul.f32 %v1644_v10, %v683_v0  ;;  %v575_v18 = vsel %vm574_vm0, %v1654_v25, %v573_v46 }
 0x166   :  { %v685_v58 = vmul.f32 %v1109_v45, %v1661_v6  ;;  %1126 = vrsqrt.f32 %v446_v40  ;;  %v1113_v43 = vpop.eup %1112  ;;  %v578_v38 = vsel %vm576_vm1, %v577_v35, %v575_v18  ;;  %v580_v13 = vmul.f32 %v1111_v20, %v1669_v17 }
 0x167   :  { %vm597_vm13 = vcmp.eq.f32.partialorder %v1702_v9, 0.0  ;;  %vm707_vm14 = vcmp.eq.f32.partialorder %v1705_v30, inf  ;;  %vm602_vm15 = vcmp.eq.f32.partialorder %v1710_v42, inf  ;;  %1128 = vrsqrt.f32 %v447_v29  ;;  %v1115_v10 = vpop.eup %1114 }
 0x168   :  { %v763_v61 = vmul.f32 %v735_v48, %v511_v31  ;;  %v720_v23 = vmul.f32 %v1654_v25, %v578_v38  ;;  %v687_v1 = vsel %vm686_vm2, %v1661_v6, %v685_v58  ;;  %v692_v32 = vmul.f32 %v1113_v43, %v1677_v24  ;;  %v1117_v60 = vpop.eup %1116 }
 0x169   :  { %vm709_vm0 = vcmp.eq.f32.partialorder %v1705_v30, 0.0  ;;  %v690_v50 = vsel %vm688_vm3, %v689_v52, %v687_v1  ;;  %v582_v8 = vsel %vm581_vm4, %v1669_v17, %v580_v13  ;;  %v587_v44 = vmul.f32 %v1115_v10, %v1689_v5  ;;  %v1119_v25 = vpop.eup %1118 }
 0x16a   :  { %vm604_vm1 = vcmp.eq.f32.partialorder %v1710_v42, 0.0  ;;  %v605_v31 = vand.u32 2147483648, %v1710_v42  ;;  %v941_v16 = vpack.c.bf16 %v763_v61, %v1686_v11  ;;  %v748_v39 = vmul.f32 %v720_v23, %v496_v53  ;;  %v1121_v29 = vpop.eup %1120 }
 0x16b   :  { %v736_v33 = vmul.f32 %v1661_v6, %v690_v50  ;;  %v585_v40 = vsel %vm583_vm5, %v584_v27, %v582_v8  ;;  %v694_v22 = vsel %vm693_vm6, %v1677_v24, %v692_v32  ;;  %v589_v35 = vsel %vm588_vm8, %v1689_v5, %v587_v44 }
 0x16c   :  { %v721_v49 = vmul.f32 %v1669_v17, %v585_v40  ;;  %v699_v11 = vmul.f32 %v1117_v60, %v1695_v28  ;;  %863 = vst [vmem:[%s1866_s2 + $0x58] sm:$0xff] %v941_v16  ;;  %v697_v6 = vsel %vm695_vm7, %v696_v59, %v694_v22  ;;  %v592_v17 = vsel %vm590_vm9, %v591_v51, %v589_v35  ;;  %v1123_v52 = vpop.eup %1122 }
 0x16d   :  { %v764_v53 = vmul.f32 %v736_v33, %v512_v21  ;;  %v594_v36 = vmul.f32 %v1119_v25, %v1702_v9  ;;  %v737_v27 = vmul.f32 %v1677_v24, %v697_v6  ;;  %v722_v19 = vmul.f32 %v1689_v5, %v592_v17 }
 0x16e   :  { %v749_v26 = vmul.f32 %v721_v49, %v497_v7  ;;  %v701_v21 = vsel %vm700_vm10, %v1695_v28, %v699_v11  ;;  %v1125_v15 = vpop.eup %1124  ;;  %v706_v46 = vmul.f32 %v1121_v29, %v1705_v30  ;;  %v601_v54 = vmul.f32 %v1123_v52, %v1710_v42 }
 0x16f   :  { %v704_v59 = vsel %vm702_vm11, %v703_v34, %v701_v21  ;;  %v596_v51 = vsel %vm595_vm12, %v1702_v9, %v594_v36  ;;  %v765_v24 = vmul.f32 %v737_v27, %v513_v62  ;;  %v750_v5 = vmul.f32 %v722_v19, %v498_v47 }
 0x170   :  { %v934_v7 = vpack.c.bf16 %v749_v26, %v748_v39  ;;  %v738_v45 = vmul.f32 %v1695_v28, %v704_v59  ;;  %v1127_v0 = vpop.eup %1126  ;;  %v599_v34 = vsel %vm597_vm13, %v598_v63, %v596_v51  ;;  %v708_v20 = vsel %vm707_vm14, %v1705_v30, %v706_v46 }
 0x171   :  { %v603_v48 = vsel %vm602_vm15, %v1710_v42, %v601_v54  ;;  %1130 = vrsqrt.f32 %v1125_v15  ;;  %v1129_v56 = vpop.eup %1128  ;;  %v942_v47 = vpack.c.bf16 %v765_v24, %v764_v53  ;;  %v723_v28 = vmul.f32 %v1702_v9, %v599_v34 }
 0x172   :  { %856 = vst [vmem:[%s1866_s2 + $0x20] sm:$0xff] %v934_v7  ;;  %v766_v62 = vmul.f32 %v738_v45, %v514_v41  ;;  %v711_v63 = vsel %vm709_vm0, %v710_v14, %v708_v20  ;;  %v606_v58 = vsel %vm604_vm1, %v605_v31, %v603_v48  ;;  %1132 = vrsqrt.f32 %v1127_v0 }
 0x173   :  { %v739_v18 = vmul.f32 %v1705_v30, %v711_v63  ;;  %864 = vst [vmem:[%s1866_s2 + $0x60] sm:$0xff] %v942_v47  ;;  %v751_v43 = vmul.f32 %v723_v28, %v499_v37  ;;  %v724_v41 = vmul.f32 %v1710_v42, %v606_v58  ;;  %1134 = vrsqrt.f32 %v1129_v56 }
 0x174   :  { %vm609_vm2 = vcmp.eq.f32.partialorder %v1125_v15, inf  ;;  %v612_v42 = vand.u32 2147483648, %v1125_v15  ;;  %vm611_vm3 = vcmp.eq.f32.partialorder %v1125_v15, 0.0  ;;  %vm616_vm4 = vcmp.eq.f32.partialorder %v1127_v0, inf }
 0x175   :  { %v767_v9 = vmul.f32 %v739_v18, %v515_v4  ;;  %v935_v38 = vpack.c.bf16 %v751_v43, %v750_v5  ;;  %v752_v30 = vmul.f32 %v724_v41, %v500_v12  ;;  %v501_v4 = vunpack.c.h.bf16 %v1350_v2 }
 0x176   :  { %v619_v1 = vand.u32 2147483648, %v1127_v0  ;;  %v502_v32 = vunpack.c.l.bf16 %v1355_v3  ;;  %vm618_vm5 = vcmp.eq.f32.partialorder %v1127_v0, 0.0  ;;  %vm623_vm6 = vcmp.eq.f32.partialorder %v1129_v56, inf }
 0x177   :  { %v943_v14 = vpack.c.bf16 %v767_v9, %v766_v62  ;;  %857 = vst [vmem:[%s1866_s2 + $0x28] sm:$0xff] %v935_v38  ;;  %v626_v31 = vand.u32 2147483648, %v1129_v56  ;;  %v503_v25 = vunpack.c.h.bf16 %v1355_v3  ;;  %vm625_vm7 = vcmp.eq.f32.partialorder %v1129_v56, 0.0 }
 0x179   :  { %865 = vst [vmem:[%s1866_s2 + $0x68] sm:$0xff] %v943_v14 }
 0x17b   :  { %v1131_v55 = vpop.eup %1130 }
 0x17c   :  { %v608_v37 = vmul.f32 %v1131_v55, %v1125_v15  ;;  %v1133_v57 = vpop.eup %1132 }
 0x17d   :  { %v615_v10 = vmul.f32 %v1133_v57, %v1127_v0  ;;  %v1135_v61 = vpop.eup %1134 }
 0x17e   :  { %v610_v13 = vsel %vm609_vm2, %v1125_v15, %v608_v37  ;;  %v622_v50 = vmul.f32 %v1135_v61, %v1129_v56 }
 0x17f   :  { %v613_v12 = vsel %vm611_vm3, %v612_v42, %v610_v13  ;;  %v617_v60 = vsel %vm616_vm4, %v1127_v0, %v615_v10 }
 0x180   :  { %v725_v23 = vmul.f32 %v1125_v15, %v613_v12  ;;  %v620_v44 = vsel %vm618_vm5, %v619_v1, %v617_v60  ;;  %v624_v16 = vsel %vm623_vm6, %v1129_v56, %v622_v50 }
 0x181   :  { %v726_v2 = vmul.f32 %v1127_v0, %v620_v44  ;;  %v627_v33 = vsel %vm625_vm7, %v626_v31, %v624_v16 }
 0x182   :  { %v753_v8 = vmul.f32 %v725_v23, %v501_v4  ;;  %v727_v29 = vmul.f32 %v1129_v56, %v627_v33 }
 0x183   :  { %v754_v40 = vmul.f32 %v726_v2, %v502_v32 }
 0x184   :  { %v936_v39 = vpack.c.bf16 %v753_v8, %v752_v30  ;;  %v755_v49 = vmul.f32 %v727_v29, %v503_v25 }
 0x186   :  { %858 = vst [vmem:[%s1866_s2 + $0x30] sm:$0xff] %v936_v39  ;;  %v937_v22 = vpack.c.bf16 %v755_v49, %v754_v40 }
 0x188   :  { %859 = vst [vmem:[%s1866_s2 + $0x38] sm:$0xff] %v937_v22 }

// kernel: alexnet_bvlc_forward.13
= control target key start
LH: loop header
LB: loop body
LE: loop exit
PB: predicated region body
PF: predicated region fallthrough
CT: control target
= control target key end

     0   :  { %s531_s15 = smov 0   ;;  %s603_s0 = inlined_call_operand.vmem [shape: bf16[2,4,4,256], index: 0, kind: input, shape index: {}]   ;;  %s604_s1 = inlined_call_operand.vmem [shape: bf16[2,4,3,256], index: 1, kind: input, shape index: {}]   ;;  %s605_s2 = inlined_call_operand.vmem [shape: bf16[2,3,4,256], index: 2, kind: input, shape index: {}]   ;;  %s606_s3 = inlined_call_operand.vmem [shape: bf16[2,3,3,256], index: 3, kind: input, shape index: {}]   ;;  %s607_s4 = inlined_call_operand.vmem [shape: bf16[2,3,3,256], index: 4, kind: output, shape index: {}]  }
   0x1 LB: > { %s473_s16 = sadd.s32 4294967295, %s504_s15   ;;  %p477_p0 = scmp.ge.s32.totalorder %s504_s15, 1  ;;  %s504_s15 = sphi %s531_s15, %s14_s15  }
   0x2   : > { %p192_p1 = scmp.lt.s32.totalorder %s504_s15, 3 }
   0x4   : > { %p193_p2 = pnand %p477_p0, %p192_p1 }
   0x5   : > { %p233_p3 = scmp.lt.s32.totalorder (!%p193_p2), %s473_s16, 1  ;;  %vm366_vm0 = vcmask (!%p193_p2), 1041408   ;;  %vm367_vm1 = vsmask.f32 (!%p193_p2), 1280  ;;  %vm369_vm2 = vcmask (!%p193_p2), 1043458  }
   0x6   : > { %196 = sbr.rel (%p193_p2) target bundleno = 46 (0x2e), region = 36  ;;  %vm370_vm3 = vsmask.f32 (!%p193_p2), 3328  ;;  %vm368_vm4 = vmand (!%p193_p2), %vm366_vm0, %vm367_vm1 }
   0x7   : > { %vm371_vm5 = vmand (!%p193_p2), %vm369_vm2, %vm370_vm3 }
   0x8   : > { %vm588_vm6 = vmor (!%p193_p2), %vm371_vm5, %vm368_vm4 }
   0xd   : > { %s611_s16 = smov (!%p233_p3, %s473_s16), 1 }
   0xe   : > { %s487_s17 = sshll.u32 %s611_s16, 4  ;;  %s539_s18 = smul.u32 12, %s611_s16 }
   0xf   : > { %s544_s21 = scalar_lea.vmem %s603_s0, %s487_s17  ;;  %s549_s24 = scalar_lea.vmem %s604_s1, %s487_s17 }
  0x10   : > { %s247_s27 = scalar_lea.vmem %s605_s2, %s539_s18  ;;  %v258_v0 = vld [vmem:[%s544_s21] sm:$0xf]  ;;  %v557_v1 = vld [vmem:[%s544_s21 + $0x4] sm:$0xf]  ;;  %v260_v18 = vld [vmem:[%s544_s21 + $0x8] sm:$0xf]  ;;  %s576_s30 = scalar_lea.vmem %s606_s3, %s539_s18 }
  0x11   : > { %v262_v2 = vld [vmem:[%s549_s24] sm:$0xf]  ;;  %v267_v4 = vld [vmem:[%s247_s27 + $0x4] sm:$0xf]  ;;  %v276_v6 = vshrl.u32 %v258_v0, 16  ;;  %v279_v7 = vshll.u32 %v258_v0, 16  ;;  %s257_s7 = scalar_lea.vmem %s607_s4, %s539_s18 }
  0x12   : > { %v266_v3 = vld [vmem:[%s247_s27] sm:$0xf]  ;;  %v272_v5 = vmax.bf16 %v262_v2, %v258_v0  ;;  %v285_v8 = vshrl.u32 %v557_v1, 16  ;;  %v562_v9 = vld [vmem:[%s549_s24 + $0x4] sm:$0xf]  ;;  %v288_v10 = vshll.u32 %v557_v1, 16 }
  0x13   : > { %v315_v11 = vshrl.u32 %v266_v3, 16  ;;  %v318_v12 = vshll.u32 %v266_v3, 16  ;;  %v324_v13 = vshrl.u32 %v267_v4, 16  ;;  %v278_v14 = vrot.slane %v276_v6, 6  ;;  %v569_v25 = vld [vmem:[%s549_s24 + $0x8] sm:$0xf] }
  0x14   : > { %v281_v15 = vrot.slane %v279_v7, 7  ;;  %v287_v16 = vrot.slane %v285_v8, 6  ;;  %v327_v17 = vshll.u32 %v267_v4, 16  ;;  %v290_v19 = vrot.slane %v288_v10, 7  ;;  %v268_v26 = vld [vmem:[%s247_s27 + $0x8] sm:$0xf] }
  0x15   : > { %v317_v20 = vrot.slane %v315_v11, 6  ;;  %v320_v21 = vrot.slane %v318_v12, 7  ;;  %v294_v22 = vshrl.u32 %v260_v18, 16  ;;  %v273_v23 = vmax.bf16 %v562_v9, %v557_v1  ;;  %v261_v33 = vld [vmem:[%s544_s21 + $0xc] sm:$0xf] }
  0x16   : > { %v282_v24 = vor.u32 %v281_v15, %v278_v14  ;;  %v297_v27 = vshll.u32 %v260_v18, 16  ;;  %v326_v28 = vrot.slane %v324_v13, 6  ;;  %v291_v29 = vor.u32 %v290_v19, %v287_v16  ;;  %v269_v46 = vld [vmem:[%s576_s30] sm:$0xf]  ;;  %v270_v51 = vld [vmem:[%s576_s30 + $0x4] sm:$0xf] }
  0x17   : > { %v321_v30 = vor.u32 %v320_v21, %v317_v20  ;;  %v296_v31 = vrot.slane %v294_v22, 6  ;;  %v329_v32 = vrot.slane %v327_v17, 7  ;;  %v333_v36 = vshrl.u32 %v268_v26, 16  ;;  %v271_v61 = vld [vmem:[%s576_s30 + $0x8] sm:$0xf] }
  0x18   : > { %v283_v34 = vrot.slane %v282_v24, 2  ;;  %v299_v35 = vrot.slane %v297_v27, 7  ;;  %v336_v37 = vshll.u32 %v268_v26, 16  ;;  %v292_v38 = vrot.slane %v291_v29, 2  ;;  %v373_v11 = vld [vmem:[%s257_s7] sm:$0xf] }
  0x19   : > { %v274_v39 = vmax.bf16 %v569_v25, %v260_v18  ;;  %v330_v40 = vor.u32 %v329_v32, %v326_v28  ;;  %v354_v41 = vshrl.u32 %v261_v33, 16  ;;  %v335_v44 = vrot.slane %v333_v36, 6  ;;  %v265_v13 = vld [vmem:[%s549_s24 + $0xc] sm:$0xf]  ;;  %v376_v15 = vld [vmem:[%s257_s7 + $0x4] sm:$0xf] }
  0x1a   : > { %v305_v42 = vmax.bf16 %v283_v34, %v272_v5  ;;  %v300_v43 = vor.u32 %v299_v35, %v296_v31  ;;  %v338_v45 = vrot.slane %v336_v37, 7  ;;  %v306_v47 = vmax.bf16 %v292_v38, %v273_v23  ;;  %v379_v20 = vld [vmem:[%s257_s7 + $0x8] sm:$0xf] }
  0x1b   : > { %v357_v48 = vshll.u32 %v261_v33, 16  ;;  %v322_v50 = vrot.slane %v321_v30, 2  ;;  %v331_v55 = vrot.slane %v330_v40, 2  ;;  %v356_v58 = vrot.slane %v354_v41, 6 }
  0x1c   : > { %v308_v49 = vmax.bf16 %v305_v42, %v266_v3  ;;  %v301_v52 = vrot.slane %v300_v43, 2  ;;  %v339_v53 = vor.u32 %v338_v45, %v335_v44  ;;  %v309_v54 = vmax.bf16 %v306_v47, %v267_v4 }
  0x1d   : > { %v359_v59 = vrot.slane %v357_v48, 7 }
  0x1e   : > { %v311_v56 = vmax.bf16 %v308_v49, %v269_v46  ;;  %v307_v57 = vmax.bf16 %v301_v52, %v274_v39  ;;  %v312_v60 = vmax.bf16 %v309_v54, %v270_v51  ;;  %v340_v0 = vrot.slane %v339_v53, 2 }
  0x1f   : > { %v360_v5 = vor.u32 %v359_v59, %v356_v58 }
  0x20   : > { %v344_v62 = vmax.bf16 %v322_v50, %v311_v56  ;;  %v310_v63 = vmax.bf16 %v307_v57, %v268_v26  ;;  %v345_v2 = vmax.bf16 %v331_v55, %v312_v60 }
  0x21   : > { %v361_v17 = vrot.slane %v360_v5, 2 }
  0x22   : > { %v347_v3 = vmax.bf16 %v344_v62, %v557_v1  ;;  %v313_v4 = vmax.bf16 %v310_v63, %v271_v61  ;;  %v348_v6 = vmax.bf16 %v345_v2, %v260_v18 }
  0x24   : > { %v350_v7 = vmax.bf16 %v347_v3, %v562_v9  ;;  %v346_v8 = vmax.bf16 %v340_v0, %v313_v4  ;;  %v351_v12 = vmax.bf16 %v348_v6, %v569_v25 }
  0x26   : > { %v363_v14 = vmax.bf16 %v350_v7, %v292_v38  ;;  %v349_v16 = vmax.bf16 %v346_v8, %v261_v33  ;;  %v364_v1 = vmax.bf16 %v351_v12, %v301_v52 }
  0x28   : > { %v374_v19 = vsel %vm588_vm6, %v363_v14, %v373_v11  ;;  %v352_v18 = vmax.bf16 %v349_v16, %v265_v13  ;;  %v377_v9 = vsel %vm588_vm6, %v364_v1, %v376_v15 }
  0x29   : > { %375 = vst [vmem:[%s257_s7] sm:$0xf] %v374_v19  ;;  %378 = vst [vmem:[%s257_s7 + $0x4] sm:$0xf] %v377_v9 }
  0x2a   : > { %v365_v21 = vmax.bf16 %v361_v17, %v352_v18 }
  0x2c   : > { %v380_v22 = vsel %vm588_vm6, %v365_v21, %v379_v20 }
  0x2d   : > { %381 = vst [vmem:[%s257_s7 + $0x8] sm:$0xf] %v380_v22 }
  0x2e PF: > { %s14_s15 = sadd.s32 1, %s504_s15  }
  0x2f   : > { %p11_p4 = scmp.ge.s32.totalorder %s14_s15, 4  }
  0x31   :  { %13 = sbr.rel (!%p11_p4) target bundleno = 1 (0x1), region = 75 }

// kernel: squeeze.5
= control target key start
LH: loop header
LB: loop body
LE: loop exit
PB: predicated region body
PF: predicated region fallthrough
CT: control target
= control target key end

     0   :  { %v403_v20 = vmov 0.0   ;;  %s483_s0 = inlined_call_operand.vmem [shape: bf16[1,18,384], index: 0, kind: input, shape index: {}]   ;;  %s484_s1 = inlined_call_operand.vmem [shape: bf16[2,3,3,384], index: 1, kind: output, shape index: {}]  }
   0x1   :  { %v358_v0 = vld [vmem:[%s483_s0 + $0x20] sm:$0xf]  ;;  %v399_v1 = vld [vmem:[%s483_s0 + $0x18] sm:$0xff]   ;;  %v400_v2 = vld [vmem:[%s483_s0 + $0x10] sm:$0xff]  }
   0x2   :  { %v17_v3 = vunpack.c.l.bf16 %v358_v0  ;;  %v385_v4 = vunpack.c.l.bf16 %v399_v1  ;;  %v386_v5 = vunpack.c.h.bf16 %v399_v1  ;;  %v389_v6 = vunpack.c.l.bf16 %v400_v2  ;;  %v401_v7 = vld [vmem:[%s483_s0 + $0x8] sm:$0xff]   ;;  %v396_v8 = vld [vmem:[%s483_s0] sm:$0xff]  }
   0x3   :  { %v390_v9 = vunpack.c.h.bf16 %v400_v2  ;;  %v393_v10 = vunpack.c.l.bf16 %v401_v7  ;;  %v394_v11 = vunpack.c.h.bf16 %v401_v7  ;;  %v397_v12 = vunpack.c.l.bf16 %v396_v8 }
   0x4   :  { %20 = vst [vmem:[#allocation1 + $0x40] sm:$0xff] %v17_v3  ;;  %36 = vst [vmem:[#allocation1 + $0x38] sm:$0xff] %v386_v5  ;;  %v398_v13 = vunpack.c.h.bf16 %v396_v8 }
   0x5   :  { %52 = vst [vmem:[#allocation1 + $0x30] sm:$0xff] %v385_v4  ;;  %180 = vst [vmem:[#allocation0 + $0x3a] ss:$22 sm:$0x3] %v389_v6  }
   0x6   :  { %182 = vst [vmem:[#allocation0 + $0x4f] ss:$25 sps:$4 sm:$0x7c] %v389_v6   ;;  %186 = vst [vmem:[#allocation0 + $0x79] sm:$0x80] %v389_v6  }
   0x7   :  { %146 = vst [vmem:[#allocation0] ss:$46 sps:$4 sm:$0xc7] %v397_v12   ;;  %148 = vst [vmem:[#allocation0 + $0x15] sm:$0x38] %v397_v12  }
   0x8   :  { %162 = vst [vmem:[#allocation0 + $0x10] ss:$46 sps:$4 sm:$0xc7] %v393_v10   ;;  %164 = vst [vmem:[#allocation0 + $0x25] sm:$0x38] %v393_v10  }
   0x9   :  { %170 = vst [vmem:[#allocation0 + $0x32] ss:$22 sm:$0x3] %v394_v11   ;;  %172 = vst [vmem:[#allocation0 + $0x47] ss:$25 sps:$4 sm:$0x7c] %v394_v11  }
   0xa   :  { %176 = vst [vmem:[#allocation0 + $0x71] sm:$0x80] %v394_v11   ;;  %190 = vst [vmem:[#allocation0 + $0x42] ss:$22 sm:$0x3] %v390_v9  }
   0xb   :  { %192 = vst [vmem:[#allocation0 + $0x57] ss:$25 sps:$4 sm:$0x7c] %v390_v9   ;;  %196 = vst [vmem:[#allocation0 + $0x81] sm:$0x80] %v390_v9  }
   0xc   :  { %154 = vst [vmem:[#allocation0 + $0x8] ss:$46 sps:$4 sm:$0xc7] %v398_v13   ;;  %156 = vst [vmem:[#allocation0 + $0x1d] sm:$0x38] %v398_v13  }
   0xd   :  { %v198_v14 = vld [vmem:[#allocation1 + $0x30] sm:$0x3]   ;;  %v202_v15 = vld [vmem:[#allocation1 + $0x38] sm:$0x3]   ;;  %v206_v16 = vld [vmem:[#allocation1 + $0x40] sm:$0x3]  }
   0xe   :  { %200 = vst [vmem:[#allocation0 + $0x79] sm:$0x3] %v198_v14   ;;  %204 = vst [vmem:[#allocation0 + $0x81] sm:$0x3] %v202_v15   ;;  %v213_v17 = vld [vmem:[#allocation0] sm:$0xf] }
   0xf   :  { %208 = vst [vmem:[#allocation0 + $0x89] sm:$0x3] %v206_v16   ;;  %v224_v18 = vld [vmem:[#allocation0 + $0x10] sm:$0xf]  ;;  %v231_v19 = vld [vmem:[#allocation0 + $0x18] sm:$0xf]  ;;  %v214_v21 = vpack.c.bf16 %v403_v20, %v213_v17 }
  0x10   :  { %v225_v23 = vpack.c.bf16 %v403_v20, %v224_v18  ;;  %v232_v24 = vpack.c.bf16 %v403_v20, %v231_v19  ;;  %v245_v26 = vld [vmem:[#allocation0 + $0x28] sm:$0xf]  ;;  %v252_v30 = vld [vmem:[#allocation0 + $0x30] sm:$0xf]  ;;  %v294_v42 = vld [vmem:[#allocation0 + $0x60] sm:$0xf] }
  0x11   :  { %v246_v29 = vpack.c.bf16 %v403_v20, %v245_v26  ;;  %v266_v32 = vld [vmem:[#allocation0 + $0x40] sm:$0xf]  ;;  %216 = vst [vmem:[%s484_s1] sm:$0x3] %v214_v21  ;;  %v253_v33 = vpack.c.bf16 %v403_v20, %v252_v30  ;;  %v273_v36 = vld [vmem:[#allocation0 + $0x48] sm:$0xf]  ;;  %v295_v45 = vpack.c.bf16 %v403_v20, %v294_v42 }
  0x12   :  { %367 = vst [vmem:[%s484_s1 + $0x4] sm:$0x3] %v225_v23  ;;  %368 = vst [vmem:[%s484_s1 + $0x6] sm:$0x3] %v232_v24  ;;  %v267_v35 = vpack.c.bf16 %v403_v20, %v266_v32  ;;  %v280_v37 = vld [vmem:[#allocation0 + $0x50] sm:$0xf]  ;;  %v274_v39 = vpack.c.bf16 %v403_v20, %v273_v36 }
  0x13   :  { %v218_v22 = vld [vmem:[#allocation0 + $0x8] sm:$0xf]  ;;  %v238_v25 = vld [vmem:[#allocation0 + $0x20] sm:$0xf]  ;;  %v259_v31 = vld [vmem:[#allocation0 + $0x38] sm:$0xf]  ;;  %v281_v40 = vpack.c.bf16 %v403_v20, %v280_v37 }
  0x14   :  { %v219_v27 = vpack.c.bf16 %v403_v20, %v218_v22  ;;  %v239_v28 = vpack.c.bf16 %v403_v20, %v238_v25  ;;  %v260_v34 = vpack.c.bf16 %v403_v20, %v259_v31  ;;  %v287_v38 = vld [vmem:[#allocation0 + $0x58] sm:$0xf]  ;;  %370 = vst [vmem:[%s484_s1 + $0xa] sm:$0x3] %v246_v29  ;;  %v301_v43 = vld [vmem:[#allocation0 + $0x68] sm:$0xf] }
  0x15   :  { %v288_v41 = vpack.c.bf16 %v403_v20, %v287_v38  ;;  %v308_v44 = vld [vmem:[#allocation0 + $0x70] sm:$0xf]  ;;  %371 = vst [vmem:[%s484_s1 + $0xc] sm:$0x3] %v253_v33  ;;  %373 = vst [vmem:[%s484_s1 + $0x10] sm:$0x3] %v267_v35  ;;  %v302_v46 = vpack.c.bf16 %v403_v20, %v301_v43 }
  0x16   :  { %366 = vst [vmem:[%s484_s1 + $0x2] sm:$0x3] %v219_v27  ;;  %369 = vst [vmem:[%s484_s1 + $0x8] sm:$0x3] %v239_v28  ;;  %v309_v47 = vpack.c.bf16 %v403_v20, %v308_v44  ;;  %v315_v48 = vld [vmem:[#allocation0 + $0x78] sm:$0xf] }
  0x17   :  { %372 = vst [vmem:[%s484_s1 + $0xe] sm:$0x3] %v260_v34  ;;  %374 = vst [vmem:[%s484_s1 + $0x12] sm:$0x3] %v274_v39  ;;  %v322_v49 = vld [vmem:[#allocation0 + $0x80] sm:$0xf]  ;;  %v316_v51 = vpack.c.bf16 %v403_v20, %v315_v48 }
  0x18   :  { %375 = vst [vmem:[%s484_s1 + $0x14] sm:$0x3] %v281_v40  ;;  %376 = vst [vmem:[%s484_s1 + $0x16] sm:$0x3] %v288_v41  ;;  %v329_v50 = vld [vmem:[#allocation0 + $0x88] sm:$0xf]  ;;  %v323_v52 = vpack.c.bf16 %v403_v20, %v322_v49 }
  0x19   :  { %377 = vst [vmem:[%s484_s1 + $0x18] sm:$0x3] %v295_v45  ;;  %378 = vst [vmem:[%s484_s1 + $0x1a] sm:$0x3] %v302_v46  ;;  %v330_v53 = vpack.c.bf16 %v403_v20, %v329_v50 }
  0x1a   :  { %379 = vst [vmem:[%s484_s1 + $0x1c] sm:$0x3] %v309_v47  ;;  %380 = vst [vmem:[%s484_s1 + $0x1e] sm:$0x3] %v316_v51 }
  0x1b   :  { %381 = vst [vmem:[%s484_s1 + $0x20] sm:$0x3] %v323_v52  ;;  %382 = vst [vmem:[%s484_s1 + $0x22] sm:$0x3] %v330_v53 }

// kernel: alexnet_bvlc_forward.14
= control target key start
LH: loop header
LB: loop body
LE: loop exit
PB: predicated region body
PF: predicated region fallthrough
CT: control target
= control target key end

     0   :  { %s5552_s12 = smov 0   ;;  %s5554_s13 = smov 0   ;;  %s6987_s0 = inlined_call_operand.vmem [shape: bf16[1,32,2304], index: 0, kind: input, shape index: {}]   ;;  %s6988_s1 = inlined_call_operand.vmem [shape: bf16[1,2304,384], index: 1, kind: input, shape index: {}]   ;;  %s6989_s2 = inlined_call_operand.vmem [shape: f32[1,1,384], index: 2, kind: input, shape index: {}]   ;;  %s6990_s3 = inlined_call_operand.vmem [shape: bf16[1,32,384], index: 3, kind: output, shape index: {}]  }
   0x1   :  { %s5556_s14 = smov 0  }
   0x2 LB: > { %s22_s15 = sadd.s32 1, %s5526_s13  ;;  %p4176_p0 = scmp.ge.s32.totalorder %s5530_s14, 1  ;;  %s5530_s14 = sphi %s5556_s14, %s13_s14   ;;  %s5526_s13 = sphi %s5554_s13, %s6992_s13   ;;  %s5522_s12 = sphi %s5552_s12, %s6991_s12  }
   0x3   : > { %p23_p1 = scmp.ge.s32.totalorder %s22_s15, 2  ;;  %p178_p2 = scmp.lt.s32.totalorder %s5530_s14, 3 }
   0x5   : > { %s6994_s15 = smov (%p23_p1, %s22_s15), 0  ;;  %p179_p3 = pnand %p4176_p0, %p178_p2 }
   0x6   : > { %v4901_v0 = vld [vmem:[%s6988_s1 + $0x4] ss:$12 sps:$4 sm:$0xff] (!%p179_p3)   ;;  %v4905_v2 = vld [vmem:[%s6988_s1] ss:$12 sps:$4 sm:$0xff] (!%p179_p3)   ;;  %v4907_v4 = vld [vmem:[%s6988_s1 + $0x1c] ss:$12 sps:$4 sm:$0xff] (!%p179_p3)  }
   0x7   : > { %182 = sbr.rel (%p179_p3) target bundleno = 678 (0x2a6), region = 32  ;;  %v4903_v1 = vld [vmem:[%s6988_s1 + $0x304] ss:$12 sps:$4 sm:$0xff] (!%p179_p3)   ;;  %3258 = vmatprep.subr.bf16.mxu1 (!%p179_p3), %v4901_v0  ;;  %v4906_v3 = vld [vmem:[%s6988_s1 + $0x300] ss:$12 sps:$4 sm:$0xff] (!%p179_p3)   ;;  %s4177_s30 = sshll.u32 (!%p179_p3), %s5522_s12, 1 }
   0x8   : > { %3344 = vmatprep.subr.bf16.mxu0 (!%p179_p3), %v4903_v1  ;;  %3259 = vmatpush1.bf16.msra.mxu1 (!%p179_p3), %v4905_v2  ;;  %v4909_v5 = vld [vmem:[%s6988_s1 + $0x31c] ss:$12 sps:$4 sm:$0xff] (!%p179_p3)   ;;  %v4911_v6 = vld [vmem:[%s6988_s1 + $0x18] ss:$12 sps:$4 sm:$0xff] (!%p179_p3)   ;;  %v4913_v8 = vld [vmem:[%s6988_s1 + $0x34] ss:$12 sps:$4 sm:$0xff] (!%p179_p3)  }
   0x9   : > { %3345 = vmatpush1.bf16.msra.mxu0 (!%p179_p3), %v4906_v3  ;;  %3260 = vmatprep.subr.bf16.mxu1 (!%p179_p3), %v4907_v4  ;;  %v4912_v7 = vld [vmem:[%s6988_s1 + $0x318] ss:$12 sps:$4 sm:$0xff] (!%p179_p3)   ;;  %v4915_v9 = vld [vmem:[%s6988_s1 + $0x334] ss:$12 sps:$4 sm:$0xff] (!%p179_p3)   ;;  %v4917_v10 = vld [vmem:[%s6988_s1 + $0x30] ss:$12 sps:$4 sm:$0xff] (!%p179_p3)  }
   0xa   : > { %3346 = vmatprep.subr.bf16.mxu0 (!%p179_p3), %v4909_v5  ;;  %v4918_v11 = vld [vmem:[%s6988_s1 + $0x330] ss:$12 sps:$4 sm:$0xff] (!%p179_p3)   ;;  %v4919_v12 = vld [vmem:[%s6988_s1 + $0x4c] ss:$12 sps:$4 sm:$0xff] (!%p179_p3)   ;;  %v4923_v14 = vld [vmem:[%s6988_s1 + $0x48] ss:$12 sps:$4 sm:$0xff] (!%p179_p3)  }
   0xb   : > { %v4921_v13 = vld [vmem:[%s6988_s1 + $0x34c] ss:$12 sps:$4 sm:$0xff] (!%p179_p3)   ;;  %v4924_v15 = vld [vmem:[%s6988_s1 + $0x348] ss:$12 sps:$4 sm:$0xff] (!%p179_p3)   ;;  %v4925_v16 = vld [vmem:[%s6988_s1 + $0x64] ss:$12 sps:$4 sm:$0xff] (!%p179_p3)  }
   0xc   : > { %3261 = vmatpush1.bf16.msra.mxu1 (!%p179_p3), %v4911_v6  ;;  %v4927_v17 = vld [vmem:[%s6988_s1 + $0x364] ss:$12 sps:$4 sm:$0xff] (!%p179_p3)   ;;  %v4929_v18 = vld [vmem:[%s6988_s1 + $0x60] ss:$12 sps:$4 sm:$0xff] (!%p179_p3)   ;;  %v4931_v20 = vld [vmem:[%s6988_s1 + $0x7c] ss:$12 sps:$4 sm:$0xff] (!%p179_p3)  }
   0xd   : > { %3347 = vmatpush1.bf16.msra.mxu0 (!%p179_p3), %v4912_v7  ;;  %3262 = vmatprep.subr.bf16.mxu1 (!%p179_p3), %v4913_v8  ;;  %v4930_v19 = vld [vmem:[%s6988_s1 + $0x360] ss:$12 sps:$4 sm:$0xff] (!%p179_p3)   ;;  %v4933_v21 = vld [vmem:[%s6988_s1 + $0x37c] ss:$12 sps:$4 sm:$0xff] (!%p179_p3)   ;;  %v4935_v22 = vld [vmem:[%s6988_s1 + $0x78] ss:$12 sps:$4 sm:$0xff] (!%p179_p3)  }
   0xe   : > { %3348 = vmatprep.subr.bf16.mxu0 %v4915_v9  ;;  %v4936_v23 = vld [vmem:[%s6988_s1 + $0x378] ss:$12 sps:$4 sm:$0xff]   ;;  %v4937_v24 = vld [vmem:[%s6988_s1 + $0x94] ss:$12 sps:$4 sm:$0xff]   ;;  %v4941_v26 = vld [vmem:[%s6988_s1 + $0x90] ss:$12 sps:$4 sm:$0xff]  }
   0xf   : > { %v4939_v25 = vld [vmem:[%s6988_s1 + $0x394] ss:$12 sps:$4 sm:$0xff]   ;;  %v4942_v27 = vld [vmem:[%s6988_s1 + $0x390] ss:$12 sps:$4 sm:$0xff]   ;;  %v4943_v28 = vld [vmem:[%s6988_s1 + $0xac] ss:$12 sps:$4 sm:$0xff]  }
  0x10   : > { %3263 = vmatpush1.bf16.msra.mxu1 %v4917_v10  ;;  %v4945_v29 = vld [vmem:[%s6988_s1 + $0x3ac] ss:$12 sps:$4 sm:$0xff]   ;;  %v4947_v30 = vld [vmem:[%s6988_s1 + $0xa8] ss:$12 sps:$4 sm:$0xff]   ;;  %v4949_v32 = vld [vmem:[%s6988_s1 + $0xc4] ss:$12 sps:$4 sm:$0xff]  }
  0x11   : > { %3349 = vmatpush1.bf16.msra.mxu0 %v4918_v11  ;;  %3264 = vmatprep.subr.bf16.mxu1 %v4919_v12  ;;  %v4948_v31 = vld [vmem:[%s6988_s1 + $0x3a8] ss:$12 sps:$4 sm:$0xff]   ;;  %p224_p4 = scmp.lt.s32.totalorder %s4177_s30, 3  ;;  %v4951_v33 = vld [vmem:[%s6988_s1 + $0x3c4] ss:$12 sps:$4 sm:$0xff]  }
  0x12   : > { %3350 = vmatprep.subr.bf16.mxu0 %v4921_v13  ;;  %v4953_v34 = vld [vmem:[%s6988_s1 + $0xc0] ss:$12 sps:$4 sm:$0xff]   ;;  %v4955_v36 = vld [vmem:[%s6988_s1 + $0xdc] ss:$12 sps:$4 sm:$0xff]   ;;  %v4959_v38 = vld [vmem:[%s6988_s1 + $0xd8] ss:$12 sps:$4 sm:$0xff]  }
  0x13   : > { %v4954_v35 = vld [vmem:[%s6988_s1 + $0x3c0] ss:$12 sps:$4 sm:$0xff]   ;;  %s6996_s30 = smov (!%p224_p4, %s4177_s30), 3  ;;  %v4957_v37 = vld [vmem:[%s6988_s1 + $0x3dc] ss:$12 sps:$4 sm:$0xff]  }
  0x14   : > { %3265 = vmatpush1.bf16.msra.mxu1 %v4923_v14  ;;  %v4960_v39 = vld [vmem:[%s6988_s1 + $0x3d8] ss:$12 sps:$4 sm:$0xff]   ;;  %v4961_v40 = vld [vmem:[%s6988_s1 + $0xf4] ss:$12 sps:$4 sm:$0xff]   ;;  %s4875_s29 = smul.u32 72, %s6996_s30 }
  0x15   : > { %3351 = vmatpush1.bf16.msra.mxu0 %v4924_v15  ;;  %3266 = vmatprep.subr.bf16.mxu1 %v4925_v16  ;;  %v4963_v41 = vld [vmem:[%s6988_s1 + $0x3f4] ss:$12 sps:$4 sm:$0xff]   ;;  %v4965_v42 = vld [vmem:[%s6988_s1 + $0xf0] ss:$12 sps:$4 sm:$0xff]   ;;  %v4967_v44 = vld [vmem:[%s6988_s1 + $0x10c] ss:$12 sps:$4 sm:$0xff]  }
  0x16   : > { %3352 = vmatprep.subr.bf16.mxu0 %v4927_v17  ;;  %v4966_v43 = vld [vmem:[%s6988_s1 + $0x3f0] ss:$12 sps:$4 sm:$0xff]   ;;  %s5714_s17 = scalar_lea.vmem %s6987_s0, %s4875_s29  ;;  %v4969_v45 = vld [vmem:[%s6988_s1 + $0x40c] ss:$12 sps:$4 sm:$0xff]   ;;  %v4971_v46 = vld [vmem:[%s6988_s1 + $0x108] ss:$12 sps:$4 sm:$0xff]  }
  0x17   : > { %v4972_v47 = vld [vmem:[%s6988_s1 + $0x408] ss:$12 sps:$4 sm:$0xff]   ;;  %v5726_v48 = vld [vmem:[%s5714_s17 + $0x4] ss:$72 sps:$4 sm:$0xff]   ;;  %v4989_v60 = vld [vmem:[%s6988_s1 + $0x150] ss:$12 sps:$4 sm:$0xff]  }
  0x18   : > { %3267 = vmatpush1.bf16.msra.mxu1 %v4929_v18  ;;  %v4973_v49 = vld [vmem:[%s6988_s1 + $0x124] ss:$12 sps:$4 sm:$0xff]   ;;  %3290 = vmatprep.mubr.bf16.mxu1 %v5726_v48  ;;  %v5005_v51 = vld [vmem:[%s5714_s17 + $0x14] ss:$72 sps:$4 sm:$0xff]   ;;  %v4977_v52 = vld [vmem:[%s6988_s1 + $0x120] ss:$12 sps:$4 sm:$0xff]  }
  0x19   : > { %3353 = vmatpush1.bf16.msra.mxu0 %v4930_v19  ;;  %3268 = vmatprep.subr.bf16.mxu1 %v4931_v20  ;;  %v4975_v50 = vld [vmem:[%s6988_s1 + $0x424] ss:$12 sps:$4 sm:$0xff]   ;;  %v4978_v53 = vld [vmem:[%s6988_s1 + $0x420] ss:$12 sps:$4 sm:$0xff]   ;;  %v4979_v54 = vld [vmem:[%s6988_s1 + $0x13c] ss:$12 sps:$4 sm:$0xff]  }
  0x1a   : > { %3354 = vmatprep.subr.bf16.mxu0 %v4933_v21  ;;  %v4981_v55 = vld [vmem:[%s6988_s1 + $0x43c] ss:$12 sps:$4 sm:$0xff]   ;;  %3376 = vmatprep.mubr.bf16.mxu0 %v5005_v51  ;;  %v4983_v56 = vld [vmem:[%s6988_s1 + $0x138] ss:$12 sps:$4 sm:$0xff]   ;;  %v4985_v58 = vld [vmem:[%s6988_s1 + $0x154] ss:$12 sps:$4 sm:$0xff]  }
  0x1b   : > { %v4984_v57 = vld [vmem:[%s6988_s1 + $0x438] ss:$12 sps:$4 sm:$0xff]   ;;  %v4987_v59 = vld [vmem:[%s6988_s1 + $0x454] ss:$12 sps:$4 sm:$0xff]   ;;  %v4990_v61 = vld [vmem:[%s6988_s1 + $0x450] ss:$12 sps:$4 sm:$0xff]  }
  0x1c   : > { %3269 = vmatpush1.bf16.msra.mxu1 %v4935_v22  ;;  %v4991_v62 = vld [vmem:[%s6988_s1 + $0x16c] ss:$12 sps:$4 sm:$0xff]   ;;  %v4995_v0 = vld [vmem:[%s6988_s1 + $0x168] ss:$12 sps:$4 sm:$0xff]   ;;  %v5002_v2 = vld [vmem:[%s6988_s1 + $0x184] ss:$12 sps:$4 sm:$0xff]  }
  0x1d   : > { %3355 = vmatpush1.bf16.msra.mxu0 %v4936_v23  ;;  %3270 = vmatprep.subr.bf16.mxu1 %v4937_v24  ;;  %v4993_v63 = vld [vmem:[%s6988_s1 + $0x46c] ss:$12 sps:$4 sm:$0xff]   ;;  %v4996_v1 = vld [vmem:[%s6988_s1 + $0x468] ss:$12 sps:$4 sm:$0xff]   ;;  %v5008_v3 = vld [vmem:[%s6988_s1 + $0x484] ss:$12 sps:$4 sm:$0xff]  }
  0x1e   : > { %3356 = vmatprep.subr.bf16.mxu0 %v4939_v25  ;;  %v5785_v4 = vld [vmem:[%s5714_s17] ss:$72 sps:$4 sm:$0xff]   ;;  %v5003_v6 = vld [vmem:[%s5714_s17 + $0x10] ss:$72 sps:$4 sm:$0xff]  }
  0x1f   : > { %v5000_v5 = vld [vmem:[%s6988_s1 + $0x180] ss:$12 sps:$4 sm:$0xff]   ;;  %v5011_v8 = vld [vmem:[%s6988_s1 + $0x19c] ss:$12 sps:$4 sm:$0xff]   ;;  %v5009_v10 = vld [vmem:[%s6988_s1 + $0x198] ss:$12 sps:$4 sm:$0xff]  }
  0x20   : > { %3271 = vmatpush1.bf16.msra.mxu1 %v4941_v26  ;;  %v5006_v7 = vld [vmem:[%s6988_s1 + $0x480] ss:$12 sps:$4 sm:$0xff]   ;;  %v5014_v9 = vld [vmem:[%s6988_s1 + $0x49c] ss:$12 sps:$4 sm:$0xff]   ;;  %v5012_v11 = vld [vmem:[%s6988_s1 + $0x498] ss:$12 sps:$4 sm:$0xff]  }
  0x21   : > { %3357 = vmatpush1.bf16.msra.mxu0 %v4942_v27  ;;  %3272 = vmatprep.subr.bf16.mxu1 %v4943_v28  ;;  %v5017_v12 = vld [vmem:[%s6988_s1 + $0x1b4] ss:$12 sps:$4 sm:$0xff]   ;;  %v5015_v14 = vld [vmem:[%s6988_s1 + $0x1b0] ss:$12 sps:$4 sm:$0xff]   ;;  %v5023_v16 = vld [vmem:[%s6988_s1 + $0x1cc] ss:$12 sps:$4 sm:$0xff]  }
  0x22   : > { %3358 = vmatprep.subr.bf16.mxu0 %v4945_v29  ;;  %v5020_v13 = vld [vmem:[%s6988_s1 + $0x4b4] ss:$12 sps:$4 sm:$0xff]   ;;  %v5018_v15 = vld [vmem:[%s6988_s1 + $0x4b0] ss:$12 sps:$4 sm:$0xff]   ;;  %v5026_v17 = vld [vmem:[%s6988_s1 + $0x4cc] ss:$12 sps:$4 sm:$0xff]  }
  0x23   : > { %v5021_v18 = vld [vmem:[%s6988_s1 + $0x1c8] ss:$12 sps:$4 sm:$0xff]   ;;  %v5029_v20 = vld [vmem:[%s6988_s1 + $0x1e4] ss:$12 sps:$4 sm:$0xff]   ;;  %v5027_v22 = vld [vmem:[%s6988_s1 + $0x1e0] ss:$12 sps:$4 sm:$0xff]  }
  0x24   : > { %3273 = vmatpush1.bf16.msra.mxu1 %v4947_v30  ;;  %v5024_v19 = vld [vmem:[%s6988_s1 + $0x4c8] ss:$12 sps:$4 sm:$0xff]   ;;  %v5032_v21 = vld [vmem:[%s6988_s1 + $0x4e4] ss:$12 sps:$4 sm:$0xff]   ;;  %v5030_v23 = vld [vmem:[%s6988_s1 + $0x4e0] ss:$12 sps:$4 sm:$0xff]  }
  0x25   : > { %3359 = vmatpush1.bf16.msra.mxu0 %v4948_v31  ;;  %3274 = vmatprep.subr.bf16.mxu1 %v4949_v32  ;;  %v5035_v24 = vld [vmem:[%s6988_s1 + $0x1fc] ss:$12 sps:$4 sm:$0xff]   ;;  %v5033_v26 = vld [vmem:[%s6988_s1 + $0x1f8] ss:$12 sps:$4 sm:$0xff]   ;;  %v5041_v28 = vld [vmem:[%s6988_s1 + $0x214] ss:$12 sps:$4 sm:$0xff]  }
  0x26   : > { %3360 = vmatprep.subr.bf16.mxu0 %v4951_v33  ;;  %v5038_v25 = vld [vmem:[%s6988_s1 + $0x4fc] ss:$12 sps:$4 sm:$0xff]   ;;  %v5036_v27 = vld [vmem:[%s6988_s1 + $0x4f8] ss:$12 sps:$4 sm:$0xff]   ;;  %v5044_v29 = vld [vmem:[%s6988_s1 + $0x514] ss:$12 sps:$4 sm:$0xff]  }
  0x27   : > { %v5039_v30 = vld [vmem:[%s6988_s1 + $0x210] ss:$12 sps:$4 sm:$0xff]   ;;  %v5047_v32 = vld [vmem:[%s6988_s1 + $0x22c] ss:$12 sps:$4 sm:$0xff]  }
  0x28   : > { %3275 = vmatpush1.bf16.msra.mxu1 %v4953_v34  ;;  %v5042_v31 = vld [vmem:[%s6988_s1 + $0x510] ss:$12 sps:$4 sm:$0xff]   ;;  %v5050_v33 = vld [vmem:[%s6988_s1 + $0x52c] ss:$12 sps:$4 sm:$0xff]  }
  0x29   : > { %3361 = vmatpush1.bf16.msra.mxu0 %v4954_v35  ;;  %3276 = vmatprep.subr.bf16.mxu1 %v4955_v36  ;;  %v5874_v34 = vld [vmem:[%s5714_s17 + $0xc] ss:$72 sps:$4 sm:$0xff]   ;;  %v5104_v35 = vld [vmem:[%s5714_s17 + $0x1c] ss:$72 sps:$4 sm:$0xff]  }
  0x2a   : > { %3362 = vmatprep.subr.bf16.mxu0 %v4957_v37  ;;  %v5045_v36 = vld [vmem:[%s6988_s1 + $0x228] ss:$12 sps:$4 sm:$0xff]   ;;  %v5071_v51 = vld [vmem:[%s6988_s1 + $0x28c] ss:$12 sps:$4 sm:$0xff]  }
  0x2b   : > { %v5048_v37 = vld [vmem:[%s6988_s1 + $0x528] ss:$12 sps:$4 sm:$0xff]  }
  0x2c   : > { %3277 = vmatpush1.bf16.msra.mxu1 %v4959_v38  ;;  %v5053_v38 = vld [vmem:[%s6988_s1 + $0x244] ss:$12 sps:$4 sm:$0xff]  }
  0x2d   : > { %3363 = vmatpush1.bf16.msra.mxu0 %v4960_v39  ;;  %3278 = vmatprep.subr.bf16.mxu1 %v4961_v40  ;;  %v5056_v39 = vld [vmem:[%s6988_s1 + $0x544] ss:$12 sps:$4 sm:$0xff]   ;;  %v5051_v40 = vld [vmem:[%s6988_s1 + $0x240] ss:$12 sps:$4 sm:$0xff]  }
  0x2e   : > { %3364 = vmatprep.subr.bf16.mxu0 %v4963_v41  ;;  %v5054_v41 = vld [vmem:[%s6988_s1 + $0x540] ss:$12 sps:$4 sm:$0xff]  }
  0x30   : > { %3279 = vmatpush1.bf16.msra.mxu1 %v4965_v42  ;;  %v5059_v42 = vld [vmem:[%s6988_s1 + $0x25c] ss:$12 sps:$4 sm:$0xff]  }
  0x31   : > { %3365 = vmatpush1.bf16.msra.mxu0 %v4966_v43  ;;  %3280 = vmatprep.subr.bf16.mxu1 %v4967_v44  ;;  %v5062_v43 = vld [vmem:[%s6988_s1 + $0x55c] ss:$12 sps:$4 sm:$0xff]   ;;  %v5057_v44 = vld [vmem:[%s6988_s1 + $0x258] ss:$12 sps:$4 sm:$0xff]  }
  0x32   : > { %3366 = vmatprep.subr.bf16.mxu0 %v4969_v45  ;;  %v5060_v45 = vld [vmem:[%s6988_s1 + $0x558] ss:$12 sps:$4 sm:$0xff]  }
  0x34   : > { %3281 = vmatpush1.bf16.msra.mxu1 %v4971_v46  ;;  %v5065_v46 = vld [vmem:[%s6988_s1 + $0x274] ss:$12 sps:$4 sm:$0xff]  }
  0x35   : > { %3367 = vmatpush1.bf16.msra.mxu0 %v4972_v47  ;;  %3282 = vmatprep.subr.bf16.mxu1 %v4973_v49  ;;  %v5068_v47 = vld [vmem:[%s6988_s1 + $0x574] ss:$12 sps:$4 sm:$0xff]   ;;  %v5063_v49 = vld [vmem:[%s6988_s1 + $0x270] ss:$12 sps:$4 sm:$0xff]  }
  0x36   : > { %3368 = vmatprep.subr.bf16.mxu0 %v4975_v50  ;;  %v5066_v50 = vld [vmem:[%s6988_s1 + $0x570] ss:$12 sps:$4 sm:$0xff]  }
  0x38   : > { %3283 = vmatpush1.bf16.msra.mxu1 %v4977_v52  ;;  %v5074_v52 = vld [vmem:[%s6988_s1 + $0x58c] ss:$12 sps:$4 sm:$0xff]  }
  0x39   : > { %3369 = vmatpush1.bf16.msra.mxu0 %v4978_v53  ;;  %3284 = vmatprep.subr.bf16.mxu1 %v4979_v54  ;;  %v5069_v53 = vld [vmem:[%s6988_s1 + $0x288] ss:$12 sps:$4 sm:$0xff]  }
  0x3a   : > { %3370 = vmatprep.subr.bf16.mxu0 %v4981_v55  ;;  %v5072_v54 = vld [vmem:[%s6988_s1 + $0x588] ss:$12 sps:$4 sm:$0xff]   ;;  %v5077_v55 = vld [vmem:[%s6988_s1 + $0x2a4] ss:$12 sps:$4 sm:$0xff]  }
  0x3c   : > { %3285 = vmatpush1.bf16.msra.mxu1 %v4983_v56  ;;  %v5080_v56 = vld [vmem:[%s6988_s1 + $0x5a4] ss:$12 sps:$4 sm:$0xff]  }
  0x3d   : > { %3371 = vmatpush1.bf16.msra.mxu0 %v4984_v57  ;;  %3286 = vmatprep.subr.bf16.mxu1 %v4985_v58  ;;  %v5075_v57 = vld [vmem:[%s6988_s1 + $0x2a0] ss:$12 sps:$4 sm:$0xff]  }
  0x3e   : > { %3372 = vmatprep.subr.bf16.mxu0 %v4987_v59  ;;  %v5078_v58 = vld [vmem:[%s6988_s1 + $0x5a0] ss:$12 sps:$4 sm:$0xff]   ;;  %v5083_v59 = vld [vmem:[%s6988_s1 + $0x2bc] ss:$12 sps:$4 sm:$0xff]  }
  0x40   : > { %3287 = vmatpush1.bf16.msra.mxu1 %v4989_v60  ;;  %v5086_v60 = vld [vmem:[%s6988_s1 + $0x5bc] ss:$12 sps:$4 sm:$0xff]  }
  0x41   : > { %3373 = vmatpush1.bf16.msra.mxu0 %v4990_v61  ;;  %3288 = vmatprep.subr.bf16.mxu1 %v4991_v62  ;;  %v5081_v61 = vld [vmem:[%s6988_s1 + $0x2b8] ss:$12 sps:$4 sm:$0xff]  }
  0x42   : > { %3374 = vmatprep.subr.bf16.mxu0 %v4993_v63  ;;  %v5084_v62 = vld [vmem:[%s6988_s1 + $0x5b8] ss:$12 sps:$4 sm:$0xff]   ;;  %v5089_v63 = vld [vmem:[%s6988_s1 + $0x2d4] ss:$12 sps:$4 sm:$0xff]  }
  0x44   : > { %3289 = vmatpush1.bf16.msra.mxu1 %v4995_v0  ;;  %v5092_v0 = vld [vmem:[%s6988_s1 + $0x5d4] ss:$12 sps:$4 sm:$0xff]  }
  0x45   : > { %3375 = vmatpush1.bf16.msra.mxu0 %v4996_v1  ;;  %3301 = vmatprep.subr.bf16.mxu1 %v5002_v2  ;;  %v5087_v1 = vld [vmem:[%s6988_s1 + $0x2d0] ss:$12 sps:$4 sm:$0xff]  }
  0x46   : > { %3387 = vmatprep.subr.bf16.mxu0 %v5008_v3  ;;  %v5090_v2 = vld [vmem:[%s6988_s1 + $0x5d0] ss:$12 sps:$4 sm:$0xff]   ;;  %v5095_v3 = vld [vmem:[%s6988_s1 + $0x2ec] ss:$12 sps:$4 sm:$0xff]  }
  0x47   : > { %3291 = vmatmul.mubr.bf16.vlgmr.msra.gmra.mrb[0].mxu1 %v5785_v4 }
  0x48   : > { %3377 = vmatmul.mubr.bf16.vlgmr.msra.gmra.mrb[0].mxu0 %v5003_v6  ;;  %3302 = vmatpush1.bf16.msra.mxu1 %v5000_v5  ;;  %v5098_v5 = vld [vmem:[%s6988_s1 + $0x5ec] ss:$12 sps:$4 sm:$0xff]   ;;  %v5093_v6 = vld [vmem:[%s6988_s1 + $0x2e8] ss:$12 sps:$4 sm:$0xff]  }
  0x49   : > { %3388 = vmatpush1.bf16.msra.mxu0 %v5006_v7  ;;  %3303 = vmatprep.subr.bf16.mxu1 %v5011_v8  ;;  %v5096_v7 = vld [vmem:[%s6988_s1 + $0x5e8] ss:$12 sps:$4 sm:$0xff]   ;;  %v5107_v8 = vld [vmem:[%s6988_s1 + $0x604] ss:$12 sps:$4 sm:$0xff]  }
  0x4a   : > { %3389 = vmatprep.subr.bf16.mxu0 %v5014_v9  ;;  %3333 = vmatprep.mubr.bf16.mxu1 %v5874_v34  ;;  %v5984_v9 = vld [vmem:[%s5714_s17 + $0x8] ss:$72 sps:$4 sm:$0xff]  }
  0x4b   : > { %3419 = vmatprep.mubr.bf16.mxu0 %v5104_v35  ;;  %v5137_v35 = vld [vmem:[%s6988_s1 + $0x694] ss:$12 sps:$4 sm:$0xff]  }
  0x4c   : > { %3304 = vmatpush1.bf16.msra.mxu1 %v5009_v10  ;;  %v5108_v10 = vld [vmem:[%s6988_s1 + $0xc8] ss:$12 sps:$4 sm:$0xff]  }
  0x4d   : > { %3390 = vmatpush1.bf16.msra.mxu0 %v5012_v11  ;;  %3305 = vmatprep.subr.bf16.mxu1 %v5017_v12  ;;  %v5102_v11 = vld [vmem:[%s5714_s17 + $0x18] ss:$72 sps:$4 sm:$0xff]  }
  0x4e   : > { %3391 = vmatprep.subr.bf16.mxu0 %v5020_v13  ;;  %v5105_v12 = vld [vmem:[%s6988_s1 + $0x600] ss:$12 sps:$4 sm:$0xff]   ;;  %v5109_v13 = vld [vmem:[%s6988_s1 + $0x8] ss:$12 sps:$4 sm:$0xff]  }
  0x50   : > { %3306 = vmatpush1.bf16.msra.mxu1 %v5015_v14  ;;  %v5112_v14 = vld [vmem:[%s6988_s1 + $0x61c] ss:$12 sps:$4 sm:$0xff]  }
  0x51   : > { %3392 = vmatpush1.bf16.msra.mxu0 %v5018_v15  ;;  %3307 = vmatprep.subr.bf16.mxu1 %v5023_v16  ;;  %v5113_v15 = vld [vmem:[%s6988_s1 + $0xe0] ss:$12 sps:$4 sm:$0xff]   ;;  %v5110_v16 = vld [vmem:[%s6988_s1 + $0x618] ss:$12 sps:$4 sm:$0xff]  }
  0x52   : > { %3393 = vmatprep.subr.bf16.mxu0 %v5026_v17  ;;  %v5114_v17 = vld [vmem:[%s6988_s1 + $0x20] ss:$12 sps:$4 sm:$0xff]  }
  0x54   : > { %3308 = vmatpush1.bf16.msra.mxu1 %v5021_v18  ;;  %v5117_v18 = vld [vmem:[%s6988_s1 + $0x634] ss:$12 sps:$4 sm:$0xff]  }
  0x55   : > { %3394 = vmatpush1.bf16.msra.mxu0 %v5024_v19  ;;  %3309 = vmatprep.subr.bf16.mxu1 %v5029_v20  ;;  %v5118_v19 = vld [vmem:[%s6988_s1 + $0xf8] ss:$12 sps:$4 sm:$0xff]   ;;  %v5115_v20 = vld [vmem:[%s6988_s1 + $0x630] ss:$12 sps:$4 sm:$0xff]  }
  0x56   : > { %3395 = vmatprep.subr.bf16.mxu0 %v5032_v21  ;;  %v5119_v21 = vld [vmem:[%s6988_s1 + $0x38] ss:$12 sps:$4 sm:$0xff]  }
  0x58   : > { %3310 = vmatpush1.bf16.msra.mxu1 %v5027_v22  ;;  %v5122_v22 = vld [vmem:[%s6988_s1 + $0x64c] ss:$12 sps:$4 sm:$0xff]  }
  0x59   : > { %3396 = vmatpush1.bf16.msra.mxu0 %v5030_v23  ;;  %3311 = vmatprep.subr.bf16.mxu1 %v5035_v24  ;;  %v5123_v23 = vld [vmem:[%s6988_s1 + $0x110] ss:$12 sps:$4 sm:$0xff]  }
  0x5a   : > { %3397 = vmatprep.subr.bf16.mxu0 %v5038_v25  ;;  %v5124_v24 = vld [vmem:[%s6988_s1 + $0x50] ss:$12 sps:$4 sm:$0xff]  }
  0x5b   : > { %v5127_v25 = vld [vmem:[%s6988_s1 + $0x664] ss:$12 sps:$4 sm:$0xff]  }
  0x5c   : > { %3312 = vmatpush1.bf16.msra.mxu1 %v5033_v26  ;;  %v5128_v26 = vld [vmem:[%s6988_s1 + $0x128] ss:$12 sps:$4 sm:$0xff]  }
  0x5d   : > { %3398 = vmatpush1.bf16.msra.mxu0 %v5036_v27  ;;  %3313 = vmatprep.subr.bf16.mxu1 %v5041_v28  ;;  %v5125_v27 = vld [vmem:[%s6988_s1 + $0x660] ss:$12 sps:$4 sm:$0xff]   ;;  %v5129_v28 = vld [vmem:[%s6988_s1 + $0x68] ss:$12 sps:$4 sm:$0xff]  }
  0x5e   : > { %3399 = vmatprep.subr.bf16.mxu0 %v5044_v29  ;;  %v5132_v29 = vld [vmem:[%s6988_s1 + $0x67c] ss:$12 sps:$4 sm:$0xff]  }
  0x60   : > { %3314 = vmatpush1.bf16.msra.mxu1 %v5039_v30  ;;  %v5133_v30 = vld [vmem:[%s6988_s1 + $0x140] ss:$12 sps:$4 sm:$0xff]  }
  0x61   : > { %3400 = vmatpush1.bf16.msra.mxu0 %v5042_v31  ;;  %3315 = vmatprep.subr.bf16.mxu1 %v5047_v32  ;;  %v6053_v31 = vld [vmem:[%s5714_s17 + $0x24] ss:$72 sps:$4 sm:$0xff]  }
  0x62   : > { %3401 = vmatprep.subr.bf16.mxu0 %v5050_v33  ;;  %v5130_v32 = vld [vmem:[%s6988_s1 + $0x678] ss:$12 sps:$4 sm:$0xff]   ;;  %v5134_v33 = vld [vmem:[%s6988_s1 + $0x80] ss:$12 sps:$4 sm:$0xff]  }
  0x64   : > { %3316 = vmatpush1.bf16.msra.mxu1 %v5045_v36  ;;  %v5138_v36 = vld [vmem:[%s6988_s1 + $0x158] ss:$12 sps:$4 sm:$0xff]  }
  0x65   : > { %3402 = vmatpush1.bf16.msra.mxu0 %v5048_v37  ;;  %3317 = vmatprep.subr.bf16.mxu1 %v5053_v38  ;;  %v5135_v37 = vld [vmem:[%s6988_s1 + $0x690] ss:$12 sps:$4 sm:$0xff]   ;;  %v5139_v38 = vld [vmem:[%s6988_s1 + $0x98] ss:$12 sps:$4 sm:$0xff]  }
  0x66   : > { %3403 = vmatprep.subr.bf16.mxu0 %v5056_v39  ;;  %v5142_v39 = vld [vmem:[%s6988_s1 + $0x6ac] ss:$12 sps:$4 sm:$0xff]  }
  0x68   : > { %3318 = vmatpush1.bf16.msra.mxu1 %v5051_v40  ;;  %v5143_v40 = vld [vmem:[%s6988_s1 + $0x170] ss:$12 sps:$4 sm:$0xff]  }
  0x69   : > { %3404 = vmatpush1.bf16.msra.mxu0 %v5054_v41  ;;  %3319 = vmatprep.subr.bf16.mxu1 %v5059_v42  ;;  %v5140_v41 = vld [vmem:[%s6988_s1 + $0x6a8] ss:$12 sps:$4 sm:$0xff]   ;;  %v5144_v42 = vld [vmem:[%s6988_s1 + $0xb0] ss:$12 sps:$4 sm:$0xff]  }
  0x6a   : > { %3405 = vmatprep.subr.bf16.mxu0 %v5062_v43  ;;  %v5147_v43 = vld [vmem:[%s6988_s1 + $0x6c4] ss:$12 sps:$4 sm:$0xff]  }
  0x6c   : > { %3320 = vmatpush1.bf16.msra.mxu1 %v5057_v44  ;;  %v5148_v44 = vld [vmem:[%s6988_s1 + $0x248] ss:$12 sps:$4 sm:$0xff]  }
  0x6d   : > { %3406 = vmatpush1.bf16.msra.mxu0 %v5060_v45  ;;  %3321 = vmatprep.subr.bf16.mxu1 %v5065_v46  ;;  %v5145_v45 = vld [vmem:[%s6988_s1 + $0x6c0] ss:$12 sps:$4 sm:$0xff]   ;;  %v5149_v46 = vld [vmem:[%s6988_s1 + $0x188] ss:$12 sps:$4 sm:$0xff]  }
  0x6e   : > { %3407 = vmatprep.subr.bf16.mxu0 %v5068_v47  ;;  %v5152_v47 = vld [vmem:[%s6988_s1 + $0x6dc] ss:$12 sps:$4 sm:$0xff]  }
  0x70   : > { %3322 = vmatpush1.bf16.msra.mxu1 %v5063_v49  ;;  %v5153_v49 = vld [vmem:[%s6988_s1 + $0x260] ss:$12 sps:$4 sm:$0xff]  }
  0x71   : > { %3408 = vmatpush1.bf16.msra.mxu0 %v5066_v50  ;;  %3323 = vmatprep.subr.bf16.mxu1 %v5071_v51  ;;  %v5150_v50 = vld [vmem:[%s6988_s1 + $0x6d8] ss:$12 sps:$4 sm:$0xff]   ;;  %v5154_v51 = vld [vmem:[%s6988_s1 + $0x1a0] ss:$12 sps:$4 sm:$0xff]  }
  0x72   : > { %3409 = vmatprep.subr.bf16.mxu0 %v5074_v52  ;;  %v5157_v52 = vld [vmem:[%s6988_s1 + $0x6f4] ss:$12 sps:$4 sm:$0xff]  }
  0x74   : > { %3324 = vmatpush1.bf16.msra.mxu1 %v5069_v53  ;;  %v5158_v53 = vld [vmem:[%s6988_s1 + $0x278] ss:$12 sps:$4 sm:$0xff]  }
  0x75   : > { %3410 = vmatpush1.bf16.msra.mxu0 %v5072_v54  ;;  %3325 = vmatprep.subr.bf16.mxu1 %v5077_v55  ;;  %v5159_v54 = vld [vmem:[%s6988_s1 + $0x1b8] ss:$12 sps:$4 sm:$0xff]  }
  0x76   : > { %3411 = vmatprep.subr.bf16.mxu0 %v5080_v56  ;;  %v5162_v55 = vld [vmem:[%s6988_s1 + $0x70c] ss:$12 sps:$4 sm:$0xff]   ;;  %v5160_v56 = vld [vmem:[%s6988_s1 + $0x708] ss:$12 sps:$4 sm:$0xff]  }
  0x78   : > { %3326 = vmatpush1.bf16.msra.mxu1 %v5075_v57  ;;  %v5164_v57 = vld [vmem:[%s6988_s1 + $0x1d0] ss:$12 sps:$4 sm:$0xff]  }
  0x79   : > { %3412 = vmatpush1.bf16.msra.mxu0 %v5078_v58  ;;  %3327 = vmatprep.subr.bf16.mxu1 %v5083_v59  ;;  %v5167_v58 = vld [vmem:[%s6988_s1 + $0x724] ss:$12 sps:$4 sm:$0xff]   ;;  %v5168_v59 = vld [vmem:[%s6988_s1 + $0x2a8] ss:$12 sps:$4 sm:$0xff]  }
  0x7a   : > { %3413 = vmatprep.subr.bf16.mxu0 %v5086_v60  ;;  %v5165_v60 = vld [vmem:[%s6988_s1 + $0x720] ss:$12 sps:$4 sm:$0xff]  }
  0x7c   : > { %3328 = vmatpush1.bf16.msra.mxu1 %v5081_v61  ;;  %v5169_v61 = vld [vmem:[%s6988_s1 + $0x1e8] ss:$12 sps:$4 sm:$0xff]  }
  0x7d   : > { %3414 = vmatpush1.bf16.msra.mxu0 %v5084_v62  ;;  %3329 = vmatprep.subr.bf16.mxu1 %v5089_v63  ;;  %v5172_v62 = vld [vmem:[%s6988_s1 + $0x73c] ss:$12 sps:$4 sm:$0xff]   ;;  %v5173_v63 = vld [vmem:[%s6988_s1 + $0x2c0] ss:$12 sps:$4 sm:$0xff]  }
  0x7e   : > { %3415 = vmatprep.subr.bf16.mxu0 %v5092_v0  ;;  %v5170_v0 = vld [vmem:[%s6988_s1 + $0x738] ss:$12 sps:$4 sm:$0xff]  }
  0x80   : > { %3330 = vmatpush1.bf16.msra.mxu1 %v5087_v1  ;;  %v5174_v1 = vld [vmem:[%s6988_s1 + $0x200] ss:$12 sps:$4 sm:$0xff]  }
  0x81   : > { %3416 = vmatpush1.bf16.msra.mxu0 %v5090_v2  ;;  %3331 = vmatprep.subr.bf16.mxu1 %v5095_v3  ;;  %v5177_v2 = vld [vmem:[%s6988_s1 + $0x754] ss:$12 sps:$4 sm:$0xff]   ;;  %v5178_v3 = vld [vmem:[%s6988_s1 + $0x2d8] ss:$12 sps:$4 sm:$0xff]  }
  0x82   : > { %3417 = vmatprep.subr.bf16.mxu0 %v5098_v5  ;;  %v5175_v5 = vld [vmem:[%s6988_s1 + $0x750] ss:$12 sps:$4 sm:$0xff]  }
  0x84   : > { %3332 = vmatpush1.bf16.msra.mxu1 %v5093_v6  ;;  %v5179_v6 = vld [vmem:[%s6988_s1 + $0x218] ss:$12 sps:$4 sm:$0xff]  }
  0x85   : > { %3418 = vmatpush1.bf16.msra.mxu0 %v5096_v7  ;;  %4641 = vmatprep.subr.bf16.mxu1 %v5108_v10  ;;  %v5182_v7 = vld [vmem:[%s6988_s1 + $0x76c] ss:$12 sps:$4 sm:$0xff]   ;;  %v5180_v10 = vld [vmem:[%s6988_s1 + $0x768] ss:$12 sps:$4 sm:$0xff]  }
  0x86   : > { %3430 = vmatprep.subr.bf16.mxu0 %v5107_v8  ;;  %v5183_v8 = vld [vmem:[%s6988_s1 + $0x2f0] ss:$12 sps:$4 sm:$0xff]  }
  0x87   : > { %3334 = vmatmul.mubr.bf16.vlgmr.msra.gmra.mrb[0].mxu1 %v5984_v9 }
  0x88   : > { %3420 = vmatmul.mubr.bf16.vlgmr.msra.gmra.mrb[0].mxu0 %v5102_v11  ;;  %4642 = vmatpush3.bf16.msra.mxu1 %v5109_v13  ;;  %v5184_v11 = vld [vmem:[%s6988_s1 + $0x230] ss:$12 sps:$4 sm:$0xff]  }
  0x89   : > { %3431 = vmatpush1.bf16.msra.mxu0 %v5105_v12  ;;  %4643 = vmatprep.subr.bf16.mxu1 %v5113_v15  ;;  %v6185_v12 = vld [vmem:[%s5714_s17 + $0x20] ss:$72 sps:$4 sm:$0xff]   ;;  %v5190_v13 = vld [vmem:[%s6988_s1 + $0x784] ss:$12 sps:$4 sm:$0xff]  }
  0x8a   : > { %3432 = vmatprep.subr.bf16.mxu0 %v5112_v14  ;;  %3677 = vmatprep.mubr.bf16.mxu1 %v5726_v48  ;;  %v5120_v48 = vld [vmem:[%s6988_s1 + $0x648] ss:$12 sps:$4 sm:$0xff]   ;;  %v5188_v15 = vld [vmem:[%s6988_s1 + $0x780] ss:$12 sps:$4 sm:$0xff]  }
  0x8b   : > { %3462 = vmatprep.mubr.bf16.mxu0 %v6053_v31  ;;  %v5191_v14 = vld [vmem:[%s6988_s1 + $0x3c8] ss:$12 sps:$4 sm:$0xff]  }
  0x8c   : > { %4644 = vmatpush3.bf16.msra.mxu1 %v5114_v17  ;;  %v5195_v17 = vld [vmem:[%s6988_s1 + $0x79c] ss:$12 sps:$4 sm:$0xff]  }
  0x8d   : > { %3433 = vmatpush1.bf16.msra.mxu0 %v5110_v16  ;;  %4645 = vmatprep.subr.bf16.mxu1 %v5118_v19  ;;  %v5192_v16 = vld [vmem:[%s6988_s1 + $0x308] ss:$12 sps:$4 sm:$0xff]   ;;  %v5193_v19 = vld [vmem:[%s6988_s1 + $0x798] ss:$12 sps:$4 sm:$0xff]  }
  0x8e   : > { %3434 = vmatprep.subr.bf16.mxu0 %v5117_v18  ;;  %v5196_v18 = vld [vmem:[%s6988_s1 + $0x3e0] ss:$12 sps:$4 sm:$0xff]  }
  0x90   : > { %4646 = vmatpush3.bf16.msra.mxu1 %v5119_v21  ;;  %v5200_v21 = vld [vmem:[%s6988_s1 + $0x7b4] ss:$12 sps:$4 sm:$0xff]  }
  0x91   : > { %3435 = vmatpush1.bf16.msra.mxu0 %v5115_v20  ;;  %4647 = vmatprep.subr.bf16.mxu1 %v5123_v23  ;;  %v5197_v20 = vld [vmem:[%s6988_s1 + $0x320] ss:$12 sps:$4 sm:$0xff]   ;;  %v5504_v23 = vld [vmem:[%s5714_s17 + $0x14] ss:$72 sps:$4 sm:$0xff]  }
  0x92   : > { %3436 = vmatprep.subr.bf16.mxu0 %v5122_v22  ;;  %v5198_v22 = vld [vmem:[%s6988_s1 + $0x7b0] ss:$12 sps:$4 sm:$0xff]  }
  0x94   : > { %4648 = vmatpush3.bf16.msra.mxu1 %v5124_v24  ;;  %v6227_v24 = vld [vmem:[%s5714_s17 + $0x2c] ss:$72 sps:$4 sm:$0xff]  }
  0x95   : > { %3437 = vmatpush1.bf16.msra.mxu0 %v5120_v48  ;;  %4649 = vmatprep.subr.bf16.mxu1 %v5128_v26  ;;  %v5202_v48 = vld [vmem:[%s6988_s1 + $0x338] ss:$12 sps:$4 sm:$0xff]   ;;  %v5206_v26 = vld [vmem:[%s6988_s1 + $0x410] ss:$12 sps:$4 sm:$0xff]  }
  0x96   : > { %3438 = vmatprep.subr.bf16.mxu0 %v5127_v25  ;;  %v5205_v25 = vld [vmem:[%s6988_s1 + $0x7cc] ss:$12 sps:$4 sm:$0xff]  }
  0x98   : > { %4650 = vmatpush3.bf16.msra.mxu1 %v5129_v28  ;;  %v5207_v28 = vld [vmem:[%s6988_s1 + $0x350] ss:$12 sps:$4 sm:$0xff]  }
  0x99   : > { %3439 = vmatpush1.bf16.msra.mxu0 %v5125_v27  ;;  %4651 = vmatprep.subr.bf16.mxu1 %v5133_v30  ;;  %v5203_v27 = vld [vmem:[%s6988_s1 + $0x7c8] ss:$12 sps:$4 sm:$0xff]  }
  0x9a   : > { %3440 = vmatprep.subr.bf16.mxu0 %v5132_v29  ;;  %v5210_v29 = vld [vmem:[%s6988_s1 + $0x7e4] ss:$12 sps:$4 sm:$0xff]   ;;  %v5211_v30 = vld [vmem:[%s6988_s1 + $0x428] ss:$12 sps:$4 sm:$0xff]  }
  0x9c   : > { %4652 = vmatpush3.bf16.msra.mxu1 %v5134_v33  ;;  %v5212_v33 = vld [vmem:[%s6988_s1 + $0x368] ss:$12 sps:$4 sm:$0xff]  }
  0x9d   : > { %3441 = vmatpush1.bf16.msra.mxu0 %v5130_v32  ;;  %4653 = vmatprep.subr.bf16.mxu1 %v5138_v36  ;;  %v5208_v32 = vld [vmem:[%s6988_s1 + $0x7e0] ss:$12 sps:$4 sm:$0xff]  }
  0x9e   : > { %3442 = vmatprep.subr.bf16.mxu0 %v5137_v35  ;;  %v5215_v35 = vld [vmem:[%s6988_s1 + $0x7fc] ss:$12 sps:$4 sm:$0xff]   ;;  %v5216_v36 = vld [vmem:[%s6988_s1 + $0x440] ss:$12 sps:$4 sm:$0xff]  }
  0xa0   : > { %4654 = vmatpush3.bf16.msra.mxu1 %v5139_v38  ;;  %v5217_v38 = vld [vmem:[%s6988_s1 + $0x380] ss:$12 sps:$4 sm:$0xff]  }
  0xa1   : > { %3443 = vmatpush1.bf16.msra.mxu0 %v5135_v37  ;;  %4655 = vmatprep.subr.bf16.mxu1 %v5143_v40  ;;  %v5213_v37 = vld [vmem:[%s6988_s1 + $0x7f8] ss:$12 sps:$4 sm:$0xff]  }
  0xa2   : > { %3444 = vmatprep.subr.bf16.mxu0 %v5142_v39  ;;  %v5220_v39 = vld [vmem:[%s6988_s1 + $0x814] ss:$12 sps:$4 sm:$0xff]   ;;  %v5221_v40 = vld [vmem:[%s6988_s1 + $0x458] ss:$12 sps:$4 sm:$0xff]  }
  0xa4   : > { %4656 = vmatpush3.bf16.msra.mxu1 %v5144_v42  ;;  %v5222_v42 = vld [vmem:[%s6988_s1 + $0x398] ss:$12 sps:$4 sm:$0xff]  }
  0xa5   : > { %3445 = vmatpush1.bf16.msra.mxu0 %v5140_v41  ;;  %4663 = vmatprep.subr.bf16.mxu1 %v5148_v44  ;;  %v5218_v41 = vld [vmem:[%s6988_s1 + $0x810] ss:$12 sps:$4 sm:$0xff]  }
  0xa6   : > { %3446 = vmatprep.subr.bf16.mxu0 %v5147_v43  ;;  %v5225_v43 = vld [vmem:[%s6988_s1 + $0x82c] ss:$12 sps:$4 sm:$0xff]   ;;  %v5226_v44 = vld [vmem:[%s6988_s1 + $0x470] ss:$12 sps:$4 sm:$0xff]  }
  0xa7   : > { %3678 = vmatmul.mubr.bf16.vlgmr.msra.gmra.mrb[4].mxu1 %v5785_v4  ;;  %v5155_v4 = vld [vmem:[%s6988_s1 + $0x6f0] ss:$12 sps:$4 sm:$0xff]  }
  0xa8   : > { %4664 = vmatpush3.bf16.msra.mxu1 %v5149_v46  ;;  %3718 = vmatprep.mubr.bf16.mxu1 %v5874_v34  ;;  %v5163_v34 = vld [vmem:[%s6988_s1 + $0x290] ss:$12 sps:$4 sm:$0xff]  }
  0xa9   : > { %3447 = vmatpush1.bf16.msra.mxu0 %v5145_v45  ;;  %4665 = vmatprep.subr.bf16.mxu1 %v5153_v49  ;;  %v5223_v45 = vld [vmem:[%s6988_s1 + $0x828] ss:$12 sps:$4 sm:$0xff]   ;;  %v5227_v46 = vld [vmem:[%s6988_s1 + $0x3b0] ss:$12 sps:$4 sm:$0xff]  }
  0xaa   : > { %3448 = vmatprep.subr.bf16.mxu0 %v5152_v47  ;;  %v5230_v47 = vld [vmem:[%s6988_s1 + $0x844] ss:$12 sps:$4 sm:$0xff]   ;;  %v5231_v49 = vld [vmem:[%s6988_s1 + $0x548] ss:$12 sps:$4 sm:$0xff]  }
  0xac   : > { %4666 = vmatpush3.bf16.msra.mxu1 %v5154_v51  ;;  %v5232_v51 = vld [vmem:[%s6988_s1 + $0x488] ss:$12 sps:$4 sm:$0xff]  }
  0xad   : > { %3449 = vmatpush1.bf16.msra.mxu0 %v5150_v50  ;;  %4667 = vmatprep.subr.bf16.mxu1 %v5158_v53  ;;  %v5228_v50 = vld [vmem:[%s6988_s1 + $0x840] ss:$12 sps:$4 sm:$0xff]  }
  0xae   : > { %3450 = vmatprep.subr.bf16.mxu0 %v5157_v52  ;;  %v5235_v52 = vld [vmem:[%s6988_s1 + $0x85c] ss:$12 sps:$4 sm:$0xff]   ;;  %v5236_v53 = vld [vmem:[%s6988_s1 + $0x560] ss:$12 sps:$4 sm:$0xff]  }
  0xb0   : > { %4668 = vmatpush3.bf16.msra.mxu1 %v5159_v54  ;;  %v5233_v54 = vld [vmem:[%s6988_s1 + $0x858] ss:$12 sps:$4 sm:$0xff]  }
  0xb1   : > { %3451 = vmatpush1.bf16.msra.mxu0 %v5155_v4  ;;  %4669 = vmatprep.subr.bf16.mxu1 %v5163_v34  ;;  %v5505_v4 = vld [vmem:[%s5714_s17 + $0x10] ss:$72 sps:$4 sm:$0xff]   ;;  %v5240_v34 = vld [vmem:[%s6988_s1 + $0x874] ss:$12 sps:$4 sm:$0xff]  }
  0xb2   : > { %3452 = vmatprep.subr.bf16.mxu0 %v5162_v55  ;;  %v5237_v55 = vld [vmem:[%s6988_s1 + $0x4a0] ss:$12 sps:$4 sm:$0xff]  }
  0xb4   : > { %4670 = vmatpush3.bf16.msra.mxu1 %v5164_v57  ;;  %v5238_v57 = vld [vmem:[%s6988_s1 + $0x870] ss:$12 sps:$4 sm:$0xff]  }
  0xb5   : > { %3453 = vmatpush1.bf16.msra.mxu0 %v5160_v56  ;;  %4671 = vmatprep.subr.bf16.mxu1 %v5168_v59  ;;  %v5241_v56 = vld [vmem:[%s6988_s1 + $0x578] ss:$12 sps:$4 sm:$0xff]  }
  0xb6   : > { %3454 = vmatprep.subr.bf16.mxu0 %v5167_v58  ;;  %v5506_v58 = vld [vmem:[%s5714_s17 + $0x1c] ss:$72 sps:$4 sm:$0xff]  }
  0xb7   : > { %v5242_v59 = vld [vmem:[%s6988_s1 + $0x4b8] ss:$12 sps:$4 sm:$0xff]  }
  0xb8   : > { %4672 = vmatpush3.bf16.msra.mxu1 %v5169_v61  ;;  %v5246_v61 = vld [vmem:[%s6988_s1 + $0x590] ss:$12 sps:$4 sm:$0xff]  }
  0xb9   : > { %3455 = vmatpush1.bf16.msra.mxu0 %v5165_v60  ;;  %4673 = vmatprep.subr.bf16.mxu1 %v5173_v63  ;;  %v5245_v60 = vld [vmem:[%s6988_s1 + $0x88c] ss:$12 sps:$4 sm:$0xff]   ;;  %v5247_v63 = vld [vmem:[%s6988_s1 + $0x4d0] ss:$12 sps:$4 sm:$0xff]  }
  0xba   : > { %3456 = vmatprep.subr.bf16.mxu0 %v5172_v62  ;;  %v5243_v62 = vld [vmem:[%s6988_s1 + $0x888] ss:$12 sps:$4 sm:$0xff]  }
  0xbc   : > { %4674 = vmatpush3.bf16.msra.mxu1 %v5174_v1  ;;  %v5251_v1 = vld [vmem:[%s6988_s1 + $0x5a8] ss:$12 sps:$4 sm:$0xff]  }
  0xbd   : > { %3457 = vmatpush1.bf16.msra.mxu0 %v5170_v0  ;;  %4675 = vmatprep.subr.bf16.mxu1 %v5178_v3  ;;  %v5250_v0 = vld [vmem:[%s6988_s1 + $0x8a4] ss:$12 sps:$4 sm:$0xff]   ;;  %v5252_v3 = vld [vmem:[%s6988_s1 + $0x4e8] ss:$12 sps:$4 sm:$0xff]  }
  0xbe   : > { %3458 = vmatprep.subr.bf16.mxu0 %v5177_v2  ;;  %v5248_v2 = vld [vmem:[%s6988_s1 + $0x8a0] ss:$12 sps:$4 sm:$0xff]  }
  0xc0   : > { %4676 = vmatpush3.bf16.msra.mxu1 %v5179_v6  ;;  %v5256_v6 = vld [vmem:[%s6988_s1 + $0x5c0] ss:$12 sps:$4 sm:$0xff]  }
  0xc1   : > { %3459 = vmatpush1.bf16.msra.mxu0 %v5175_v5  ;;  %4677 = vmatprep.subr.bf16.mxu1 %v5183_v8  ;;  %v5255_v5 = vld [vmem:[%s6988_s1 + $0x8bc] ss:$12 sps:$4 sm:$0xff]   ;;  %v5257_v8 = vld [vmem:[%s6988_s1 + $0x500] ss:$12 sps:$4 sm:$0xff]  }
  0xc2   : > { %3460 = vmatprep.subr.bf16.mxu0 %v5182_v7  ;;  %v5253_v7 = vld [vmem:[%s6988_s1 + $0x8b8] ss:$12 sps:$4 sm:$0xff]  }
  0xc4   : > { %4678 = vmatpush3.bf16.msra.mxu1 %v5184_v11  ;;  %v5261_v11 = vld [vmem:[%s6988_s1 + $0x5d8] ss:$12 sps:$4 sm:$0xff]  }
  0xc5   : > { %3461 = vmatpush1.bf16.msra.mxu0 %v5180_v10  ;;  %4685 = vmatprep.subr.bf16.mxu1 %v5191_v14  ;;  %v5260_v10 = vld [vmem:[%s6988_s1 + $0x8d4] ss:$12 sps:$4 sm:$0xff]   ;;  %v5262_v14 = vld [vmem:[%s6988_s1 + $0x518] ss:$12 sps:$4 sm:$0xff]  }
  0xc6   : > { %3473 = vmatprep.subr.bf16.mxu0 %v5190_v13  ;;  %v5258_v13 = vld [vmem:[%s6988_s1 + $0x8d0] ss:$12 sps:$4 sm:$0xff]  }
  0xc7   : > { %3719 = vmatmul.mubr.bf16.vlgmr.msra.gmra.mrb[8].mxu1 %v5984_v9  ;;  %v5201_v9 = vld [vmem:[%s6988_s1 + $0x3f8] ss:$12 sps:$4 sm:$0xff]  }
  0xc8   : > { %3463 = vmatmul.mubr.bf16.vlgmr.msra.gmra.mrb[0].mxu0 %v6185_v12  ;;  %4686 = vmatpush3.bf16.msra.mxu1 %v5192_v16  ;;  %v5266_v16 = vld [vmem:[%s6988_s1 + $0x5f0] ss:$12 sps:$4 sm:$0xff]  }
  0xc9   : > { %3474 = vmatpush1.bf16.msra.mxu0 %v5188_v15  ;;  %4687 = vmatprep.subr.bf16.mxu1 %v5196_v18  ;;  %v5265_v15 = vld [vmem:[%s6988_s1 + $0x8ec] ss:$12 sps:$4 sm:$0xff]   ;;  %v5267_v18 = vld [vmem:[%s6988_s1 + $0x530] ss:$12 sps:$4 sm:$0xff]  }
  0xca   : > { %3475 = vmatprep.subr.bf16.mxu0 %v5195_v17  ;;  %3759 = vmatprep.mubr.bf16.mxu1 %v5504_v23  ;;  %v5263_v17 = vld [vmem:[%s6988_s1 + $0x8e8] ss:$12 sps:$4 sm:$0xff]  }
  0xcb   : > { %3505 = vmatprep.mubr.bf16.mxu0 %v6227_v24  ;;  %v5278_v23 = vld [vmem:[%s6988_s1 + $0x91c] ss:$12 sps:$4 sm:$0xff]  }
  0xcc   : > { %4688 = vmatpush3.bf16.msra.mxu1 %v5197_v20  ;;  %v5274_v20 = vld [vmem:[%s6988_s1 + $0x6c8] ss:$12 sps:$4 sm:$0xff]  }
  0xcd   : > { %3476 = vmatpush1.bf16.msra.mxu0 %v5193_v19  ;;  %4689 = vmatprep.subr.bf16.mxu1 %v5201_v9  ;;  %v5273_v19 = vld [vmem:[%s6988_s1 + $0x904] ss:$12 sps:$4 sm:$0xff]   ;;  %v5271_v9 = vld [vmem:[%s6988_s1 + $0x900] ss:$12 sps:$4 sm:$0xff]  }
  0xce   : > { %3477 = vmatprep.subr.bf16.mxu0 %v5200_v21  ;;  %v6395_v21 = vld [vmem:[%s5714_s17 + $0x28] ss:$72 sps:$4 sm:$0xff]  }
  0xd0   : > { %4690 = vmatpush3.bf16.msra.mxu1 %v5202_v48  ;;  %v5279_v48 = vld [vmem:[%s6988_s1 + $0x6e0] ss:$12 sps:$4 sm:$0xff]  }
  0xd1   : > { %3478 = vmatpush1.bf16.msra.mxu0 %v5198_v22  ;;  %4691 = vmatprep.subr.bf16.mxu1 %v5206_v26  ;;  %v5275_v22 = vld [vmem:[%s6988_s1 + $0x608] ss:$12 sps:$4 sm:$0xff]  }
  0xd2   : > { %3479 = vmatprep.subr.bf16.mxu0 %v5205_v25  ;;  %v5276_v25 = vld [vmem:[%s6988_s1 + $0x918] ss:$12 sps:$4 sm:$0xff]   ;;  %v6413_v26 = vld [vmem:[%s5714_s17 + $0x34] ss:$72 sps:$4 sm:$0xff]  }
  0xd4   : > { %4692 = vmatpush3.bf16.msra.mxu1 %v5207_v28  ;;  %v5280_v28 = vld [vmem:[%s6988_s1 + $0x620] ss:$12 sps:$4 sm:$0xff]  }
  0xd5   : > { %3480 = vmatpush1.bf16.msra.mxu0 %v5203_v27  ;;  %4693 = vmatprep.subr.bf16.mxu1 %v5211_v30  ;;  %v5507_v27 = vld [vmem:[%s5714_s17 + $0x18] ss:$72 sps:$4 sm:$0xff]  }
  0xd6   : > { %3481 = vmatprep.subr.bf16.mxu0 %v5210_v29  ;;  %v5283_v29 = vld [vmem:[%s6988_s1 + $0x934] ss:$12 sps:$4 sm:$0xff]   ;;  %v5284_v30 = vld [vmem:[%s6988_s1 + $0x6f8] ss:$12 sps:$4 sm:$0xff]  }
  0xd8   : > { %4694 = vmatpush3.bf16.msra.mxu1 %v5212_v33  ;;  %v5285_v33 = vld [vmem:[%s6988_s1 + $0x638] ss:$12 sps:$4 sm:$0xff]  }
  0xd9   : > { %3482 = vmatpush1.bf16.msra.mxu0 %v5208_v32  ;;  %4695 = vmatprep.subr.bf16.mxu1 %v5216_v36  ;;  %v5281_v32 = vld [vmem:[%s6988_s1 + $0x930] ss:$12 sps:$4 sm:$0xff]   ;;  %v5286_v36 = vld [vmem:[%s6988_s1 + $0x948] ss:$12 sps:$4 sm:$0xff]  }
  0xda   : > { %3483 = vmatprep.subr.bf16.mxu0 %v5215_v35  ;;  %v5288_v35 = vld [vmem:[%s6988_s1 + $0x94c] ss:$12 sps:$4 sm:$0xff]  }
  0xdc   : > { %4696 = vmatpush3.bf16.msra.mxu1 %v5217_v38  ;;  %v5293_v38 = vld [vmem:[%s6988_s1 + $0x964] ss:$12 sps:$4 sm:$0xff]  }
  0xdd   : > { %3484 = vmatpush1.bf16.msra.mxu0 %v5213_v37  ;;  %4697 = vmatprep.subr.bf16.mxu1 %v5221_v40  ;;  %v5290_v37 = vld [vmem:[%s6988_s1 + $0x650] ss:$12 sps:$4 sm:$0xff]   ;;  %v5291_v40 = vld [vmem:[%s6988_s1 + $0x960] ss:$12 sps:$4 sm:$0xff]  }
  0xde   : > { %3485 = vmatprep.subr.bf16.mxu0 %v5220_v39  ;;  %v5294_v39 = vld [vmem:[%s6988_s1 + $0x728] ss:$12 sps:$4 sm:$0xff]  }
  0xe0   : > { %4698 = vmatpush3.bf16.msra.mxu1 %v5222_v42  ;;  %v5298_v42 = vld [vmem:[%s6988_s1 + $0x97c] ss:$12 sps:$4 sm:$0xff]  }
  0xe1   : > { %3486 = vmatpush1.bf16.msra.mxu0 %v5218_v41  ;;  %4699 = vmatprep.subr.bf16.mxu1 %v5226_v44  ;;  %v5295_v41 = vld [vmem:[%s6988_s1 + $0x668] ss:$12 sps:$4 sm:$0xff]   ;;  %v5296_v44 = vld [vmem:[%s6988_s1 + $0x978] ss:$12 sps:$4 sm:$0xff]  }
  0xe2   : > { %3487 = vmatprep.subr.bf16.mxu0 %v5225_v43  ;;  %v5299_v43 = vld [vmem:[%s6988_s1 + $0x740] ss:$12 sps:$4 sm:$0xff]  }
  0xe4   : > { %4700 = vmatpush3.bf16.msra.mxu1 %v5227_v46  ;;  %v5303_v46 = vld [vmem:[%s6988_s1 + $0x994] ss:$12 sps:$4 sm:$0xff]  }
  0xe5   : > { %3488 = vmatpush1.bf16.msra.mxu0 %v5223_v45  ;;  %4707 = vmatprep.subr.bf16.mxu1 %v5231_v49  ;;  %v5300_v45 = vld [vmem:[%s6988_s1 + $0x680] ss:$12 sps:$4 sm:$0xff]   ;;  %v5301_v49 = vld [vmem:[%s6988_s1 + $0x990] ss:$12 sps:$4 sm:$0xff]  }
  0xe6   : > { %3489 = vmatprep.subr.bf16.mxu0 %v5230_v47  ;;  %v5304_v47 = vld [vmem:[%s6988_s1 + $0x758] ss:$12 sps:$4 sm:$0xff]  }
  0xe7   : > { %3760 = vmatmul.mubr.bf16.vlgmr.msra.gmra.mrb[12].mxu1 %v5505_v4  ;;  %v5310_v4 = vld [vmem:[%s6988_s1 + $0x6b0] ss:$12 sps:$4 sm:$0xff]  }
  0xe8   : > { %4708 = vmatpush3.bf16.msra.mxu1 %v5232_v51  ;;  %3800 = vmatprep.mubr.bf16.mxu1 %v5506_v58  ;;  %v5308_v51 = vld [vmem:[%s6988_s1 + $0x9ac] ss:$12 sps:$4 sm:$0xff]  }
  0xe9   : > { %3490 = vmatpush1.bf16.msra.mxu0 %v5228_v50  ;;  %4709 = vmatprep.subr.bf16.mxu1 %v5236_v53  ;;  %v5305_v50 = vld [vmem:[%s6988_s1 + $0x698] ss:$12 sps:$4 sm:$0xff]   ;;  %v5306_v53 = vld [vmem:[%s6988_s1 + $0x9a8] ss:$12 sps:$4 sm:$0xff]   ;;  %v5319_v58 = vld [vmem:[%s6988_s1 + $0x860] ss:$12 sps:$4 sm:$0xff]  }
  0xea   : > { %3491 = vmatprep.subr.bf16.mxu0 %v5235_v52  ;;  %v5309_v52 = vld [vmem:[%s6988_s1 + $0x770] ss:$12 sps:$4 sm:$0xff]  }
  0xec   : > { %4710 = vmatpush3.bf16.msra.mxu1 %v5237_v55  ;;  %v5314_v55 = vld [vmem:[%s6988_s1 + $0x848] ss:$12 sps:$4 sm:$0xff]  }
  0xed   : > { %3492 = vmatpush1.bf16.msra.mxu0 %v5233_v54  ;;  %4711 = vmatprep.subr.bf16.mxu1 %v5241_v56  ;;  %v5313_v54 = vld [vmem:[%s6988_s1 + $0x9c4] ss:$12 sps:$4 sm:$0xff]   ;;  %v5315_v56 = vld [vmem:[%s6988_s1 + $0x788] ss:$12 sps:$4 sm:$0xff]  }
  0xee   : > { %3493 = vmatprep.subr.bf16.mxu0 %v5240_v34  ;;  %v5311_v34 = vld [vmem:[%s6988_s1 + $0x9c0] ss:$12 sps:$4 sm:$0xff]  }
  0xf0   : > { %4712 = vmatpush3.bf16.msra.mxu1 %v5242_v59  ;;  %v5316_v59 = vld [vmem:[%s6988_s1 + $0x9d8] ss:$12 sps:$4 sm:$0xff]  }
  0xf1   : > { %3494 = vmatpush1.bf16.msra.mxu0 %v5238_v57  ;;  %4713 = vmatprep.subr.bf16.mxu1 %v5246_v61  ;;  %v5318_v57 = vld [vmem:[%s6988_s1 + $0x9dc] ss:$12 sps:$4 sm:$0xff]   ;;  %v5323_v61 = vld [vmem:[%s6988_s1 + $0x9f4] ss:$12 sps:$4 sm:$0xff]  }
  0xf2   : > { %3495 = vmatprep.subr.bf16.mxu0 %v5245_v60  ;;  %v5320_v60 = vld [vmem:[%s6988_s1 + $0x7a0] ss:$12 sps:$4 sm:$0xff]  }
  0xf4   : > { %4714 = vmatpush3.bf16.msra.mxu1 %v5247_v63  ;;  %v5325_v63 = vld [vmem:[%s6988_s1 + $0x7b8] ss:$12 sps:$4 sm:$0xff]  }
  0xf5   : > { %3496 = vmatpush1.bf16.msra.mxu0 %v5243_v62  ;;  %4715 = vmatprep.subr.bf16.mxu1 %v5251_v1  ;;  %v5321_v62 = vld [vmem:[%s6988_s1 + $0x9f0] ss:$12 sps:$4 sm:$0xff]  }
  0xf6   : > { %3497 = vmatprep.subr.bf16.mxu0 %v5250_v0  ;;  %v5328_v0 = vld [vmem:[%s6988_s1 + $0xa0c] ss:$12 sps:$4 sm:$0xff]   ;;  %v5329_v1 = vld [vmem:[%s6988_s1 + $0x890] ss:$12 sps:$4 sm:$0xff]  }
  0xf8   : > { %4716 = vmatpush3.bf16.msra.mxu1 %v5252_v3  ;;  %v5333_v3 = vld [vmem:[%s6988_s1 + $0xa24] ss:$12 sps:$4 sm:$0xff]  }
  0xf9   : > { %3498 = vmatpush1.bf16.msra.mxu0 %v5248_v2  ;;  %4717 = vmatprep.subr.bf16.mxu1 %v5256_v6  ;;  %v5330_v2 = vld [vmem:[%s6988_s1 + $0x7d0] ss:$12 sps:$4 sm:$0xff]   ;;  %v5331_v6 = vld [vmem:[%s6988_s1 + $0xa20] ss:$12 sps:$4 sm:$0xff]  }
  0xfa   : > { %3499 = vmatprep.subr.bf16.mxu0 %v5255_v5  ;;  %v5334_v5 = vld [vmem:[%s6988_s1 + $0x8a8] ss:$12 sps:$4 sm:$0xff]  }
  0xfc   : > { %4718 = vmatpush3.bf16.msra.mxu1 %v5257_v8  ;;  %v5338_v8 = vld [vmem:[%s6988_s1 + $0xa3c] ss:$12 sps:$4 sm:$0xff]  }
  0xfd   : > { %3500 = vmatpush1.bf16.msra.mxu0 %v5253_v7  ;;  %4719 = vmatprep.subr.bf16.mxu1 %v5261_v11  ;;  %v5335_v7 = vld [vmem:[%s6988_s1 + $0x7e8] ss:$12 sps:$4 sm:$0xff]   ;;  %v5336_v11 = vld [vmem:[%s6988_s1 + $0xa38] ss:$12 sps:$4 sm:$0xff]  }
  0xfe   : > { %3501 = vmatprep.subr.bf16.mxu0 %v5260_v10  ;;  %v5339_v10 = vld [vmem:[%s6988_s1 + $0x8c0] ss:$12 sps:$4 sm:$0xff]  }
 0x100   : > { %4720 = vmatpush3.bf16.msra.mxu1 %v5262_v14  ;;  %v5343_v14 = vld [vmem:[%s6988_s1 + $0xa54] ss:$12 sps:$4 sm:$0xff]  }
 0x101   : > { %3502 = vmatpush1.bf16.msra.mxu0 %v5258_v13  ;;  %4721 = vmatprep.subr.bf16.mxu1 %v5266_v16  ;;  %v5340_v13 = vld [vmem:[%s6988_s1 + $0x800] ss:$12 sps:$4 sm:$0xff]   ;;  %v5341_v16 = vld [vmem:[%s6988_s1 + $0xa50] ss:$12 sps:$4 sm:$0xff]  }
 0x102   : > { %3503 = vmatprep.subr.bf16.mxu0 %v5265_v15  ;;  %v5344_v15 = vld [vmem:[%s6988_s1 + $0x8d8] ss:$12 sps:$4 sm:$0xff]  }
 0x104   : > { %4722 = vmatpush3.bf16.msra.mxu1 %v5267_v18  ;;  %v5348_v18 = vld [vmem:[%s6988_s1 + $0xa6c] ss:$12 sps:$4 sm:$0xff]  }
 0x105   : > { %3504 = vmatpush1.bf16.msra.mxu0 %v5263_v17  ;;  %4729 = vmatprep.subr.bf16.mxu1 %v5274_v20  ;;  %v5345_v17 = vld [vmem:[%s6988_s1 + $0x818] ss:$12 sps:$4 sm:$0xff]   ;;  %v5346_v20 = vld [vmem:[%s6988_s1 + $0xa68] ss:$12 sps:$4 sm:$0xff]  }
 0x106   : > { %3516 = vmatprep.subr.bf16.mxu0 %v5273_v19  ;;  %v5349_v19 = vld [vmem:[%s6988_s1 + $0x8f0] ss:$12 sps:$4 sm:$0xff]  }
 0x107   : > { %3801 = vmatmul.mubr.bf16.vlgmr.msra.gmra.mrb[16].mxu1 %v5507_v27  ;;  %v5358_v27 = vld [vmem:[%s6988_s1 + $0x908] ss:$12 sps:$4 sm:$0xff]  }
 0x108   : > { %3506 = vmatmul.mubr.bf16.vlgmr.msra.gmra.mrb[0].mxu0 %v6395_v21  ;;  %4730 = vmatpush3.bf16.msra.mxu1 %v5275_v22  ;;  %v5356_v22 = vld [vmem:[%s6988_s1 + $0xa84] ss:$12 sps:$4 sm:$0xff]  }
 0x109   : > { %3517 = vmatpush1.bf16.msra.mxu0 %v5271_v9  ;;  %4731 = vmatprep.subr.bf16.mxu1 %v5279_v48  ;;  %v5350_v9 = vld [vmem:[%s6988_s1 + $0x830] ss:$12 sps:$4 sm:$0xff]  }
 0x10a   : > { %3518 = vmatprep.subr.bf16.mxu0 %v5278_v23  ;;  %3841 = vmatprep.mubr.bf16.mxu1 %v6053_v31  ;;  %v5289_v31 = vld [vmem:[%s6988_s1 + $0x710] ss:$12 sps:$4 sm:$0xff]   ;;  %v5357_v23 = vld [vmem:[%s6988_s1 + $0x9c8] ss:$12 sps:$4 sm:$0xff]  }
 0x10b   : > { %3548 = vmatprep.mubr.bf16.mxu0 %v6413_v26  ;;  %v6599_v48 = vld [vmem:[%s5714_s17 + $0x30] ss:$72 sps:$4 sm:$0xff]  }
 0x10c   : > { %4732 = vmatpush3.bf16.msra.mxu1 %v5280_v28  ;;  %v5361_v28 = vld [vmem:[%s6988_s1 + $0xa9c] ss:$12 sps:$4 sm:$0xff]  }
 0x10d   : > { %3519 = vmatpush1.bf16.msra.mxu0 %v5276_v25  ;;  %4733 = vmatprep.subr.bf16.mxu1 %v5284_v30  ;;  %v5354_v25 = vld [vmem:[%s6988_s1 + $0xa80] ss:$12 sps:$4 sm:$0xff]   ;;  %v5359_v30 = vld [vmem:[%s6988_s1 + $0xa98] ss:$12 sps:$4 sm:$0xff]  }
 0x10e   : > { %3520 = vmatprep.subr.bf16.mxu0 %v5283_v29  ;;  %v5362_v29 = vld [vmem:[%s6988_s1 + $0x9e0] ss:$12 sps:$4 sm:$0xff]  }
 0x110   : > { %4734 = vmatpush3.bf16.msra.mxu1 %v5285_v33  ;;  %v5363_v33 = vld [vmem:[%s6988_s1 + $0x920] ss:$12 sps:$4 sm:$0xff]  }
 0x111   : > { %3521 = vmatpush1.bf16.msra.mxu0 %v5281_v32  ;;  %4735 = vmatprep.subr.bf16.mxu1 %v5289_v31  ;;  %v6617_v32 = vld [vmem:[%s5714_s17 + $0x3c] ss:$72 sps:$4 sm:$0xff]  }
 0x112   : > { %3522 = vmatprep.subr.bf16.mxu0 %v5288_v35  ;;  %v5366_v35 = vld [vmem:[%s6988_s1 + $0xab4] ss:$12 sps:$4 sm:$0xff]   ;;  %v5367_v31 = vld [vmem:[%s6988_s1 + $0x9f8] ss:$12 sps:$4 sm:$0xff]  }
 0x114   : > { %4736 = vmatpush3.bf16.msra.mxu1 %v5290_v37  ;;  %v5371_v37 = vld [vmem:[%s6988_s1 + $0xacc] ss:$12 sps:$4 sm:$0xff]  }
 0x115   : > { %3523 = vmatpush1.bf16.msra.mxu0 %v5286_v36  ;;  %4737 = vmatprep.subr.bf16.mxu1 %v5294_v39  ;;  %v5368_v36 = vld [vmem:[%s6988_s1 + $0x938] ss:$12 sps:$4 sm:$0xff]   ;;  %v5373_v39 = vld [vmem:[%s6988_s1 + $0x950] ss:$12 sps:$4 sm:$0xff]  }
 0x116   : > { %3524 = vmatprep.subr.bf16.mxu0 %v5293_v38  ;;  %v5369_v38 = vld [vmem:[%s6988_s1 + $0xac8] ss:$12 sps:$4 sm:$0xff]  }
 0x118   : > { %4738 = vmatpush3.bf16.msra.mxu1 %v5295_v41  ;;  %v5377_v41 = vld [vmem:[%s6988_s1 + $0xa28] ss:$12 sps:$4 sm:$0xff]  }
 0x119   : > { %3525 = vmatpush1.bf16.msra.mxu0 %v5291_v40  ;;  %4739 = vmatprep.subr.bf16.mxu1 %v5299_v43  ;;  %v5376_v40 = vld [vmem:[%s6988_s1 + $0xae4] ss:$12 sps:$4 sm:$0xff]   ;;  %v5378_v43 = vld [vmem:[%s6988_s1 + $0x968] ss:$12 sps:$4 sm:$0xff]  }
 0x11a   : > { %3526 = vmatprep.subr.bf16.mxu0 %v5298_v42  ;;  %v5374_v42 = vld [vmem:[%s6988_s1 + $0xae0] ss:$12 sps:$4 sm:$0xff]  }
 0x11c   : > { %4740 = vmatpush3.bf16.msra.mxu1 %v5300_v45  ;;  %v5382_v45 = vld [vmem:[%s6988_s1 + $0xa40] ss:$12 sps:$4 sm:$0xff]  }
 0x11d   : > { %3527 = vmatpush1.bf16.msra.mxu0 %v5296_v44  ;;  %4741 = vmatprep.subr.bf16.mxu1 %v5304_v47  ;;  %v5381_v44 = vld [vmem:[%s6988_s1 + $0xafc] ss:$12 sps:$4 sm:$0xff]   ;;  %v5383_v47 = vld [vmem:[%s6988_s1 + $0x980] ss:$12 sps:$4 sm:$0xff]  }
 0x11e   : > { %3528 = vmatprep.subr.bf16.mxu0 %v5303_v46  ;;  %v5379_v46 = vld [vmem:[%s6988_s1 + $0xaf8] ss:$12 sps:$4 sm:$0xff]  }
 0x120   : > { %4742 = vmatpush3.bf16.msra.mxu1 %v5305_v50  ;;  %v5387_v50 = vld [vmem:[%s6988_s1 + $0xa58] ss:$12 sps:$4 sm:$0xff]  }
 0x121   : > { %3529 = vmatpush1.bf16.msra.mxu0 %v5301_v49  ;;  %4743 = vmatprep.subr.bf16.mxu1 %v5309_v52  ;;  %v5386_v49 = vld [vmem:[%s6988_s1 + $0xb14] ss:$12 sps:$4 sm:$0xff]  }
 0x122   : > { %3530 = vmatprep.subr.bf16.mxu0 %v5308_v51 }
 0x124   : > { %4744 = vmatpush3.bf16.msra.mxu1 %v5310_v4 }
 0x125   : > { %3531 = vmatpush1.bf16.msra.mxu0 %v5306_v53  ;;  %4751 = vmatprep.subr.bf16.mxu1 %v5314_v55  ;;  %v5384_v53 = vld [vmem:[%s6988_s1 + $0xb10] ss:$12 sps:$4 sm:$0xff]  }
 0x126   : > { %3532 = vmatprep.subr.bf16.mxu0 %v5313_v54  ;;  %v5388_v54 = vld [vmem:[%s6988_s1 + $0x998] ss:$12 sps:$4 sm:$0xff]  }
 0x127   : > { %3842 = vmatmul.mubr.bf16.vlgmr.msra.gmra.mrb[20].mxu1 %v6185_v12  ;;  %v5324_v12 = vld [vmem:[%s6988_s1 + $0x878] ss:$12 sps:$4 sm:$0xff]  }
 0x128   : > { %4752 = vmatpush3.bf16.msra.mxu1 %v5315_v56  ;;  %3882 = vmatprep.mubr.bf16.mxu1 %v6227_v24  ;;  %v5326_v24 = vld [vmem:[%s6988_s1 + $0xa08] ss:$12 sps:$4 sm:$0xff]   ;;  %v5392_v56 = vld [vmem:[%s6988_s1 + $0xa70] ss:$12 sps:$4 sm:$0xff]  }
 0x129   : > { %3533 = vmatpush1.bf16.msra.mxu0 %v5311_v34  ;;  %4753 = vmatprep.subr.bf16.mxu1 %v5319_v58  ;;  %v5391_v34 = vld [vmem:[%s6988_s1 + $0xb2c] ss:$12 sps:$4 sm:$0xff]   ;;  %v5393_v58 = vld [vmem:[%s6988_s1 + $0x9b0] ss:$12 sps:$4 sm:$0xff]  }
 0x12a   : > { %3534 = vmatprep.subr.bf16.mxu0 %v5318_v57  ;;  %v5389_v57 = vld [vmem:[%s6988_s1 + $0xb28] ss:$12 sps:$4 sm:$0xff]  }
 0x12c   : > { %4754 = vmatpush3.bf16.msra.mxu1 %v5320_v60  ;;  %v5397_v60 = vld [vmem:[%s6988_s1 + $0xb48] ss:$12 sps:$4 sm:$0xff]  }
 0x12d   : > { %3535 = vmatpush1.bf16.msra.mxu0 %v5316_v59  ;;  %4755 = vmatprep.subr.bf16.mxu1 %v5324_v12  ;;  %v5396_v59 = vld [vmem:[%s6988_s1 + $0xb44] ss:$12 sps:$4 sm:$0xff]   ;;  %v5398_v12 = vld [vmem:[%s6988_s1 + $0xa88] ss:$12 sps:$4 sm:$0xff]  }
 0x12e   : > { %3536 = vmatprep.subr.bf16.mxu0 %v5323_v61  ;;  %v5394_v61 = vld [vmem:[%s6988_s1 + $0xb40] ss:$12 sps:$4 sm:$0xff]  }
 0x130   : > { %4756 = vmatpush3.bf16.msra.mxu1 %v5325_v63  ;;  %v5402_v63 = vld [vmem:[%s6988_s1 + $0xb60] ss:$12 sps:$4 sm:$0xff]  }
 0x131   : > { %3537 = vmatpush1.bf16.msra.mxu0 %v5321_v62  ;;  %4757 = vmatprep.subr.bf16.mxu1 %v5329_v1  ;;  %v5401_v62 = vld [vmem:[%s6988_s1 + $0xb5c] ss:$12 sps:$4 sm:$0xff]   ;;  %v5403_v1 = vld [vmem:[%s6988_s1 + $0xaa0] ss:$12 sps:$4 sm:$0xff]  }
 0x132   : > { %3538 = vmatprep.subr.bf16.mxu0 %v5328_v0  ;;  %v5399_v0 = vld [vmem:[%s6988_s1 + $0xb58] ss:$12 sps:$4 sm:$0xff]  }
 0x134   : > { %4758 = vmatpush3.bf16.msra.mxu1 %v5330_v2  ;;  %v5407_v2 = vld [vmem:[%s6988_s1 + $0xb78] ss:$12 sps:$4 sm:$0xff]  }
 0x135   : > { %3539 = vmatpush1.bf16.msra.mxu0 %v5326_v24  ;;  %4759 = vmatprep.subr.bf16.mxu1 %v5334_v5  ;;  %v5406_v24 = vld [vmem:[%s6988_s1 + $0xb74] ss:$12 sps:$4 sm:$0xff]   ;;  %v5408_v5 = vld [vmem:[%s6988_s1 + $0xab8] ss:$12 sps:$4 sm:$0xff]  }
 0x136   : > { %3540 = vmatprep.subr.bf16.mxu0 %v5333_v3  ;;  %v5404_v3 = vld [vmem:[%s6988_s1 + $0xb70] ss:$12 sps:$4 sm:$0xff]  }
 0x138   : > { %4760 = vmatpush3.bf16.msra.mxu1 %v5335_v7  ;;  %v5412_v7 = vld [vmem:[%s6988_s1 + $0xb90] ss:$12 sps:$4 sm:$0xff]  }
 0x139   : > { %3541 = vmatpush1.bf16.msra.mxu0 %v5331_v6  ;;  %4761 = vmatprep.subr.bf16.mxu1 %v5339_v10  ;;  %v5411_v6 = vld [vmem:[%s6988_s1 + $0xb8c] ss:$12 sps:$4 sm:$0xff]   ;;  %v5413_v10 = vld [vmem:[%s6988_s1 + $0xad0] ss:$12 sps:$4 sm:$0xff]  }
 0x13a   : > { %3542 = vmatprep.subr.bf16.mxu0 %v5338_v8  ;;  %v5409_v8 = vld [vmem:[%s6988_s1 + $0xb88] ss:$12 sps:$4 sm:$0xff]  }
 0x13c   : > { %4762 = vmatpush3.bf16.msra.mxu1 %v5340_v13  ;;  %v5417_v13 = vld [vmem:[%s6988_s1 + $0xba8] ss:$12 sps:$4 sm:$0xff]  }
 0x13d   : > { %3543 = vmatpush1.bf16.msra.mxu0 %v5336_v11  ;;  %4763 = vmatprep.subr.bf16.mxu1 %v5344_v15  ;;  %v5416_v11 = vld [vmem:[%s6988_s1 + $0xba4] ss:$12 sps:$4 sm:$0xff]   ;;  %v5418_v15 = vld [vmem:[%s6988_s1 + $0xae8] ss:$12 sps:$4 sm:$0xff]  }
 0x13e   : > { %3544 = vmatprep.subr.bf16.mxu0 %v5343_v14  ;;  %v5414_v14 = vld [vmem:[%s6988_s1 + $0xba0] ss:$12 sps:$4 sm:$0xff]  }
 0x140   : > { %4764 = vmatpush3.bf16.msra.mxu1 %v5345_v17  ;;  %v5422_v17 = vld [vmem:[%s6988_s1 + $0xbc0] ss:$12 sps:$4 sm:$0xff]  }
 0x141   : > { %3545 = vmatpush1.bf16.msra.mxu0 %v5341_v16  ;;  %4765 = vmatprep.subr.bf16.mxu1 %v5349_v19  ;;  %v5421_v16 = vld [vmem:[%s6988_s1 + $0xbbc] ss:$12 sps:$4 sm:$0xff]   ;;  %v5423_v19 = vld [vmem:[%s6988_s1 + $0xb00] ss:$12 sps:$4 sm:$0xff]  }
 0x142   : > { %3546 = vmatprep.subr.bf16.mxu0 %v5348_v18  ;;  %v5419_v18 = vld [vmem:[%s6988_s1 + $0xbb8] ss:$12 sps:$4 sm:$0xff]  }
 0x144   : > { %4766 = vmatpush3.bf16.msra.mxu1 %v5350_v9  ;;  %v5427_v9 = vld [vmem:[%s6988_s1 + $0xbd8] ss:$12 sps:$4 sm:$0xff]  }
 0x145   : > { %3547 = vmatpush1.bf16.msra.mxu0 %v5346_v20  ;;  %4773 = vmatprep.subr.bf16.mxu1 %v5357_v23  ;;  %v5426_v20 = vld [vmem:[%s6988_s1 + $0xbd4] ss:$12 sps:$4 sm:$0xff]  }
 0x146   : > { %3559 = vmatprep.subr.bf16.mxu0 %v5356_v22 }
 0x147   : > { %3883 = vmatmul.mubr.bf16.vlgmr.msra.gmra.mrb[24].mxu1 %v6395_v21  ;;  %v5364_v21 = vld [vmem:[%s6988_s1 + $0xab0] ss:$12 sps:$4 sm:$0xff]  }
 0x148   : > { %3549 = vmatmul.mubr.bf16.vlgmr.msra.gmra.mrb[0].mxu0 %v6599_v48  ;;  %4774 = vmatpush3.bf16.msra.mxu1 %v5358_v27 }
 0x149   : > { %3560 = vmatpush1.bf16.msra.mxu0 %v5354_v25  ;;  %4775 = vmatprep.subr.bf16.mxu1 %v5362_v29  ;;  %v5428_v25 = vld [vmem:[%s6988_s1 + $0xb18] ss:$12 sps:$4 sm:$0xff]  }
 0x14a   : > { %3561 = vmatprep.subr.bf16.mxu0 %v5361_v28  ;;  %3923 = vmatprep.mubr.bf16.mxu1 %v6413_v26  ;;  %v5372_v26 = vld [vmem:[%s6988_s1 + $0xa10] ss:$12 sps:$4 sm:$0xff]   ;;  %v5431_v29 = vld [vmem:[%s6988_s1 + $0xbec] ss:$12 sps:$4 sm:$0xff]  }
 0x14b   : > { %3591 = vmatprep.mubr.bf16.mxu0 %v6617_v32 }
 0x14c   : > { %4776 = vmatpush3.bf16.msra.mxu1 %v5363_v33 }
 0x14d   : > { %3562 = vmatpush1.bf16.msra.mxu0 %v5359_v30  ;;  %4777 = vmatprep.subr.bf16.mxu1 %v5367_v31  ;;  %v5432_v30 = vld [vmem:[%s6988_s1 + $0xbf0] ss:$12 sps:$4 sm:$0xff]  }
 0x14e   : > { %3563 = vmatprep.subr.bf16.mxu0 %v5366_v35  ;;  %v5429_v35 = vld [vmem:[%s6988_s1 + $0xbe8] ss:$12 sps:$4 sm:$0xff]   ;;  %v5433_v31 = vld [vmem:[%s6988_s1 + $0xb30] ss:$12 sps:$4 sm:$0xff]  }
 0x150   : > { %4778 = vmatpush3.bf16.msra.mxu1 %v5368_v36  ;;  %v5440_v36 = vld [vmem:[%s6988_s1 + $0xcc8] ss:$12 sps:$4 sm:$0xff]  }
 0x151   : > { %3564 = vmatpush1.bf16.msra.mxu0 %v5364_v21  ;;  %4779 = vmatprep.subr.bf16.mxu1 %v5372_v26  ;;  %v5439_v21 = vld [vmem:[%s6988_s1 + $0xc04] ss:$12 sps:$4 sm:$0xff]   ;;  %v5437_v26 = vld [vmem:[%s6988_s1 + $0xc00] ss:$12 sps:$4 sm:$0xff]  }
 0x152   : > { %3565 = vmatprep.subr.bf16.mxu0 %v5371_v37  ;;  %v5434_v37 = vld [vmem:[%s5714_s17 + $0x38] ss:$72 sps:$4 sm:$0xff]  }
 0x154   : > { %4780 = vmatpush3.bf16.msra.mxu1 %v5373_v39  ;;  %v5444_v39 = vld [vmem:[%s6988_s1 + $0xc1c] ss:$12 sps:$4 sm:$0xff]  }
 0x155   : > { %3566 = vmatpush1.bf16.msra.mxu0 %v5369_v38  ;;  %4781 = vmatprep.subr.bf16.mxu1 %v5377_v41  ;;  %v5441_v38 = vld [vmem:[%s6988_s1 + $0xc08] ss:$12 sps:$4 sm:$0xff]   ;;  %v5479_v41 = vld [vmem:[%s5714_s17 + $0x44] ss:$72 sps:$4 sm:$0xff]  }
 0x156   : > { %3567 = vmatprep.subr.bf16.mxu0 %v5376_v40  ;;  %v5445_v40 = vld [vmem:[%s6988_s1 + $0xce0] ss:$12 sps:$4 sm:$0xff]  }
 0x158   : > { %4782 = vmatpush3.bf16.msra.mxu1 %v5378_v43  ;;  %v5446_v43 = vld [vmem:[%s6988_s1 + $0xc20] ss:$12 sps:$4 sm:$0xff]  }
 0x159   : > { %3568 = vmatpush1.bf16.msra.mxu0 %v5374_v42  ;;  %4783 = vmatprep.subr.bf16.mxu1 %v5382_v45  ;;  %v5442_v42 = vld [vmem:[%s6988_s1 + $0xc18] ss:$12 sps:$4 sm:$0xff]  }
 0x15a   : > { %3569 = vmatprep.subr.bf16.mxu0 %v5381_v44  ;;  %v6680_v51 = vpop.f32.mrb[0].mxu1  ;;  %v5449_v44 = vld [vmem:[%s6988_s1 + $0xc34] ss:$12 sps:$4 sm:$0xff]   ;;  %v5450_v45 = vld [vmem:[%s6988_s1 + $0xcf8] ss:$12 sps:$4 sm:$0xff]  }
 0x15b   : > { %v6682_v52 = vpop.f32.mrb[1].mxu1 }
 0x15c   : > { %v6687_v4 = vpop.f32.mrb[2].mxu1  ;;  %4784 = vmatpush3.bf16.msra.mxu1 %v5383_v47  ;;  %v5447_v47 = vld [vmem:[%s6988_s1 + $0xc30] ss:$12 sps:$4 sm:$0xff]  }
 0x15d   : > { %3570 = vmatpush1.bf16.msra.mxu0 %v5379_v46  ;;  %v6692_v55 = vpop.f32.mrb[3].mxu1  ;;  %4785 = vmatprep.subr.bf16.mxu1 %v5387_v50  ;;  %v849_v46 = vlaneseq  ;;  %v5454_v50 = vld [vmem:[%s6988_s1 + $0xc4c] ss:$12 sps:$4 sm:$0xff]  }
 0x15e   : > { %3571 = vmatprep.subr.bf16.mxu0 %v5386_v49  ;;  %v5451_v49 = vld [vmem:[%s6988_s1 + $0xc38] ss:$12 sps:$4 sm:$0xff]  }
 0x160   : > { %4786 = vmatpush3.bf16.msra.mxu1 %v5388_v54  ;;  %v6852_v54 = vshrl.u32 %v849_v46, 7 }
 0x161   : > { %3572 = vmatpush1.bf16.msra.mxu0 %v5384_v53  ;;  %4787 = vmatprep.subr.bf16.mxu1 %v5392_v56  ;;  %v5455_v53 = vld [vmem:[%s6988_s1 + $0xd10] ss:$12 sps:$4 sm:$0xff]  }
 0x162   : > { %3573 = vmatprep.subr.bf16.mxu0 %v5391_v34  ;;  %v5452_v34 = vld [vmem:[%s6988_s1 + $0xc48] ss:$12 sps:$4 sm:$0xff]   ;;  %v5456_v56 = vld [vmem:[%s6988_s1 + $0xc50] ss:$12 sps:$4 sm:$0xff]  }
 0x164   : > { %4788 = vmatpush3.bf16.msra.mxu1 %v5393_v58  ;;  %v5460_v58 = vld [vmem:[%s6988_s1 + $0xd28] ss:$12 sps:$4 sm:$0xff]  }
 0x165   : > { %3574 = vmatpush1.bf16.msra.mxu0 %v5389_v57  ;;  %4795 = vmatprep.subr.bf16.mxu1 %v5397_v60  ;;  %v5459_v57 = vld [vmem:[%s6988_s1 + $0xc64] ss:$12 sps:$4 sm:$0xff]   ;;  %v5457_v60 = vld [vmem:[%s6988_s1 + $0xc60] ss:$12 sps:$4 sm:$0xff]  }
 0x166   : > { %3575 = vmatprep.subr.bf16.mxu0 %v5396_v59  ;;  %v859_v59 = vsub.s32 2, %v6852_v54 }
 0x167   : > { %3924 = vmatmul.mubr.bf16.vlgmr.msra.gmra.mrb[28].mxu1 %v6599_v48  ;;  %v5424_v48 = vld [vmem:[%s6988_s1 + $0xbd0] ss:$12 sps:$4 sm:$0xff]  }
 0x168   : > { %4796 = vmatpush3.bf16.msra.mxu1 %v5398_v12  ;;  %3964 = vmatprep.mubr.bf16.mxu1 %v6617_v32  ;;  %v6876_v12 = vld [vmem:[%s6989_s2] sm:$0x7] }
 0x169   : > { %3576 = vmatpush1.bf16.msra.mxu0 %v5394_v61  ;;  %4797 = vmatprep.subr.bf16.mxu1 %v5402_v63  ;;  %v5461_v61 = vld [vmem:[%s6988_s1 + $0xc68] ss:$12 sps:$4 sm:$0xff]   ;;  %v5465_v63 = vld [vmem:[%s6988_s1 + $0xd40] ss:$12 sps:$4 sm:$0xff]  }
 0x16a   : > { %3577 = vmatprep.subr.bf16.mxu0 %v5401_v62  ;;  %v5464_v62 = vld [vmem:[%s6988_s1 + $0xc7c] ss:$12 sps:$4 sm:$0xff]  }
 0x16c   : > { %4798 = vmatpush3.bf16.msra.mxu1 %v5403_v1  ;;  %v5462_v1 = vld [vmem:[%s6988_s1 + $0xc78] ss:$12 sps:$4 sm:$0xff]  }
 0x16d   : > { %3578 = vmatpush1.bf16.msra.mxu0 %v5399_v0  ;;  %4799 = vmatprep.subr.bf16.mxu1 %v5407_v2  ;;  %v860_v0 = vrot.slane %v6876_v12, %v859_v59  ;;  %v5469_v2 = vld [vmem:[%s6988_s1 + $0xc94] ss:$12 sps:$4 sm:$0xff]  }
 0x16e   : > { %3579 = vmatprep.subr.bf16.mxu0 %v5406_v24  ;;  %v5466_v24 = vld [vmem:[%s6988_s1 + $0xc80] ss:$12 sps:$4 sm:$0xff]  }
 0x170   : > { %4800 = vmatpush3.bf16.msra.mxu1 %v5408_v5 }
 0x171   : > { %3580 = vmatpush1.bf16.msra.mxu0 %v5404_v3  ;;  %4801 = vmatprep.subr.bf16.mxu1 %v5412_v7  ;;  %v5470_v3 = vld [vmem:[%s6988_s1 + $0xd58] ss:$12 sps:$4 sm:$0xff]  }
 0x172   : > { %3581 = vmatprep.subr.bf16.mxu0 %v5411_v6 }
 0x174   : > { %4802 = vmatpush3.bf16.msra.mxu1 %v5413_v10 }
 0x175   : > { %3582 = vmatpush1.bf16.msra.mxu0 %v5409_v8  ;;  %4803 = vmatprep.subr.bf16.mxu1 %v5417_v13  ;;  %v5471_v13 = vld [vmem:[%s6988_s1 + $0xc98] ss:$12 sps:$4 sm:$0xff]  }
 0x176   : > { %3583 = vmatprep.subr.bf16.mxu0 %v5416_v11  ;;  %v5467_v11 = vld [vmem:[%s6988_s1 + $0xc90] ss:$12 sps:$4 sm:$0xff]  }
 0x178   : > { %4804 = vmatpush3.bf16.msra.mxu1 %v5418_v15  ;;  %v5474_v15 = vld [vmem:[%s6988_s1 + $0xcac] ss:$12 sps:$4 sm:$0xff]  }
 0x179   : > { %3584 = vmatpush1.bf16.msra.mxu0 %v5414_v14  ;;  %4805 = vmatprep.subr.bf16.mxu1 %v5422_v17 }
 0x17a   : > { %3585 = vmatprep.subr.bf16.mxu0 %v5421_v16  ;;  %v4657_v22 = vpop.f32.mrb[4].mxu1  ;;  %v5475_v16 = vld [vmem:[%s6988_s1 + $0xd70] ss:$12 sps:$4 sm:$0xff]  }
 0x17b   : > { %v4658_v23 = vpop.f32.mrb[5].mxu1 }
 0x17c   : > { %4806 = vmatpush3.bf16.msra.mxu1 %v5423_v19  ;;  %v6792_v27 = vadd.f32 %v4658_v23, %v4657_v22  ;;  %v4660_v28 = vpop.f32.mrb[6].mxu1  ;;  %v5476_v22 = vld [vmem:[%s6988_s1 + $0xcb0] ss:$12 sps:$4 sm:$0xff]  }
 0x17d   : > { %3586 = vmatpush1.bf16.msra.mxu0 %v5419_v18  ;;  %4807 = vmatprep.subr.bf16.mxu1 %v5427_v9  ;;  %v4661_v32 = vpop.f32.mrb[7].mxu1  ;;  %v5472_v9 = vld [vmem:[%s6988_s1 + $0xca8] ss:$12 sps:$4 sm:$0xff]   ;;  %v5482_v23 = vld [vmem:[%s6988_s1 + $0xcc4] ss:$12 sps:$4 sm:$0xff]  }
 0x17e   : > { %3587 = vmatprep.subr.bf16.mxu0 %v5426_v20  ;;  %v6800_v33 = vadd.f32 %v4661_v32, %v4660_v28  ;;  %v3680_v5 = vadd.f32 %v6792_v27, %v860_v0  ;;  %v5485_v27 = vld [vmem:[%s6988_s1 + $0xcdc] ss:$12 sps:$4 sm:$0xff]   ;;  %v5483_v28 = vld [vmem:[%s6988_s1 + $0xcd8] ss:$12 sps:$4 sm:$0xff]  }
 0x17f   : > { %v5491_v32 = vld [vmem:[%s6988_s1 + $0xd0c] ss:$12 sps:$4 sm:$0xff]  }
 0x180   : > { %4808 = vmatpush3.bf16.msra.mxu1 %v5428_v25  ;;  %v3683_v17 = vadd.f32 %v6800_v33, %v860_v0  ;;  %v5480_v25 = vld [vmem:[%s6988_s1 + $0xcc0] ss:$12 sps:$4 sm:$0xff]   ;;  %v5489_v33 = vld [vmem:[%s6988_s1 + $0xd08] ss:$12 sps:$4 sm:$0xff]  }
 0x181   : > { %3588 = vmatpush1.bf16.msra.mxu0 %v5424_v48  ;;  %4809 = vmatprep.subr.bf16.mxu1 %v5432_v30  ;;  %v5477_v48 = vld [vmem:[%s5714_s17 + $0x40] ss:$72 sps:$4 sm:$0xff]   ;;  %v5486_v30 = vld [vmem:[%s6988_s1 + $0xcf0] ss:$12 sps:$4 sm:$0xff]   ;;  %s4876_s17 = smul.u32 12, %s6996_s30 }
 0x182   : > { %3589 = vmatprep.subr.bf16.mxu0 %v5431_v29  ;;  %v5488_v29 = vld [vmem:[%s6988_s1 + $0xcf4] ss:$12 sps:$4 sm:$0xff]  }
 0x183   : > { %s250_s25 = scalar_lea.vmem %s6990_s3, %s4876_s17 }
 0x184   : > { %4810 = vmatpush3.bf16.msra.mxu1 %v5433_v31  ;;  %v5492_v31 = vld [vmem:[%s6988_s1 + $0xd20] ss:$12 sps:$4 sm:$0xff]  }
 0x185   : > { %3590 = vmatpush1.bf16.msra.mxu0 %v5429_v35  ;;  %4817 = vmatprep.subr.bf16.mxu1 %v5440_v36  ;;  %v5494_v35 = vld [vmem:[%s6988_s1 + $0xd24] ss:$12 sps:$4 sm:$0xff]  }
 0x186   : > { %3602 = vmatprep.subr.bf16.mxu0 %v5439_v21  ;;  %v5497_v21 = vld [vmem:[%s6988_s1 + $0xd3c] ss:$12 sps:$4 sm:$0xff]   ;;  %v5495_v36 = vld [vmem:[%s6988_s1 + $0xd38] ss:$12 sps:$4 sm:$0xff]  }
 0x187   : > { %3965 = vmatmul.mubr.bf16.vlgmr.msra.gmra.mrb[32].mxu1 %v5434_v37 }
 0x188   : > { %3592 = vmatmul.mubr.bf16.vlgmr.msra.gmra.mrb[0].mxu0 %v5434_v37  ;;  %4818 = vmatpush3.bf16.msra.mxu1 %v5441_v38  ;;  %v5500_v37 = vld [vmem:[%s6988_s1 + $0xd54] ss:$12 sps:$4 sm:$0xff]  }
 0x189   : > { %3603 = vmatpush1.bf16.msra.mxu0 %v5437_v26  ;;  %4819 = vmatprep.subr.bf16.mxu1 %v5445_v40 }
 0x18a   : > { %3604 = vmatprep.subr.bf16.mxu0 %v5444_v39  ;;  %4005 = vmatprep.mubr.bf16.mxu1 %v5479_v41 }
 0x18b   : > { %3634 = vmatprep.mubr.bf16.mxu0 %v5479_v41  ;;  %v5498_v41 = vld [vmem:[%s6988_s1 + $0xd50] ss:$12 sps:$4 sm:$0xff]  }
 0x18c   : > { %4820 = vmatpush3.bf16.msra.mxu1 %v5446_v43  ;;  %v5503_v43 = vld [vmem:[%s6988_s1 + $0xd6c] ss:$12 sps:$4 sm:$0xff]  }
 0x18d   : > { %3605 = vmatpush1.bf16.msra.mxu0 %v5442_v42  ;;  %4821 = vmatprep.subr.bf16.mxu1 %v5450_v45 }
 0x18e   : > { %3606 = vmatprep.subr.bf16.mxu0 %v5449_v44 }
 0x190   : > { %4822 = vmatpush3.bf16.msra.mxu1 %v5451_v49 }
 0x191   : > { %3607 = vmatpush1.bf16.msra.mxu0 %v5447_v47  ;;  %4823 = vmatprep.subr.bf16.mxu1 %v5455_v53  ;;  %v5501_v47 = vld [vmem:[%s6988_s1 + $0xd68] ss:$12 sps:$4 sm:$0xff]  }
 0x192   : > { %3608 = vmatprep.subr.bf16.mxu0 %v5454_v50 }
 0x194   : > { %4824 = vmatpush3.bf16.msra.mxu1 %v5456_v56 }
 0x195   : > { %3609 = vmatpush1.bf16.msra.mxu0 %v5452_v34  ;;  %4825 = vmatprep.subr.bf16.mxu1 %v5460_v58 }
 0x196   : > { %3610 = vmatprep.subr.bf16.mxu0 %v5459_v57 }
 0x198   : > { %4826 = vmatpush3.bf16.msra.mxu1 %v5461_v61 }
 0x199   : > { %3611 = vmatpush1.bf16.msra.mxu0 %v5457_v60  ;;  %4827 = vmatprep.subr.bf16.mxu1 %v5465_v63 }
 0x19a   : > { %3612 = vmatprep.subr.bf16.mxu0 %v5464_v62  ;;  %v4679_v6 = vpop.f32.mrb[8].mxu1 }
 0x19b   : > { %v4680_v7 = vpop.f32.mrb[9].mxu1 }
 0x19c   : > { %v4681_v8 = vadd.f32 %v4680_v7, %v4679_v6  ;;  %v4682_v10 = vpop.f32.mrb[10].mxu1  ;;  %4828 = vmatpush3.bf16.msra.mxu1 %v5466_v24 }
 0x19d   : > { %3613 = vmatpush1.bf16.msra.mxu0 %v5462_v1  ;;  %v4683_v14 = vpop.f32.mrb[11].mxu1  ;;  %4829 = vmatprep.subr.bf16.mxu1 %v5470_v3 }
 0x19e   : > { %3614 = vmatprep.subr.bf16.mxu0 %v5469_v2  ;;  %v3721_v18 = vadd.f32 %v4681_v8, %v3680_v5  ;;  %v4684_v19 = vadd.f32 %v4683_v14, %v4682_v10 }
 0x1a0   : > { %v3724_v20 = vadd.f32 %v4684_v19, %v3683_v17  ;;  %4830 = vmatpush3.bf16.msra.mxu1 %v5471_v13 }
 0x1a1   : > { %3615 = vmatpush1.bf16.msra.mxu0 %v5467_v11  ;;  %4831 = vmatprep.subr.bf16.mxu1 %v5475_v16 }
 0x1a2   : > { %3616 = vmatprep.subr.bf16.mxu0 %v5474_v15 }
 0x1a4   : > { %4832 = vmatpush3.bf16.msra.mxu1 %v5476_v22 }
 0x1a5   : > { %3617 = vmatpush1.bf16.msra.mxu0 %v5472_v9 }
 0x1a6   : > { %3618 = vmatprep.subr.bf16.mxu0 %v5482_v23 }
 0x1a7   : > { %4006 = vmatmul.mubr.bf16.vlgmr.msra.gmra.mrb[36].mxu1 %v5477_v48 }
 0x1a9   : > { %3619 = vmatpush1.bf16.msra.mxu0 %v5480_v25 }
 0x1aa   : > { %3620 = vmatprep.subr.bf16.mxu0 %v5485_v27 }
 0x1ad   : > { %3621 = vmatpush1.bf16.msra.mxu0 %v5483_v28 }
 0x1ae   : > { %3622 = vmatprep.subr.bf16.mxu0 %v5488_v29 }
 0x1b1   : > { %3623 = vmatpush1.bf16.msra.mxu0 %v5486_v30 }
 0x1b2   : > { %3624 = vmatprep.subr.bf16.mxu0 %v5491_v32 }
 0x1b5   : > { %3625 = vmatpush1.bf16.msra.mxu0 %v5489_v33 }
 0x1b6   : > { %3626 = vmatprep.subr.bf16.mxu0 %v5494_v35 }
 0x1b9   : > { %3627 = vmatpush1.bf16.msra.mxu0 %v5492_v31 }
 0x1ba   : > { %3628 = vmatprep.subr.bf16.mxu0 %v5497_v21  ;;  %v4701_v26 = vpop.f32.mrb[12].mxu1 }
 0x1bb   : > { %v4702_v38 = vpop.f32.mrb[13].mxu1 }
 0x1bc   : > { %v4703_v39 = vadd.f32 %v4702_v38, %v4701_v26  ;;  %v4704_v40 = vpop.f32.mrb[14].mxu1 }
 0x1bd   : > { %3629 = vmatpush1.bf16.msra.mxu0 %v5495_v36  ;;  %v4705_v42 = vpop.f32.mrb[15].mxu1 }
 0x1be   : > { %3630 = vmatprep.subr.bf16.mxu0 %v5500_v37  ;;  %v3762_v44 = vadd.f32 %v4703_v39, %v3721_v18  ;;  %v4706_v45 = vadd.f32 %v4705_v42, %v4704_v40  ;;  %v851_v42 = vsub.s32 0, %v6852_v54 }
 0x1c0   : > { %v3765_v46 = vadd.f32 %v4706_v45, %v3724_v20 }
 0x1c1   : > { %3631 = vmatpush1.bf16.msra.mxu0 %v5498_v41 }
 0x1c2   : > { %3632 = vmatprep.subr.bf16.mxu0 %v5503_v43  ;;  %v855_v43 = vsub.s32 1, %v6852_v54 }
 0x1c4   : > { %v856_v45 = vrot.slane %v6876_v12, %v855_v43 }
 0x1c5   : > { %3633 = vmatpush1.bf16.msra.mxu0 %v5501_v47 }
 0x1c6   : > { %v4841_v47 = vadd.f32 %v6682_v52, %v856_v45 }
 0x1c8   : > { %3635 = vmatmul.mubr.bf16.vlgmr.msra.gmra.mrb[0].mxu0 %v5477_v48 }
 0x1da   : > { %v4723_v49 = vpop.f32.mrb[16].mxu1 }
 0x1db   : > { %v4724_v50 = vpop.f32.mrb[17].mxu1 }
 0x1dc   : > { %v4725_v53 = vadd.f32 %v4724_v50, %v4723_v49  ;;  %v4726_v34 = vpop.f32.mrb[18].mxu1 }
 0x1dd   : > { %v4727_v56 = vpop.f32.mrb[19].mxu1 }
 0x1de   : > { %v3803_v57 = vadd.f32 %v4725_v53, %v3762_v44  ;;  %v4728_v58 = vadd.f32 %v4727_v56, %v4726_v34  ;;  %v852_v44 = vrot.slane %v6876_v12, %v851_v42  ;;  %v4845_v56 = vadd.f32 %v6692_v55, %v856_v45 }
 0x1e0   : > { %v3806_v59 = vadd.f32 %v4728_v58, %v3765_v46  ;;  %v4839_v46 = vadd.f32 %v6680_v51, %v852_v44  ;;  %v4843_v50 = vadd.f32 %v6687_v4, %v852_v44 }
 0x1fa   : > { %v4745_v60 = vpop.f32.mrb[20].mxu1 }
 0x1fb   : > { %v4746_v61 = vpop.f32.mrb[21].mxu1 }
 0x1fc   : > { %v4747_v62 = vadd.f32 %v4746_v61, %v4745_v60  ;;  %v4748_v63 = vpop.f32.mrb[22].mxu1 }
 0x1fd   : > { %v4749_v0 = vpop.f32.mrb[23].mxu1 }
 0x1fe   : > { %v3844_v1 = vadd.f32 %v4747_v62, %v3803_v57  ;;  %v4750_v24 = vadd.f32 %v4749_v0, %v4748_v63 }
 0x200   : > { %v3847_v2 = vadd.f32 %v4750_v24, %v3806_v59 }
 0x21a   : > { %v4767_v3 = vpop.f32.mrb[24].mxu1 }
 0x21b   : > { %v4768_v5 = vpop.f32.mrb[25].mxu1 }
 0x21c   : > { %v4769_v6 = vadd.f32 %v4768_v5, %v4767_v3  ;;  %v4770_v7 = vpop.f32.mrb[26].mxu1 }
 0x21d   : > { %v4771_v8 = vpop.f32.mrb[27].mxu1 }
 0x21e   : > { %v3885_v10 = vadd.f32 %v4769_v6, %v3844_v1  ;;  %v4772_v11 = vadd.f32 %v4771_v8, %v4770_v7 }
 0x220   : > { %v3888_v13 = vadd.f32 %v4772_v11, %v3847_v2 }
 0x23a   : > { %v4789_v14 = vpop.f32.mrb[28].mxu1 }
 0x23b   : > { %v4790_v15 = vpop.f32.mrb[29].mxu1 }
 0x23c   : > { %v4791_v16 = vadd.f32 %v4790_v15, %v4789_v14  ;;  %v4792_v17 = vpop.f32.mrb[30].mxu1 }
 0x23d   : > { %v4793_v18 = vpop.f32.mrb[31].mxu1 }
 0x23e   : > { %v3926_v19 = vadd.f32 %v4791_v16, %v3885_v10  ;;  %v4794_v20 = vadd.f32 %v4793_v18, %v4792_v17 }
 0x240   : > { %v3929_v9 = vadd.f32 %v4794_v20, %v3888_v13 }
 0x25a   : > { %v4811_v22 = vpop.f32.mrb[32].mxu1 }
 0x25b   : > { %v4812_v23 = vpop.f32.mrb[33].mxu1 }
 0x25c   : > { %v4813_v48 = vadd.f32 %v4812_v23, %v4811_v22  ;;  %v4814_v25 = vpop.f32.mrb[34].mxu1 }
 0x25d   : > { %v4815_v27 = vpop.f32.mrb[35].mxu1 }
 0x25e   : > { %v3967_v28 = vadd.f32 %v4813_v48, %v3926_v19  ;;  %v4816_v29 = vadd.f32 %v4815_v27, %v4814_v25 }
 0x260   : > { %v3970_v30 = vadd.f32 %v4816_v29, %v3929_v9 }
 0x27a   : > { %v4833_v32 = vpop.f32.mrb[36].mxu1 }
 0x27b   : > { %v4834_v33 = vpop.f32.mrb[37].mxu1 }
 0x27c   : > { %v4835_v35 = vadd.f32 %v4834_v33, %v4833_v32  ;;  %v4836_v31 = vpop.f32.mrb[38].mxu1 }
 0x27d   : > { %v4837_v21 = vpop.f32.mrb[39].mxu1 }
 0x27e   : > { %v4008_v36 = vadd.f32 %v4835_v35, %v3967_v28  ;;  %v4838_v37 = vadd.f32 %v4837_v21, %v4836_v31 }
 0x280   : > { %v4016_v26 = vmax.f32 %v4008_v36, 0.0  ;;  %v4011_v38 = vadd.f32 %v4838_v37, %v3970_v30 }
 0x282   : > { %v4638_v39 = vpack.c.bf16 %v4016_v26, %v4016_v26  ;;  %v4019_v40 = vmax.f32 %v4011_v38, 0.0 }
 0x284   : > { %4041 = vst [vmem:[%s250_s25 + $0x8] sm:$0xf] %v4638_v39  ;;  %v4640_v41 = vpack.c.bf16 %v4019_v40, %v4019_v40 }
 0x286   : > { %4043 = vst [vmem:[%s250_s25 + $0x14] sm:$0xf] %v4640_v41 }
 0x29b   : > { %v3636_v49 = vpop.f32.mrb[0].mxu0 }
 0x29c   : > { %v4840_v53 = vadd.f32 %v4839_v46, %v3636_v49  ;;  %v3638_v34 = vpop.f32.mrb[1].mxu0 }
 0x29d   : > { %v4842_v57 = vadd.f32 %v4841_v47, %v3638_v34  ;;  %v3640_v58 = vpop.f32.mrb[2].mxu0 }
 0x29e   : > { %v4014_v59 = vmax.f32 %v4840_v53, 0.0  ;;  %v4844_v60 = vadd.f32 %v4843_v50, %v3640_v58  ;;  %v3642_v54 = vpop.f32.mrb[3].mxu0 }
 0x29f   : > { %v4015_v61 = vmax.f32 %v4842_v57, 0.0  ;;  %v4846_v62 = vadd.f32 %v4845_v56, %v3642_v54 }
 0x2a0   : > { %v4017_v63 = vmax.f32 %v4844_v60, 0.0 }
 0x2a1   : > { %v4637_v12 = vpack.c.bf16 %v4015_v61, %v4014_v59  ;;  %v4018_v0 = vmax.f32 %v4846_v62, 0.0 }
 0x2a3   : > { %4040 = vst [vmem:[%s250_s25] sm:$0xff] %v4637_v12  ;;  %v4639_v51 = vpack.c.bf16 %v4018_v0, %v4017_v63 }
 0x2a5   : > { %4042 = vst [vmem:[%s250_s25 + $0xc] sm:$0xff] %v4639_v51 }
 0x2a6 PF: > { %s13_s14 = sadd.s32 1, %s5530_s14   ;;  %s6991_s12 = smov %s5526_s13 }
 0x2a7   : > { %p10_p5 = scmp.ge.s32.totalorder %s13_s14, 4   ;;  %s6992_s13 = smov %s6994_s15 }
 0x2a9   :  { %12 = sbr.rel (!%p10_p5) target bundleno = 2 (0x2), region = 68 }

// kernel: alexnet_bvlc_forward.15
= control target key start
LH: loop header
LB: loop body
LE: loop exit
PB: predicated region body
PF: predicated region fallthrough
CT: control target
= control target key end

     0   :  { %s3112_s12 = smov 0   ;;  %s3114_s13 = smov 0   ;;  %s3413_s0 = inlined_call_operand.vmem [shape: bf16[2,32,1792], index: 0, kind: input, shape index: {}]   ;;  %s3414_s1 = inlined_call_operand.vmem [shape: bf16[2,1792,256], index: 1, kind: input, shape index: {}]   ;;  %s3415_s2 = inlined_call_operand.vmem [shape: f32[2,1,256], index: 2, kind: input, shape index: {}]   ;;  %s3416_s3 = inlined_call_operand.vmem [shape: bf16[2,32,256], index: 3, kind: output, shape index: {}]  }
   0x1   :  { %s3116_s14 = smov 0  }
   0x2 LB: > { %s25_s15 = sadd.s32 1, %s3086_s13  ;;  %p2307_p0 = scmp.ge.s32.totalorder %s3090_s14, 1  ;;  %s3090_s14 = sphi %s3116_s14, %s13_s14   ;;  %s3086_s13 = sphi %s3114_s13, %s3418_s13   ;;  %s3082_s12 = sphi %s3112_s12, %s3417_s12  }
   0x3   : > { %p27_p1 = scmp.ge.s32.totalorder %s25_s15, 2  ;;  %p178_p2 = scmp.lt.s32.totalorder %s3090_s14, 3 }
   0x5   : > { %s3420_s15 = smov (%p27_p1, %s25_s15), 0  ;;  %p179_p3 = pnand %p2307_p0, %p178_p2 }
   0x6   : > { %p222_p4 = scmp.lt.s32.totalorder (!%p179_p3), %s3082_s12, 1 }
   0x7   : > { %182 = sbr.rel (%p179_p3) target bundleno = 498 (0x1f2), region = 32 }
   0xe   : > { %s3422_s12 = smov (!%p222_p4, %s3082_s12), 1 }
   0xf   : > { %s2665_s16 = smul.u32 1792, %s3422_s12  ;;  %s2310_s24 = sshll.u32 %s3422_s12, 1 }
  0x10   : > { %s2664_s20 = smul.u32 224, %s3422_s12  ;;  %s240_s27 = scalar_lea.vmem %s3415_s2, %s2310_s24 }
  0x11   : > { %s3136_s19 = scalar_lea.vmem %s3414_s1, %s2665_s16  ;;  %s2571_s28 = sshll.u32 %s3422_s12, 5 }
  0x12   : > { %v2690_v0 = vld [vmem:[%s3136_s19 + $0x4] ss:$8 sps:$4 sm:$0xff]   ;;  %v2694_v2 = vld [vmem:[%s3136_s19] ss:$8 sps:$4 sm:$0xff]   ;;  %v2696_v4 = vld [vmem:[%s3136_s19 + $0x14] ss:$8 sps:$4 sm:$0xff]   ;;  %s3187_s23 = scalar_lea.vmem %s3413_s0, %s2664_s20  ;;  %s250_s4 = scalar_lea.vmem %s3416_s3, %s2571_s28 }
  0x13   : > { %v2692_v1 = vld [vmem:[%s3136_s19 + $0x304] ss:$8 sps:$4 sm:$0xff]   ;;  %1776 = vmatprep.subr.bf16.mxu1 %v2690_v0  ;;  %v2695_v3 = vld [vmem:[%s3136_s19 + $0x300] ss:$8 sps:$4 sm:$0xff]   ;;  %v2698_v5 = vld [vmem:[%s3136_s19 + $0x314] ss:$8 sps:$4 sm:$0xff]  }
  0x14   : > { %1935 = vmatprep.subr.bf16.mxu0 %v2692_v1  ;;  %1777 = vmatpush1.bf16.msra.mxu1 %v2694_v2  ;;  %v2700_v6 = vld [vmem:[%s3136_s19 + $0x10] ss:$8 sps:$4 sm:$0xff]   ;;  %v2702_v8 = vld [vmem:[%s3136_s19 + $0x24] ss:$8 sps:$4 sm:$0xff]   ;;  %v2706_v10 = vld [vmem:[%s3136_s19 + $0x20] ss:$8 sps:$4 sm:$0xff]  }
  0x15   : > { %1936 = vmatpush1.bf16.msra.mxu0 %v2695_v3  ;;  %1778 = vmatprep.subr.bf16.mxu1 %v2696_v4  ;;  %v2701_v7 = vld [vmem:[%s3136_s19 + $0x310] ss:$8 sps:$4 sm:$0xff]   ;;  %v2704_v9 = vld [vmem:[%s3136_s19 + $0x324] ss:$8 sps:$4 sm:$0xff]   ;;  %v2707_v11 = vld [vmem:[%s3136_s19 + $0x320] ss:$8 sps:$4 sm:$0xff]  }
  0x16   : > { %1937 = vmatprep.subr.bf16.mxu0 %v2698_v5  ;;  %v2708_v12 = vld [vmem:[%s3136_s19 + $0x34] ss:$8 sps:$4 sm:$0xff]   ;;  %v2712_v14 = vld [vmem:[%s3136_s19 + $0x30] ss:$8 sps:$4 sm:$0xff]   ;;  %v2714_v16 = vld [vmem:[%s3136_s19 + $0x44] ss:$8 sps:$4 sm:$0xff]  }
  0x17   : > { %v2710_v13 = vld [vmem:[%s3136_s19 + $0x334] ss:$8 sps:$4 sm:$0xff]   ;;  %v2713_v15 = vld [vmem:[%s3136_s19 + $0x330] ss:$8 sps:$4 sm:$0xff]   ;;  %v2716_v17 = vld [vmem:[%s3136_s19 + $0x344] ss:$8 sps:$4 sm:$0xff]  }
  0x18   : > { %1779 = vmatpush1.bf16.msra.mxu1 %v2700_v6  ;;  %v2718_v18 = vld [vmem:[%s3136_s19 + $0x40] ss:$8 sps:$4 sm:$0xff]   ;;  %v2720_v20 = vld [vmem:[%s3136_s19 + $0x54] ss:$8 sps:$4 sm:$0xff]   ;;  %v2724_v22 = vld [vmem:[%s3136_s19 + $0x50] ss:$8 sps:$4 sm:$0xff]  }
  0x19   : > { %1938 = vmatpush1.bf16.msra.mxu0 %v2701_v7  ;;  %1780 = vmatprep.subr.bf16.mxu1 %v2702_v8  ;;  %v2719_v19 = vld [vmem:[%s3136_s19 + $0x340] ss:$8 sps:$4 sm:$0xff]   ;;  %v2722_v21 = vld [vmem:[%s3136_s19 + $0x354] ss:$8 sps:$4 sm:$0xff]   ;;  %v2725_v23 = vld [vmem:[%s3136_s19 + $0x350] ss:$8 sps:$4 sm:$0xff]  }
  0x1a   : > { %1939 = vmatprep.subr.bf16.mxu0 %v2704_v9  ;;  %v2726_v24 = vld [vmem:[%s3136_s19 + $0x64] ss:$8 sps:$4 sm:$0xff]   ;;  %v2730_v26 = vld [vmem:[%s3136_s19 + $0x60] ss:$8 sps:$4 sm:$0xff]   ;;  %v2732_v28 = vld [vmem:[%s3136_s19 + $0x74] ss:$8 sps:$4 sm:$0xff]  }
  0x1b   : > { %v2728_v25 = vld [vmem:[%s3136_s19 + $0x364] ss:$8 sps:$4 sm:$0xff]   ;;  %v2731_v27 = vld [vmem:[%s3136_s19 + $0x360] ss:$8 sps:$4 sm:$0xff]   ;;  %v2734_v29 = vld [vmem:[%s3136_s19 + $0x374] ss:$8 sps:$4 sm:$0xff]  }
  0x1c   : > { %1781 = vmatpush1.bf16.msra.mxu1 %v2706_v10  ;;  %v2736_v30 = vld [vmem:[%s3136_s19 + $0x70] ss:$8 sps:$4 sm:$0xff]   ;;  %v2738_v32 = vld [vmem:[%s3136_s19 + $0x84] ss:$8 sps:$4 sm:$0xff]   ;;  %v2742_v34 = vld [vmem:[%s3136_s19 + $0x80] ss:$8 sps:$4 sm:$0xff]  }
  0x1d   : > { %1940 = vmatpush1.bf16.msra.mxu0 %v2707_v11  ;;  %1782 = vmatprep.subr.bf16.mxu1 %v2708_v12  ;;  %v2737_v31 = vld [vmem:[%s3136_s19 + $0x370] ss:$8 sps:$4 sm:$0xff]   ;;  %v2740_v33 = vld [vmem:[%s3136_s19 + $0x384] ss:$8 sps:$4 sm:$0xff]   ;;  %v2743_v35 = vld [vmem:[%s3136_s19 + $0x380] ss:$8 sps:$4 sm:$0xff]  }
  0x1e   : > { %1941 = vmatprep.subr.bf16.mxu0 %v2710_v13  ;;  %v2744_v36 = vld [vmem:[%s3136_s19 + $0x94] ss:$8 sps:$4 sm:$0xff]   ;;  %v2748_v38 = vld [vmem:[%s3136_s19 + $0x90] ss:$8 sps:$4 sm:$0xff]   ;;  %v2750_v40 = vld [vmem:[%s3136_s19 + $0xa4] ss:$8 sps:$4 sm:$0xff]  }
  0x1f   : > { %v2746_v37 = vld [vmem:[%s3136_s19 + $0x394] ss:$8 sps:$4 sm:$0xff]   ;;  %v2749_v39 = vld [vmem:[%s3136_s19 + $0x390] ss:$8 sps:$4 sm:$0xff]   ;;  %v2752_v41 = vld [vmem:[%s3136_s19 + $0x3a4] ss:$8 sps:$4 sm:$0xff]  }
  0x20   : > { %1783 = vmatpush1.bf16.msra.mxu1 %v2712_v14  ;;  %v2754_v42 = vld [vmem:[%s3136_s19 + $0xa0] ss:$8 sps:$4 sm:$0xff]   ;;  %v2756_v44 = vld [vmem:[%s3136_s19 + $0xb4] ss:$8 sps:$4 sm:$0xff]   ;;  %v2760_v46 = vld [vmem:[%s3136_s19 + $0xb0] ss:$8 sps:$4 sm:$0xff]  }
  0x21   : > { %1942 = vmatpush1.bf16.msra.mxu0 %v2713_v15  ;;  %1784 = vmatprep.subr.bf16.mxu1 %v2714_v16  ;;  %v2755_v43 = vld [vmem:[%s3136_s19 + $0x3a0] ss:$8 sps:$4 sm:$0xff]   ;;  %v2758_v45 = vld [vmem:[%s3136_s19 + $0x3b4] ss:$8 sps:$4 sm:$0xff]   ;;  %v2761_v47 = vld [vmem:[%s3136_s19 + $0x3b0] ss:$8 sps:$4 sm:$0xff]  }
  0x22   : > { %1943 = vmatprep.subr.bf16.mxu0 %v2716_v17  ;;  %v2788_v48 = vld [vmem:[%s3187_s23 + $0x4] ss:$56 sps:$4 sm:$0xff]   ;;  %v2766_v52 = vld [vmem:[%s3136_s19 + $0xc0] ss:$8 sps:$4 sm:$0xff]   ;;  %v2772_v56 = vld [vmem:[%s3136_s19 + $0xd0] ss:$8 sps:$4 sm:$0xff]  }
  0x23   : > { %v2762_v49 = vld [vmem:[%s3136_s19 + $0xc4] ss:$8 sps:$4 sm:$0xff]   ;;  %1808 = vmatprep.mubr.bf16.mxu1 %v2788_v48  ;;  %v2794_v51 = vld [vmem:[%s3187_s23 + $0x1c] ss:$56 sps:$4 sm:$0xff]   ;;  %v2767_v53 = vld [vmem:[%s3136_s19 + $0x3c0] ss:$8 sps:$4 sm:$0xff]  }
  0x24   : > { %1785 = vmatpush1.bf16.msra.mxu1 %v2718_v18  ;;  %v2764_v50 = vld [vmem:[%s3136_s19 + $0x3c4] ss:$8 sps:$4 sm:$0xff]   ;;  %v2768_v54 = vld [vmem:[%s3136_s19 + $0xd4] ss:$8 sps:$4 sm:$0xff]   ;;  %1967 = vmatprep.mubr.bf16.mxu0 %v2794_v51  ;;  %v2773_v57 = vld [vmem:[%s3136_s19 + $0x3d0] ss:$8 sps:$4 sm:$0xff]  }
  0x25   : > { %1944 = vmatpush1.bf16.msra.mxu0 %v2719_v19  ;;  %1786 = vmatprep.subr.bf16.mxu1 %v2720_v20  ;;  %v2770_v55 = vld [vmem:[%s3136_s19 + $0x3d4] ss:$8 sps:$4 sm:$0xff]   ;;  %v2774_v58 = vld [vmem:[%s3136_s19 + $0xe4] ss:$8 sps:$4 sm:$0xff]   ;;  %v2778_v60 = vld [vmem:[%s3136_s19 + $0xe0] ss:$8 sps:$4 sm:$0xff]  }
  0x26   : > { %1945 = vmatprep.subr.bf16.mxu0 %v2722_v21  ;;  %v2776_v59 = vld [vmem:[%s3136_s19 + $0x3e4] ss:$8 sps:$4 sm:$0xff]   ;;  %v2779_v61 = vld [vmem:[%s3136_s19 + $0x3e0] ss:$8 sps:$4 sm:$0xff]   ;;  %v2780_v62 = vld [vmem:[%s3136_s19 + $0xf4] ss:$8 sps:$4 sm:$0xff]  }
  0x27   : > { %v2782_v63 = vld [vmem:[%s3136_s19 + $0x3f4] ss:$8 sps:$4 sm:$0xff]   ;;  %v2784_v0 = vld [vmem:[%s3136_s19 + $0xf0] ss:$8 sps:$4 sm:$0xff]   ;;  %v2791_v2 = vld [vmem:[%s3136_s19 + $0x104] ss:$8 sps:$4 sm:$0xff]  }
  0x28   : > { %1787 = vmatpush1.bf16.msra.mxu1 %v2724_v22  ;;  %v2785_v1 = vld [vmem:[%s3136_s19 + $0x3f0] ss:$8 sps:$4 sm:$0xff]   ;;  %v2797_v3 = vld [vmem:[%s3136_s19 + $0x404] ss:$8 sps:$4 sm:$0xff]   ;;  %v2789_v5 = vld [vmem:[%s3136_s19 + $0x100] ss:$8 sps:$4 sm:$0xff]  }
  0x29   : > { %1946 = vmatpush1.bf16.msra.mxu0 %v2725_v23  ;;  %1788 = vmatprep.subr.bf16.mxu1 %v2726_v24  ;;  %v2786_v4 = vld [vmem:[%s3187_s23] ss:$56 sps:$4 sm:$0xff]   ;;  %v2800_v8 = vld [vmem:[%s3136_s19 + $0x114] ss:$8 sps:$4 sm:$0xff]   ;;  %v2806_v12 = vld [vmem:[%s3136_s19 + $0x124] ss:$8 sps:$4 sm:$0xff]  }
  0x2a   : > { %1947 = vmatprep.subr.bf16.mxu0 %v2728_v25  ;;  %v2792_v6 = vld [vmem:[%s3187_s23 + $0x18] ss:$56 sps:$4 sm:$0xff]   ;;  %v2795_v7 = vld [vmem:[%s3136_s19 + $0x400] ss:$8 sps:$4 sm:$0xff]   ;;  %v2803_v9 = vld [vmem:[%s3136_s19 + $0x414] ss:$8 sps:$4 sm:$0xff]  }
  0x2b   : > { %v2798_v10 = vld [vmem:[%s3136_s19 + $0x110] ss:$8 sps:$4 sm:$0xff]   ;;  %v2809_v13 = vld [vmem:[%s3136_s19 + $0x424] ss:$8 sps:$4 sm:$0xff]   ;;  %v2804_v14 = vld [vmem:[%s3136_s19 + $0x120] ss:$8 sps:$4 sm:$0xff]  }
  0x2c   : > { %1789 = vmatpush1.bf16.msra.mxu1 %v2730_v26  ;;  %v2801_v11 = vld [vmem:[%s3136_s19 + $0x410] ss:$8 sps:$4 sm:$0xff]   ;;  %v2807_v15 = vld [vmem:[%s3136_s19 + $0x420] ss:$8 sps:$4 sm:$0xff]   ;;  %v2812_v16 = vld [vmem:[%s3136_s19 + $0x134] ss:$8 sps:$4 sm:$0xff]  }
  0x2d   : > { %1948 = vmatpush1.bf16.msra.mxu0 %v2731_v27  ;;  %1790 = vmatprep.subr.bf16.mxu1 %v2732_v28  ;;  %v2815_v17 = vld [vmem:[%s3136_s19 + $0x434] ss:$8 sps:$4 sm:$0xff]   ;;  %v2810_v18 = vld [vmem:[%s3136_s19 + $0x130] ss:$8 sps:$4 sm:$0xff]   ;;  %v2818_v20 = vld [vmem:[%s3136_s19 + $0x144] ss:$8 sps:$4 sm:$0xff]  }
  0x2e   : > { %1949 = vmatprep.subr.bf16.mxu0 %v2734_v29  ;;  %v2813_v19 = vld [vmem:[%s3136_s19 + $0x430] ss:$8 sps:$4 sm:$0xff]   ;;  %v2821_v21 = vld [vmem:[%s3136_s19 + $0x444] ss:$8 sps:$4 sm:$0xff]   ;;  %v2816_v22 = vld [vmem:[%s3136_s19 + $0x140] ss:$8 sps:$4 sm:$0xff]  }
  0x2f   : > { %v2819_v23 = vld [vmem:[%s3136_s19 + $0x440] ss:$8 sps:$4 sm:$0xff]   ;;  %v2824_v24 = vld [vmem:[%s3136_s19 + $0x154] ss:$8 sps:$4 sm:$0xff]   ;;  %v2822_v26 = vld [vmem:[%s3136_s19 + $0x150] ss:$8 sps:$4 sm:$0xff]  }
  0x30   : > { %1791 = vmatpush1.bf16.msra.mxu1 %v2736_v30  ;;  %v2827_v25 = vld [vmem:[%s3136_s19 + $0x454] ss:$8 sps:$4 sm:$0xff]   ;;  %v2825_v27 = vld [vmem:[%s3136_s19 + $0x450] ss:$8 sps:$4 sm:$0xff]   ;;  %v2830_v29 = vld [vmem:[%s3136_s19 + $0x164] ss:$8 sps:$4 sm:$0xff]  }
  0x31   : > { %1950 = vmatpush1.bf16.msra.mxu0 %v2737_v31  ;;  %1792 = vmatprep.subr.bf16.mxu1 %v2738_v32  ;;  %v2876_v28 = vld [vmem:[%s3187_s23 + $0x74] ss:$56 sps:$4 sm:$0xff]   ;;  %v2828_v32 = vld [vmem:[%s3136_s19 + $0x160] ss:$8 sps:$4 sm:$0xff]   ;;  %v2846_v48 = vld [vmem:[%s3136_s19 + $0x190] ss:$8 sps:$4 sm:$0xff]  }
  0x32   : > { %1951 = vmatprep.subr.bf16.mxu0 %v2740_v33  ;;  %v2833_v30 = vld [vmem:[%s3136_s19 + $0x464] ss:$8 sps:$4 sm:$0xff]   ;;  %v2831_v33 = vld [vmem:[%s3136_s19 + $0x460] ss:$8 sps:$4 sm:$0xff]  }
  0x33   : > { %v2881_v31 = vld [vmem:[%s3187_s23 + $0x8c] ss:$56 sps:$4 sm:$0xff]  }
  0x34   : > { %1793 = vmatpush1.bf16.msra.mxu1 %v2742_v34  ;;  %v2886_v34 = vld [vmem:[%s3187_s23 + $0x70] ss:$56 sps:$4 sm:$0xff]   ;;  %v2857_v51 = vld [vmem:[%s3136_s19 + $0x4a4] ss:$8 sps:$4 sm:$0xff]  }
  0x35   : > { %1952 = vmatpush1.bf16.msra.mxu0 %v2743_v35  ;;  %1794 = vmatprep.subr.bf16.mxu1 %v2744_v36  ;;  %v2887_v35 = vld [vmem:[%s3187_s23 + $0x88] ss:$56 sps:$4 sm:$0xff]   ;;  %v2836_v36 = vld [vmem:[%s3136_s19 + $0x174] ss:$8 sps:$4 sm:$0xff]  }
  0x36   : > { %1953 = vmatprep.subr.bf16.mxu0 %v2746_v37  ;;  %v2839_v37 = vld [vmem:[%s3136_s19 + $0x474] ss:$8 sps:$4 sm:$0xff]  }
  0x38   : > { %1795 = vmatpush1.bf16.msra.mxu1 %v2748_v38  ;;  %v2834_v38 = vld [vmem:[%s3136_s19 + $0x170] ss:$8 sps:$4 sm:$0xff]  }
  0x39   : > { %1954 = vmatpush1.bf16.msra.mxu0 %v2749_v39  ;;  %1796 = vmatprep.subr.bf16.mxu1 %v2750_v40  ;;  %v2837_v39 = vld [vmem:[%s3136_s19 + $0x470] ss:$8 sps:$4 sm:$0xff]   ;;  %v2896_v40 = vld [vmem:[%s3187_s23 + $0xc] ss:$56 sps:$4 sm:$0xff]  }
  0x3a   : > { %1955 = vmatprep.subr.bf16.mxu0 %v2752_v41  ;;  %v2842_v41 = vld [vmem:[%s3136_s19 + $0x184] ss:$8 sps:$4 sm:$0xff]  }
  0x3c   : > { %1797 = vmatpush1.bf16.msra.mxu1 %v2754_v42  ;;  %v2845_v42 = vld [vmem:[%s3136_s19 + $0x484] ss:$8 sps:$4 sm:$0xff]  }
  0x3d   : > { %1956 = vmatpush1.bf16.msra.mxu0 %v2755_v43  ;;  %1798 = vmatprep.subr.bf16.mxu1 %v2756_v44  ;;  %v2902_v43 = vld [vmem:[%s3187_s23 + $0x24] ss:$56 sps:$4 sm:$0xff]   ;;  %v2840_v44 = vld [vmem:[%s3136_s19 + $0x180] ss:$8 sps:$4 sm:$0xff]  }
  0x3e   : > { %1957 = vmatprep.subr.bf16.mxu0 %v2758_v45  ;;  %v2843_v45 = vld [vmem:[%s3136_s19 + $0x480] ss:$8 sps:$4 sm:$0xff]  }
  0x40   : > { %1799 = vmatpush1.bf16.msra.mxu1 %v2760_v46  ;;  %v2848_v46 = vld [vmem:[%s3136_s19 + $0x194] ss:$8 sps:$4 sm:$0xff]  }
  0x41   : > { %1958 = vmatpush1.bf16.msra.mxu0 %v2761_v47  ;;  %1800 = vmatprep.subr.bf16.mxu1 %v2762_v49  ;;  %v2851_v47 = vld [vmem:[%s3136_s19 + $0x494] ss:$8 sps:$4 sm:$0xff]   ;;  %v2849_v49 = vld [vmem:[%s3136_s19 + $0x490] ss:$8 sps:$4 sm:$0xff]  }
  0x42   : > { %1959 = vmatprep.subr.bf16.mxu0 %v2764_v50  ;;  %v2854_v50 = vld [vmem:[%s3136_s19 + $0x1a4] ss:$8 sps:$4 sm:$0xff]  }
  0x44   : > { %1801 = vmatpush1.bf16.msra.mxu1 %v2766_v52  ;;  %v2852_v52 = vld [vmem:[%s3136_s19 + $0x1a0] ss:$8 sps:$4 sm:$0xff]  }
  0x45   : > { %1960 = vmatpush1.bf16.msra.mxu0 %v2767_v53  ;;  %1802 = vmatprep.subr.bf16.mxu1 %v2768_v54  ;;  %v2855_v53 = vld [vmem:[%s3136_s19 + $0x4a0] ss:$8 sps:$4 sm:$0xff]   ;;  %v2860_v54 = vld [vmem:[%s3136_s19 + $0x1b4] ss:$8 sps:$4 sm:$0xff]  }
  0x46   : > { %1961 = vmatprep.subr.bf16.mxu0 %v2770_v55  ;;  %v2863_v55 = vld [vmem:[%s3136_s19 + $0x4b4] ss:$8 sps:$4 sm:$0xff]  }
  0x48   : > { %1803 = vmatpush1.bf16.msra.mxu1 %v2772_v56  ;;  %v2858_v56 = vld [vmem:[%s3136_s19 + $0x1b0] ss:$8 sps:$4 sm:$0xff]  }
  0x49   : > { %1962 = vmatpush1.bf16.msra.mxu0 %v2773_v57  ;;  %1804 = vmatprep.subr.bf16.mxu1 %v2774_v58  ;;  %v2861_v57 = vld [vmem:[%s3136_s19 + $0x4b0] ss:$8 sps:$4 sm:$0xff]   ;;  %v2866_v58 = vld [vmem:[%s3136_s19 + $0x1c4] ss:$8 sps:$4 sm:$0xff]  }
  0x4a   : > { %1963 = vmatprep.subr.bf16.mxu0 %v2776_v59  ;;  %v2869_v59 = vld [vmem:[%s3136_s19 + $0x4c4] ss:$8 sps:$4 sm:$0xff]  }
  0x4c   : > { %1805 = vmatpush1.bf16.msra.mxu1 %v2778_v60  ;;  %v2864_v60 = vld [vmem:[%s3136_s19 + $0x1c0] ss:$8 sps:$4 sm:$0xff]  }
  0x4d   : > { %1964 = vmatpush1.bf16.msra.mxu0 %v2779_v61  ;;  %1806 = vmatprep.subr.bf16.mxu1 %v2780_v62  ;;  %v2867_v61 = vld [vmem:[%s3136_s19 + $0x4c0] ss:$8 sps:$4 sm:$0xff]   ;;  %v2872_v62 = vld [vmem:[%s3136_s19 + $0x1d4] ss:$8 sps:$4 sm:$0xff]  }
  0x4e   : > { %1965 = vmatprep.subr.bf16.mxu0 %v2782_v63  ;;  %v2875_v63 = vld [vmem:[%s3136_s19 + $0x4d4] ss:$8 sps:$4 sm:$0xff]  }
  0x50   : > { %1807 = vmatpush1.bf16.msra.mxu1 %v2784_v0  ;;  %v2870_v0 = vld [vmem:[%s3136_s19 + $0x1d0] ss:$8 sps:$4 sm:$0xff]  }
  0x51   : > { %1966 = vmatpush1.bf16.msra.mxu0 %v2785_v1  ;;  %1829 = vmatprep.subr.bf16.mxu1 %v2791_v2  ;;  %v2873_v1 = vld [vmem:[%s3136_s19 + $0x4d0] ss:$8 sps:$4 sm:$0xff]   ;;  %v2880_v2 = vld [vmem:[%s3136_s19 + $0x1e4] ss:$8 sps:$4 sm:$0xff]  }
  0x52   : > { %1988 = vmatprep.subr.bf16.mxu0 %v2797_v3  ;;  %v2885_v3 = vld [vmem:[%s3136_s19 + $0x4e4] ss:$8 sps:$4 sm:$0xff]  }
  0x53   : > { %1809 = vmatmul.mubr.bf16.vlgmr.msra.gmra.mrb[0].mxu1 %v2786_v4  ;;  %v2878_v4 = vld [vmem:[%s3136_s19 + $0x1e0] ss:$8 sps:$4 sm:$0xff]  }
  0x54   : > { %1968 = vmatmul.mubr.bf16.vlgmr.msra.gmra.mrb[0].mxu0 %v2792_v6  ;;  %1830 = vmatpush1.bf16.msra.mxu1 %v2789_v5  ;;  %v2883_v5 = vld [vmem:[%s3136_s19 + $0x4e0] ss:$8 sps:$4 sm:$0xff]   ;;  %v2890_v6 = vld [vmem:[%s3136_s19 + $0x1f4] ss:$8 sps:$4 sm:$0xff]  }
  0x55   : > { %1989 = vmatpush1.bf16.msra.mxu0 %v2795_v7  ;;  %1831 = vmatprep.subr.bf16.mxu1 %v2800_v8  ;;  %v2893_v7 = vld [vmem:[%s3136_s19 + $0x4f4] ss:$8 sps:$4 sm:$0xff]   ;;  %v2888_v8 = vld [vmem:[%s3136_s19 + $0x1f0] ss:$8 sps:$4 sm:$0xff]  }
  0x56   : > { %1990 = vmatprep.subr.bf16.mxu0 %v2803_v9  ;;  %1818 = vmatprep.mubr.bf16.mxu1 %v2876_v28  ;;  %v2891_v9 = vld [vmem:[%s3136_s19 + $0x4f0] ss:$8 sps:$4 sm:$0xff]   ;;  %v2920_v28 = vld [vmem:[%s3136_s19 + $0x234] ss:$8 sps:$4 sm:$0xff]  }
  0x57   : > { %1977 = vmatprep.mubr.bf16.mxu0 %v2881_v31  ;;  %v2921_v31 = vld [vmem:[%s3136_s19 + $0x530] ss:$8 sps:$4 sm:$0xff]  }
  0x58   : > { %1832 = vmatpush1.bf16.msra.mxu1 %v2798_v10  ;;  %v2899_v10 = vld [vmem:[%s3136_s19 + $0x204] ss:$8 sps:$4 sm:$0xff]  }
  0x59   : > { %1991 = vmatpush1.bf16.msra.mxu0 %v2801_v11  ;;  %1833 = vmatprep.subr.bf16.mxu1 %v2806_v12  ;;  %v2905_v11 = vld [vmem:[%s3136_s19 + $0x504] ss:$8 sps:$4 sm:$0xff]   ;;  %v2894_v12 = vld [vmem:[%s3187_s23 + $0x8] ss:$56 sps:$4 sm:$0xff]  }
  0x5a   : > { %1992 = vmatprep.subr.bf16.mxu0 %v2809_v13  ;;  %v2897_v13 = vld [vmem:[%s3136_s19 + $0x200] ss:$8 sps:$4 sm:$0xff]  }
  0x5b   : > { %1819 = vmatmul.mubr.bf16.gmra.mrb[4].mxu1 %v2886_v34  ;;  %v2929_v34 = vld [vmem:[%s3136_s19 + $0x544] ss:$8 sps:$4 sm:$0xff]  }
  0x5c   : > { %1834 = vmatpush1.bf16.msra.mxu1 %v2804_v14  ;;  %1978 = vmatmul.mubr.bf16.gmra.mrb[4].mxu0 %v2887_v35  ;;  %v2900_v14 = vld [vmem:[%s3187_s23 + $0x20] ss:$56 sps:$4 sm:$0xff]   ;;  %v3007_v35 = vld [vmem:[%s3187_s23 + $0x2c] ss:$56 sps:$4 sm:$0xff]  }
  0x5d   : > { %1993 = vmatpush1.bf16.msra.mxu0 %v2807_v15  ;;  %1835 = vmatprep.subr.bf16.mxu1 %v2812_v16  ;;  %v2903_v15 = vld [vmem:[%s3136_s19 + $0x500] ss:$8 sps:$4 sm:$0xff]   ;;  %v2908_v16 = vld [vmem:[%s3136_s19 + $0x214] ss:$8 sps:$4 sm:$0xff]  }
  0x5e   : > { %1994 = vmatprep.subr.bf16.mxu0 %v2815_v17  ;;  %1861 = vmatprep.mubr.bf16.mxu1 %v2896_v40  ;;  %v2911_v17 = vld [vmem:[%s3136_s19 + $0x514] ss:$8 sps:$4 sm:$0xff]   ;;  %v2930_v40 = vld [vmem:[%s3136_s19 + $0x250] ss:$8 sps:$4 sm:$0xff]  }
  0x5f   : > { %2020 = vmatprep.mubr.bf16.mxu0 %v2902_v43  ;;  %v2941_v43 = vld [vmem:[%s3136_s19 + $0x564] ss:$8 sps:$4 sm:$0xff]  }
  0x60   : > { %1836 = vmatpush1.bf16.msra.mxu1 %v2810_v18  ;;  %v2906_v18 = vld [vmem:[%s3136_s19 + $0x210] ss:$8 sps:$4 sm:$0xff]  }
  0x61   : > { %1995 = vmatpush1.bf16.msra.mxu0 %v2813_v19  ;;  %1837 = vmatprep.subr.bf16.mxu1 %v2818_v20  ;;  %v2909_v19 = vld [vmem:[%s3136_s19 + $0x510] ss:$8 sps:$4 sm:$0xff]   ;;  %v2984_v20 = vld [vmem:[%s3187_s23 + $0x7c] ss:$56 sps:$4 sm:$0xff]  }
  0x62   : > { %1996 = vmatprep.subr.bf16.mxu0 %v2821_v21  ;;  %v2914_v21 = vld [vmem:[%s3136_s19 + $0x224] ss:$8 sps:$4 sm:$0xff]  }
  0x64   : > { %1838 = vmatpush1.bf16.msra.mxu1 %v2816_v22  ;;  %v2986_v22 = vld [vmem:[%s3187_s23 + $0x94] ss:$56 sps:$4 sm:$0xff]  }
  0x65   : > { %1997 = vmatpush1.bf16.msra.mxu0 %v2819_v23  ;;  %1839 = vmatprep.subr.bf16.mxu1 %v2824_v24  ;;  %v2917_v23 = vld [vmem:[%s3136_s19 + $0x524] ss:$8 sps:$4 sm:$0xff]   ;;  %v2912_v24 = vld [vmem:[%s3136_s19 + $0x220] ss:$8 sps:$4 sm:$0xff]  }
  0x66   : > { %1998 = vmatprep.subr.bf16.mxu0 %v2827_v25  ;;  %v2915_v25 = vld [vmem:[%s3136_s19 + $0x520] ss:$8 sps:$4 sm:$0xff]  }
  0x68   : > { %1840 = vmatpush1.bf16.msra.mxu1 %v2822_v26  ;;  %v2988_v26 = vld [vmem:[%s3187_s23 + $0x78] ss:$56 sps:$4 sm:$0xff]  }
  0x69   : > { %1999 = vmatpush1.bf16.msra.mxu0 %v2825_v27  ;;  %1841 = vmatprep.subr.bf16.mxu1 %v2830_v29  ;;  %v2992_v27 = vld [vmem:[%s3187_s23 + $0x90] ss:$56 sps:$4 sm:$0xff]   ;;  %v2923_v29 = vld [vmem:[%s3136_s19 + $0x534] ss:$8 sps:$4 sm:$0xff]  }
  0x6a   : > { %2000 = vmatprep.subr.bf16.mxu0 %v2833_v30  ;;  %v2918_v30 = vld [vmem:[%s3136_s19 + $0x230] ss:$8 sps:$4 sm:$0xff]  }
  0x6c   : > { %1842 = vmatpush1.bf16.msra.mxu1 %v2828_v32  ;;  %v2926_v32 = vld [vmem:[%s3136_s19 + $0x244] ss:$8 sps:$4 sm:$0xff]  }
  0x6d   : > { %2001 = vmatpush1.bf16.msra.mxu0 %v2831_v33  ;;  %1843 = vmatprep.subr.bf16.mxu1 %v2836_v36  ;;  %v3004_v33 = vld [vmem:[%s3187_s23 + $0x14] ss:$56 sps:$4 sm:$0xff]   ;;  %v2924_v36 = vld [vmem:[%s3136_s19 + $0x240] ss:$8 sps:$4 sm:$0xff]  }
  0x6e   : > { %2002 = vmatprep.subr.bf16.mxu0 %v2839_v37  ;;  %v2927_v37 = vld [vmem:[%s3136_s19 + $0x540] ss:$8 sps:$4 sm:$0xff]  }
  0x70   : > { %1844 = vmatpush1.bf16.msra.mxu1 %v2834_v38  ;;  %v2932_v38 = vld [vmem:[%s3136_s19 + $0x254] ss:$8 sps:$4 sm:$0xff]  }
  0x71   : > { %2003 = vmatpush1.bf16.msra.mxu0 %v2837_v39  ;;  %1845 = vmatprep.subr.bf16.mxu1 %v2842_v41  ;;  %v2935_v39 = vld [vmem:[%s3136_s19 + $0x554] ss:$8 sps:$4 sm:$0xff]   ;;  %v2933_v41 = vld [vmem:[%s3136_s19 + $0x550] ss:$8 sps:$4 sm:$0xff]  }
  0x72   : > { %2004 = vmatprep.subr.bf16.mxu0 %v2845_v42  ;;  %v2938_v42 = vld [vmem:[%s3136_s19 + $0x264] ss:$8 sps:$4 sm:$0xff]  }
  0x74   : > { %1846 = vmatpush1.bf16.msra.mxu1 %v2840_v44  ;;  %v2936_v44 = vld [vmem:[%s3136_s19 + $0x260] ss:$8 sps:$4 sm:$0xff]  }
  0x75   : > { %2005 = vmatpush1.bf16.msra.mxu0 %v2843_v45  ;;  %1847 = vmatprep.subr.bf16.mxu1 %v2848_v46  ;;  %v2939_v45 = vld [vmem:[%s3136_s19 + $0x560] ss:$8 sps:$4 sm:$0xff]   ;;  %v2944_v46 = vld [vmem:[%s3136_s19 + $0x274] ss:$8 sps:$4 sm:$0xff]  }
  0x76   : > { %2006 = vmatprep.subr.bf16.mxu0 %v2851_v47  ;;  %v2947_v47 = vld [vmem:[%s3136_s19 + $0x574] ss:$8 sps:$4 sm:$0xff]  }
  0x78   : > { %1848 = vmatpush1.bf16.msra.mxu1 %v2846_v48  ;;  %v2942_v48 = vld [vmem:[%s3136_s19 + $0x270] ss:$8 sps:$4 sm:$0xff]  }
  0x79   : > { %2007 = vmatpush1.bf16.msra.mxu0 %v2849_v49  ;;  %1849 = vmatprep.subr.bf16.mxu1 %v2854_v50  ;;  %v2945_v49 = vld [vmem:[%s3136_s19 + $0x570] ss:$8 sps:$4 sm:$0xff]   ;;  %v2950_v50 = vld [vmem:[%s3136_s19 + $0x284] ss:$8 sps:$4 sm:$0xff]  }
  0x7a   : > { %2008 = vmatprep.subr.bf16.mxu0 %v2857_v51  ;;  %v2953_v51 = vld [vmem:[%s3136_s19 + $0x584] ss:$8 sps:$4 sm:$0xff]  }
  0x7c   : > { %1850 = vmatpush1.bf16.msra.mxu1 %v2852_v52  ;;  %v2948_v52 = vld [vmem:[%s3136_s19 + $0x280] ss:$8 sps:$4 sm:$0xff]  }
  0x7d   : > { %2009 = vmatpush1.bf16.msra.mxu0 %v2855_v53  ;;  %1851 = vmatprep.subr.bf16.mxu1 %v2860_v54  ;;  %v2951_v53 = vld [vmem:[%s3136_s19 + $0x580] ss:$8 sps:$4 sm:$0xff]   ;;  %v2956_v54 = vld [vmem:[%s3136_s19 + $0x294] ss:$8 sps:$4 sm:$0xff]  }
  0x7e   : > { %2010 = vmatprep.subr.bf16.mxu0 %v2863_v55  ;;  %v2959_v55 = vld [vmem:[%s3136_s19 + $0x594] ss:$8 sps:$4 sm:$0xff]  }
  0x80   : > { %1852 = vmatpush1.bf16.msra.mxu1 %v2858_v56  ;;  %v2954_v56 = vld [vmem:[%s3136_s19 + $0x290] ss:$8 sps:$4 sm:$0xff]  }
  0x81   : > { %2011 = vmatpush1.bf16.msra.mxu0 %v2861_v57  ;;  %1853 = vmatprep.subr.bf16.mxu1 %v2866_v58  ;;  %v2957_v57 = vld [vmem:[%s3136_s19 + $0x590] ss:$8 sps:$4 sm:$0xff]   ;;  %v2962_v58 = vld [vmem:[%s3136_s19 + $0x2a4] ss:$8 sps:$4 sm:$0xff]  }
  0x82   : > { %2012 = vmatprep.subr.bf16.mxu0 %v2869_v59  ;;  %v2965_v59 = vld [vmem:[%s3136_s19 + $0x5a4] ss:$8 sps:$4 sm:$0xff]  }
  0x84   : > { %1854 = vmatpush1.bf16.msra.mxu1 %v2864_v60  ;;  %v2960_v60 = vld [vmem:[%s3136_s19 + $0x2a0] ss:$8 sps:$4 sm:$0xff]  }
  0x85   : > { %2013 = vmatpush1.bf16.msra.mxu0 %v2867_v61  ;;  %1855 = vmatprep.subr.bf16.mxu1 %v2872_v62  ;;  %v2963_v61 = vld [vmem:[%s3136_s19 + $0x5a0] ss:$8 sps:$4 sm:$0xff]   ;;  %v2968_v62 = vld [vmem:[%s3136_s19 + $0x2b4] ss:$8 sps:$4 sm:$0xff]  }
  0x86   : > { %2014 = vmatprep.subr.bf16.mxu0 %v2875_v63  ;;  %v2971_v63 = vld [vmem:[%s3136_s19 + $0x5b4] ss:$8 sps:$4 sm:$0xff]  }
  0x88   : > { %1856 = vmatpush1.bf16.msra.mxu1 %v2870_v0  ;;  %v2966_v0 = vld [vmem:[%s3136_s19 + $0x2b0] ss:$8 sps:$4 sm:$0xff]  }
  0x89   : > { %2015 = vmatpush1.bf16.msra.mxu0 %v2873_v1  ;;  %1857 = vmatprep.subr.bf16.mxu1 %v2880_v2  ;;  %v2969_v1 = vld [vmem:[%s3136_s19 + $0x5b0] ss:$8 sps:$4 sm:$0xff]   ;;  %v2974_v2 = vld [vmem:[%s3136_s19 + $0x2c4] ss:$8 sps:$4 sm:$0xff]  }
  0x8a   : > { %2016 = vmatprep.subr.bf16.mxu0 %v2885_v3  ;;  %v2977_v3 = vld [vmem:[%s3136_s19 + $0x5c4] ss:$8 sps:$4 sm:$0xff]  }
  0x8c   : > { %1858 = vmatpush1.bf16.msra.mxu1 %v2878_v4  ;;  %v2972_v4 = vld [vmem:[%s3136_s19 + $0x2c0] ss:$8 sps:$4 sm:$0xff]  }
  0x8d   : > { %2017 = vmatpush1.bf16.msra.mxu0 %v2883_v5  ;;  %1859 = vmatprep.subr.bf16.mxu1 %v2890_v6  ;;  %v2975_v5 = vld [vmem:[%s3136_s19 + $0x5c0] ss:$8 sps:$4 sm:$0xff]   ;;  %v2980_v6 = vld [vmem:[%s3136_s19 + $0x2d4] ss:$8 sps:$4 sm:$0xff]  }
  0x8e   : > { %2018 = vmatprep.subr.bf16.mxu0 %v2893_v7  ;;  %v2983_v7 = vld [vmem:[%s3136_s19 + $0x5d4] ss:$8 sps:$4 sm:$0xff]  }
  0x90   : > { %1860 = vmatpush1.bf16.msra.mxu1 %v2888_v8  ;;  %v2978_v8 = vld [vmem:[%s3136_s19 + $0x2d0] ss:$8 sps:$4 sm:$0xff]  }
  0x91   : > { %2019 = vmatpush1.bf16.msra.mxu0 %v2891_v9  ;;  %1882 = vmatprep.subr.bf16.mxu1 %v2899_v10  ;;  %v2981_v9 = vld [vmem:[%s3136_s19 + $0x5d0] ss:$8 sps:$4 sm:$0xff]   ;;  %v2991_v10 = vld [vmem:[%s3136_s19 + $0x2e4] ss:$8 sps:$4 sm:$0xff]  }
  0x92   : > { %2041 = vmatprep.subr.bf16.mxu0 %v2905_v11  ;;  %v2995_v11 = vld [vmem:[%s3136_s19 + $0x5e4] ss:$8 sps:$4 sm:$0xff]  }
  0x93   : > { %1862 = vmatmul.mubr.bf16.vlgmr.msra.gmra.mrb[0].mxu1 %v2894_v12  ;;  %v2989_v12 = vld [vmem:[%s3136_s19 + $0x2e0] ss:$8 sps:$4 sm:$0xff]  }
  0x94   : > { %2021 = vmatmul.mubr.bf16.vlgmr.msra.gmra.mrb[0].mxu0 %v2900_v14  ;;  %1883 = vmatpush1.bf16.msra.mxu1 %v2897_v13  ;;  %v2993_v13 = vld [vmem:[%s3136_s19 + $0x5e0] ss:$8 sps:$4 sm:$0xff]   ;;  %v2998_v14 = vld [vmem:[%s3136_s19 + $0x2f4] ss:$8 sps:$4 sm:$0xff]  }
  0x95   : > { %2042 = vmatpush1.bf16.msra.mxu0 %v2903_v15  ;;  %1884 = vmatprep.subr.bf16.mxu1 %v2908_v16  ;;  %v3001_v15 = vld [vmem:[%s3136_s19 + $0x5f4] ss:$8 sps:$4 sm:$0xff]   ;;  %v2996_v16 = vld [vmem:[%s3136_s19 + $0x2f0] ss:$8 sps:$4 sm:$0xff]  }
  0x96   : > { %2043 = vmatprep.subr.bf16.mxu0 %v2911_v17  ;;  %1871 = vmatprep.mubr.bf16.mxu1 %v2984_v20  ;;  %v2999_v17 = vld [vmem:[%s3136_s19 + $0x5f0] ss:$8 sps:$4 sm:$0xff]   ;;  %v3005_v20 = vld [vmem:[%s3187_s23 + $0x28] ss:$56 sps:$4 sm:$0xff]  }
  0x97   : > { %2030 = vmatprep.mubr.bf16.mxu0 %v2986_v22  ;;  %v3013_v22 = vld [vmem:[%s3136_s19 + $0x614] ss:$8 sps:$4 sm:$0xff]  }
  0x98   : > { %1885 = vmatpush1.bf16.msra.mxu1 %v2906_v18  ;;  %v3010_v18 = vld [vmem:[%s3136_s19 + $0x604] ss:$8 sps:$4 sm:$0xff]  }
  0x99   : > { %2044 = vmatpush1.bf16.msra.mxu0 %v2909_v19  ;;  %1886 = vmatprep.subr.bf16.mxu1 %v2914_v21  ;;  %v3002_v19 = vld [vmem:[%s3187_s23 + $0x10] ss:$56 sps:$4 sm:$0xff]  }
  0x9a   : > { %2045 = vmatprep.subr.bf16.mxu0 %v2917_v23  ;;  %v3008_v21 = vld [vmem:[%s3136_s19 + $0x600] ss:$8 sps:$4 sm:$0xff]   ;;  %v3014_v23 = vld [vmem:[%s3187_s23 + $0x84] ss:$56 sps:$4 sm:$0xff]  }
  0x9b   : > { %1872 = vmatmul.mubr.bf16.gmra.mrb[4].mxu1 %v2988_v26  ;;  %v3022_v26 = vld [vmem:[%s3136_s19 + $0x624] ss:$8 sps:$4 sm:$0xff]  }
  0x9c   : > { %2031 = vmatmul.mubr.bf16.gmra.mrb[4].mxu0 %v2992_v27  ;;  %1887 = vmatpush1.bf16.msra.mxu1 %v2912_v24  ;;  %v3016_v24 = vld [vmem:[%s3187_s23 + $0x9c] ss:$56 sps:$4 sm:$0xff]   ;;  %v3018_v27 = vld [vmem:[%s3187_s23 + $0x80] ss:$56 sps:$4 sm:$0xff]  }
  0x9d   : > { %2046 = vmatpush1.bf16.msra.mxu0 %v2915_v25  ;;  %1888 = vmatprep.subr.bf16.mxu1 %v2920_v28  ;;  %v3011_v25 = vld [vmem:[%s3136_s19 + $0x610] ss:$8 sps:$4 sm:$0xff]  }
  0x9e   : > { %2047 = vmatprep.subr.bf16.mxu0 %v2923_v29  ;;  %1914 = vmatprep.mubr.bf16.mxu1 %v3004_v33  ;;  %v3019_v28 = vld [vmem:[%s3187_s23 + $0x98] ss:$56 sps:$4 sm:$0xff]   ;;  %v3020_v29 = vld [vmem:[%s3136_s19 + $0x620] ss:$8 sps:$4 sm:$0xff]  }
  0x9f   : > { %2073 = vmatprep.mubr.bf16.mxu0 %v3007_v35  ;;  %v3023_v33 = vld [vmem:[%s3136_s19 + $0x630] ss:$8 sps:$4 sm:$0xff]   ;;  %v3026_v35 = vld [vmem:[%s3136_s19 + $0x640] ss:$8 sps:$4 sm:$0xff]  }
  0xa0   : > { %1889 = vmatpush1.bf16.msra.mxu1 %v2918_v30  ;;  %v3025_v30 = vld [vmem:[%s3136_s19 + $0x634] ss:$8 sps:$4 sm:$0xff]  }
  0xa1   : > { %2048 = vmatpush1.bf16.msra.mxu0 %v2921_v31  ;;  %1890 = vmatprep.subr.bf16.mxu1 %v2926_v32  ;;  %v3064_v31 = vld [vmem:[%s3187_s23 + $0x34] ss:$56 sps:$4 sm:$0xff]   ;;  %v3067_v32 = vld [vmem:[%s3187_s23 + $0xa4] ss:$56 sps:$4 sm:$0xff]  }
  0xa2   : > { %2049 = vmatprep.subr.bf16.mxu0 %v2929_v34  ;;  %v3028_v34 = vld [vmem:[%s3136_s19 + $0x644] ss:$8 sps:$4 sm:$0xff]  }
  0xa4   : > { %1891 = vmatpush1.bf16.msra.mxu1 %v2924_v36  ;;  %v3031_v36 = vld [vmem:[%s3136_s19 + $0x654] ss:$8 sps:$4 sm:$0xff]  }
  0xa5   : > { %2050 = vmatpush1.bf16.msra.mxu0 %v2927_v37  ;;  %1892 = vmatprep.subr.bf16.mxu1 %v2932_v38  ;;  %v3029_v37 = vld [vmem:[%s3136_s19 + $0x650] ss:$8 sps:$4 sm:$0xff]   ;;  %v3034_v38 = vld [vmem:[%s3136_s19 + $0x664] ss:$8 sps:$4 sm:$0xff]  }
  0xa6   : > { %2051 = vmatprep.subr.bf16.mxu0 %v2935_v39  ;;  %v3032_v39 = vld [vmem:[%s3136_s19 + $0x660] ss:$8 sps:$4 sm:$0xff]  }
  0xa8   : > { %1893 = vmatpush1.bf16.msra.mxu1 %v2930_v40  ;;  %v3037_v40 = vld [vmem:[%s3136_s19 + $0x674] ss:$8 sps:$4 sm:$0xff]  }
  0xa9   : > { %2052 = vmatpush1.bf16.msra.mxu0 %v2933_v41  ;;  %1894 = vmatprep.subr.bf16.mxu1 %v2938_v42  ;;  %v3035_v41 = vld [vmem:[%s3136_s19 + $0x670] ss:$8 sps:$4 sm:$0xff]   ;;  %v3040_v42 = vld [vmem:[%s3136_s19 + $0x684] ss:$8 sps:$4 sm:$0xff]  }
  0xaa   : > { %2053 = vmatprep.subr.bf16.mxu0 %v2941_v43  ;;  %v3038_v43 = vld [vmem:[%s3136_s19 + $0x680] ss:$8 sps:$4 sm:$0xff]  }
  0xac   : > { %1895 = vmatpush1.bf16.msra.mxu1 %v2936_v44  ;;  %v3043_v44 = vld [vmem:[%s3136_s19 + $0x694] ss:$8 sps:$4 sm:$0xff]  }
  0xad   : > { %2054 = vmatpush1.bf16.msra.mxu0 %v2939_v45  ;;  %1896 = vmatprep.subr.bf16.mxu1 %v2944_v46  ;;  %v3041_v45 = vld [vmem:[%s3136_s19 + $0x690] ss:$8 sps:$4 sm:$0xff]   ;;  %v3046_v46 = vld [vmem:[%s3136_s19 + $0x6a4] ss:$8 sps:$4 sm:$0xff]  }
  0xae   : > { %2055 = vmatprep.subr.bf16.mxu0 %v2947_v47  ;;  %v3044_v47 = vld [vmem:[%s3136_s19 + $0x6a0] ss:$8 sps:$4 sm:$0xff]  }
  0xb0   : > { %1897 = vmatpush1.bf16.msra.mxu1 %v2942_v48  ;;  %v3049_v48 = vld [vmem:[%s3136_s19 + $0x6b4] ss:$8 sps:$4 sm:$0xff]  }
  0xb1   : > { %2056 = vmatpush1.bf16.msra.mxu0 %v2945_v49  ;;  %1898 = vmatprep.subr.bf16.mxu1 %v2950_v50  ;;  %v3047_v49 = vld [vmem:[%s3136_s19 + $0x6b0] ss:$8 sps:$4 sm:$0xff]   ;;  %v3052_v50 = vld [vmem:[%s3136_s19 + $0x6c4] ss:$8 sps:$4 sm:$0xff]  }
  0xb2   : > { %2057 = vmatprep.subr.bf16.mxu0 %v2953_v51  ;;  %v3050_v51 = vld [vmem:[%s3136_s19 + $0x6c0] ss:$8 sps:$4 sm:$0xff]  }
  0xb4   : > { %1899 = vmatpush1.bf16.msra.mxu1 %v2948_v52  ;;  %v3055_v52 = vld [vmem:[%s3136_s19 + $0x6d4] ss:$8 sps:$4 sm:$0xff]  }
  0xb5   : > { %2058 = vmatpush1.bf16.msra.mxu0 %v2951_v53  ;;  %1900 = vmatprep.subr.bf16.mxu1 %v2956_v54  ;;  %v3053_v53 = vld [vmem:[%s3136_s19 + $0x6d0] ss:$8 sps:$4 sm:$0xff]   ;;  %v3058_v54 = vld [vmem:[%s3136_s19 + $0x6e4] ss:$8 sps:$4 sm:$0xff]  }
  0xb6   : > { %2059 = vmatprep.subr.bf16.mxu0 %v2959_v55  ;;  %v3056_v55 = vld [vmem:[%s3136_s19 + $0x6e0] ss:$8 sps:$4 sm:$0xff]  }
  0xb8   : > { %1901 = vmatpush1.bf16.msra.mxu1 %v2954_v56  ;;  %v3061_v56 = vld [vmem:[%s3136_s19 + $0x6f4] ss:$8 sps:$4 sm:$0xff]  }
  0xb9   : > { %2060 = vmatpush1.bf16.msra.mxu0 %v2957_v57  ;;  %1902 = vmatprep.subr.bf16.mxu1 %v2962_v58  ;;  %v3059_v57 = vld [vmem:[%s3136_s19 + $0x6f0] ss:$8 sps:$4 sm:$0xff]  }
  0xba   : > { %2061 = vmatprep.subr.bf16.mxu0 %v2965_v59  ;;  %v3062_v58 = vld [vmem:[%s3187_s23 + $0x30] ss:$56 sps:$4 sm:$0xff]   ;;  %v3065_v59 = vld [vmem:[%s3187_s23 + $0xa0] ss:$56 sps:$4 sm:$0xff]  }
  0xbc   : > { %1903 = vmatpush1.bf16.msra.mxu1 %v2960_v60  ;;  %v506_v60 = vlaneseq }
  0xbd   : > { %2062 = vmatpush1.bf16.msra.mxu0 %v2963_v61  ;;  %1904 = vmatprep.subr.bf16.mxu1 %v2968_v62 }
  0xbe   : > { %2063 = vmatprep.subr.bf16.mxu0 %v2971_v63  ;;  %v507_v61 = vshrl.u32 %v506_v60, 7 }
  0xc0   : > { %1905 = vmatpush1.bf16.msra.mxu1 %v2966_v0 }
  0xc1   : > { %2064 = vmatpush1.bf16.msra.mxu0 %v2969_v1  ;;  %1906 = vmatprep.subr.bf16.mxu1 %v2974_v2  ;;  %v508_v1 = vsub.s32 0, %v507_v61 }
  0xc2   : > { %2065 = vmatprep.subr.bf16.mxu0 %v2977_v3  ;;  %v504_v3 = vld [vmem:[%s240_s27] sm:$0x3] }
  0xc4   : > { %1907 = vmatpush1.bf16.msra.mxu1 %v2972_v4  ;;  %v512_v4 = vsub.s32 1, %v507_v61 }
  0xc5   : > { %2066 = vmatpush1.bf16.msra.mxu0 %v2975_v5  ;;  %1908 = vmatprep.subr.bf16.mxu1 %v2980_v6  ;;  %v509_v5 = vrot.slane %v504_v3, %v508_v1 }
  0xc6   : > { %2067 = vmatprep.subr.bf16.mxu0 %v2983_v7  ;;  %v513_v6 = vrot.slane %v504_v3, %v512_v4 }
  0xc8   : > { %1909 = vmatpush1.bf16.msra.mxu1 %v2978_v8 }
  0xc9   : > { %2068 = vmatpush1.bf16.msra.mxu0 %v2981_v9  ;;  %1910 = vmatprep.subr.bf16.mxu1 %v2991_v10 }
  0xca   : > { %2069 = vmatprep.subr.bf16.mxu0 %v2995_v11 }
  0xcc   : > { %1911 = vmatpush1.bf16.msra.mxu1 %v2989_v12 }
  0xcd   : > { %2070 = vmatpush1.bf16.msra.mxu0 %v2993_v13  ;;  %1912 = vmatprep.subr.bf16.mxu1 %v2998_v14 }
  0xce   : > { %2071 = vmatprep.subr.bf16.mxu0 %v3001_v15 }
  0xd0   : > { %1913 = vmatpush1.bf16.msra.mxu1 %v2996_v16 }
  0xd1   : > { %2072 = vmatpush1.bf16.msra.mxu0 %v2999_v17  ;;  %2576 = vmatprep.subr.bf16.mxu1 %v3010_v18 }
  0xd2   : > { %2094 = vmatprep.subr.bf16.mxu0 %v3010_v18 }
  0xd3   : > { %1915 = vmatmul.mubr.bf16.vlgmr.msra.gmra.mrb[0].mxu1 %v3002_v19 }
  0xd4   : > { %2074 = vmatmul.mubr.bf16.vlgmr.msra.gmra.mrb[0].mxu0 %v3005_v20  ;;  %2592 = vmatpush1.bf16.msra.mxu1 %v3008_v21 }
  0xd5   : > { %2095 = vmatpush1.bf16.msra.mxu0 %v3008_v21  ;;  %2577 = vmatprep.subr.bf16.mxu1 %v3013_v22 }
  0xd6   : > { %2096 = vmatprep.subr.bf16.mxu0 %v3013_v22  ;;  %1924 = vmatprep.mubr.bf16.mxu1 %v3014_v23 }
  0xd7   : > { %2083 = vmatprep.mubr.bf16.mxu0 %v3016_v24 }
  0xd8   : > { %2593 = vmatpush1.bf16.msra.mxu1 %v3011_v25 }
  0xd9   : > { %2097 = vmatpush1.bf16.msra.mxu0 %v3011_v25  ;;  %2578 = vmatprep.subr.bf16.mxu1 %v3022_v26 }
  0xda   : > { %2098 = vmatprep.subr.bf16.mxu0 %v3022_v26 }
  0xdb   : > { %1925 = vmatmul.mubr.bf16.gmra.mrb[4].mxu1 %v3018_v27 }
  0xdc   : > { %2084 = vmatmul.mubr.bf16.gmra.mrb[4].mxu0 %v3019_v28  ;;  %2594 = vmatpush1.bf16.msra.mxu1 %v3020_v29 }
  0xdd   : > { %2099 = vmatpush1.bf16.msra.mxu0 %v3020_v29  ;;  %2579 = vmatprep.subr.bf16.mxu1 %v3025_v30 }
  0xde   : > { %2100 = vmatprep.subr.bf16.mxu0 %v3025_v30  ;;  %2126 = vmatprep.mubr.bf16.mxu0 %v3064_v31 }
  0xdf   : > { %2136 = vmatprep.mubr.bf16.mxu1 %v3067_v32 }
  0xe0   : > { %2595 = vmatpush1.bf16.msra.mxu1 %v3023_v33 }
  0xe1   : > { %2101 = vmatpush1.bf16.msra.mxu0 %v3023_v33  ;;  %2580 = vmatprep.subr.bf16.mxu1 %v3028_v34 }
  0xe2   : > { %2102 = vmatprep.subr.bf16.mxu0 %v3028_v34 }
  0xe4   : > { %2596 = vmatpush1.bf16.msra.mxu1 %v3026_v35 }
  0xe5   : > { %2103 = vmatpush1.bf16.msra.mxu0 %v3026_v35  ;;  %2581 = vmatprep.subr.bf16.mxu1 %v3031_v36 }
  0xe6   : > { %2104 = vmatprep.subr.bf16.mxu0 %v3031_v36 }
  0xe8   : > { %2597 = vmatpush1.bf16.msra.mxu1 %v3029_v37 }
  0xe9   : > { %2105 = vmatpush1.bf16.msra.mxu0 %v3029_v37  ;;  %2582 = vmatprep.subr.bf16.mxu1 %v3034_v38 }
  0xea   : > { %2106 = vmatprep.subr.bf16.mxu0 %v3034_v38 }
  0xec   : > { %2598 = vmatpush1.bf16.msra.mxu1 %v3032_v39 }
  0xed   : > { %2107 = vmatpush1.bf16.msra.mxu0 %v3032_v39  ;;  %2583 = vmatprep.subr.bf16.mxu1 %v3037_v40 }
  0xee   : > { %2108 = vmatprep.subr.bf16.mxu0 %v3037_v40 }
  0xf0   : > { %2599 = vmatpush1.bf16.msra.mxu1 %v3035_v41 }
  0xf1   : > { %2109 = vmatpush1.bf16.msra.mxu0 %v3035_v41  ;;  %2584 = vmatprep.subr.bf16.mxu1 %v3040_v42 }
  0xf2   : > { %2110 = vmatprep.subr.bf16.mxu0 %v3040_v42 }
  0xf4   : > { %2600 = vmatpush1.bf16.msra.mxu1 %v3038_v43 }
  0xf5   : > { %2111 = vmatpush1.bf16.msra.mxu0 %v3038_v43  ;;  %2585 = vmatprep.subr.bf16.mxu1 %v3043_v44 }
  0xf6   : > { %2112 = vmatprep.subr.bf16.mxu0 %v3043_v44 }
  0xf8   : > { %2601 = vmatpush1.bf16.msra.mxu1 %v3041_v45 }
  0xf9   : > { %2113 = vmatpush1.bf16.msra.mxu0 %v3041_v45  ;;  %2586 = vmatprep.subr.bf16.mxu1 %v3046_v46 }
  0xfa   : > { %2114 = vmatprep.subr.bf16.mxu0 %v3046_v46 }
  0xfc   : > { %2602 = vmatpush1.bf16.msra.mxu1 %v3044_v47 }
  0xfd   : > { %2115 = vmatpush1.bf16.msra.mxu0 %v3044_v47  ;;  %2587 = vmatprep.subr.bf16.mxu1 %v3049_v48 }
  0xfe   : > { %2116 = vmatprep.subr.bf16.mxu0 %v3049_v48 }
 0x100   : > { %2603 = vmatpush1.bf16.msra.mxu1 %v3047_v49 }
 0x101   : > { %2117 = vmatpush1.bf16.msra.mxu0 %v3047_v49  ;;  %2588 = vmatprep.subr.bf16.mxu1 %v3052_v50 }
 0x102   : > { %2118 = vmatprep.subr.bf16.mxu0 %v3052_v50 }
 0x104   : > { %2604 = vmatpush1.bf16.msra.mxu1 %v3050_v51 }
 0x105   : > { %2119 = vmatpush1.bf16.msra.mxu0 %v3050_v51  ;;  %2589 = vmatprep.subr.bf16.mxu1 %v3055_v52 }
 0x106   : > { %2120 = vmatprep.subr.bf16.mxu0 %v3055_v52 }
 0x108   : > { %2605 = vmatpush1.bf16.msra.mxu1 %v3053_v53 }
 0x109   : > { %2121 = vmatpush1.bf16.msra.mxu0 %v3053_v53  ;;  %2590 = vmatprep.subr.bf16.mxu1 %v3058_v54 }
 0x10a   : > { %2122 = vmatprep.subr.bf16.mxu0 %v3058_v54 }
 0x10c   : > { %2606 = vmatpush1.bf16.msra.mxu1 %v3056_v55 }
 0x10d   : > { %2123 = vmatpush1.bf16.msra.mxu0 %v3056_v55  ;;  %2591 = vmatprep.subr.bf16.mxu1 %v3061_v56 }
 0x10e   : > { %2124 = vmatprep.subr.bf16.mxu0 %v3061_v56 }
 0x110   : > { %2607 = vmatpush1.bf16.msra.mxu1 %v3059_v57 }
 0x111   : > { %2125 = vmatpush1.bf16.msra.mxu0 %v3059_v57 }
 0x113   : > { %2137 = vmatmul.mubr.bf16.vlgmr.msra.gmra.mrb[8].mxu1 %v3065_v59 }
 0x114   : > { %2127 = vmatmul.mubr.bf16.vlgmr.msra.gmra.mrb[0].mxu0 %v3062_v58 }
 0x1a6   : > { %v1916_v62 = vpop.f32.mrb[0].mxu1 }
 0x1a7   : > { %v1918_v63 = vpop.f32.mrb[1].mxu1  ;;  %v2608_v23 = vadd.f32 %v1916_v62, %v509_v5 }
 0x1a8   : > { %v1920_v0 = vpop.f32.mrb[2].mxu1  ;;  %v2610_v24 = vadd.f32 %v1918_v63, %v513_v6 }
 0x1a9   : > { %v1922_v2 = vpop.f32.mrb[3].mxu1  ;;  %v2612_v27 = vadd.f32 %v1920_v0, %v509_v5 }
 0x1aa   : > { %v2614_v32 = vadd.f32 %v1922_v2, %v513_v6 }
 0x1ae   : > { %v1926_v7 = vpop.f32.mrb[4].mxu1 }
 0x1af   : > { %v2085_v8 = vpop.f32.mrb[4].mxu0  ;;  %v2616_v9 = vadd.f32 %v1926_v7, %v509_v5  ;;  %v1928_v10 = vpop.f32.mrb[5].mxu1 }
 0x1b0   : > { %v2087_v11 = vpop.f32.mrb[5].mxu0  ;;  %v2619_v12 = vadd.f32 %v1928_v10, %v513_v6  ;;  %v1930_v13 = vpop.f32.mrb[6].mxu1 }
 0x1b1   : > { %v2089_v14 = vpop.f32.mrb[6].mxu0  ;;  %v2617_v15 = vadd.f32 %v2616_v9, %v2085_v8  ;;  %v2622_v16 = vadd.f32 %v1930_v13, %v509_v5  ;;  %v1932_v17 = vpop.f32.mrb[7].mxu1 }
 0x1b2   : > { %v2091_v18 = vpop.f32.mrb[7].mxu0  ;;  %v2620_v19 = vadd.f32 %v2619_v12, %v2087_v11  ;;  %v2625_v20 = vadd.f32 %v1932_v17, %v513_v6 }
 0x1b3   : > { %v2623_v21 = vadd.f32 %v2622_v16, %v2089_v14 }
 0x1b4   : > { %v2626_v22 = vadd.f32 %v2625_v20, %v2091_v18 }
 0x1e6   : > { %v2138_v26 = vpop.f32.mrb[8].mxu1 }
 0x1e7   : > { %v2128_v25 = vpop.f32.mrb[0].mxu0  ;;  %v2618_v29 = vadd.f32 %v2617_v15, %v2138_v26  ;;  %v2140_v31 = vpop.f32.mrb[9].mxu1 }
 0x1e8   : > { %v2609_v28 = vadd.f32 %v2608_v23, %v2128_v25  ;;  %v2130_v30 = vpop.f32.mrb[1].mxu0  ;;  %v2621_v34 = vadd.f32 %v2620_v19, %v2140_v31  ;;  %v2142_v36 = vpop.f32.mrb[10].mxu1 }
 0x1e9   : > { %v2611_v33 = vadd.f32 %v2610_v24, %v2130_v30  ;;  %v2132_v35 = vpop.f32.mrb[2].mxu0  ;;  %v2151_v38 = vmax.f32 %v2618_v29, 0.0  ;;  %v2624_v40 = vadd.f32 %v2623_v21, %v2142_v36  ;;  %v2144_v42 = vpop.f32.mrb[11].mxu1 }
 0x1ea   : > { %v2147_v37 = vmax.f32 %v2609_v28, 0.0  ;;  %v2613_v39 = vadd.f32 %v2612_v27, %v2132_v35  ;;  %v2134_v41 = vpop.f32.mrb[3].mxu0  ;;  %v2152_v44 = vmax.f32 %v2621_v34, 0.0  ;;  %v2627_v46 = vadd.f32 %v2626_v22, %v2144_v42 }
 0x1eb   : > { %v2148_v43 = vmax.f32 %v2611_v33, 0.0  ;;  %v2615_v45 = vadd.f32 %v2614_v32, %v2134_v41  ;;  %v2153_v48 = vmax.f32 %v2624_v40, 0.0 }
 0x1ec   : > { %v2149_v47 = vmax.f32 %v2613_v39, 0.0  ;;  %v2574_v50 = vpack.c.bf16 %v2152_v44, %v2151_v38  ;;  %v2154_v52 = vmax.f32 %v2627_v46, 0.0 }
 0x1ed   : > { %v2572_v49 = vpack.c.bf16 %v2148_v43, %v2147_v37  ;;  %v2150_v51 = vmax.f32 %v2615_v45, 0.0 }
 0x1ee   : > { %2181 = vst [vmem:[%s250_s4 + $0x10] sm:$0xff] %v2574_v50  ;;  %v2575_v54 = vpack.c.bf16 %v2154_v52, %v2153_v48 }
 0x1ef   : > { %2179 = vst [vmem:[%s250_s4] sm:$0xff] %v2572_v49  ;;  %v2573_v53 = vpack.c.bf16 %v2150_v51, %v2149_v47 }
 0x1f0   : > { %2182 = vst [vmem:[%s250_s4 + $0x18] sm:$0xff] %v2575_v54 }
 0x1f1   : > { %2180 = vst [vmem:[%s250_s4 + $0x8] sm:$0xff] %v2573_v53 }
 0x1f2 PF: > { %s13_s14 = sadd.s32 1, %s3090_s14   ;;  %s3417_s12 = smov %s3086_s13 }
 0x1f3   : > { %p10_p5 = scmp.ge.s32.totalorder %s13_s14, 4   ;;  %s3418_s13 = smov %s3420_s15 }
 0x1f5   :  { %12 = sbr.rel (!%p10_p5) target bundleno = 2 (0x2), region = 68 }

// kernel: squeeze.6
= control target key start
LH: loop header
LB: loop body
LE: loop exit
PB: predicated region body
PF: predicated region fallthrough
CT: control target
= control target key end

     0   :  { %v268_v15 = vmov 0.0   ;;  %s324_s0 = inlined_call_operand.vmem [shape: bf16[1,18,256], index: 0, kind: input, shape index: {}]   ;;  %s325_s1 = inlined_call_operand.vmem [shape: bf16[2,3,3,256], index: 1, kind: output, shape index: {}]  }
   0x1   :  { %v265_v0 = vld [vmem:[%s324_s0 + $0x10] sm:$0xff]   ;;  %v266_v1 = vld [vmem:[%s324_s0 + $0x8] sm:$0xff]   ;;  %v262_v2 = vld [vmem:[%s324_s0] sm:$0xff]  }
   0x2   :  { %v255_v3 = vunpack.c.l.bf16 %v265_v0  ;;  %v256_v4 = vunpack.c.h.bf16 %v265_v0  ;;  %v259_v5 = vunpack.c.l.bf16 %v266_v1  ;;  %v260_v6 = vunpack.c.h.bf16 %v266_v1 }
   0x3   :  { %v263_v7 = vunpack.c.l.bf16 %v262_v2  ;;  %v264_v8 = vunpack.c.h.bf16 %v262_v2 }
   0x4   :  { %20 = vst [vmem:[#allocation1 + $0x28] sm:$0xff] %v256_v4  ;;  %36 = vst [vmem:[#allocation1 + $0x20] sm:$0xff] %v255_v3 }
   0x5   :  { %114 = vst [vmem:[#allocation0 + $0x22] ss:$14 sm:$0x3] %v259_v5   ;;  %116 = vst [vmem:[#allocation0 + $0x2f] ss:$17 sps:$4 sm:$0x7c] %v259_v5  }
   0x6   :  { %120 = vst [vmem:[#allocation0 + $0x49] sm:$0x80] %v259_v5   ;;  %124 = vst [vmem:[#allocation0 + $0x2a] ss:$14 sm:$0x3] %v260_v6  }
   0x7   :  { %126 = vst [vmem:[#allocation0 + $0x37] ss:$17 sps:$4 sm:$0x7c] %v260_v6   ;;  %130 = vst [vmem:[#allocation0 + $0x51] sm:$0x80] %v260_v6  }
   0x8   :  { %98 = vst [vmem:[#allocation0] sm:$0x7] %v263_v7   ;;  %100 = vst [vmem:[#allocation0 + $0xd] sm:$0x38] %v263_v7  }
   0x9   :  { %102 = vst [vmem:[#allocation0 + $0x1a] sm:$0xc0] %v263_v7   ;;  %106 = vst [vmem:[#allocation0 + $0x8] sm:$0x7] %v264_v8  }
   0xa   :  { %108 = vst [vmem:[#allocation0 + $0x15] sm:$0x38] %v264_v8   ;;  %110 = vst [vmem:[#allocation0 + $0x22] sm:$0xc0] %v264_v8  }
   0xb   :  { %v132_v9 = vld [vmem:[#allocation1 + $0x20] sm:$0x3]   ;;  %v136_v10 = vld [vmem:[#allocation1 + $0x28] sm:$0x3]  }
   0xc   :  { %v182_v11 = vld [vmem:[#allocation0 + $0x30] sm:$0xf]  ;;  %134 = vst [vmem:[#allocation0 + $0x51] sm:$0x3] %v132_v9   ;;  %138 = vst [vmem:[#allocation0 + $0x59] sm:$0x3] %v136_v10  }
   0xd   :  { %v183_v16 = vpack.c.bf16 %v268_v15, %v182_v11  ;;  %v196_v27 = vld [vmem:[#allocation0 + $0x40] sm:$0xf] }
   0xe   :  { %v189_v26 = vld [vmem:[#allocation0 + $0x38] sm:$0xf]  ;;  %v203_v28 = vld [vmem:[#allocation0 + $0x48] sm:$0xf]  ;;  %v197_v30 = vpack.c.bf16 %v268_v15, %v196_v27 }
   0xf   :  { %v143_v12 = vld [vmem:[#allocation0] sm:$0xf]  ;;  %v154_v14 = vld [vmem:[#allocation0 + $0x10] sm:$0xf]  ;;  %247 = vst [vmem:[%s325_s1 + $0xc] sm:$0x3] %v183_v16  ;;  %v190_v29 = vpack.c.bf16 %v268_v15, %v189_v26  ;;  %v204_v31 = vpack.c.bf16 %v268_v15, %v203_v28 }
  0x10   :  { %v148_v13 = vld [vmem:[#allocation0 + $0x8] sm:$0xf]  ;;  %v144_v17 = vpack.c.bf16 %v268_v15, %v143_v12  ;;  %v155_v19 = vpack.c.bf16 %v268_v15, %v154_v14  ;;  %v168_v21 = vld [vmem:[#allocation0 + $0x20] sm:$0xf]  ;;  %249 = vst [vmem:[%s325_s1 + $0x10] sm:$0x3] %v197_v30 }
  0x11   :  { %v149_v18 = vpack.c.bf16 %v268_v15, %v148_v13  ;;  %v161_v20 = vld [vmem:[#allocation0 + $0x18] sm:$0xf]  ;;  %v175_v22 = vld [vmem:[#allocation0 + $0x28] sm:$0xf]  ;;  %v169_v24 = vpack.c.bf16 %v268_v15, %v168_v21  ;;  %248 = vst [vmem:[%s325_s1 + $0xe] sm:$0x3] %v190_v29 }
  0x12   :  { %v162_v23 = vpack.c.bf16 %v268_v15, %v161_v20  ;;  %v176_v25 = vpack.c.bf16 %v268_v15, %v175_v22  ;;  %146 = vst [vmem:[%s325_s1] sm:$0x3] %v144_v17  ;;  %243 = vst [vmem:[%s325_s1 + $0x4] sm:$0x3] %v155_v19 }
  0x13   :  { %242 = vst [vmem:[%s325_s1 + $0x2] sm:$0x3] %v149_v18  ;;  %245 = vst [vmem:[%s325_s1 + $0x8] sm:$0x3] %v169_v24  ;;  %v210_v32 = vld [vmem:[#allocation0 + $0x50] sm:$0xf] }
  0x14   :  { %244 = vst [vmem:[%s325_s1 + $0x6] sm:$0x3] %v162_v23  ;;  %246 = vst [vmem:[%s325_s1 + $0xa] sm:$0x3] %v176_v25  ;;  %v217_v33 = vld [vmem:[#allocation0 + $0x58] sm:$0xf]  ;;  %v211_v34 = vpack.c.bf16 %v268_v15, %v210_v32 }
  0x15   :  { %250 = vst [vmem:[%s325_s1 + $0x12] sm:$0x3] %v204_v31  ;;  %v218_v35 = vpack.c.bf16 %v268_v15, %v217_v33 }
  0x16   :  { %251 = vst [vmem:[%s325_s1 + $0x14] sm:$0x3] %v211_v34 }
  0x17   :  { %252 = vst [vmem:[%s325_s1 + $0x16] sm:$0x3] %v218_v35 }

// kernel: alexnet_bvlc_forward.17
= control target key start
LH: loop header
LB: loop body
LE: loop exit
PB: predicated region body
PF: predicated region fallthrough
CT: control target
= control target key end

     0   :  { %s431_s15 = smov 0   ;;  %s457_s0 = inlined_call_operand.vmem [shape: bf16[2,2,2,256], index: 0, kind: input, shape index: {}]   ;;  %s458_s1 = inlined_call_operand.vmem [shape: bf16[2,2,1,256], index: 1, kind: input, shape index: {}]   ;;  %s459_s2 = inlined_call_operand.vmem [shape: bf16[2,1,2,256], index: 2, kind: input, shape index: {}]   ;;  %s460_s3 = inlined_call_operand.vmem [shape: bf16[2,1,1,256], index: 3, kind: input, shape index: {}]   ;;  %s461_s4 = inlined_call_operand.vmem [shape: bf16[2,1,1,256], index: 4, kind: output, shape index: {}]  }
   0x1 LB: > { %s375_s16 = sadd.s32 4294967295, %s404_s15   ;;  %p379_p0 = scmp.ge.s32.totalorder %s404_s15, 1  ;;  %s404_s15 = sphi %s431_s15, %s14_s15  }
   0x2   : > { %p188_p1 = scmp.lt.s32.totalorder %s404_s15, 3 }
   0x4   : > { %p189_p2 = pnand %p379_p0, %p188_p1 }
   0x5   : > { %p224_p3 = scmp.lt.s32.totalorder (!%p189_p2), %s375_s16, 1  ;;  %vm276_vm0 = vcmask (!%p189_p2), 1040384   ;;  %vm277_vm1 = vsmask.f32 (!%p189_p2), 256  ;;  %vm279_vm2 = vcmask (!%p189_p2), 1041409  }
   0x6   : > { %192 = sbr.rel (%p189_p2) target bundleno = 36 (0x24), region = 36  ;;  %vm280_vm3 = vsmask.f32 (!%p189_p2), 1280  ;;  %vm278_vm4 = vmand (!%p189_p2), %vm276_vm0, %vm277_vm1 }
   0x7   : > { %vm281_vm5 = vmand (!%p189_p2), %vm279_vm2, %vm280_vm3 }
   0x8   : > { %vm282_vm6 = vmor (!%p189_p2), %vm281_vm5, %vm278_vm4 }
   0xd   : > { %s463_s16 = smov (!%p224_p3, %s375_s16), 1 }
   0xe   : > { %s380_s17 = sshll.u32 %s463_s16, 2  ;;  %s382_s18 = sshll.u32 %s463_s16, 1 }
   0xf   : > { %s227_s21 = scalar_lea.vmem %s457_s0, %s380_s17  ;;  %s231_s24 = scalar_lea.vmem %s458_s1, %s380_s17 }
  0x10   : > { %s235_s27 = scalar_lea.vmem %s459_s2, %s382_s18  ;;  %v244_v0 = vld [vmem:[%s227_s21] sm:$0x3]  ;;  %s239_s30 = scalar_lea.vmem %s460_s3, %s382_s18  ;;  %v245_v10 = vld [vmem:[%s227_s21 + $0x2] sm:$0x3] }
  0x11   : > { %v246_v1 = vld [vmem:[%s231_s24] sm:$0x3]  ;;  %v252_v3 = vshrl.u32 %v244_v0, 16  ;;  %v247_v12 = vld [vmem:[%s231_s24 + $0x2] sm:$0x3]  ;;  %s243_s7 = scalar_lea.vmem %s461_s4, %s382_s18  ;;  %v270_v14 = vshrl.u32 %v245_v10, 16 }
  0x12   : > { %v250_v2 = vmax.bf16 %v246_v1, %v244_v0  ;;  %v248_v4 = vld [vmem:[%s235_s27] sm:$0x3] }
  0x13   : > { %v249_v6 = vld [vmem:[%s239_s30] sm:$0x3]  ;;  %v261_v8 = vshrl.u32 %v248_v4, 16 }
  0x14   : > { %v257_v5 = vmax.bf16 %v252_v3, %v250_v2  ;;  %v283_v16 = vld [vmem:[%s243_s7] sm:$0x3] }
  0x16   : > { %v258_v7 = vmax.bf16 %v257_v5, %v248_v4 }
  0x18   : > { %v259_v9 = vmax.bf16 %v258_v7, %v249_v6 }
  0x1a   : > { %v266_v11 = vmax.bf16 %v261_v8, %v259_v9 }
  0x1c   : > { %v267_v13 = vmax.bf16 %v266_v11, %v245_v10 }
  0x1e   : > { %v268_v15 = vmax.bf16 %v267_v13, %v247_v12 }
  0x20   : > { %v275_v17 = vmax.bf16 %v270_v14, %v268_v15 }
  0x22   : > { %v284_v18 = vsel %vm282_vm6, %v275_v17, %v283_v16 }
  0x23   : > { %285 = vst [vmem:[%s243_s7] sm:$0x3] %v284_v18 }
  0x24 PF: > { %s14_s15 = sadd.s32 1, %s404_s15  }
  0x25   : > { %p11_p4 = scmp.ge.s32.totalorder %s14_s15, 4  }
  0x27   :  { %13 = sbr.rel (!%p11_p4) target bundleno = 1 (0x1), region = 75 }

// kernel: alexnet_bvlc_forward.16
= control target key start
LH: loop header
LB: loop body
LE: loop exit
PB: predicated region body
PF: predicated region fallthrough
CT: control target
= control target key end

     0   :  { %s2405_s12 = smov 0   ;;  %s2407_s13 = smov 0   ;;  %s2594_s0 = inlined_call_operand.vmem [shape: bf16[2,32,1792], index: 0, kind: input, shape index: {}]   ;;  %s2595_s1 = inlined_call_operand.vmem [shape: bf16[2,1792,128], index: 1, kind: input, shape index: {}]   ;;  %s2596_s2 = inlined_call_operand.vmem [shape: f32[2,1,128], index: 2, kind: input, shape index: {}]   ;;  %s2597_s3 = inlined_call_operand.vmem [shape: bf16[2,32,128], index: 3, kind: output, shape index: {}]  }
   0x1   :  { %s2409_s14 = smov 0  }
   0x2 LB: > { %s25_s15 = sadd.s32 1, %s2379_s13  ;;  %p1801_p0 = scmp.ge.s32.totalorder %s2383_s14, 1  ;;  %s2383_s14 = sphi %s2409_s14, %s13_s14   ;;  %s2379_s13 = sphi %s2407_s13, %s2599_s13   ;;  %s2375_s12 = sphi %s2405_s12, %s2598_s12  }
   0x3   : > { %p27_p1 = scmp.ge.s32.totalorder %s25_s15, 2  ;;  %p177_p2 = scmp.lt.s32.totalorder %s2383_s14, 3 }
   0x5   : > { %s2601_s15 = smov (%p27_p1, %s25_s15), 0  ;;  %p178_p3 = pnand %p1801_p0, %p177_p2 }
   0x6   : > { %p219_p4 = scmp.lt.s32.totalorder (!%p178_p3), %s2375_s12, 1 }
   0x7   : > { %181 = sbr.rel (%p178_p3) target bundleno = 373 (0x175), region = 32 }
   0xe   : > { %s2603_s12 = smov (!%p219_p4, %s2375_s12), 1 }
   0xf   : > { %s2182_s16 = smul.u32 896, %s2603_s12  ;;  %s236_s26 = scalar_lea.vmem %s2596_s2, %s2603_s12 }
  0x10   : > { %s2181_s20 = smul.u32 224, %s2603_s12  ;;  %s1953_s27 = sshll.u32 %s2603_s12, 4 }
  0x11   : > { %s2429_s19 = scalar_lea.vmem %s2595_s1, %s2182_s16  ;;  %s245_s30 = scalar_lea.vmem %s2597_s3, %s1953_s27 }
  0x12   : > { %v2207_v0 = vld [vmem:[%s2429_s19 + $0x40] sm:$0xff]   ;;  %v2211_v4 = vld [vmem:[%s2429_s19 + $0x48] sm:$0xff]   ;;  %v2215_v8 = vld [vmem:[%s2429_s19 + $0x50] sm:$0xff]   ;;  %s2465_s23 = scalar_lea.vmem %s2594_s0, %s2181_s20 }
  0x13   : > { %v2208_v1 = vld [vmem:[%s2429_s19 + $0xc0] sm:$0xff]   ;;  %1969 = vmatprep.subr.bf16.mxu0 %v2207_v0  ;;  %v2212_v5 = vld [vmem:[%s2429_s19 + $0xc8] sm:$0xff]   ;;  %v2216_v9 = vld [vmem:[%s2429_s19 + $0xd0] sm:$0xff]  }
  0x14   : > { %v2209_v2 = vld [vmem:[%s2429_s19] sm:$0xff]   ;;  %1997 = vmatprep.subr.bf16.mxu1 %v2208_v1  ;;  %v2213_v6 = vld [vmem:[%s2429_s19 + $0x8] sm:$0xff]   ;;  %v2217_v10 = vld [vmem:[%s2429_s19 + $0x10] sm:$0xff]  }
  0x15   : > { %v2210_v3 = vld [vmem:[%s2429_s19 + $0x80] sm:$0xff]   ;;  %1970 = vmatpush3.bf16.msra.mxu0 %v2209_v2  ;;  %v2214_v7 = vld [vmem:[%s2429_s19 + $0x88] sm:$0xff]   ;;  %v2218_v11 = vld [vmem:[%s2429_s19 + $0x90] sm:$0xff]  }
  0x16   : > { %1998 = vmatpush3.bf16.msra.mxu1 %v2210_v3  ;;  %1971 = vmatprep.subr.bf16.mxu0 %v2211_v4  ;;  %v2219_v12 = vld [vmem:[%s2429_s19 + $0x58] sm:$0xff]   ;;  %v2223_v16 = vld [vmem:[%s2429_s19 + $0x60] sm:$0xff]   ;;  %v2227_v20 = vld [vmem:[%s2429_s19 + $0x68] sm:$0xff]  }
  0x17   : > { %1999 = vmatprep.subr.bf16.mxu1 %v2212_v5  ;;  %v2220_v13 = vld [vmem:[%s2429_s19 + $0xd8] sm:$0xff]   ;;  %v2224_v17 = vld [vmem:[%s2429_s19 + $0xe0] sm:$0xff]   ;;  %v2228_v21 = vld [vmem:[%s2429_s19 + $0xe8] sm:$0xff]  }
  0x18   : > { %v2221_v14 = vld [vmem:[%s2429_s19 + $0x18] sm:$0xff]   ;;  %v2225_v18 = vld [vmem:[%s2429_s19 + $0x20] sm:$0xff]   ;;  %v2229_v22 = vld [vmem:[%s2429_s19 + $0x28] sm:$0xff]  }
  0x19   : > { %1972 = vmatpush3.bf16.msra.mxu0 %v2213_v6  ;;  %v2222_v15 = vld [vmem:[%s2429_s19 + $0x98] sm:$0xff]   ;;  %v2226_v19 = vld [vmem:[%s2429_s19 + $0xa0] sm:$0xff]   ;;  %v2230_v23 = vld [vmem:[%s2429_s19 + $0xa8] sm:$0xff]  }
  0x1a   : > { %2000 = vmatpush3.bf16.msra.mxu1 %v2214_v7  ;;  %1973 = vmatprep.subr.bf16.mxu0 %v2215_v8  ;;  %v2231_v24 = vld [vmem:[%s2429_s19 + $0x70] sm:$0xff]   ;;  %v2235_v28 = vld [vmem:[%s2429_s19 + $0x78] sm:$0xff]   ;;  %v2242_v34 = vld [vmem:[%s2465_s23 + $0x8] ss:$56 sps:$4 sm:$0xff]  }
  0x1b   : > { %2001 = vmatprep.subr.bf16.mxu1 %v2216_v9  ;;  %v2232_v25 = vld [vmem:[%s2429_s19 + $0xf0] sm:$0xff]   ;;  %v2236_v29 = vld [vmem:[%s2429_s19 + $0xf8] sm:$0xff]   ;;  %v2244_v35 = vld [vmem:[%s2465_s23 + $0xc] ss:$56 sps:$4 sm:$0xff]  }
  0x1c   : > { %v2233_v26 = vld [vmem:[%s2429_s19 + $0x30] sm:$0xff]   ;;  %v2237_v30 = vld [vmem:[%s2429_s19 + $0x38] sm:$0xff]   ;;  %v2245_v36 = vld [vmem:[%s2429_s19 + $0x140] sm:$0xff]   ;;  %1400 = vmatprep.mubr.bf16.mxu1 %v2244_v35 }
  0x1d   : > { %1974 = vmatpush3.bf16.msra.mxu0 %v2217_v10  ;;  %v2234_v27 = vld [vmem:[%s2429_s19 + $0xb0] sm:$0xff]   ;;  %v2238_v31 = vld [vmem:[%s2429_s19 + $0xb8] sm:$0xff]   ;;  %v2246_v37 = vld [vmem:[%s2429_s19 + $0x1c0] sm:$0xff]  }
  0x1e   : > { %2002 = vmatpush3.bf16.msra.mxu1 %v2218_v11  ;;  %1975 = vmatprep.subr.bf16.mxu0 %v2219_v12  ;;  %v2239_v32 = vld [vmem:[%s2465_s23] ss:$56 sps:$4 sm:$0xff]   ;;  %v2241_v33 = vld [vmem:[%s2465_s23 + $0x4] ss:$56 sps:$4 sm:$0xff]   ;;  %v2249_v40 = vld [vmem:[%s2429_s19 + $0x148] sm:$0xff]  }
  0x1f   : > { %2003 = vmatprep.subr.bf16.mxu1 %v2220_v13  ;;  %1351 = vmatprep.mubr.bf16.mxu0 %v2241_v33  ;;  %v2247_v38 = vld [vmem:[%s2429_s19 + $0x100] sm:$0xff]   ;;  %v2250_v41 = vld [vmem:[%s2429_s19 + $0x1c8] sm:$0xff]   ;;  %v2253_v44 = vld [vmem:[%s2429_s19 + $0x150] sm:$0xff]  }
  0x20   : > { %v2248_v39 = vld [vmem:[%s2429_s19 + $0x180] sm:$0xff]   ;;  %v2251_v42 = vld [vmem:[%s2429_s19 + $0x108] sm:$0xff]   ;;  %v2254_v45 = vld [vmem:[%s2429_s19 + $0x1d0] sm:$0xff]  }
  0x21   : > { %1976 = vmatpush3.bf16.msra.mxu0 %v2221_v14  ;;  %v2252_v43 = vld [vmem:[%s2429_s19 + $0x188] sm:$0xff]   ;;  %v2255_v46 = vld [vmem:[%s2429_s19 + $0x110] sm:$0xff]   ;;  %v2257_v48 = vld [vmem:[%s2429_s19 + $0x158] sm:$0xff]  }
  0x22   : > { %2004 = vmatpush3.bf16.msra.mxu1 %v2222_v15  ;;  %1977 = vmatprep.subr.bf16.mxu0 %v2223_v16  ;;  %v2256_v47 = vld [vmem:[%s2429_s19 + $0x190] sm:$0xff]   ;;  %v2258_v49 = vld [vmem:[%s2429_s19 + $0x1d8] sm:$0xff]   ;;  %v2261_v52 = vld [vmem:[%s2429_s19 + $0x160] sm:$0xff]  }
  0x23   : > { %2005 = vmatprep.subr.bf16.mxu1 %v2224_v17  ;;  %v2259_v50 = vld [vmem:[%s2429_s19 + $0x118] sm:$0xff]   ;;  %v2262_v53 = vld [vmem:[%s2429_s19 + $0x1e0] sm:$0xff]   ;;  %v2265_v56 = vld [vmem:[%s2465_s23 + $0x74] ss:$56 sps:$4 sm:$0xff]  }
  0x24   : > { %v2260_v51 = vld [vmem:[%s2429_s19 + $0x198] sm:$0xff]   ;;  %v2263_v54 = vld [vmem:[%s2429_s19 + $0x120] sm:$0xff]   ;;  %v2267_v57 = vld [vmem:[%s2465_s23 + $0x70] ss:$56 sps:$4 sm:$0xff]  }
  0x25   : > { %1978 = vmatpush3.bf16.msra.mxu0 %v2225_v18  ;;  %v2264_v55 = vld [vmem:[%s2429_s19 + $0x1a0] sm:$0xff]   ;;  %v2268_v58 = vld [vmem:[%s2429_s19 + $0x168] sm:$0xff]   ;;  %v2270_v60 = vld [vmem:[%s2465_s23 + $0x7c] ss:$56 sps:$4 sm:$0xff]  }
  0x26   : > { %2006 = vmatpush3.bf16.msra.mxu1 %v2226_v19  ;;  %1979 = vmatprep.subr.bf16.mxu0 %v2227_v20  ;;  %v2269_v59 = vld [vmem:[%s2429_s19 + $0x1e8] sm:$0xff]   ;;  %v2274_v63 = vld [vmem:[%s2465_s23 + $0x78] ss:$56 sps:$4 sm:$0xff]   ;;  %v2288_v11 = vld [vmem:[%s2465_s23 + $0x1c] ss:$56 sps:$4 sm:$0xff]  }
  0x27   : > { %2007 = vmatprep.subr.bf16.mxu1 %v2228_v21  ;;  %v2272_v61 = vld [vmem:[%s2429_s19 + $0x128] sm:$0xff]   ;;  %v2275_v0 = vld [vmem:[%s2429_s19 + $0x170] sm:$0xff]   ;;  %v2279_v4 = vld [vmem:[%s2429_s19 + $0x178] sm:$0xff]  }
  0x28   : > { %v2273_v62 = vld [vmem:[%s2429_s19 + $0x1a8] sm:$0xff]   ;;  %v2276_v1 = vld [vmem:[%s2429_s19 + $0x1f0] sm:$0xff]   ;;  %v2280_v5 = vld [vmem:[%s2429_s19 + $0x1f8] sm:$0xff]  }
  0x29   : > { %1980 = vmatpush3.bf16.msra.mxu0 %v2229_v22  ;;  %v2277_v2 = vld [vmem:[%s2429_s19 + $0x130] sm:$0xff]   ;;  %v2281_v6 = vld [vmem:[%s2429_s19 + $0x138] sm:$0xff]   ;;  %v2289_v12 = vld [vmem:[%s2429_s19 + $0x240] sm:$0xff]  }
  0x2a   : > { %2008 = vmatpush3.bf16.msra.mxu1 %v2230_v23  ;;  %1981 = vmatprep.subr.bf16.mxu0 %v2231_v24  ;;  %v2278_v3 = vld [vmem:[%s2429_s19 + $0x1b0] sm:$0xff]   ;;  %v2282_v7 = vld [vmem:[%s2429_s19 + $0x1b8] sm:$0xff]   ;;  %v2290_v13 = vld [vmem:[%s2429_s19 + $0x2c0] sm:$0xff]  }
  0x2b   : > { %2009 = vmatprep.subr.bf16.mxu1 %v2232_v25  ;;  %v2283_v8 = vld [vmem:[%s2465_s23 + $0x10] ss:$56 sps:$4 sm:$0xff]   ;;  %v2285_v9 = vld [vmem:[%s2465_s23 + $0x14] ss:$56 sps:$4 sm:$0xff]   ;;  %v2291_v14 = vld [vmem:[%s2429_s19 + $0x200] sm:$0xff]  }
  0x2c   : > { %v2286_v10 = vld [vmem:[%s2465_s23 + $0x18] ss:$56 sps:$4 sm:$0xff]   ;;  %v2292_v15 = vld [vmem:[%s2429_s19 + $0x280] sm:$0xff]   ;;  %v2293_v16 = vld [vmem:[%s2429_s19 + $0x248] sm:$0xff]  }
  0x2d   : > { %1982 = vmatpush3.bf16.msra.mxu0 %v2233_v26  ;;  %v2294_v17 = vld [vmem:[%s2429_s19 + $0x2c8] sm:$0xff]   ;;  %v2297_v20 = vld [vmem:[%s2465_s23 + $0x84] ss:$56 sps:$4 sm:$0xff]   ;;  %v2299_v21 = vld [vmem:[%s2465_s23 + $0x80] ss:$56 sps:$4 sm:$0xff]  }
  0x2e   : > { %2010 = vmatpush3.bf16.msra.mxu1 %v2234_v27  ;;  %1983 = vmatprep.subr.bf16.mxu0 %v2235_v28  ;;  %v2295_v18 = vld [vmem:[%s2429_s19 + $0x208] sm:$0xff]   ;;  %v2300_v22 = vld [vmem:[%s2429_s19 + $0x250] sm:$0xff]   ;;  %v2307_v28 = vld [vmem:[%s2429_s19 + $0x258] sm:$0xff]  }
  0x2f   : > { %2011 = vmatprep.subr.bf16.mxu1 %v2236_v29  ;;  %v2296_v19 = vld [vmem:[%s2429_s19 + $0x288] sm:$0xff]   ;;  %v2301_v23 = vld [vmem:[%s2429_s19 + $0x2d0] sm:$0xff]   ;;  %v2308_v29 = vld [vmem:[%s2429_s19 + $0x2d8] sm:$0xff]  }
  0x30   : > { %v2302_v24 = vld [vmem:[%s2465_s23 + $0x8c] ss:$56 sps:$4 sm:$0xff]   ;;  %v2304_v25 = vld [vmem:[%s2429_s19 + $0x210] sm:$0xff]   ;;  %v2306_v27 = vld [vmem:[%s2465_s23 + $0x88] ss:$56 sps:$4 sm:$0xff]  }
  0x31   : > { %1984 = vmatpush3.bf16.msra.mxu0 %v2237_v30  ;;  %v2305_v26 = vld [vmem:[%s2429_s19 + $0x290] sm:$0xff]   ;;  %v2309_v30 = vld [vmem:[%s2429_s19 + $0x218] sm:$0xff]   ;;  %v2312_v33 = vld [vmem:[%s2429_s19 + $0x2e0] sm:$0xff]  }
  0x32   : > { %2012 = vmatpush3.bf16.msra.mxu1 %v2238_v31  ;;  %2025 = vmatprep.subr.bf16.mxu0 %v2245_v36  ;;  %v2310_v31 = vld [vmem:[%s2429_s19 + $0x298] sm:$0xff]   ;;  %v2314_v35 = vld [vmem:[%s2429_s19 + $0x2a0] sm:$0xff]   ;;  %v2315_v36 = vld [vmem:[%s2429_s19 + $0x268] sm:$0xff]  }
  0x33   : > { %2053 = vmatprep.subr.bf16.mxu1 %v2246_v37  ;;  %v2316_v37 = vld [vmem:[%s2429_s19 + $0x2e8] sm:$0xff]  }
  0x34   : > { %1352 = vmatmul.mubr.bf16.vlgmr.msra.gmra.mrb[0].mxu0 %v2239_v32  ;;  %v2311_v32 = vld [vmem:[%s2429_s19 + $0x260] sm:$0xff]  }
  0x35   : > { %1401 = vmatmul.mubr.bf16.vlgmr.msra.gmra.mrb[0].mxu1 %v2242_v34  ;;  %2026 = vmatpush3.bf16.msra.mxu0 %v2247_v38  ;;  %v2313_v34 = vld [vmem:[%s2429_s19 + $0x220] sm:$0xff]   ;;  %v2317_v38 = vld [vmem:[%s2429_s19 + $0x228] sm:$0xff]  }
  0x36   : > { %2054 = vmatpush3.bf16.msra.mxu1 %v2248_v39  ;;  %2027 = vmatprep.subr.bf16.mxu0 %v2249_v40  ;;  %v2318_v39 = vld [vmem:[%s2429_s19 + $0x2a8] sm:$0xff]   ;;  %v2319_v40 = vld [vmem:[%s2429_s19 + $0x270] sm:$0xff]  }
  0x37   : > { %2055 = vmatprep.subr.bf16.mxu1 %v2250_v41  ;;  %1359 = vmatprep.mubr.bf16.mxu0 %v2265_v56  ;;  %v2320_v41 = vld [vmem:[%s2429_s19 + $0x2f0] sm:$0xff]  }
  0x38   : > { %1408 = vmatprep.mubr.bf16.mxu1 %v2270_v60  ;;  %v2337_v56 = vld [vmem:[%s2465_s23 + $0x94] ss:$56 sps:$4 sm:$0xff]  }
  0x39   : > { %2028 = vmatpush3.bf16.msra.mxu0 %v2251_v42  ;;  %v2321_v42 = vld [vmem:[%s2429_s19 + $0x230] sm:$0xff]  }
  0x3a   : > { %2056 = vmatpush3.bf16.msra.mxu1 %v2252_v43  ;;  %2029 = vmatprep.subr.bf16.mxu0 %v2253_v44  ;;  %v2322_v43 = vld [vmem:[%s2429_s19 + $0x2b0] sm:$0xff]   ;;  %v2323_v44 = vld [vmem:[%s2429_s19 + $0x278] sm:$0xff]  }
  0x3b   : > { %2057 = vmatprep.subr.bf16.mxu1 %v2254_v45  ;;  %v2324_v45 = vld [vmem:[%s2429_s19 + $0x2f8] sm:$0xff]   ;;  %v2343_v60 = vld [vmem:[%s2429_s19 + $0x310] sm:$0xff]  }
  0x3c   : > { %1360 = vmatmul.mubr.bf16.gmra.mrb[4].mxu0 %v2267_v57  ;;  %v2339_v57 = vld [vmem:[%s2465_s23 + $0x90] ss:$56 sps:$4 sm:$0xff]  }
  0x3d   : > { %2030 = vmatpush3.bf16.msra.mxu0 %v2255_v46  ;;  %1409 = vmatmul.mubr.bf16.gmra.mrb[4].mxu1 %v2274_v63  ;;  %v2325_v46 = vld [vmem:[%s2429_s19 + $0x238] sm:$0xff]  }
  0x3e   : > { %2058 = vmatpush3.bf16.msra.mxu1 %v2256_v47  ;;  %2031 = vmatprep.subr.bf16.mxu0 %v2257_v48  ;;  %v2326_v47 = vld [vmem:[%s2429_s19 + $0x2b8] sm:$0xff]  }
  0x3f   : > { %2059 = vmatprep.subr.bf16.mxu1 %v2258_v49  ;;  %1449 = vmatprep.mubr.bf16.mxu0 %v2285_v9  ;;  %v2327_v48 = vld [vmem:[%s2465_s23 + $0x20] ss:$56 sps:$4 sm:$0xff]   ;;  %v2329_v49 = vld [vmem:[%s2465_s23 + $0x24] ss:$56 sps:$4 sm:$0xff]  }
  0x40   : > { %1498 = vmatprep.mubr.bf16.mxu1 %v2288_v11  ;;  %v2346_v63 = vld [vmem:[%s2429_s19 + $0x318] sm:$0xff]  }
  0x41   : > { %2032 = vmatpush3.bf16.msra.mxu0 %v2259_v50  ;;  %v2330_v50 = vld [vmem:[%s2465_s23 + $0x28] ss:$56 sps:$4 sm:$0xff]   ;;  %v2354_v9 = vld [vmem:[%s2429_s19 + $0x338] sm:$0xff]  }
  0x42   : > { %2060 = vmatpush3.bf16.msra.mxu1 %v2260_v51  ;;  %2033 = vmatprep.subr.bf16.mxu0 %v2261_v52  ;;  %v2332_v51 = vld [vmem:[%s2465_s23 + $0x2c] ss:$56 sps:$4 sm:$0xff]   ;;  %v2358_v11 = vld [vmem:[%s2465_s23 + $0xa0] ss:$56 sps:$4 sm:$0xff]  }
  0x43   : > { %2061 = vmatprep.subr.bf16.mxu1 %v2262_v53  ;;  %v2333_v52 = vld [vmem:[%s2429_s19 + $0x340] sm:$0xff]  }
  0x44   : > { %v2334_v53 = vld [vmem:[%s2429_s19 + $0x300] sm:$0xff]  }
  0x45   : > { %2034 = vmatpush3.bf16.msra.mxu0 %v2263_v54  ;;  %v2335_v54 = vld [vmem:[%s2429_s19 + $0x348] sm:$0xff]  }
  0x46   : > { %2062 = vmatpush3.bf16.msra.mxu1 %v2264_v55  ;;  %2035 = vmatprep.subr.bf16.mxu0 %v2268_v58  ;;  %v2336_v55 = vld [vmem:[%s2429_s19 + $0x308] sm:$0xff]   ;;  %v2340_v58 = vld [vmem:[%s2429_s19 + $0x350] sm:$0xff]  }
  0x47   : > { %2063 = vmatprep.subr.bf16.mxu1 %v2269_v59  ;;  %v2341_v59 = vld [vmem:[%s2465_s23 + $0x9c] ss:$56 sps:$4 sm:$0xff]  }
  0x49   : > { %2036 = vmatpush3.bf16.msra.mxu0 %v2272_v61  ;;  %v2344_v61 = vld [vmem:[%s2465_s23 + $0x98] ss:$56 sps:$4 sm:$0xff]  }
  0x4a   : > { %2064 = vmatpush3.bf16.msra.mxu1 %v2273_v62  ;;  %2037 = vmatprep.subr.bf16.mxu0 %v2275_v0  ;;  %v2345_v62 = vld [vmem:[%s2429_s19 + $0x358] sm:$0xff]   ;;  %v2347_v0 = vld [vmem:[%s2429_s19 + $0x360] sm:$0xff]  }
  0x4b   : > { %2065 = vmatprep.subr.bf16.mxu1 %v2276_v1  ;;  %v2348_v1 = vld [vmem:[%s2429_s19 + $0x320] sm:$0xff]  }
  0x4d   : > { %2038 = vmatpush3.bf16.msra.mxu0 %v2277_v2  ;;  %v2349_v2 = vld [vmem:[%s2429_s19 + $0x368] sm:$0xff]  }
  0x4e   : > { %2066 = vmatpush3.bf16.msra.mxu1 %v2278_v3  ;;  %2039 = vmatprep.subr.bf16.mxu0 %v2279_v4  ;;  %v2350_v3 = vld [vmem:[%s2429_s19 + $0x328] sm:$0xff]  }
  0x4f   : > { %2067 = vmatprep.subr.bf16.mxu1 %v2280_v5  ;;  %v2357_v4 = vld [vmem:[%s2465_s23 + $0x34] ss:$56 sps:$4 sm:$0xff]  }
  0x50   : > { %v2351_v5 = vld [vmem:[%s2429_s19 + $0x370] sm:$0xff]  }
  0x51   : > { %2040 = vmatpush3.bf16.msra.mxu0 %v2281_v6  ;;  %v2360_v6 = vld [vmem:[%s2465_s23 + $0xa4] ss:$56 sps:$4 sm:$0xff]  }
  0x52   : > { %2068 = vmatpush3.bf16.msra.mxu1 %v2282_v7  ;;  %2081 = vmatprep.subr.bf16.mxu0 %v2289_v12  ;;  %v2352_v7 = vld [vmem:[%s2429_s19 + $0x330] sm:$0xff]  }
  0x53   : > { %2109 = vmatprep.subr.bf16.mxu1 %v2290_v13 }
  0x54   : > { %1450 = vmatmul.mubr.bf16.vlgmr.msra.gmra.mrb[8].mxu0 %v2283_v8  ;;  %v2353_v8 = vld [vmem:[%s2429_s19 + $0x378] sm:$0xff]  }
  0x55   : > { %1499 = vmatmul.mubr.bf16.vlgmr.msra.gmra.mrb[8].mxu1 %v2286_v10  ;;  %2082 = vmatpush3.bf16.msra.mxu0 %v2291_v14  ;;  %v2355_v10 = vld [vmem:[%s2465_s23 + $0x30] ss:$56 sps:$4 sm:$0xff]   ;;  %v1806_v14 = vld [vmem:[%s236_s26] ss:$0 sm:$0xff] }
  0x56   : > { %2110 = vmatpush3.bf16.msra.mxu1 %v2292_v15  ;;  %2083 = vmatprep.subr.bf16.mxu0 %v2293_v16 }
  0x57   : > { %2111 = vmatprep.subr.bf16.mxu1 %v2294_v17  ;;  %1457 = vmatprep.mubr.bf16.mxu0 %v2297_v20 }
  0x58   : > { %1506 = vmatprep.mubr.bf16.mxu1 %v2302_v24 }
  0x59   : > { %2084 = vmatpush3.bf16.msra.mxu0 %v2295_v18 }
  0x5a   : > { %2112 = vmatpush3.bf16.msra.mxu1 %v2296_v19  ;;  %2085 = vmatprep.subr.bf16.mxu0 %v2300_v22 }
  0x5b   : > { %2113 = vmatprep.subr.bf16.mxu1 %v2301_v23 }
  0x5c   : > { %1458 = vmatmul.mubr.bf16.gmra.mrb[12].mxu0 %v2299_v21 }
  0x5d   : > { %2086 = vmatpush3.bf16.msra.mxu0 %v2304_v25  ;;  %1507 = vmatmul.mubr.bf16.gmra.mrb[12].mxu1 %v2306_v27 }
  0x5e   : > { %2114 = vmatpush3.bf16.msra.mxu1 %v2305_v26  ;;  %2087 = vmatprep.subr.bf16.mxu0 %v2307_v28 }
  0x5f   : > { %2115 = vmatprep.subr.bf16.mxu1 %v2308_v29  ;;  %1547 = vmatprep.mubr.bf16.mxu0 %v2329_v49 }
  0x60   : > { %1596 = vmatprep.mubr.bf16.mxu1 %v2332_v51 }
  0x61   : > { %2088 = vmatpush3.bf16.msra.mxu0 %v2309_v30 }
  0x62   : > { %2116 = vmatpush3.bf16.msra.mxu1 %v2310_v31  ;;  %2089 = vmatprep.subr.bf16.mxu0 %v2311_v32 }
  0x63   : > { %2117 = vmatprep.subr.bf16.mxu1 %v2312_v33 }
  0x65   : > { %2090 = vmatpush3.bf16.msra.mxu0 %v2313_v34 }
  0x66   : > { %2118 = vmatpush3.bf16.msra.mxu1 %v2314_v35  ;;  %2091 = vmatprep.subr.bf16.mxu0 %v2315_v36 }
  0x67   : > { %2119 = vmatprep.subr.bf16.mxu1 %v2316_v37 }
  0x69   : > { %2092 = vmatpush3.bf16.msra.mxu0 %v2317_v38 }
  0x6a   : > { %2120 = vmatpush3.bf16.msra.mxu1 %v2318_v39  ;;  %2093 = vmatprep.subr.bf16.mxu0 %v2319_v40 }
  0x6b   : > { %2121 = vmatprep.subr.bf16.mxu1 %v2320_v41 }
  0x6d   : > { %2094 = vmatpush3.bf16.msra.mxu0 %v2321_v42 }
  0x6e   : > { %2122 = vmatpush3.bf16.msra.mxu1 %v2322_v43  ;;  %2095 = vmatprep.subr.bf16.mxu0 %v2323_v44 }
  0x6f   : > { %2123 = vmatprep.subr.bf16.mxu1 %v2324_v45 }
  0x71   : > { %2096 = vmatpush3.bf16.msra.mxu0 %v2325_v46 }
  0x72   : > { %2124 = vmatpush3.bf16.msra.mxu1 %v2326_v47  ;;  %2137 = vmatprep.subr.bf16.mxu0 %v2333_v52 }
  0x73   : > { %2165 = vmatprep.subr.bf16.mxu1 %v2333_v52 }
  0x74   : > { %1548 = vmatmul.mubr.bf16.vlgmr.msra.gmra.mrb[16].mxu0 %v2327_v48 }
  0x75   : > { %1597 = vmatmul.mubr.bf16.vlgmr.msra.gmra.mrb[16].mxu1 %v2330_v50  ;;  %2138 = vmatpush3.bf16.msra.mxu0 %v2334_v53 }
  0x76   : > { %2173 = vmatpush3.bf16.msra.mxu1 %v2334_v53  ;;  %2139 = vmatprep.subr.bf16.mxu0 %v2335_v54 }
  0x77   : > { %2166 = vmatprep.subr.bf16.mxu1 %v2335_v54  ;;  %1555 = vmatprep.mubr.bf16.mxu0 %v2337_v56 }
  0x78   : > { %1604 = vmatprep.mubr.bf16.mxu1 %v2341_v59 }
  0x79   : > { %2140 = vmatpush3.bf16.msra.mxu0 %v2336_v55 }
  0x7a   : > { %2174 = vmatpush3.bf16.msra.mxu1 %v2336_v55  ;;  %2141 = vmatprep.subr.bf16.mxu0 %v2340_v58 }
  0x7b   : > { %2167 = vmatprep.subr.bf16.mxu1 %v2340_v58 }
  0x7c   : > { %1556 = vmatmul.mubr.bf16.gmra.mrb[20].mxu0 %v2339_v57 }
  0x7d   : > { %2142 = vmatpush3.bf16.msra.mxu0 %v2343_v60  ;;  %1605 = vmatmul.mubr.bf16.gmra.mrb[20].mxu1 %v2344_v61 }
  0x7e   : > { %2175 = vmatpush3.bf16.msra.mxu1 %v2343_v60  ;;  %2143 = vmatprep.subr.bf16.mxu0 %v2345_v62 }
  0x7f   : > { %2168 = vmatprep.subr.bf16.mxu1 %v2345_v62  ;;  %1645 = vmatprep.mubr.bf16.mxu0 %v2357_v4 }
  0x80   : > { %1653 = vmatprep.mubr.bf16.mxu1 %v2360_v6 }
  0x81   : > { %2144 = vmatpush3.bf16.msra.mxu0 %v2346_v63 }
  0x82   : > { %2176 = vmatpush3.bf16.msra.mxu1 %v2346_v63  ;;  %2145 = vmatprep.subr.bf16.mxu0 %v2347_v0 }
  0x83   : > { %2169 = vmatprep.subr.bf16.mxu1 %v2347_v0 }
  0x85   : > { %2146 = vmatpush3.bf16.msra.mxu0 %v2348_v1 }
  0x86   : > { %2177 = vmatpush3.bf16.msra.mxu1 %v2348_v1  ;;  %2147 = vmatprep.subr.bf16.mxu0 %v2349_v2 }
  0x87   : > { %2170 = vmatprep.subr.bf16.mxu1 %v2349_v2 }
  0x89   : > { %2148 = vmatpush3.bf16.msra.mxu0 %v2350_v3 }
  0x8a   : > { %2178 = vmatpush3.bf16.msra.mxu1 %v2350_v3  ;;  %2149 = vmatprep.subr.bf16.mxu0 %v2351_v5 }
  0x8b   : > { %2171 = vmatprep.subr.bf16.mxu1 %v2351_v5 }
  0x8d   : > { %2150 = vmatpush3.bf16.msra.mxu0 %v2352_v7 }
  0x8e   : > { %2179 = vmatpush3.bf16.msra.mxu1 %v2352_v7  ;;  %2151 = vmatprep.subr.bf16.mxu0 %v2353_v8 }
  0x8f   : > { %2172 = vmatprep.subr.bf16.mxu1 %v2353_v8 }
  0x91   : > { %2152 = vmatpush3.bf16.msra.mxu0 %v2354_v9 }
  0x92   : > { %2180 = vmatpush3.bf16.msra.mxu1 %v2354_v9 }
  0x94   : > { %1646 = vmatmul.mubr.bf16.vlgmr.msra.gmra.mrb[24].mxu0 %v2355_v10 }
  0x95   : > { %1654 = vmatmul.mubr.bf16.vlgmr.msra.gmra.mrb[24].mxu1 %v2358_v11 }
 0x107   : > { %v1985_v12 = vpop.f32.mrb[0].mxu0 }
 0x108   : > { %v2013_v13 = vpop.f32.mrb[0].mxu1  ;;  %v1986_v15 = vpop.f32.mrb[1].mxu0 }
 0x109   : > { %v1987_v16 = vadd.f32 %v1986_v15, %v1985_v12  ;;  %v2014_v17 = vpop.f32.mrb[1].mxu1  ;;  %v1988_v18 = vpop.f32.mrb[2].mxu0 }
 0x10a   : > { %v2015_v19 = vadd.f32 %v2014_v17, %v2013_v13  ;;  %v2016_v20 = vpop.f32.mrb[2].mxu1  ;;  %v1989_v21 = vpop.f32.mrb[3].mxu0 }
 0x10b   : > { %v1354_v22 = vadd.f32 %v1987_v16, %v1806_v14  ;;  %v1990_v23 = vadd.f32 %v1989_v21, %v1988_v18  ;;  %v2017_v24 = vpop.f32.mrb[3].mxu1 }
 0x10c   : > { %v2018_v25 = vadd.f32 %v2017_v24, %v2016_v20 }
 0x10d   : > { %v1403_v26 = vadd.f32 %v2015_v19, %v1354_v22  ;;  %v1357_v27 = vadd.f32 %v1990_v23, %v1806_v14 }
 0x10f   : > { %v1406_v28 = vadd.f32 %v2018_v25, %v1357_v27  ;;  %v1991_v29 = vpop.f32.mrb[4].mxu0 }
 0x110   : > { %v1992_v30 = vpop.f32.mrb[5].mxu0  ;;  %v2019_v36 = vpop.f32.mrb[4].mxu1 }
 0x111   : > { %v1993_v31 = vadd.f32 %v1992_v30, %v1991_v29  ;;  %v1994_v32 = vpop.f32.mrb[6].mxu0  ;;  %v2020_v37 = vpop.f32.mrb[5].mxu1 }
 0x112   : > { %v1995_v33 = vpop.f32.mrb[7].mxu0  ;;  %v2021_v39 = vadd.f32 %v2020_v37, %v2019_v36  ;;  %v2022_v40 = vpop.f32.mrb[6].mxu1 }
 0x113   : > { %v1996_v34 = vadd.f32 %v1995_v33, %v1994_v32  ;;  %v1362_v35 = vadd.f32 %v1993_v31, %v1806_v14  ;;  %v2023_v41 = vpop.f32.mrb[7].mxu1 }
 0x114   : > { %v2024_v43 = vadd.f32 %v2023_v41, %v2022_v40 }
 0x115   : > { %v1365_v38 = vadd.f32 %v1996_v34, %v1806_v14  ;;  %v1411_v42 = vadd.f32 %v2021_v39, %v1362_v35 }
 0x117   : > { %v1414_v44 = vadd.f32 %v2024_v43, %v1365_v38 }
 0x127   : > { %v2041_v45 = vpop.f32.mrb[8].mxu0 }
 0x128   : > { %v2069_v46 = vpop.f32.mrb[8].mxu1  ;;  %v2042_v47 = vpop.f32.mrb[9].mxu0 }
 0x129   : > { %v2043_v48 = vadd.f32 %v2042_v47, %v2041_v45  ;;  %v2070_v49 = vpop.f32.mrb[9].mxu1  ;;  %v2044_v50 = vpop.f32.mrb[10].mxu0 }
 0x12a   : > { %v2071_v51 = vadd.f32 %v2070_v49, %v2069_v46  ;;  %v2072_v52 = vpop.f32.mrb[10].mxu1  ;;  %v2045_v53 = vpop.f32.mrb[11].mxu0 }
 0x12b   : > { %v1452_v54 = vadd.f32 %v2043_v48, %v1403_v26  ;;  %v2046_v55 = vadd.f32 %v2045_v53, %v2044_v50  ;;  %v2073_v56 = vpop.f32.mrb[11].mxu1 }
 0x12c   : > { %v2074_v57 = vadd.f32 %v2073_v56, %v2072_v52 }
 0x12d   : > { %v1501_v58 = vadd.f32 %v2071_v51, %v1452_v54  ;;  %v1455_v59 = vadd.f32 %v2046_v55, %v1406_v28 }
 0x12f   : > { %v1504_v60 = vadd.f32 %v2074_v57, %v1455_v59  ;;  %v2047_v61 = vpop.f32.mrb[12].mxu0 }
 0x130   : > { %v2048_v62 = vpop.f32.mrb[13].mxu0  ;;  %v2075_v4 = vpop.f32.mrb[12].mxu1 }
 0x131   : > { %v2049_v63 = vadd.f32 %v2048_v62, %v2047_v61  ;;  %v2050_v0 = vpop.f32.mrb[14].mxu0  ;;  %v2076_v6 = vpop.f32.mrb[13].mxu1 }
 0x132   : > { %v2051_v1 = vpop.f32.mrb[15].mxu0  ;;  %v2077_v7 = vadd.f32 %v2076_v6, %v2075_v4  ;;  %v2078_v8 = vpop.f32.mrb[14].mxu1 }
 0x133   : > { %v1460_v2 = vadd.f32 %v2049_v63, %v1411_v42  ;;  %v2052_v3 = vadd.f32 %v2051_v1, %v2050_v0  ;;  %v2079_v9 = vpop.f32.mrb[15].mxu1 }
 0x134   : > { %v2080_v11 = vadd.f32 %v2079_v9, %v2078_v8 }
 0x135   : > { %v1463_v5 = vadd.f32 %v2052_v3, %v1414_v44  ;;  %v1509_v10 = vadd.f32 %v2077_v7, %v1460_v2 }
 0x137   : > { %v1512_v12 = vadd.f32 %v2080_v11, %v1463_v5 }
 0x147   : > { %v2097_v13 = vpop.f32.mrb[16].mxu0 }
 0x148   : > { %v2098_v14 = vpop.f32.mrb[17].mxu0  ;;  %v2125_v15 = vpop.f32.mrb[16].mxu1 }
 0x149   : > { %v2099_v16 = vadd.f32 %v2098_v14, %v2097_v13  ;;  %v2100_v17 = vpop.f32.mrb[18].mxu0  ;;  %v2126_v18 = vpop.f32.mrb[17].mxu1 }
 0x14a   : > { %v2101_v19 = vpop.f32.mrb[19].mxu0  ;;  %v2127_v21 = vadd.f32 %v2126_v18, %v2125_v15  ;;  %v2128_v22 = vpop.f32.mrb[18].mxu1 }
 0x14b   : > { %v1550_v20 = vadd.f32 %v2099_v16, %v1501_v58  ;;  %v2102_v23 = vadd.f32 %v2101_v19, %v2100_v17  ;;  %v2129_v24 = vpop.f32.mrb[19].mxu1 }
 0x14c   : > { %v2130_v27 = vadd.f32 %v2129_v24, %v2128_v22 }
 0x14d   : > { %v1599_v25 = vadd.f32 %v2127_v21, %v1550_v20  ;;  %v1553_v26 = vadd.f32 %v2102_v23, %v1504_v60 }
 0x14f   : > { %v1602_v28 = vadd.f32 %v2130_v27, %v1553_v26  ;;  %v2103_v29 = vpop.f32.mrb[20].mxu0 }
 0x150   : > { %v2104_v30 = vpop.f32.mrb[21].mxu0  ;;  %v2131_v33 = vpop.f32.mrb[20].mxu1 }
 0x151   : > { %v2105_v31 = vadd.f32 %v2104_v30, %v2103_v29  ;;  %v2106_v32 = vpop.f32.mrb[22].mxu0  ;;  %v2132_v37 = vpop.f32.mrb[21].mxu1 }
 0x152   : > { %v2107_v34 = vpop.f32.mrb[23].mxu0  ;;  %v2133_v38 = vadd.f32 %v2132_v37, %v2131_v33  ;;  %v2134_v39 = vpop.f32.mrb[22].mxu1 }
 0x153   : > { %v1558_v35 = vadd.f32 %v2105_v31, %v1509_v10  ;;  %v2108_v36 = vadd.f32 %v2107_v34, %v2106_v32  ;;  %v2135_v41 = vpop.f32.mrb[23].mxu1 }
 0x154   : > { %v2136_v43 = vadd.f32 %v2135_v41, %v2134_v39 }
 0x155   : > { %v1561_v40 = vadd.f32 %v2108_v36, %v1512_v12  ;;  %v1607_v42 = vadd.f32 %v2133_v38, %v1558_v35 }
 0x157   : > { %v1610_v44 = vadd.f32 %v2136_v43, %v1561_v40 }
 0x167   : > { %v2153_v45 = vpop.f32.mrb[24].mxu0 }
 0x168   : > { %v2159_v46 = vpop.f32.mrb[24].mxu1  ;;  %v2154_v47 = vpop.f32.mrb[25].mxu0 }
 0x169   : > { %v2155_v48 = vadd.f32 %v2154_v47, %v2153_v45  ;;  %v2160_v49 = vpop.f32.mrb[25].mxu1  ;;  %v2156_v50 = vpop.f32.mrb[26].mxu0 }
 0x16a   : > { %v2161_v51 = vadd.f32 %v2160_v49, %v2159_v46  ;;  %v2162_v52 = vpop.f32.mrb[26].mxu1  ;;  %v2157_v53 = vpop.f32.mrb[27].mxu0 }
 0x16b   : > { %v1648_v54 = vadd.f32 %v2155_v48, %v1599_v25  ;;  %v2158_v55 = vadd.f32 %v2157_v53, %v2156_v50  ;;  %v2163_v56 = vpop.f32.mrb[27].mxu1 }
 0x16c   : > { %v1656_v57 = vadd.f32 %v2161_v51, %v1607_v42  ;;  %v2164_v58 = vadd.f32 %v2163_v56, %v2162_v52 }
 0x16d   : > { %v1651_v59 = vadd.f32 %v2158_v55, %v1602_v28  ;;  %v1662_v61 = vmax.f32 %v1648_v54, 0.0 }
 0x16e   : > { %v1659_v60 = vadd.f32 %v2164_v58, %v1610_v44  ;;  %v1664_v63 = vmax.f32 %v1656_v57, 0.0 }
 0x16f   : > { %v1663_v62 = vmax.f32 %v1651_v59, 0.0 }
 0x170   : > { %v1665_v0 = vmax.f32 %v1659_v60, 0.0 }
 0x171   : > { %v1961_v1 = vpack.c.bf16 %v1663_v62, %v1662_v61 }
 0x172   : > { %v1966_v2 = vpack.c.bf16 %v1665_v0, %v1664_v63 }
 0x173   : > { %1962 = vst [vmem:[%s245_s30] sm:$0xff] %v1961_v1  }
 0x174   : > { %1968 = vst [vmem:[%s245_s30 + $0x8] sm:$0xff] %v1966_v2  }
 0x175 PF: > { %s13_s14 = sadd.s32 1, %s2383_s14   ;;  %s2598_s12 = smov %s2379_s13 }
 0x176   : > { %p10_p5 = scmp.ge.s32.totalorder %s13_s14, 4   ;;  %s2599_s13 = smov %s2601_s15 }
 0x178   :  { %12 = sbr.rel (!%p10_p5) target bundleno = 2 (0x2), region = 68 }

</bundles_post_ra>
